<compile_context>
chip_gen: v5e
topology: v5e:2x2
jax: 0.10.0
libtpu: 0.0.40
codegen_flags: <defaults>
</compile_context>

<pallas_src>
import math

import jax
import jax.numpy as jnp
from jax import lax
from jax.experimental import pallas as pl
from jax.experimental.pallas import tpu as pltpu

# ---------------- small synthetic CLIP-ViT config ----------------
B = 2
IMG = 32
PATCH = 8
GH = GW = IMG // PATCH            # 4 x 4 patch grid
N_PATCH = GH * GW                 # 16 patches
WIDTH = 32                        # clip_embed_dim == vit width
HEADS = 4
HEAD_DIM = WIDTH // HEADS
LAYERS = 4
OUT_DIM = 64                      # vit.proj output dim
VPT_WIDTH = 4
VPT_DEPTH = 2                     # deep VPT (must be >= 2 and < LAYERS)
LN_EPS = 1e-5
VPT_LN_EPS = 1e-6
DTYPE = jnp.float32
MXU_DTYPE = jnp.bfloat16          # matmul operand dtype (f32 accumulation)

# ---- fixed in-kernel token layout (sublane-aligned, static for all layers) ----
NT = 24                           # padded token count (multiple of 8)
TOK_VPT = 0                       # rows 0..3   : VPT prompt tokens
TOK_CLS = 7                       # row 7       : CLS token
TOK_PATCH = 8                     # rows 8..23  : patch tokens
# rows 4..6 are padding and never valid attention keys.

# ---- packed global f32 slab (gvec) row map ----
GV_BASE = 0          # rows 0..23 : base tokens (zeros; row7 = cls+pos0; rows8..23 = pos[1:])
GV_LN_PRE_G = 24
GV_LN_PRE_B = 25
GV_VPT_NORM_G = 26
GV_VPT_NORM_B = 27
GV_LN_POST_G = 28
GV_LN_POST_B = 29
GV_VPT_PROJ_B = 30
GV_PROMPT = 32       # rows 32..39 : visual_prompt reshaped [VPT_DEPTH*VPT_WIDTH, W]
GV_ROWS = 40

# ---- packed per-layer f32 slab (lvec) row map (lane width 128) ----
LV_LN1_G, LV_LN1_B, LV_LN2_G, LV_LN2_B, LV_OUT_B, LV_MLP_B, LV_QKV_B, LV_FC_B = range(8)
LV_LANES = 128


# ---------------- single fused Pallas kernel ----------------
def _fused_kernel(
    patches_ref,        # [1, N_PATCH, 3*P*P]  f32   (per-batch block)
    gvec_ref,           # [GV_ROWS, W]         f32
    lvec_ref,           # [L, 8, 128]          f32
    conv_w_ref,         # [3*P*P, W]           bf16
    vpt_proj_w_ref,     # [W, W]               bf16
    qkv_w_ref,          # [L, W, 3W]           bf16
    out_w_ref,          # [L, H, HD, W]        bf16  (out-proj pre-split per head)
    fc_w_ref,           # [L, W, 4W]           bf16
    mlp_w_ref,          # [L, 4W, W]           bf16
    proj_ref,           # [W, OUT_DIM]         bf16
    # outputs (per-batch blocks)
    img_patches_ref,    # [1, N_PATCH, W]
    x_cls_ref,          # [1, 1, OUT_DIM]
    x_out_ref,          # [1, 1+N_PATCH, W]
):
    f32 = jnp.float32

    def ln(x, g, b, eps):
        x = x.astype(f32)
        mu = jnp.mean(x, axis=-1, keepdims=True)
        xc = x - mu
        var = jnp.mean(xc * xc, axis=-1, keepdims=True)
        return xc * lax.rsqrt(var + eps) * g.astype(f32) + b.astype(f32)

    def mm(x, w, bias=None):
        acc = jnp.dot(x.astype(MXU_DTYPE), w, preferred_element_type=f32)
        if bias is not None:
            acc = acc + bias.astype(f32)
        return acc

    # ---- vit.conv1 (stride == kernel) as a patch matmul ----
    img = mm(patches_ref[0], conv_w_ref[...])                       # [16, W] f32
    img_patches_ref[0] = img.astype(img_patches_ref.dtype)

    # ---- VPT prompt projection (all depths at once; dropout == identity in eval) ----
    vp_all = mm(gvec_ref[GV_PROMPT:GV_PROMPT + VPT_DEPTH * VPT_WIDTH, :],
                vpt_proj_w_ref[...],
                gvec_ref[GV_VPT_PROJ_B:GV_VPT_PROJ_B + 1, :])       # [8, W] f32

    # ---- assemble fixed 24-row token slab: [vpt | pad | cls | patches] ----
    base_mid = gvec_ref[VPT_WIDTH:TOK_PATCH, :]                     # rows 4..7 (pad, cls+pos0)
    base_patch = gvec_ref[TOK_PATCH:NT, :]                          # rows 8..23 (pos[1:])
    x = jnp.concatenate(
        [vp_all[0:VPT_WIDTH], base_mid, img + base_patch], axis=0)  # [24, W] f32

    # ---- ln_pre ----
    x = ln(x, gvec_ref[GV_LN_PRE_G:GV_LN_PRE_G + 1, :],
           gvec_ref[GV_LN_PRE_B:GV_LN_PRE_B + 1, :], LN_EPS)

    # ---- attention key-validity biases (hoisted, full [NT, NT]) ----
    col = lax.broadcasted_iota(jnp.int32, (NT, NT), 1)
    neg = jnp.float32(-1e9)
    # layers < VPT_DEPTH: keys = {vpt, cls, patches};  layers >= VPT_DEPTH: {cls, patches}
    kbias_a = jnp.where((col < VPT_WIDTH) | (col >= TOK_CLS), 0.0, neg).astype(f32)
    kbias_b = jnp.where(col >= TOK_CLS, 0.0, neg).astype(f32)

    scale = 1.0 / math.sqrt(HEAD_DIM)

    def resblock(x, l, kbias):
        # --- multi-head attention ---
        h = ln(x, lvec_ref[l, LV_LN1_G:LV_LN1_G + 1, :WIDTH],
               lvec_ref[l, LV_LN1_B:LV_LN1_B + 1, :WIDTH], LN_EPS)
        qkv = mm(h, qkv_w_ref[l], lvec_ref[l, LV_QKV_B:LV_QKV_B + 1, :3 * WIDTH])  # [24,3W] f32
        attn = None
        for hh in range(HEADS):                                     # static head unroll
            lo = hh * HEAD_DIM
            qh = qkv[:, lo:lo + HEAD_DIM].astype(MXU_DTYPE)
            kh = qkv[:, WIDTH + lo:WIDTH + lo + HEAD_DIM].astype(MXU_DTYPE)
            vh = qkv[:, 2 * WIDTH + lo:2 * WIDTH + lo + HEAD_DIM].astype(MXU_DTYPE)
            # q @ k^T via dot_general contracting last dims (no explicit transpose)
            s = lax.dot_general(qh, kh, (((1,), (1,)), ((), ())),
                                preferred_element_type=f32) * scale + kbias
            s = s - jnp.max(s, axis=-1, keepdims=True)
            p = jnp.exp(s)
            p = p * pl.reciprocal(jnp.sum(p, axis=-1, keepdims=True), approx=True)
            ctx = jnp.dot(p.astype(MXU_DTYPE), vh, preferred_element_type=f32)      # [24, HD]
            # fold the output projection per head (no lane concat of contexts)
            part = jnp.dot(ctx.astype(MXU_DTYPE), out_w_ref[l, hh],
                           preferred_element_type=f32)                              # [24, W]
            attn = part if attn is None else attn + part
        x = x + attn + lvec_ref[l, LV_OUT_B:LV_OUT_B + 1, :WIDTH].astype(f32)
        # --- MLP (QuickGELU) ---
        h = ln(x, lvec_ref[l, LV_LN2_G:LV_LN2_G + 1, :WIDTH],
               lvec_ref[l, LV_LN2_B:LV_LN2_B + 1, :WIDTH], LN_EPS)
        h = mm(h, fc_w_ref[l], lvec_ref[l, LV_FC_B:LV_FC_B + 1, :])                  # [24, 4W]
        h = h * jax.nn.sigmoid(1.702 * h)
        return x + mm(h, mlp_w_ref[l], lvec_ref[l, LV_MLP_B:LV_MLP_B + 1, :WIDTH])

    # ---- deep-VPT transformer (vpt_depth > 1 path of deep_vpt_forward) ----
    for i in range(LAYERS):
        if 1 <= i < VPT_DEPTH:
            # re-insert the raw projected prompt for this depth (replaces rows 0..3)
            dp = vp_all[(i - 1) * VPT_WIDTH:i * VPT_WIDTH]
            x = jnp.concatenate([dp, x[VPT_WIDTH:]], axis=0)        # one-time, aligned start
        kbias = kbias_a if i < VPT_DEPTH else kbias_b               # token drop == mask change
        x = resblock(x, i, kbias)

    # ---- vpt_norm over the surviving [cls, patches] tokens ----
    x = ln(x, gvec_ref[GV_VPT_NORM_G:GV_VPT_NORM_G + 1, :],
           gvec_ref[GV_VPT_NORM_B:GV_VPT_NORM_B + 1, :], VPT_LN_EPS)
    x_out_ref[0] = x[TOK_CLS:NT].astype(x_out_ref.dtype)            # [17, W] = [cls; patches]

    # ---- CLS head: ln_post + projection ----
    xc = ln(x[TOK_CLS:TOK_CLS + 1],
            gvec_ref[GV_LN_POST_G:GV_LN_POST_G + 1, :],
            gvec_ref[GV_LN_POST_B:GV_LN_POST_B + 1, :], LN_EPS)     # [1, W]
    x_cls_ref[0] = mm(xc, proj_ref[...]).astype(x_cls_ref.dtype)    # [1, OUT_DIM]


# ---------------- wrapper: one pallas_call for the whole forward ----------------
def clip_vit_forward(packed, image, text_embedding):
    del text_embedding  # passed to deep_vpt_forward in the reference but never used
    Bb = image.shape[0]
    p = PATCH

    # conv1 with stride == kernel -> non-overlapping patch extraction (pure relayout)
    patches = image.reshape(Bb, 3, GH, p, GW, p)
    patches = patches.transpose(0, 2, 4, 1, 3, 5).reshape(Bb, N_PATCH, 3 * p * p)

    operands = [
        patches,
        packed["gvec"], packed["lvec"],
        packed["conv_w"], packed["vpt_proj_w"],
        packed["qkv_w"], packed["out_w"], packed["fc_w"], packed["mlp_w"],
        packed["proj"],
    ]

    def batch_spec(shape):
        nd = len(shape)
        return pl.BlockSpec((1,) + tuple(shape[1:]),
                            lambda b, _n=nd: (b,) + (0,) * (_n - 1))

    def full_spec(shape):
        nd = len(shape)
        # Grid-invariant full block (constant index map); on v7x one could additionally
        # request pipeline_mode=pl.Buffered(1), irrelevant for VMEM at this size.
        return pl.BlockSpec(tuple(shape), lambda b, _n=nd: (0,) * _n)

    in_specs = [batch_spec(patches.shape)] + [full_spec(o.shape) for o in operands[1:]]

    out_shape = (
        jax.ShapeDtypeStruct((Bb, N_PATCH, WIDTH), DTYPE),
        jax.ShapeDtypeStruct((Bb, 1, OUT_DIM), DTYPE),
        jax.ShapeDtypeStruct((Bb, 1 + N_PATCH, WIDTH), DTYPE),
    )
    out_specs = (
        batch_spec((Bb, N_PATCH, WIDTH)),
        batch_spec((Bb, 1, OUT_DIM)),
        batch_spec((Bb, 1 + N_PATCH, WIDTH)),
    )

    return pl.pallas_call(
        _fused_kernel,
        grid=(Bb,),
        in_specs=in_specs,
        out_specs=out_specs,
        out_shape=out_shape,
        compiler_params=pltpu.CompilerParams(dimension_semantics=("parallel",)),
    )(*operands)


# ---------------- deterministic synthetic parameters ----------------
def init_params(key):
    ks = iter(jax.random.split(key, 64))

    def nrm(shape, scale=0.02, dtype=DTYPE):
        return (scale * jax.random.normal(next(ks), shape, jnp.float32)).astype(dtype)

    def ones(*s):
        return jnp.ones(s, DTYPE)

    def zeros(*s):
        return jnp.zeros(s, DTYPE)

    W_DT = MXU_DTYPE   # matmul weights stored bf16 (f32 accumulation in-kernel)
    val = math.sqrt(6.0 / float(3 * PATCH * PATCH + WIDTH))   # same formula as the module

    return {
        "conv_w": nrm((3 * PATCH * PATCH, WIDTH), dtype=W_DT),   # conv1 (c,kh,kw)->out, no bias
        "class_embedding": nrm((1, WIDTH)),
        "positional_embedding": nrm((1 + N_PATCH, WIDTH)),
        "ln_pre_g": ones(1, WIDTH), "ln_pre_b": zeros(1, WIDTH),
        "ln_post_g": ones(1, WIDTH), "ln_post_b": zeros(1, WIDTH),
        "vpt_norm_g": ones(1, WIDTH), "vpt_norm_b": zeros(1, WIDTH),
        "proj": nrm((WIDTH, OUT_DIM), dtype=W_DT),
        "vpt_proj_w": nrm((WIDTH, WIDTH), scale=math.sqrt(2.0 / WIDTH), dtype=W_DT),
        "vpt_proj_b": zeros(1, WIDTH),
        "visual_prompt": jax.random.uniform(next(ks), (VPT_DEPTH, VPT_WIDTH, WIDTH),
                                            DTYPE, -val, val),
        # stacked per-layer transformer weights (leading LAYERS axis)
        "ln1_g": ones(LAYERS, 1, WIDTH), "ln1_b": zeros(LAYERS, 1, WIDTH),
        "qkv_w": nrm((LAYERS, WIDTH, 3 * WIDTH), dtype=W_DT),
        "qkv_b": zeros(LAYERS, 1, 3 * WIDTH),
        "out_w": nrm((LAYERS, WIDTH, WIDTH), dtype=W_DT),
        "out_b": zeros(LAYERS, 1, WIDTH),
        "ln2_g": ones(LAYERS, 1, WIDTH), "ln2_b": zeros(LAYERS, 1, WIDTH),
        "fc_w": nrm((LAYERS, WIDTH, 4 * WIDTH), dtype=W_DT),
        "fc_b": zeros(LAYERS, 1, 4 * WIDTH),
        "mlp_w": nrm((LAYERS, 4 * WIDTH, WIDTH), dtype=W_DT),
        "mlp_b": zeros(LAYERS, 1, WIDTH),
    }


def pack_params(raw):
    """Pack the ~25 module parameters into 10 kernel operands (done once, outside jit)."""
    f32 = jnp.float32

    # global f32 slab: base token layout + LN gains/biases + vpt_proj bias + raw prompts
    gvec = jnp.zeros((GV_ROWS, WIDTH), f32)
    gvec = gvec.at[TOK_CLS].set(raw["class_embedding"][0] + raw["positional_embedding"][0])
    gvec = gvec.at[TOK_PATCH:NT].set(raw["positional_embedding"][1:])
    gvec = gvec.at[GV_LN_PRE_G].set(raw["ln_pre_g"][0])
    gvec = gvec.at[GV_LN_PRE_B].set(raw["ln_pre_b"][0])
    gvec = gvec.at[GV_VPT_NORM_G].set(raw["vpt_norm_g"][0])
    gvec = gvec.at[GV_VPT_NORM_B].set(raw["vpt_norm_b"][0])
    gvec = gvec.at[GV_LN_POST_G].set(raw["ln_post_g"][0])
    gvec = gvec.at[GV_LN_POST_B].set(raw["ln_post_b"][0])
    gvec = gvec.at[GV_VPT_PROJ_B].set(raw["vpt_proj_b"][0])
    gvec = gvec.at[GV_PROMPT:GV_PROMPT + VPT_DEPTH * VPT_WIDTH].set(
        raw["visual_prompt"].reshape(VPT_DEPTH * VPT_WIDTH, WIDTH))

    # per-layer f32 slab: all small gains / biases, lane-padded to 128
    lvec = jnp.zeros((LAYERS, 8, LV_LANES), f32)
    lvec = lvec.at[:, LV_LN1_G, :WIDTH].set(raw["ln1_g"][:, 0, :])
    lvec = lvec.at[:, LV_LN1_B, :WIDTH].set(raw["ln1_b"][:, 0, :])
    lvec = lvec.at[:, LV_LN2_G, :WIDTH].set(raw["ln2_g"][:, 0, :])
    lvec = lvec.at[:, LV_LN2_B, :WIDTH].set(raw["ln2_b"][:, 0, :])
    lvec = lvec.at[:, LV_OUT_B, :WIDTH].set(raw["out_b"][:, 0, :])
    lvec = lvec.at[:, LV_MLP_B, :WIDTH].set(raw["mlp_b"][:, 0, :])
    lvec = lvec.at[:, LV_QKV_B, :3 * WIDTH].set(raw["qkv_b"][:, 0, :])
    lvec = lvec.at[:, LV_FC_B, :4 * WIDTH].set(raw["fc_b"][:, 0, :])

    return {
        "gvec": gvec,
        "lvec": lvec,
        "conv_w": raw["conv_w"],
        "vpt_proj_w": raw["vpt_proj_w"],
        "qkv_w": raw["qkv_w"],
        # out-projection pre-split per head: rows lo..lo+HD of [W, W] belong to head hh
        "out_w": raw["out_w"].reshape(LAYERS, HEADS, HEAD_DIM, WIDTH),
        "fc_w": raw["fc_w"],
        "mlp_w": raw["mlp_w"],
        "proj": raw["proj"],
    }


if __name__ == "__main__":
    key = jax.random.PRNGKey(0)
    kp, ki, kt = jax.random.split(key, 3)
    raw_params = init_params(kp)
    packed = pack_params(raw_params)
    image = jax.random.normal(ki, (B, 3, IMG, IMG), DTYPE)          # [B, 3, H, W] (NCHW)
    text_embedding = jax.random.normal(kt, (B, 1, OUT_DIM), DTYPE)  # unused by forward

    fwd = jax.jit(clip_vit_forward)
    img_patches, x_cls, x = fwd(packed, image, text_embedding)
    jax.block_until_ready((img_patches, x_cls, x))

    assert img_patches.shape == (B, N_PATCH, WIDTH)
    assert x_cls.shape == (B, 1, OUT_DIM)
    assert x.shape == (B, 1 + N_PATCH, WIDTH)
    assert bool(jnp.all(jnp.isfinite(img_patches)))
    assert bool(jnp.all(jnp.isfinite(x_cls)))
    assert bool(jnp.all(jnp.isfinite(x)))
    print("KERNEL_OK")
</pallas_src>

<mosaic_0001>
module attributes {stable_mosaic.version = 11 : i64} {
  func.func @_fused_kernel(%arg0: i32, %arg1: memref<1x16x192xf32, #tpu.memory_space<vmem>>, %arg2: memref<40x32xf32, #tpu.memory_space<vmem>>, %arg3: memref<4x8x128xf32, #tpu.memory_space<vmem>>, %arg4: memref<192x32xbf16, #tpu.memory_space<vmem>>, %arg5: memref<32x32xbf16, #tpu.memory_space<vmem>>, %arg6: memref<4x32x96xbf16, #tpu.memory_space<vmem>>, %arg7: memref<4x4x8x32xbf16, #tpu.memory_space<vmem>>, %arg8: memref<4x32x128xbf16, #tpu.memory_space<vmem>>, %arg9: memref<4x128x32xbf16, #tpu.memory_space<vmem>>, %arg10: memref<32x64xbf16, #tpu.memory_space<vmem>>, %arg11: memref<1x16x32xf32, #tpu.memory_space<vmem>>, %arg12: memref<1x1x64xf32, #tpu.memory_space<vmem>>, %arg13: memref<1x17x32xf32, #tpu.memory_space<vmem>>) attributes {dimension_semantics = [#tpu.dimension_semantics<parallel>], iteration_bounds = array<i64: 2>, scalar_prefetch = 0 : i64, scratch_operands = 0 : i64, tpu.core_type = #tpu.core_type<tc>, window_params = [{transform_indices = @transform_0, window_bounds = array<i64: 1, 16, 192>}, {pipeline_mode = #tpu.pipeline_mode<synchronous>, transform_indices = @transform_1, window_bounds = array<i64: 40, 32>}, {pipeline_mode = #tpu.pipeline_mode<synchronous>, transform_indices = @transform_2, window_bounds = array<i64: 4, 8, 128>}, {pipeline_mode = #tpu.pipeline_mode<synchronous>, transform_indices = @transform_3, window_bounds = array<i64: 192, 32>}, {pipeline_mode = #tpu.pipeline_mode<synchronous>, transform_indices = @transform_4, window_bounds = array<i64: 32, 32>}, {pipeline_mode = #tpu.pipeline_mode<synchronous>, transform_indices = @transform_5, window_bounds = array<i64: 4, 32, 96>}, {pipeline_mode = #tpu.pipeline_mode<synchronous>, transform_indices = @transform_6, window_bounds = array<i64: 4, 4, 8, 32>}, {pipeline_mode = #tpu.pipeline_mode<synchronous>, transform_indices = @transform_7, window_bounds = array<i64: 4, 32, 128>}, {pipeline_mode = #tpu.pipeline_mode<synchronous>, transform_indices = @transform_8, window_bounds = array<i64: 4, 128, 32>}, {pipeline_mode = #tpu.pipeline_mode<synchronous>, transform_indices = @transform_9, window_bounds = array<i64: 32, 64>}, {transform_indices = @transform_10, window_bounds = array<i64: 1, 16, 32>}, {transform_indices = @transform_11, window_bounds = array<i64: 1, 1, 64>}, {transform_indices = @transform_12, window_bounds = array<i64: 1, 17, 32>}]} {
    %c0 = arith.constant 0 : index
    %c0_0 = arith.constant 0 : index
    %c0_1 = arith.constant 0 : index
    %0 = vector.load %arg1[%c0, %c0_0, %c0_1] : memref<1x16x192xf32, #tpu.memory_space<vmem>>, vector<1x16x192xf32>
    %1 = vector.shape_cast %0 : vector<1x16x192xf32> to vector<16x192xf32>
    %c0_2 = arith.constant 0 : index
    %c0_3 = arith.constant 0 : index
    %2 = vector.load %arg4[%c0_2, %c0_3] : memref<192x32xbf16, #tpu.memory_space<vmem>>, vector<192x32xbf16>
    %3 = arith.truncf %1 : vector<16x192xf32> to vector<16x192xbf16>
    %cst = arith.constant dense<0.000000e+00> : vector<16x32xf32>
    %4 = tpu.matmul %3, %2, %cst {dimension_numbers = #tpu.dot_dimension_numbers<[1], [0], [0], [1], [0, 0, 1, 1], [], []>} : vector<16x192xbf16>, vector<192x32xbf16>, vector<16x32xf32> -> vector<16x32xf32>
    %c0_4 = arith.constant 0 : index
    %c0_5 = arith.constant 0 : index
    %c0_6 = arith.constant 0 : index
    %5 = vector.load %arg11[%c0_4, %c0_5, %c0_6] : memref<1x16x32xf32, #tpu.memory_space<vmem>>, vector<1x16x32xf32>
    %6 = vector.shape_cast %5 : vector<1x16x32xf32> to vector<16x32xf32>
    %7 = vector.shape_cast %4 : vector<16x32xf32> to vector<1x16x32xf32>
    tpu.vector_store %arg11[%c0_4, %c0_5, %c0_6], %7 {strides = array<i32>} : memref<1x16x32xf32, #tpu.memory_space<vmem>>, vector<1x16x32xf32>,
    %c32 = arith.constant 32 : index
    %c0_7 = arith.constant 0 : index
    %8 = vector.load %arg2[%c32, %c0_7] : memref<40x32xf32, #tpu.memory_space<vmem>>, vector<8x32xf32>
    %c0_8 = arith.constant 0 : index
    %c0_9 = arith.constant 0 : index
    %9 = vector.load %arg5[%c0_8, %c0_9] : memref<32x32xbf16, #tpu.memory_space<vmem>>, vector<32x32xbf16>
    %c30 = arith.constant 30 : index
    %c0_10 = arith.constant 0 : index
    %10 = vector.load %arg2[%c30, %c0_10] : memref<40x32xf32, #tpu.memory_space<vmem>>, vector<1x32xf32>
    %11 = arith.truncf %8 : vector<8x32xf32> to vector<8x32xbf16>
    %cst_11 = arith.constant dense<0.000000e+00> : vector<8x32xf32>
    %12 = tpu.matmul %11, %9, %cst_11 {dimension_numbers = #tpu.dot_dimension_numbers<[1], [0], [0], [1], [0, 0, 1, 1], [], []>} : vector<8x32xbf16>, vector<32x32xbf16>, vector<8x32xf32> -> vector<8x32xf32>
    %13 = vector.broadcast %10 : vector<1x32xf32> to vector<8x32xf32>
    %14 = arith.addf %12, %13 : vector<8x32xf32>
    %c4 = arith.constant 4 : index
    %c0_12 = arith.constant 0 : index
    %15 = vector.load %arg2[%c4, %c0_12] : memref<40x32xf32, #tpu.memory_space<vmem>>, vector<4x32xf32>
    %c8 = arith.constant 8 : index
    %c0_13 = arith.constant 0 : index
    %16 = vector.load %arg2[%c8, %c0_13] : memref<40x32xf32, #tpu.memory_space<vmem>>, vector<16x32xf32>
    %17 = vector.extract_strided_slice %14 {offsets = [0, 0], sizes = [4, 32], strides = [1, 1]} : vector<8x32xf32> to vector<4x32xf32>
    %18 = arith.addf %4, %16 : vector<16x32xf32>
    %19 = tpu.concatenate %17, %15, %18 in 0 : vector<4x32xf32>, vector<4x32xf32>, vector<16x32xf32> -> vector<24x32xf32>
    %c24 = arith.constant 24 : index
    %c0_14 = arith.constant 0 : index
    %20 = vector.load %arg2[%c24, %c0_14] : memref<40x32xf32, #tpu.memory_space<vmem>>, vector<1x32xf32>
    %c25 = arith.constant 25 : index
    %c0_15 = arith.constant 0 : index
    %21 = vector.load %arg2[%c25, %c0_15] : memref<40x32xf32, #tpu.memory_space<vmem>>, vector<1x32xf32>
    %cst_16 = arith.constant dense<0.000000e+00> : vector<24xf32>
    %22 = vector.multi_reduction <add>, %19, %cst_16 [1] : vector<24x32xf32> to vector<24xf32>
    %23 = vector.shape_cast %22 : vector<24xf32> to vector<24x1xf32>
    %cst_17 = arith.constant 3.200000e+01 : f32
    %24 = vector.broadcast %cst_17 : f32 to vector<24x1xf32>
    %25 = arith.divf %23, %24 : vector<24x1xf32>
    %26 = vector.broadcast %25 : vector<24x1xf32> to vector<24x32xf32>
    %27 = arith.subf %19, %26 : vector<24x32xf32>
    %28 = arith.mulf %27, %27 : vector<24x32xf32>
    %cst_18 = arith.constant dense<0.000000e+00> : vector<24xf32>
    %29 = vector.multi_reduction <add>, %28, %cst_18 [1] : vector<24x32xf32> to vector<24xf32>
    %30 = vector.shape_cast %29 : vector<24xf32> to vector<24x1xf32>
    %cst_19 = arith.constant 3.200000e+01 : f32
    %31 = vector.broadcast %cst_19 : f32 to vector<24x1xf32>
    %32 = arith.divf %30, %31 : vector<24x1xf32>
    %cst_20 = arith.constant 9.99999974E-6 : f32
    %33 = vector.broadcast %cst_20 : f32 to vector<24x1xf32>
    %34 = arith.addf %32, %33 : vector<24x1xf32>
    %35 = math.rsqrt %34 : vector<24x1xf32>
    %36 = vector.broadcast %35 : vector<24x1xf32> to vector<24x32xf32>
    %37 = arith.mulf %27, %36 : vector<24x32xf32>
    %38 = vector.broadcast %20 : vector<1x32xf32> to vector<24x32xf32>
    %39 = arith.mulf %37, %38 : vector<24x32xf32>
    %40 = vector.broadcast %21 : vector<1x32xf32> to vector<24x32xf32>
    %41 = arith.addf %39, %40 : vector<24x32xf32>
    %42 = tpu.iota {dimensions = array<i32: 1>} : vector<24x24xi32>
    %c4_i32 = arith.constant 4 : i32
    %43 = vector.broadcast %c4_i32 : i32 to vector<24x24xi32>
    %44 = arith.cmpi slt, %42, %43 : vector<24x24xi32>
    %c7_i32 = arith.constant 7 : i32
    %45 = vector.broadcast %c7_i32 : i32 to vector<24x24xi32>
    %46 = arith.cmpi sge, %42, %45 : vector<24x24xi32>
    %47 = arith.ori %44, %46 : vector<24x24xi1>
    %cst_21 = arith.constant 0.000000e+00 : f32
    %cst_22 = arith.constant -1.000000e+09 : f32
    %48 = vector.broadcast %cst_21 : f32 to vector<24x24xf32>
    %49 = vector.broadcast %cst_22 : f32 to vector<24x24xf32>
    %50 = arith.select %47, %48, %49 : vector<24x24xi1>, vector<24x24xf32>
    %c7_i32_23 = arith.constant 7 : i32
    %51 = vector.broadcast %c7_i32_23 : i32 to vector<24x24xi32>
    %52 = arith.cmpi sge, %42, %51 : vector<24x24xi32>
    %cst_24 = arith.constant 0.000000e+00 : f32
    %cst_25 = arith.constant -1.000000e+09 : f32
    %53 = vector.broadcast %cst_24 : f32 to vector<24x24xf32>
    %54 = vector.broadcast %cst_25 : f32 to vector<24x24xf32>
    %55 = arith.select %52, %53, %54 : vector<24x24xi1>, vector<24x24xf32>
    %c0_26 = arith.constant 0 : index
    %c0_27 = arith.constant 0 : index
    %c0_28 = arith.constant 0 : index
    %56 = vector.load %arg3[%c0_26, %c0_27, %c0_28] : memref<4x8x128xf32, #tpu.memory_space<vmem>>, vector<1x1x32xf32>
    %57 = vector.shape_cast %56 : vector<1x1x32xf32> to vector<1x32xf32>
    %c0_29 = arith.constant 0 : index
    %c1 = arith.constant 1 : index
    %c0_30 = arith.constant 0 : index
    %58 = vector.load %arg3[%c0_29, %c1, %c0_30] : memref<4x8x128xf32, #tpu.memory_space<vmem>>, vector<1x1x32xf32>
    %59 = vector.shape_cast %58 : vector<1x1x32xf32> to vector<1x32xf32>
    %cst_31 = arith.constant dense<0.000000e+00> : vector<24xf32>
    %60 = vector.multi_reduction <add>, %41, %cst_31 [1] : vector<24x32xf32> to vector<24xf32>
    %61 = vector.shape_cast %60 : vector<24xf32> to vector<24x1xf32>
    %cst_32 = arith.constant 3.200000e+01 : f32
    %62 = vector.broadcast %cst_32 : f32 to vector<24x1xf32>
    %63 = arith.divf %61, %62 : vector<24x1xf32>
    %64 = vector.broadcast %63 : vector<24x1xf32> to vector<24x32xf32>
    %65 = arith.subf %41, %64 : vector<24x32xf32>
    %66 = arith.mulf %65, %65 : vector<24x32xf32>
    %cst_33 = arith.constant dense<0.000000e+00> : vector<24xf32>
    %67 = vector.multi_reduction <add>, %66, %cst_33 [1] : vector<24x32xf32> to vector<24xf32>
    %68 = vector.shape_cast %67 : vector<24xf32> to vector<24x1xf32>
    %cst_34 = arith.constant 3.200000e+01 : f32
    %69 = vector.broadcast %cst_34 : f32 to vector<24x1xf32>
    %70 = arith.divf %68, %69 : vector<24x1xf32>
    %cst_35 = arith.constant 9.99999974E-6 : f32
    %71 = vector.broadcast %cst_35 : f32 to vector<24x1xf32>
    %72 = arith.addf %70, %71 : vector<24x1xf32>
    %73 = math.rsqrt %72 : vector<24x1xf32>
    %74 = vector.broadcast %73 : vector<24x1xf32> to vector<24x32xf32>
    %75 = arith.mulf %65, %74 : vector<24x32xf32>
    %76 = vector.broadcast %57 : vector<1x32xf32> to vector<24x32xf32>
    %77 = arith.mulf %75, %76 : vector<24x32xf32>
    %78 = vector.broadcast %59 : vector<1x32xf32> to vector<24x32xf32>
    %79 = arith.addf %77, %78 : vector<24x32xf32>
    %c0_36 = arith.constant 0 : index
    %c0_37 = arith.constant 0 : index
    %c0_38 = arith.constant 0 : index
    %80 = vector.load %arg6[%c0_36, %c0_37, %c0_38] : memref<4x32x96xbf16, #tpu.memory_space<vmem>>, vector<1x32x96xbf16>
    %81 = vector.shape_cast %80 : vector<1x32x96xbf16> to vector<32x96xbf16>
    %c0_39 = arith.constant 0 : index
    %c6 = arith.constant 6 : index
    %c0_40 = arith.constant 0 : index
    %82 = vector.load %arg3[%c0_39, %c6, %c0_40] : memref<4x8x128xf32, #tpu.memory_space<vmem>>, vector<1x1x96xf32>
    %83 = vector.shape_cast %82 : vector<1x1x96xf32> to vector<1x96xf32>
    %84 = arith.truncf %79 : vector<24x32xf32> to vector<24x32xbf16>
    %cst_41 = arith.constant dense<0.000000e+00> : vector<24x96xf32>
    %85 = tpu.matmul %84, %81, %cst_41 {dimension_numbers = #tpu.dot_dimension_numbers<[1], [0], [0], [1], [0, 0, 1, 1], [], []>} : vector<24x32xbf16>, vector<32x96xbf16>, vector<24x96xf32> -> vector<24x96xf32>
    %86 = vector.broadcast %83 : vector<1x96xf32> to vector<24x96xf32>
    %87 = arith.addf %85, %86 : vector<24x96xf32>
    %88 = vector.extract_strided_slice %87 {offsets = [0, 0], sizes = [24, 8], strides = [1, 1]} : vector<24x96xf32> to vector<24x8xf32>
    %89 = arith.truncf %88 : vector<24x8xf32> to vector<24x8xbf16>
    %90 = vector.extract_strided_slice %87 {offsets = [0, 32], sizes = [24, 8], strides = [1, 1]} : vector<24x96xf32> to vector<24x8xf32>
    %91 = arith.truncf %90 : vector<24x8xf32> to vector<24x8xbf16>
    %92 = vector.extract_strided_slice %87 {offsets = [0, 64], sizes = [24, 8], strides = [1, 1]} : vector<24x96xf32> to vector<24x8xf32>
    %93 = arith.truncf %92 : vector<24x8xf32> to vector<24x8xbf16>
    %cst_42 = arith.constant dense<0.000000e+00> : vector<24x24xf32>
    %94 = tpu.matmul %89, %91, %cst_42 {dimension_numbers = #tpu.dot_dimension_numbers<[1], [1], [0], [0], [0, 0, 1, 0], [], []>} : vector<24x8xbf16>, vector<24x8xbf16>, vector<24x24xf32> -> vector<24x24xf32>
    %cst_43 = arith.constant 0.353553385 : f32
    %95 = vector.broadcast %cst_43 : f32 to vector<24x24xf32>
    %96 = arith.mulf %94, %95 : vector<24x24xf32>
    %97 = arith.addf %96, %50 : vector<24x24xf32>
    %cst_44 = arith.constant dense<0xFF800000> : vector<24xf32>
    %98 = vector.multi_reduction <maximumf>, %97, %cst_44 [1] : vector<24x24xf32> to vector<24xf32>
    %99 = vector.shape_cast %98 : vector<24xf32> to vector<24x1xf32>
    %100 = vector.broadcast %99 : vector<24x1xf32> to vector<24x24xf32>
    %101 = arith.subf %97, %100 : vector<24x24xf32>
    %102 = math.exp %101 : vector<24x24xf32>
    %cst_45 = arith.constant dense<0.000000e+00> : vector<24xf32>
    %103 = vector.multi_reduction <add>, %102, %cst_45 [1] : vector<24x24xf32> to vector<24xf32>
    %104 = vector.shape_cast %103 : vector<24xf32> to vector<24x1xf32>
    %105 = tpu.reciprocal %104 {approx = true} : vector<24x1xf32> -> vector<24x1xf32>
    %106 = vector.broadcast %105 : vector<24x1xf32> to vector<24x24xf32>
    %107 = arith.mulf %102, %106 : vector<24x24xf32>
    %108 = arith.truncf %107 : vector<24x24xf32> to vector<24x24xbf16>
    %cst_46 = arith.constant dense<0.000000e+00> : vector<24x8xf32>
    %109 = tpu.matmul %108, %93, %cst_46 {dimension_numbers = #tpu.dot_dimension_numbers<[1], [0], [0], [1], [0, 0, 1, 1], [], []>} : vector<24x24xbf16>, vector<24x8xbf16>, vector<24x8xf32> -> vector<24x8xf32>
    %110 = arith.truncf %109 : vector<24x8xf32> to vector<24x8xbf16>
    %c0_47 = arith.constant 0 : index
    %c0_48 = arith.constant 0 : index
    %c0_49 = arith.constant 0 : index
    %c0_50 = arith.constant 0 : index
    %111 = vector.load %arg7[%c0_47, %c0_48, %c0_49, %c0_50] : memref<4x4x8x32xbf16, #tpu.memory_space<vmem>>, vector<1x1x8x32xbf16>
    %112 = vector.shape_cast %111 : vector<1x1x8x32xbf16> to vector<8x32xbf16>
    %cst_51 = arith.constant dense<0.000000e+00> : vector<24x32xf32>
    %113 = tpu.matmul %110, %112, %cst_51 {dimension_numbers = #tpu.dot_dimension_numbers<[1], [0], [0], [1], [0, 0, 1, 1], [], []>} : vector<24x8xbf16>, vector<8x32xbf16>, vector<24x32xf32> -> vector<24x32xf32>
    %114 = vector.extract_strided_slice %87 {offsets = [0, 8], sizes = [24, 8], strides = [1, 1]} : vector<24x96xf32> to vector<24x8xf32>
    %115 = arith.truncf %114 : vector<24x8xf32> to vector<24x8xbf16>
    %116 = vector.extract_strided_slice %87 {offsets = [0, 40], sizes = [24, 8], strides = [1, 1]} : vector<24x96xf32> to vector<24x8xf32>
    %117 = arith.truncf %116 : vector<24x8xf32> to vector<24x8xbf16>
    %118 = vector.extract_strided_slice %87 {offsets = [0, 72], sizes = [24, 8], strides = [1, 1]} : vector<24x96xf32> to vector<24x8xf32>
    %119 = arith.truncf %118 : vector<24x8xf32> to vector<24x8xbf16>
    %cst_52 = arith.constant dense<0.000000e+00> : vector<24x24xf32>
    %120 = tpu.matmul %115, %117, %cst_52 {dimension_numbers = #tpu.dot_dimension_numbers<[1], [1], [0], [0], [0, 0, 1, 0], [], []>} : vector<24x8xbf16>, vector<24x8xbf16>, vector<24x24xf32> -> vector<24x24xf32>
    %cst_53 = arith.constant 0.353553385 : f32
    %121 = vector.broadcast %cst_53 : f32 to vector<24x24xf32>
    %122 = arith.mulf %120, %121 : vector<24x24xf32>
    %123 = arith.addf %122, %50 : vector<24x24xf32>
    %cst_54 = arith.constant dense<0xFF800000> : vector<24xf32>
    %124 = vector.multi_reduction <maximumf>, %123, %cst_54 [1] : vector<24x24xf32> to vector<24xf32>
    %125 = vector.shape_cast %124 : vector<24xf32> to vector<24x1xf32>
    %126 = vector.broadcast %125 : vector<24x1xf32> to vector<24x24xf32>
    %127 = arith.subf %123, %126 : vector<24x24xf32>
    %128 = math.exp %127 : vector<24x24xf32>
    %cst_55 = arith.constant dense<0.000000e+00> : vector<24xf32>
    %129 = vector.multi_reduction <add>, %128, %cst_55 [1] : vector<24x24xf32> to vector<24xf32>
    %130 = vector.shape_cast %129 : vector<24xf32> to vector<24x1xf32>
    %131 = tpu.reciprocal %130 {approx = true} : vector<24x1xf32> -> vector<24x1xf32>
    %132 = vector.broadcast %131 : vector<24x1xf32> to vector<24x24xf32>
    %133 = arith.mulf %128, %132 : vector<24x24xf32>
    %134 = arith.truncf %133 : vector<24x24xf32> to vector<24x24xbf16>
    %cst_56 = arith.constant dense<0.000000e+00> : vector<24x8xf32>
    %135 = tpu.matmul %134, %119, %cst_56 {dimension_numbers = #tpu.dot_dimension_numbers<[1], [0], [0], [1], [0, 0, 1, 1], [], []>} : vector<24x24xbf16>, vector<24x8xbf16>, vector<24x8xf32> -> vector<24x8xf32>
    %136 = arith.truncf %135 : vector<24x8xf32> to vector<24x8xbf16>
    %c0_57 = arith.constant 0 : index
    %c1_58 = arith.constant 1 : index
    %c0_59 = arith.constant 0 : index
    %c0_60 = arith.constant 0 : index
    %137 = vector.load %arg7[%c0_57, %c1_58, %c0_59, %c0_60] : memref<4x4x8x32xbf16, #tpu.memory_space<vmem>>, vector<1x1x8x32xbf16>
    %138 = vector.shape_cast %137 : vector<1x1x8x32xbf16> to vector<8x32xbf16>
    %cst_61 = arith.constant dense<0.000000e+00> : vector<24x32xf32>
    %139 = tpu.matmul %136, %138, %cst_61 {dimension_numbers = #tpu.dot_dimension_numbers<[1], [0], [0], [1], [0, 0, 1, 1], [], []>} : vector<24x8xbf16>, vector<8x32xbf16>, vector<24x32xf32> -> vector<24x32xf32>
    %140 = arith.addf %113, %139 : vector<24x32xf32>
    %141 = vector.extract_strided_slice %87 {offsets = [0, 16], sizes = [24, 8], strides = [1, 1]} : vector<24x96xf32> to vector<24x8xf32>
    %142 = arith.truncf %141 : vector<24x8xf32> to vector<24x8xbf16>
    %143 = vector.extract_strided_slice %87 {offsets = [0, 48], sizes = [24, 8], strides = [1, 1]} : vector<24x96xf32> to vector<24x8xf32>
    %144 = arith.truncf %143 : vector<24x8xf32> to vector<24x8xbf16>
    %145 = vector.extract_strided_slice %87 {offsets = [0, 80], sizes = [24, 8], strides = [1, 1]} : vector<24x96xf32> to vector<24x8xf32>
    %146 = arith.truncf %145 : vector<24x8xf32> to vector<24x8xbf16>
    %cst_62 = arith.constant dense<0.000000e+00> : vector<24x24xf32>
    %147 = tpu.matmul %142, %144, %cst_62 {dimension_numbers = #tpu.dot_dimension_numbers<[1], [1], [0], [0], [0, 0, 1, 0], [], []>} : vector<24x8xbf16>, vector<24x8xbf16>, vector<24x24xf32> -> vector<24x24xf32>
    %cst_63 = arith.constant 0.353553385 : f32
    %148 = vector.broadcast %cst_63 : f32 to vector<24x24xf32>
    %149 = arith.mulf %147, %148 : vector<24x24xf32>
    %150 = arith.addf %149, %50 : vector<24x24xf32>
    %cst_64 = arith.constant dense<0xFF800000> : vector<24xf32>
    %151 = vector.multi_reduction <maximumf>, %150, %cst_64 [1] : vector<24x24xf32> to vector<24xf32>
    %152 = vector.shape_cast %151 : vector<24xf32> to vector<24x1xf32>
    %153 = vector.broadcast %152 : vector<24x1xf32> to vector<24x24xf32>
    %154 = arith.subf %150, %153 : vector<24x24xf32>
    %155 = math.exp %154 : vector<24x24xf32>
    %cst_65 = arith.constant dense<0.000000e+00> : vector<24xf32>
    %156 = vector.multi_reduction <add>, %155, %cst_65 [1] : vector<24x24xf32> to vector<24xf32>
    %157 = vector.shape_cast %156 : vector<24xf32> to vector<24x1xf32>
    %158 = tpu.reciprocal %157 {approx = true} : vector<24x1xf32> -> vector<24x1xf32>
    %159 = vector.broadcast %158 : vector<24x1xf32> to vector<24x24xf32>
    %160 = arith.mulf %155, %159 : vector<24x24xf32>
    %161 = arith.truncf %160 : vector<24x24xf32> to vector<24x24xbf16>
    %cst_66 = arith.constant dense<0.000000e+00> : vector<24x8xf32>
    %162 = tpu.matmul %161, %146, %cst_66 {dimension_numbers = #tpu.dot_dimension_numbers<[1], [0], [0], [1], [0, 0, 1, 1], [], []>} : vector<24x24xbf16>, vector<24x8xbf16>, vector<24x8xf32> -> vector<24x8xf32>
    %163 = arith.truncf %162 : vector<24x8xf32> to vector<24x8xbf16>
    %c0_67 = arith.constant 0 : index
    %c2 = arith.constant 2 : index
    %c0_68 = arith.constant 0 : index
    %c0_69 = arith.constant 0 : index
    %164 = vector.load %arg7[%c0_67, %c2, %c0_68, %c0_69] : memref<4x4x8x32xbf16, #tpu.memory_space<vmem>>, vector<1x1x8x32xbf16>
    %165 = vector.shape_cast %164 : vector<1x1x8x32xbf16> to vector<8x32xbf16>
    %cst_70 = arith.constant dense<0.000000e+00> : vector<24x32xf32>
    %166 = tpu.matmul %163, %165, %cst_70 {dimension_numbers = #tpu.dot_dimension_numbers<[1], [0], [0], [1], [0, 0, 1, 1], [], []>} : vector<24x8xbf16>, vector<8x32xbf16>, vector<24x32xf32> -> vector<24x32xf32>
    %167 = arith.addf %140, %166 : vector<24x32xf32>
    %168 = vector.extract_strided_slice %87 {offsets = [0, 24], sizes = [24, 8], strides = [1, 1]} : vector<24x96xf32> to vector<24x8xf32>
    %169 = arith.truncf %168 : vector<24x8xf32> to vector<24x8xbf16>
    %170 = vector.extract_strided_slice %87 {offsets = [0, 56], sizes = [24, 8], strides = [1, 1]} : vector<24x96xf32> to vector<24x8xf32>
    %171 = arith.truncf %170 : vector<24x8xf32> to vector<24x8xbf16>
    %172 = vector.extract_strided_slice %87 {offsets = [0, 88], sizes = [24, 8], strides = [1, 1]} : vector<24x96xf32> to vector<24x8xf32>
    %173 = arith.truncf %172 : vector<24x8xf32> to vector<24x8xbf16>
    %cst_71 = arith.constant dense<0.000000e+00> : vector<24x24xf32>
    %174 = tpu.matmul %169, %171, %cst_71 {dimension_numbers = #tpu.dot_dimension_numbers<[1], [1], [0], [0], [0, 0, 1, 0], [], []>} : vector<24x8xbf16>, vector<24x8xbf16>, vector<24x24xf32> -> vector<24x24xf32>
    %cst_72 = arith.constant 0.353553385 : f32
    %175 = vector.broadcast %cst_72 : f32 to vector<24x24xf32>
    %176 = arith.mulf %174, %175 : vector<24x24xf32>
    %177 = arith.addf %176, %50 : vector<24x24xf32>
    %cst_73 = arith.constant dense<0xFF800000> : vector<24xf32>
    %178 = vector.multi_reduction <maximumf>, %177, %cst_73 [1] : vector<24x24xf32> to vector<24xf32>
    %179 = vector.shape_cast %178 : vector<24xf32> to vector<24x1xf32>
    %180 = vector.broadcast %179 : vector<24x1xf32> to vector<24x24xf32>
    %181 = arith.subf %177, %180 : vector<24x24xf32>
    %182 = math.exp %181 : vector<24x24xf32>
    %cst_74 = arith.constant dense<0.000000e+00> : vector<24xf32>
    %183 = vector.multi_reduction <add>, %182, %cst_74 [1] : vector<24x24xf32> to vector<24xf32>
    %184 = vector.shape_cast %183 : vector<24xf32> to vector<24x1xf32>
    %185 = tpu.reciprocal %184 {approx = true} : vector<24x1xf32> -> vector<24x1xf32>
    %186 = vector.broadcast %185 : vector<24x1xf32> to vector<24x24xf32>
    %187 = arith.mulf %182, %186 : vector<24x24xf32>
    %188 = arith.truncf %187 : vector<24x24xf32> to vector<24x24xbf16>
    %cst_75 = arith.constant dense<0.000000e+00> : vector<24x8xf32>
    %189 = tpu.matmul %188, %173, %cst_75 {dimension_numbers = #tpu.dot_dimension_numbers<[1], [0], [0], [1], [0, 0, 1, 1], [], []>} : vector<24x24xbf16>, vector<24x8xbf16>, vector<24x8xf32> -> vector<24x8xf32>
    %190 = arith.truncf %189 : vector<24x8xf32> to vector<24x8xbf16>
    %c0_76 = arith.constant 0 : index
    %c3 = arith.constant 3 : index
    %c0_77 = arith.constant 0 : index
    %c0_78 = arith.constant 0 : index
    %191 = vector.load %arg7[%c0_76, %c3, %c0_77, %c0_78] : memref<4x4x8x32xbf16, #tpu.memory_space<vmem>>, vector<1x1x8x32xbf16>
    %192 = vector.shape_cast %191 : vector<1x1x8x32xbf16> to vector<8x32xbf16>
    %cst_79 = arith.constant dense<0.000000e+00> : vector<24x32xf32>
    %193 = tpu.matmul %190, %192, %cst_79 {dimension_numbers = #tpu.dot_dimension_numbers<[1], [0], [0], [1], [0, 0, 1, 1], [], []>} : vector<24x8xbf16>, vector<8x32xbf16>, vector<24x32xf32> -> vector<24x32xf32>
    %194 = arith.addf %167, %193 : vector<24x32xf32>
    %195 = arith.addf %41, %194 : vector<24x32xf32>
    %c0_80 = arith.constant 0 : index
    %c4_81 = arith.constant 4 : index
    %c0_82 = arith.constant 0 : index
    %196 = vector.load %arg3[%c0_80, %c4_81, %c0_82] : memref<4x8x128xf32, #tpu.memory_space<vmem>>, vector<1x1x32xf32>
    %197 = vector.shape_cast %196 : vector<1x1x32xf32> to vector<1x32xf32>
    %198 = vector.broadcast %197 : vector<1x32xf32> to vector<24x32xf32>
    %199 = arith.addf %195, %198 : vector<24x32xf32>
    %c0_83 = arith.constant 0 : index
    %c2_84 = arith.constant 2 : index
    %c0_85 = arith.constant 0 : index
    %200 = vector.load %arg3[%c0_83, %c2_84, %c0_85] : memref<4x8x128xf32, #tpu.memory_space<vmem>>, vector<1x1x32xf32>
    %201 = vector.shape_cast %200 : vector<1x1x32xf32> to vector<1x32xf32>
    %c0_86 = arith.constant 0 : index
    %c3_87 = arith.constant 3 : index
    %c0_88 = arith.constant 0 : index
    %202 = vector.load %arg3[%c0_86, %c3_87, %c0_88] : memref<4x8x128xf32, #tpu.memory_space<vmem>>, vector<1x1x32xf32>
    %203 = vector.shape_cast %202 : vector<1x1x32xf32> to vector<1x32xf32>
    %cst_89 = arith.constant dense<0.000000e+00> : vector<24xf32>
    %204 = vector.multi_reduction <add>, %199, %cst_89 [1] : vector<24x32xf32> to vector<24xf32>
    %205 = vector.shape_cast %204 : vector<24xf32> to vector<24x1xf32>
    %cst_90 = arith.constant 3.200000e+01 : f32
    %206 = vector.broadcast %cst_90 : f32 to vector<24x1xf32>
    %207 = arith.divf %205, %206 : vector<24x1xf32>
    %208 = vector.broadcast %207 : vector<24x1xf32> to vector<24x32xf32>
    %209 = arith.subf %199, %208 : vector<24x32xf32>
    %210 = arith.mulf %209, %209 : vector<24x32xf32>
    %cst_91 = arith.constant dense<0.000000e+00> : vector<24xf32>
    %211 = vector.multi_reduction <add>, %210, %cst_91 [1] : vector<24x32xf32> to vector<24xf32>
    %212 = vector.shape_cast %211 : vector<24xf32> to vector<24x1xf32>
    %cst_92 = arith.constant 3.200000e+01 : f32
    %213 = vector.broadcast %cst_92 : f32 to vector<24x1xf32>
    %214 = arith.divf %212, %213 : vector<24x1xf32>
    %cst_93 = arith.constant 9.99999974E-6 : f32
    %215 = vector.broadcast %cst_93 : f32 to vector<24x1xf32>
    %216 = arith.addf %214, %215 : vector<24x1xf32>
    %217 = math.rsqrt %216 : vector<24x1xf32>
    %218 = vector.broadcast %217 : vector<24x1xf32> to vector<24x32xf32>
    %219 = arith.mulf %209, %218 : vector<24x32xf32>
    %220 = vector.broadcast %201 : vector<1x32xf32> to vector<24x32xf32>
    %221 = arith.mulf %219, %220 : vector<24x32xf32>
    %222 = vector.broadcast %203 : vector<1x32xf32> to vector<24x32xf32>
    %223 = arith.addf %221, %222 : vector<24x32xf32>
    %c0_94 = arith.constant 0 : index
    %c0_95 = arith.constant 0 : index
    %c0_96 = arith.constant 0 : index
    %224 = vector.load %arg8[%c0_94, %c0_95, %c0_96] : memref<4x32x128xbf16, #tpu.memory_space<vmem>>, vector<1x32x128xbf16>
    %225 = vector.shape_cast %224 : vector<1x32x128xbf16> to vector<32x128xbf16>
    %c0_97 = arith.constant 0 : index
    %c7 = arith.constant 7 : index
    %c0_98 = arith.constant 0 : index
    %226 = vector.load %arg3[%c0_97, %c7, %c0_98] : memref<4x8x128xf32, #tpu.memory_space<vmem>>, vector<1x1x128xf32>
    %227 = vector.shape_cast %226 : vector<1x1x128xf32> to vector<1x128xf32>
    %228 = arith.truncf %223 : vector<24x32xf32> to vector<24x32xbf16>
    %cst_99 = arith.constant dense<0.000000e+00> : vector<24x128xf32>
    %229 = tpu.matmul %228, %225, %cst_99 {dimension_numbers = #tpu.dot_dimension_numbers<[1], [0], [0], [1], [0, 0, 1, 1], [], []>} : vector<24x32xbf16>, vector<32x128xbf16>, vector<24x128xf32> -> vector<24x128xf32>
    %230 = vector.broadcast %227 : vector<1x128xf32> to vector<24x128xf32>
    %231 = arith.addf %229, %230 : vector<24x128xf32>
    %cst_100 = arith.constant 1.702000e+00 : f32
    %232 = vector.broadcast %cst_100 : f32 to vector<24x128xf32>
    %233 = arith.mulf %232, %231 : vector<24x128xf32>
    %234 = arith.negf %233 : vector<24x128xf32>
    %235 = math.exp %234 : vector<24x128xf32>
    %cst_101 = arith.constant 1.000000e+00 : f32
    %236 = vector.broadcast %cst_101 : f32 to vector<24x128xf32>
    %237 = arith.addf %236, %235 : vector<24x128xf32>
    %238 = arith.divf %236, %237 : vector<24x128xf32>
    %239 = arith.mulf %231, %238 : vector<24x128xf32>
    %c0_102 = arith.constant 0 : index
    %c0_103 = arith.constant 0 : index
    %c0_104 = arith.constant 0 : index
    %240 = vector.load %arg9[%c0_102, %c0_103, %c0_104] : memref<4x128x32xbf16, #tpu.memory_space<vmem>>, vector<1x128x32xbf16>
    %241 = vector.shape_cast %240 : vector<1x128x32xbf16> to vector<128x32xbf16>
    %c0_105 = arith.constant 0 : index
    %c5 = arith.constant 5 : index
    %c0_106 = arith.constant 0 : index
    %242 = vector.load %arg3[%c0_105, %c5, %c0_106] : memref<4x8x128xf32, #tpu.memory_space<vmem>>, vector<1x1x32xf32>
    %243 = vector.shape_cast %242 : vector<1x1x32xf32> to vector<1x32xf32>
    %244 = arith.truncf %239 : vector<24x128xf32> to vector<24x128xbf16>
    %cst_107 = arith.constant dense<0.000000e+00> : vector<24x32xf32>
    %245 = tpu.matmul %244, %241, %cst_107 {dimension_numbers = #tpu.dot_dimension_numbers<[1], [0], [0], [1], [0, 0, 1, 1], [], []>} : vector<24x128xbf16>, vector<128x32xbf16>, vector<24x32xf32> -> vector<24x32xf32>
    %246 = vector.broadcast %243 : vector<1x32xf32> to vector<24x32xf32>
    %247 = arith.addf %245, %246 : vector<24x32xf32>
    %248 = arith.addf %199, %247 : vector<24x32xf32>
    %249 = vector.extract_strided_slice %14 {offsets = [0, 0], sizes = [4, 32], strides = [1, 1]} : vector<8x32xf32> to vector<4x32xf32>
    %250 = vector.extract_strided_slice %248 {offsets = [4, 0], sizes = [20, 32], strides = [1, 1]} : vector<24x32xf32> to vector<20x32xf32>
    %251 = tpu.concatenate %249, %250 in 0 : vector<4x32xf32>, vector<20x32xf32> -> vector<24x32xf32>
    %c1_108 = arith.constant 1 : index
    %c0_109 = arith.constant 0 : index
    %c0_110 = arith.constant 0 : index
    %252 = vector.load %arg3[%c1_108, %c0_109, %c0_110] : memref<4x8x128xf32, #tpu.memory_space<vmem>>, vector<1x1x32xf32>
    %253 = vector.shape_cast %252 : vector<1x1x32xf32> to vector<1x32xf32>
    %c1_111 = arith.constant 1 : index
    %c1_112 = arith.constant 1 : index
    %c0_113 = arith.constant 0 : index
    %254 = vector.load %arg3[%c1_111, %c1_112, %c0_113] : memref<4x8x128xf32, #tpu.memory_space<vmem>>, vector<1x1x32xf32>
    %255 = vector.shape_cast %254 : vector<1x1x32xf32> to vector<1x32xf32>
    %cst_114 = arith.constant dense<0.000000e+00> : vector<24xf32>
    %256 = vector.multi_reduction <add>, %251, %cst_114 [1] : vector<24x32xf32> to vector<24xf32>
    %257 = vector.shape_cast %256 : vector<24xf32> to vector<24x1xf32>
    %cst_115 = arith.constant 3.200000e+01 : f32
    %258 = vector.broadcast %cst_115 : f32 to vector<24x1xf32>
    %259 = arith.divf %257, %258 : vector<24x1xf32>
    %260 = vector.broadcast %259 : vector<24x1xf32> to vector<24x32xf32>
    %261 = arith.subf %251, %260 : vector<24x32xf32>
    %262 = arith.mulf %261, %261 : vector<24x32xf32>
    %cst_116 = arith.constant dense<0.000000e+00> : vector<24xf32>
    %263 = vector.multi_reduction <add>, %262, %cst_116 [1] : vector<24x32xf32> to vector<24xf32>
    %264 = vector.shape_cast %263 : vector<24xf32> to vector<24x1xf32>
    %cst_117 = arith.constant 3.200000e+01 : f32
    %265 = vector.broadcast %cst_117 : f32 to vector<24x1xf32>
    %266 = arith.divf %264, %265 : vector<24x1xf32>
    %cst_118 = arith.constant 9.99999974E-6 : f32
    %267 = vector.broadcast %cst_118 : f32 to vector<24x1xf32>
    %268 = arith.addf %266, %267 : vector<24x1xf32>
    %269 = math.rsqrt %268 : vector<24x1xf32>
    %270 = vector.broadcast %269 : vector<24x1xf32> to vector<24x32xf32>
    %271 = arith.mulf %261, %270 : vector<24x32xf32>
    %272 = vector.broadcast %253 : vector<1x32xf32> to vector<24x32xf32>
    %273 = arith.mulf %271, %272 : vector<24x32xf32>
    %274 = vector.broadcast %255 : vector<1x32xf32> to vector<24x32xf32>
    %275 = arith.addf %273, %274 : vector<24x32xf32>
    %c1_119 = arith.constant 1 : index
    %c0_120 = arith.constant 0 : index
    %c0_121 = arith.constant 0 : index
    %276 = vector.load %arg6[%c1_119, %c0_120, %c0_121] : memref<4x32x96xbf16, #tpu.memory_space<vmem>>, vector<1x32x96xbf16>
    %277 = vector.shape_cast %276 : vector<1x32x96xbf16> to vector<32x96xbf16>
    %c1_122 = arith.constant 1 : index
    %c6_123 = arith.constant 6 : index
    %c0_124 = arith.constant 0 : index
    %278 = vector.load %arg3[%c1_122, %c6_123, %c0_124] : memref<4x8x128xf32, #tpu.memory_space<vmem>>, vector<1x1x96xf32>
    %279 = vector.shape_cast %278 : vector<1x1x96xf32> to vector<1x96xf32>
    %280 = arith.truncf %275 : vector<24x32xf32> to vector<24x32xbf16>
    %cst_125 = arith.constant dense<0.000000e+00> : vector<24x96xf32>
    %281 = tpu.matmul %280, %277, %cst_125 {dimension_numbers = #tpu.dot_dimension_numbers<[1], [0], [0], [1], [0, 0, 1, 1], [], []>} : vector<24x32xbf16>, vector<32x96xbf16>, vector<24x96xf32> -> vector<24x96xf32>
    %282 = vector.broadcast %279 : vector<1x96xf32> to vector<24x96xf32>
    %283 = arith.addf %281, %282 : vector<24x96xf32>
    %284 = vector.extract_strided_slice %283 {offsets = [0, 0], sizes = [24, 8], strides = [1, 1]} : vector<24x96xf32> to vector<24x8xf32>
    %285 = arith.truncf %284 : vector<24x8xf32> to vector<24x8xbf16>
    %286 = vector.extract_strided_slice %283 {offsets = [0, 32], sizes = [24, 8], strides = [1, 1]} : vector<24x96xf32> to vector<24x8xf32>
    %287 = arith.truncf %286 : vector<24x8xf32> to vector<24x8xbf16>
    %288 = vector.extract_strided_slice %283 {offsets = [0, 64], sizes = [24, 8], strides = [1, 1]} : vector<24x96xf32> to vector<24x8xf32>
    %289 = arith.truncf %288 : vector<24x8xf32> to vector<24x8xbf16>
    %cst_126 = arith.constant dense<0.000000e+00> : vector<24x24xf32>
    %290 = tpu.matmul %285, %287, %cst_126 {dimension_numbers = #tpu.dot_dimension_numbers<[1], [1], [0], [0], [0, 0, 1, 0], [], []>} : vector<24x8xbf16>, vector<24x8xbf16>, vector<24x24xf32> -> vector<24x24xf32>
    %cst_127 = arith.constant 0.353553385 : f32
    %291 = vector.broadcast %cst_127 : f32 to vector<24x24xf32>
    %292 = arith.mulf %290, %291 : vector<24x24xf32>
    %293 = arith.addf %292, %50 : vector<24x24xf32>
    %cst_128 = arith.constant dense<0xFF800000> : vector<24xf32>
    %294 = vector.multi_reduction <maximumf>, %293, %cst_128 [1] : vector<24x24xf32> to vector<24xf32>
    %295 = vector.shape_cast %294 : vector<24xf32> to vector<24x1xf32>
    %296 = vector.broadcast %295 : vector<24x1xf32> to vector<24x24xf32>
    %297 = arith.subf %293, %296 : vector<24x24xf32>
    %298 = math.exp %297 : vector<24x24xf32>
    %cst_129 = arith.constant dense<0.000000e+00> : vector<24xf32>
    %299 = vector.multi_reduction <add>, %298, %cst_129 [1] : vector<24x24xf32> to vector<24xf32>
    %300 = vector.shape_cast %299 : vector<24xf32> to vector<24x1xf32>
    %301 = tpu.reciprocal %300 {approx = true} : vector<24x1xf32> -> vector<24x1xf32>
    %302 = vector.broadcast %301 : vector<24x1xf32> to vector<24x24xf32>
    %303 = arith.mulf %298, %302 : vector<24x24xf32>
    %304 = arith.truncf %303 : vector<24x24xf32> to vector<24x24xbf16>
    %cst_130 = arith.constant dense<0.000000e+00> : vector<24x8xf32>
    %305 = tpu.matmul %304, %289, %cst_130 {dimension_numbers = #tpu.dot_dimension_numbers<[1], [0], [0], [1], [0, 0, 1, 1], [], []>} : vector<24x24xbf16>, vector<24x8xbf16>, vector<24x8xf32> -> vector<24x8xf32>
    %306 = arith.truncf %305 : vector<24x8xf32> to vector<24x8xbf16>
    %c1_131 = arith.constant 1 : index
    %c0_132 = arith.constant 0 : index
    %c0_133 = arith.constant 0 : index
    %c0_134 = arith.constant 0 : index
    %307 = vector.load %arg7[%c1_131, %c0_132, %c0_133, %c0_134] : memref<4x4x8x32xbf16, #tpu.memory_space<vmem>>, vector<1x1x8x32xbf16>
    %308 = vector.shape_cast %307 : vector<1x1x8x32xbf16> to vector<8x32xbf16>
    %cst_135 = arith.constant dense<0.000000e+00> : vector<24x32xf32>
    %309 = tpu.matmul %306, %308, %cst_135 {dimension_numbers = #tpu.dot_dimension_numbers<[1], [0], [0], [1], [0, 0, 1, 1], [], []>} : vector<24x8xbf16>, vector<8x32xbf16>, vector<24x32xf32> -> vector<24x32xf32>
    %310 = vector.extract_strided_slice %283 {offsets = [0, 8], sizes = [24, 8], strides = [1, 1]} : vector<24x96xf32> to vector<24x8xf32>
    %311 = arith.truncf %310 : vector<24x8xf32> to vector<24x8xbf16>
    %312 = vector.extract_strided_slice %283 {offsets = [0, 40], sizes = [24, 8], strides = [1, 1]} : vector<24x96xf32> to vector<24x8xf32>
    %313 = arith.truncf %312 : vector<24x8xf32> to vector<24x8xbf16>
    %314 = vector.extract_strided_slice %283 {offsets = [0, 72], sizes = [24, 8], strides = [1, 1]} : vector<24x96xf32> to vector<24x8xf32>
    %315 = arith.truncf %314 : vector<24x8xf32> to vector<24x8xbf16>
    %cst_136 = arith.constant dense<0.000000e+00> : vector<24x24xf32>
    %316 = tpu.matmul %311, %313, %cst_136 {dimension_numbers = #tpu.dot_dimension_numbers<[1], [1], [0], [0], [0, 0, 1, 0], [], []>} : vector<24x8xbf16>, vector<24x8xbf16>, vector<24x24xf32> -> vector<24x24xf32>
    %cst_137 = arith.constant 0.353553385 : f32
    %317 = vector.broadcast %cst_137 : f32 to vector<24x24xf32>
    %318 = arith.mulf %316, %317 : vector<24x24xf32>
    %319 = arith.addf %318, %50 : vector<24x24xf32>
    %cst_138 = arith.constant dense<0xFF800000> : vector<24xf32>
    %320 = vector.multi_reduction <maximumf>, %319, %cst_138 [1] : vector<24x24xf32> to vector<24xf32>
    %321 = vector.shape_cast %320 : vector<24xf32> to vector<24x1xf32>
    %322 = vector.broadcast %321 : vector<24x1xf32> to vector<24x24xf32>
    %323 = arith.subf %319, %322 : vector<24x24xf32>
    %324 = math.exp %323 : vector<24x24xf32>
    %cst_139 = arith.constant dense<0.000000e+00> : vector<24xf32>
    %325 = vector.multi_reduction <add>, %324, %cst_139 [1] : vector<24x24xf32> to vector<24xf32>
    %326 = vector.shape_cast %325 : vector<24xf32> to vector<24x1xf32>
    %327 = tpu.reciprocal %326 {approx = true} : vector<24x1xf32> -> vector<24x1xf32>
    %328 = vector.broadcast %327 : vector<24x1xf32> to vector<24x24xf32>
    %329 = arith.mulf %324, %328 : vector<24x24xf32>
    %330 = arith.truncf %329 : vector<24x24xf32> to vector<24x24xbf16>
    %cst_140 = arith.constant dense<0.000000e+00> : vector<24x8xf32>
    %331 = tpu.matmul %330, %315, %cst_140 {dimension_numbers = #tpu.dot_dimension_numbers<[1], [0], [0], [1], [0, 0, 1, 1], [], []>} : vector<24x24xbf16>, vector<24x8xbf16>, vector<24x8xf32> -> vector<24x8xf32>
    %332 = arith.truncf %331 : vector<24x8xf32> to vector<24x8xbf16>
    %c1_141 = arith.constant 1 : index
    %c1_142 = arith.constant 1 : index
    %c0_143 = arith.constant 0 : index
    %c0_144 = arith.constant 0 : index
    %333 = vector.load %arg7[%c1_141, %c1_142, %c0_143, %c0_144] : memref<4x4x8x32xbf16, #tpu.memory_space<vmem>>, vector<1x1x8x32xbf16>
    %334 = vector.shape_cast %333 : vector<1x1x8x32xbf16> to vector<8x32xbf16>
    %cst_145 = arith.constant dense<0.000000e+00> : vector<24x32xf32>
    %335 = tpu.matmul %332, %334, %cst_145 {dimension_numbers = #tpu.dot_dimension_numbers<[1], [0], [0], [1], [0, 0, 1, 1], [], []>} : vector<24x8xbf16>, vector<8x32xbf16>, vector<24x32xf32> -> vector<24x32xf32>
    %336 = arith.addf %309, %335 : vector<24x32xf32>
    %337 = vector.extract_strided_slice %283 {offsets = [0, 16], sizes = [24, 8], strides = [1, 1]} : vector<24x96xf32> to vector<24x8xf32>
    %338 = arith.truncf %337 : vector<24x8xf32> to vector<24x8xbf16>
    %339 = vector.extract_strided_slice %283 {offsets = [0, 48], sizes = [24, 8], strides = [1, 1]} : vector<24x96xf32> to vector<24x8xf32>
    %340 = arith.truncf %339 : vector<24x8xf32> to vector<24x8xbf16>
    %341 = vector.extract_strided_slice %283 {offsets = [0, 80], sizes = [24, 8], strides = [1, 1]} : vector<24x96xf32> to vector<24x8xf32>
    %342 = arith.truncf %341 : vector<24x8xf32> to vector<24x8xbf16>
    %cst_146 = arith.constant dense<0.000000e+00> : vector<24x24xf32>
    %343 = tpu.matmul %338, %340, %cst_146 {dimension_numbers = #tpu.dot_dimension_numbers<[1], [1], [0], [0], [0, 0, 1, 0], [], []>} : vector<24x8xbf16>, vector<24x8xbf16>, vector<24x24xf32> -> vector<24x24xf32>
    %cst_147 = arith.constant 0.353553385 : f32
    %344 = vector.broadcast %cst_147 : f32 to vector<24x24xf32>
    %345 = arith.mulf %343, %344 : vector<24x24xf32>
    %346 = arith.addf %345, %50 : vector<24x24xf32>
    %cst_148 = arith.constant dense<0xFF800000> : vector<24xf32>
    %347 = vector.multi_reduction <maximumf>, %346, %cst_148 [1] : vector<24x24xf32> to vector<24xf32>
    %348 = vector.shape_cast %347 : vector<24xf32> to vector<24x1xf32>
    %349 = vector.broadcast %348 : vector<24x1xf32> to vector<24x24xf32>
    %350 = arith.subf %346, %349 : vector<24x24xf32>
    %351 = math.exp %350 : vector<24x24xf32>
    %cst_149 = arith.constant dense<0.000000e+00> : vector<24xf32>
    %352 = vector.multi_reduction <add>, %351, %cst_149 [1] : vector<24x24xf32> to vector<24xf32>
    %353 = vector.shape_cast %352 : vector<24xf32> to vector<24x1xf32>
    %354 = tpu.reciprocal %353 {approx = true} : vector<24x1xf32> -> vector<24x1xf32>
    %355 = vector.broadcast %354 : vector<24x1xf32> to vector<24x24xf32>
    %356 = arith.mulf %351, %355 : vector<24x24xf32>
    %357 = arith.truncf %356 : vector<24x24xf32> to vector<24x24xbf16>
    %cst_150 = arith.constant dense<0.000000e+00> : vector<24x8xf32>
    %358 = tpu.matmul %357, %342, %cst_150 {dimension_numbers = #tpu.dot_dimension_numbers<[1], [0], [0], [1], [0, 0, 1, 1], [], []>} : vector<24x24xbf16>, vector<24x8xbf16>, vector<24x8xf32> -> vector<24x8xf32>
    %359 = arith.truncf %358 : vector<24x8xf32> to vector<24x8xbf16>
    %c1_151 = arith.constant 1 : index
    %c2_152 = arith.constant 2 : index
    %c0_153 = arith.constant 0 : index
    %c0_154 = arith.constant 0 : index
    %360 = vector.load %arg7[%c1_151, %c2_152, %c0_153, %c0_154] : memref<4x4x8x32xbf16, #tpu.memory_space<vmem>>, vector<1x1x8x32xbf16>
    %361 = vector.shape_cast %360 : vector<1x1x8x32xbf16> to vector<8x32xbf16>
    %cst_155 = arith.constant dense<0.000000e+00> : vector<24x32xf32>
    %362 = tpu.matmul %359, %361, %cst_155 {dimension_numbers = #tpu.dot_dimension_numbers<[1], [0], [0], [1], [0, 0, 1, 1], [], []>} : vector<24x8xbf16>, vector<8x32xbf16>, vector<24x32xf32> -> vector<24x32xf32>
    %363 = arith.addf %336, %362 : vector<24x32xf32>
    %364 = vector.extract_strided_slice %283 {offsets = [0, 24], sizes = [24, 8], strides = [1, 1]} : vector<24x96xf32> to vector<24x8xf32>
    %365 = arith.truncf %364 : vector<24x8xf32> to vector<24x8xbf16>
    %366 = vector.extract_strided_slice %283 {offsets = [0, 56], sizes = [24, 8], strides = [1, 1]} : vector<24x96xf32> to vector<24x8xf32>
    %367 = arith.truncf %366 : vector<24x8xf32> to vector<24x8xbf16>
    %368 = vector.extract_strided_slice %283 {offsets = [0, 88], sizes = [24, 8], strides = [1, 1]} : vector<24x96xf32> to vector<24x8xf32>
    %369 = arith.truncf %368 : vector<24x8xf32> to vector<24x8xbf16>
    %cst_156 = arith.constant dense<0.000000e+00> : vector<24x24xf32>
    %370 = tpu.matmul %365, %367, %cst_156 {dimension_numbers = #tpu.dot_dimension_numbers<[1], [1], [0], [0], [0, 0, 1, 0], [], []>} : vector<24x8xbf16>, vector<24x8xbf16>, vector<24x24xf32> -> vector<24x24xf32>
    %cst_157 = arith.constant 0.353553385 : f32
    %371 = vector.broadcast %cst_157 : f32 to vector<24x24xf32>
    %372 = arith.mulf %370, %371 : vector<24x24xf32>
    %373 = arith.addf %372, %50 : vector<24x24xf32>
    %cst_158 = arith.constant dense<0xFF800000> : vector<24xf32>
    %374 = vector.multi_reduction <maximumf>, %373, %cst_158 [1] : vector<24x24xf32> to vector<24xf32>
    %375 = vector.shape_cast %374 : vector<24xf32> to vector<24x1xf32>
    %376 = vector.broadcast %375 : vector<24x1xf32> to vector<24x24xf32>
    %377 = arith.subf %373, %376 : vector<24x24xf32>
    %378 = math.exp %377 : vector<24x24xf32>
    %cst_159 = arith.constant dense<0.000000e+00> : vector<24xf32>
    %379 = vector.multi_reduction <add>, %378, %cst_159 [1] : vector<24x24xf32> to vector<24xf32>
    %380 = vector.shape_cast %379 : vector<24xf32> to vector<24x1xf32>
    %381 = tpu.reciprocal %380 {approx = true} : vector<24x1xf32> -> vector<24x1xf32>
    %382 = vector.broadcast %381 : vector<24x1xf32> to vector<24x24xf32>
    %383 = arith.mulf %378, %382 : vector<24x24xf32>
    %384 = arith.truncf %383 : vector<24x24xf32> to vector<24x24xbf16>
    %cst_160 = arith.constant dense<0.000000e+00> : vector<24x8xf32>
    %385 = tpu.matmul %384, %369, %cst_160 {dimension_numbers = #tpu.dot_dimension_numbers<[1], [0], [0], [1], [0, 0, 1, 1], [], []>} : vector<24x24xbf16>, vector<24x8xbf16>, vector<24x8xf32> -> vector<24x8xf32>
    %386 = arith.truncf %385 : vector<24x8xf32> to vector<24x8xbf16>
    %c1_161 = arith.constant 1 : index
    %c3_162 = arith.constant 3 : index
    %c0_163 = arith.constant 0 : index
    %c0_164 = arith.constant 0 : index
    %387 = vector.load %arg7[%c1_161, %c3_162, %c0_163, %c0_164] : memref<4x4x8x32xbf16, #tpu.memory_space<vmem>>, vector<1x1x8x32xbf16>
    %388 = vector.shape_cast %387 : vector<1x1x8x32xbf16> to vector<8x32xbf16>
    %cst_165 = arith.constant dense<0.000000e+00> : vector<24x32xf32>
    %389 = tpu.matmul %386, %388, %cst_165 {dimension_numbers = #tpu.dot_dimension_numbers<[1], [0], [0], [1], [0, 0, 1, 1], [], []>} : vector<24x8xbf16>, vector<8x32xbf16>, vector<24x32xf32> -> vector<24x32xf32>
    %390 = arith.addf %363, %389 : vector<24x32xf32>
    %391 = arith.addf %251, %390 : vector<24x32xf32>
    %c1_166 = arith.constant 1 : index
    %c4_167 = arith.constant 4 : index
    %c0_168 = arith.constant 0 : index
    %392 = vector.load %arg3[%c1_166, %c4_167, %c0_168] : memref<4x8x128xf32, #tpu.memory_space<vmem>>, vector<1x1x32xf32>
    %393 = vector.shape_cast %392 : vector<1x1x32xf32> to vector<1x32xf32>
    %394 = vector.broadcast %393 : vector<1x32xf32> to vector<24x32xf32>
    %395 = arith.addf %391, %394 : vector<24x32xf32>
    %c1_169 = arith.constant 1 : index
    %c2_170 = arith.constant 2 : index
    %c0_171 = arith.constant 0 : index
    %396 = vector.load %arg3[%c1_169, %c2_170, %c0_171] : memref<4x8x128xf32, #tpu.memory_space<vmem>>, vector<1x1x32xf32>
    %397 = vector.shape_cast %396 : vector<1x1x32xf32> to vector<1x32xf32>
    %c1_172 = arith.constant 1 : index
    %c3_173 = arith.constant 3 : index
    %c0_174 = arith.constant 0 : index
    %398 = vector.load %arg3[%c1_172, %c3_173, %c0_174] : memref<4x8x128xf32, #tpu.memory_space<vmem>>, vector<1x1x32xf32>
    %399 = vector.shape_cast %398 : vector<1x1x32xf32> to vector<1x32xf32>
    %cst_175 = arith.constant dense<0.000000e+00> : vector<24xf32>
    %400 = vector.multi_reduction <add>, %395, %cst_175 [1] : vector<24x32xf32> to vector<24xf32>
    %401 = vector.shape_cast %400 : vector<24xf32> to vector<24x1xf32>
    %cst_176 = arith.constant 3.200000e+01 : f32
    %402 = vector.broadcast %cst_176 : f32 to vector<24x1xf32>
    %403 = arith.divf %401, %402 : vector<24x1xf32>
    %404 = vector.broadcast %403 : vector<24x1xf32> to vector<24x32xf32>
    %405 = arith.subf %395, %404 : vector<24x32xf32>
    %406 = arith.mulf %405, %405 : vector<24x32xf32>
    %cst_177 = arith.constant dense<0.000000e+00> : vector<24xf32>
    %407 = vector.multi_reduction <add>, %406, %cst_177 [1] : vector<24x32xf32> to vector<24xf32>
    %408 = vector.shape_cast %407 : vector<24xf32> to vector<24x1xf32>
    %cst_178 = arith.constant 3.200000e+01 : f32
    %409 = vector.broadcast %cst_178 : f32 to vector<24x1xf32>
    %410 = arith.divf %408, %409 : vector<24x1xf32>
    %cst_179 = arith.constant 9.99999974E-6 : f32
    %411 = vector.broadcast %cst_179 : f32 to vector<24x1xf32>
    %412 = arith.addf %410, %411 : vector<24x1xf32>
    %413 = math.rsqrt %412 : vector<24x1xf32>
    %414 = vector.broadcast %413 : vector<24x1xf32> to vector<24x32xf32>
    %415 = arith.mulf %405, %414 : vector<24x32xf32>
    %416 = vector.broadcast %397 : vector<1x32xf32> to vector<24x32xf32>
    %417 = arith.mulf %415, %416 : vector<24x32xf32>
    %418 = vector.broadcast %399 : vector<1x32xf32> to vector<24x32xf32>
    %419 = arith.addf %417, %418 : vector<24x32xf32>
    %c1_180 = arith.constant 1 : index
    %c0_181 = arith.constant 0 : index
    %c0_182 = arith.constant 0 : index
    %420 = vector.load %arg8[%c1_180, %c0_181, %c0_182] : memref<4x32x128xbf16, #tpu.memory_space<vmem>>, vector<1x32x128xbf16>
    %421 = vector.shape_cast %420 : vector<1x32x128xbf16> to vector<32x128xbf16>
    %c1_183 = arith.constant 1 : index
    %c7_184 = arith.constant 7 : index
    %c0_185 = arith.constant 0 : index
    %422 = vector.load %arg3[%c1_183, %c7_184, %c0_185] : memref<4x8x128xf32, #tpu.memory_space<vmem>>, vector<1x1x128xf32>
    %423 = vector.shape_cast %422 : vector<1x1x128xf32> to vector<1x128xf32>
    %424 = arith.truncf %419 : vector<24x32xf32> to vector<24x32xbf16>
    %cst_186 = arith.constant dense<0.000000e+00> : vector<24x128xf32>
    %425 = tpu.matmul %424, %421, %cst_186 {dimension_numbers = #tpu.dot_dimension_numbers<[1], [0], [0], [1], [0, 0, 1, 1], [], []>} : vector<24x32xbf16>, vector<32x128xbf16>, vector<24x128xf32> -> vector<24x128xf32>
    %426 = vector.broadcast %423 : vector<1x128xf32> to vector<24x128xf32>
    %427 = arith.addf %425, %426 : vector<24x128xf32>
    %cst_187 = arith.constant 1.702000e+00 : f32
    %428 = vector.broadcast %cst_187 : f32 to vector<24x128xf32>
    %429 = arith.mulf %428, %427 : vector<24x128xf32>
    %430 = arith.negf %429 : vector<24x128xf32>
    %431 = math.exp %430 : vector<24x128xf32>
    %cst_188 = arith.constant 1.000000e+00 : f32
    %432 = vector.broadcast %cst_188 : f32 to vector<24x128xf32>
    %433 = arith.addf %432, %431 : vector<24x128xf32>
    %434 = arith.divf %432, %433 : vector<24x128xf32>
    %435 = arith.mulf %427, %434 : vector<24x128xf32>
    %c1_189 = arith.constant 1 : index
    %c0_190 = arith.constant 0 : index
    %c0_191 = arith.constant 0 : index
    %436 = vector.load %arg9[%c1_189, %c0_190, %c0_191] : memref<4x128x32xbf16, #tpu.memory_space<vmem>>, vector<1x128x32xbf16>
    %437 = vector.shape_cast %436 : vector<1x128x32xbf16> to vector<128x32xbf16>
    %c1_192 = arith.constant 1 : index
    %c5_193 = arith.constant 5 : index
    %c0_194 = arith.constant 0 : index
    %438 = vector.load %arg3[%c1_192, %c5_193, %c0_194] : memref<4x8x128xf32, #tpu.memory_space<vmem>>, vector<1x1x32xf32>
    %439 = vector.shape_cast %438 : vector<1x1x32xf32> to vector<1x32xf32>
    %440 = arith.truncf %435 : vector<24x128xf32> to vector<24x128xbf16>
    %cst_195 = arith.constant dense<0.000000e+00> : vector<24x32xf32>
    %441 = tpu.matmul %440, %437, %cst_195 {dimension_numbers = #tpu.dot_dimension_numbers<[1], [0], [0], [1], [0, 0, 1, 1], [], []>} : vector<24x128xbf16>, vector<128x32xbf16>, vector<24x32xf32> -> vector<24x32xf32>
    %442 = vector.broadcast %439 : vector<1x32xf32> to vector<24x32xf32>
    %443 = arith.addf %441, %442 : vector<24x32xf32>
    %444 = arith.addf %395, %443 : vector<24x32xf32>
    %c2_196 = arith.constant 2 : index
    %c0_197 = arith.constant 0 : index
    %c0_198 = arith.constant 0 : index
    %445 = vector.load %arg3[%c2_196, %c0_197, %c0_198] : memref<4x8x128xf32, #tpu.memory_space<vmem>>, vector<1x1x32xf32>
    %446 = vector.shape_cast %445 : vector<1x1x32xf32> to vector<1x32xf32>
    %c2_199 = arith.constant 2 : index
    %c1_200 = arith.constant 1 : index
    %c0_201 = arith.constant 0 : index
    %447 = vector.load %arg3[%c2_199, %c1_200, %c0_201] : memref<4x8x128xf32, #tpu.memory_space<vmem>>, vector<1x1x32xf32>
    %448 = vector.shape_cast %447 : vector<1x1x32xf32> to vector<1x32xf32>
    %cst_202 = arith.constant dense<0.000000e+00> : vector<24xf32>
    %449 = vector.multi_reduction <add>, %444, %cst_202 [1] : vector<24x32xf32> to vector<24xf32>
    %450 = vector.shape_cast %449 : vector<24xf32> to vector<24x1xf32>
    %cst_203 = arith.constant 3.200000e+01 : f32
    %451 = vector.broadcast %cst_203 : f32 to vector<24x1xf32>
    %452 = arith.divf %450, %451 : vector<24x1xf32>
    %453 = vector.broadcast %452 : vector<24x1xf32> to vector<24x32xf32>
    %454 = arith.subf %444, %453 : vector<24x32xf32>
    %455 = arith.mulf %454, %454 : vector<24x32xf32>
    %cst_204 = arith.constant dense<0.000000e+00> : vector<24xf32>
    %456 = vector.multi_reduction <add>, %455, %cst_204 [1] : vector<24x32xf32> to vector<24xf32>
    %457 = vector.shape_cast %456 : vector<24xf32> to vector<24x1xf32>
    %cst_205 = arith.constant 3.200000e+01 : f32
    %458 = vector.broadcast %cst_205 : f32 to vector<24x1xf32>
    %459 = arith.divf %457, %458 : vector<24x1xf32>
    %cst_206 = arith.constant 9.99999974E-6 : f32
    %460 = vector.broadcast %cst_206 : f32 to vector<24x1xf32>
    %461 = arith.addf %459, %460 : vector<24x1xf32>
    %462 = math.rsqrt %461 : vector<24x1xf32>
    %463 = vector.broadcast %462 : vector<24x1xf32> to vector<24x32xf32>
    %464 = arith.mulf %454, %463 : vector<24x32xf32>
    %465 = vector.broadcast %446 : vector<1x32xf32> to vector<24x32xf32>
    %466 = arith.mulf %464, %465 : vector<24x32xf32>
    %467 = vector.broadcast %448 : vector<1x32xf32> to vector<24x32xf32>
    %468 = arith.addf %466, %467 : vector<24x32xf32>
    %c2_207 = arith.constant 2 : index
    %c0_208 = arith.constant 0 : index
    %c0_209 = arith.constant 0 : index
    %469 = vector.load %arg6[%c2_207, %c0_208, %c0_209] : memref<4x32x96xbf16, #tpu.memory_space<vmem>>, vector<1x32x96xbf16>
    %470 = vector.shape_cast %469 : vector<1x32x96xbf16> to vector<32x96xbf16>
    %c2_210 = arith.constant 2 : index
    %c6_211 = arith.constant 6 : index
    %c0_212 = arith.constant 0 : index
    %471 = vector.load %arg3[%c2_210, %c6_211, %c0_212] : memref<4x8x128xf32, #tpu.memory_space<vmem>>, vector<1x1x96xf32>
    %472 = vector.shape_cast %471 : vector<1x1x96xf32> to vector<1x96xf32>
    %473 = arith.truncf %468 : vector<24x32xf32> to vector<24x32xbf16>
    %cst_213 = arith.constant dense<0.000000e+00> : vector<24x96xf32>
    %474 = tpu.matmul %473, %470, %cst_213 {dimension_numbers = #tpu.dot_dimension_numbers<[1], [0], [0], [1], [0, 0, 1, 1], [], []>} : vector<24x32xbf16>, vector<32x96xbf16>, vector<24x96xf32> -> vector<24x96xf32>
    %475 = vector.broadcast %472 : vector<1x96xf32> to vector<24x96xf32>
    %476 = arith.addf %474, %475 : vector<24x96xf32>
    %477 = vector.extract_strided_slice %476 {offsets = [0, 0], sizes = [24, 8], strides = [1, 1]} : vector<24x96xf32> to vector<24x8xf32>
    %478 = arith.truncf %477 : vector<24x8xf32> to vector<24x8xbf16>
    %479 = vector.extract_strided_slice %476 {offsets = [0, 32], sizes = [24, 8], strides = [1, 1]} : vector<24x96xf32> to vector<24x8xf32>
    %480 = arith.truncf %479 : vector<24x8xf32> to vector<24x8xbf16>
    %481 = vector.extract_strided_slice %476 {offsets = [0, 64], sizes = [24, 8], strides = [1, 1]} : vector<24x96xf32> to vector<24x8xf32>
    %482 = arith.truncf %481 : vector<24x8xf32> to vector<24x8xbf16>
    %cst_214 = arith.constant dense<0.000000e+00> : vector<24x24xf32>
    %483 = tpu.matmul %478, %480, %cst_214 {dimension_numbers = #tpu.dot_dimension_numbers<[1], [1], [0], [0], [0, 0, 1, 0], [], []>} : vector<24x8xbf16>, vector<24x8xbf16>, vector<24x24xf32> -> vector<24x24xf32>
    %cst_215 = arith.constant 0.353553385 : f32
    %484 = vector.broadcast %cst_215 : f32 to vector<24x24xf32>
    %485 = arith.mulf %483, %484 : vector<24x24xf32>
    %486 = arith.addf %485, %55 : vector<24x24xf32>
    %cst_216 = arith.constant dense<0xFF800000> : vector<24xf32>
    %487 = vector.multi_reduction <maximumf>, %486, %cst_216 [1] : vector<24x24xf32> to vector<24xf32>
    %488 = vector.shape_cast %487 : vector<24xf32> to vector<24x1xf32>
    %489 = vector.broadcast %488 : vector<24x1xf32> to vector<24x24xf32>
    %490 = arith.subf %486, %489 : vector<24x24xf32>
    %491 = math.exp %490 : vector<24x24xf32>
    %cst_217 = arith.constant dense<0.000000e+00> : vector<24xf32>
    %492 = vector.multi_reduction <add>, %491, %cst_217 [1] : vector<24x24xf32> to vector<24xf32>
    %493 = vector.shape_cast %492 : vector<24xf32> to vector<24x1xf32>
    %494 = tpu.reciprocal %493 {approx = true} : vector<24x1xf32> -> vector<24x1xf32>
    %495 = vector.broadcast %494 : vector<24x1xf32> to vector<24x24xf32>
    %496 = arith.mulf %491, %495 : vector<24x24xf32>
    %497 = arith.truncf %496 : vector<24x24xf32> to vector<24x24xbf16>
    %cst_218 = arith.constant dense<0.000000e+00> : vector<24x8xf32>
    %498 = tpu.matmul %497, %482, %cst_218 {dimension_numbers = #tpu.dot_dimension_numbers<[1], [0], [0], [1], [0, 0, 1, 1], [], []>} : vector<24x24xbf16>, vector<24x8xbf16>, vector<24x8xf32> -> vector<24x8xf32>
    %499 = arith.truncf %498 : vector<24x8xf32> to vector<24x8xbf16>
    %c2_219 = arith.constant 2 : index
    %c0_220 = arith.constant 0 : index
    %c0_221 = arith.constant 0 : index
    %c0_222 = arith.constant 0 : index
    %500 = vector.load %arg7[%c2_219, %c0_220, %c0_221, %c0_222] : memref<4x4x8x32xbf16, #tpu.memory_space<vmem>>, vector<1x1x8x32xbf16>
    %501 = vector.shape_cast %500 : vector<1x1x8x32xbf16> to vector<8x32xbf16>
    %cst_223 = arith.constant dense<0.000000e+00> : vector<24x32xf32>
    %502 = tpu.matmul %499, %501, %cst_223 {dimension_numbers = #tpu.dot_dimension_numbers<[1], [0], [0], [1], [0, 0, 1, 1], [], []>} : vector<24x8xbf16>, vector<8x32xbf16>, vector<24x32xf32> -> vector<24x32xf32>
    %503 = vector.extract_strided_slice %476 {offsets = [0, 8], sizes = [24, 8], strides = [1, 1]} : vector<24x96xf32> to vector<24x8xf32>
    %504 = arith.truncf %503 : vector<24x8xf32> to vector<24x8xbf16>
    %505 = vector.extract_strided_slice %476 {offsets = [0, 40], sizes = [24, 8], strides = [1, 1]} : vector<24x96xf32> to vector<24x8xf32>
    %506 = arith.truncf %505 : vector<24x8xf32> to vector<24x8xbf16>
    %507 = vector.extract_strided_slice %476 {offsets = [0, 72], sizes = [24, 8], strides = [1, 1]} : vector<24x96xf32> to vector<24x8xf32>
    %508 = arith.truncf %507 : vector<24x8xf32> to vector<24x8xbf16>
    %cst_224 = arith.constant dense<0.000000e+00> : vector<24x24xf32>
    %509 = tpu.matmul %504, %506, %cst_224 {dimension_numbers = #tpu.dot_dimension_numbers<[1], [1], [0], [0], [0, 0, 1, 0], [], []>} : vector<24x8xbf16>, vector<24x8xbf16>, vector<24x24xf32> -> vector<24x24xf32>
    %cst_225 = arith.constant 0.353553385 : f32
    %510 = vector.broadcast %cst_225 : f32 to vector<24x24xf32>
    %511 = arith.mulf %509, %510 : vector<24x24xf32>
    %512 = arith.addf %511, %55 : vector<24x24xf32>
    %cst_226 = arith.constant dense<0xFF800000> : vector<24xf32>
    %513 = vector.multi_reduction <maximumf>, %512, %cst_226 [1] : vector<24x24xf32> to vector<24xf32>
    %514 = vector.shape_cast %513 : vector<24xf32> to vector<24x1xf32>
    %515 = vector.broadcast %514 : vector<24x1xf32> to vector<24x24xf32>
    %516 = arith.subf %512, %515 : vector<24x24xf32>
    %517 = math.exp %516 : vector<24x24xf32>
    %cst_227 = arith.constant dense<0.000000e+00> : vector<24xf32>
    %518 = vector.multi_reduction <add>, %517, %cst_227 [1] : vector<24x24xf32> to vector<24xf32>
    %519 = vector.shape_cast %518 : vector<24xf32> to vector<24x1xf32>
    %520 = tpu.reciprocal %519 {approx = true} : vector<24x1xf32> -> vector<24x1xf32>
    %521 = vector.broadcast %520 : vector<24x1xf32> to vector<24x24xf32>
    %522 = arith.mulf %517, %521 : vector<24x24xf32>
    %523 = arith.truncf %522 : vector<24x24xf32> to vector<24x24xbf16>
    %cst_228 = arith.constant dense<0.000000e+00> : vector<24x8xf32>
    %524 = tpu.matmul %523, %508, %cst_228 {dimension_numbers = #tpu.dot_dimension_numbers<[1], [0], [0], [1], [0, 0, 1, 1], [], []>} : vector<24x24xbf16>, vector<24x8xbf16>, vector<24x8xf32> -> vector<24x8xf32>
    %525 = arith.truncf %524 : vector<24x8xf32> to vector<24x8xbf16>
    %c2_229 = arith.constant 2 : index
    %c1_230 = arith.constant 1 : index
    %c0_231 = arith.constant 0 : index
    %c0_232 = arith.constant 0 : index
    %526 = vector.load %arg7[%c2_229, %c1_230, %c0_231, %c0_232] : memref<4x4x8x32xbf16, #tpu.memory_space<vmem>>, vector<1x1x8x32xbf16>
    %527 = vector.shape_cast %526 : vector<1x1x8x32xbf16> to vector<8x32xbf16>
    %cst_233 = arith.constant dense<0.000000e+00> : vector<24x32xf32>
    %528 = tpu.matmul %525, %527, %cst_233 {dimension_numbers = #tpu.dot_dimension_numbers<[1], [0], [0], [1], [0, 0, 1, 1], [], []>} : vector<24x8xbf16>, vector<8x32xbf16>, vector<24x32xf32> -> vector<24x32xf32>
    %529 = arith.addf %502, %528 : vector<24x32xf32>
    %530 = vector.extract_strided_slice %476 {offsets = [0, 16], sizes = [24, 8], strides = [1, 1]} : vector<24x96xf32> to vector<24x8xf32>
    %531 = arith.truncf %530 : vector<24x8xf32> to vector<24x8xbf16>
    %532 = vector.extract_strided_slice %476 {offsets = [0, 48], sizes = [24, 8], strides = [1, 1]} : vector<24x96xf32> to vector<24x8xf32>
    %533 = arith.truncf %532 : vector<24x8xf32> to vector<24x8xbf16>
    %534 = vector.extract_strided_slice %476 {offsets = [0, 80], sizes = [24, 8], strides = [1, 1]} : vector<24x96xf32> to vector<24x8xf32>
    %535 = arith.truncf %534 : vector<24x8xf32> to vector<24x8xbf16>
    %cst_234 = arith.constant dense<0.000000e+00> : vector<24x24xf32>
    %536 = tpu.matmul %531, %533, %cst_234 {dimension_numbers = #tpu.dot_dimension_numbers<[1], [1], [0], [0], [0, 0, 1, 0], [], []>} : vector<24x8xbf16>, vector<24x8xbf16>, vector<24x24xf32> -> vector<24x24xf32>
    %cst_235 = arith.constant 0.353553385 : f32
    %537 = vector.broadcast %cst_235 : f32 to vector<24x24xf32>
    %538 = arith.mulf %536, %537 : vector<24x24xf32>
    %539 = arith.addf %538, %55 : vector<24x24xf32>
    %cst_236 = arith.constant dense<0xFF800000> : vector<24xf32>
    %540 = vector.multi_reduction <maximumf>, %539, %cst_236 [1] : vector<24x24xf32> to vector<24xf32>
    %541 = vector.shape_cast %540 : vector<24xf32> to vector<24x1xf32>
    %542 = vector.broadcast %541 : vector<24x1xf32> to vector<24x24xf32>
    %543 = arith.subf %539, %542 : vector<24x24xf32>
    %544 = math.exp %543 : vector<24x24xf32>
    %cst_237 = arith.constant dense<0.000000e+00> : vector<24xf32>
    %545 = vector.multi_reduction <add>, %544, %cst_237 [1] : vector<24x24xf32> to vector<24xf32>
    %546 = vector.shape_cast %545 : vector<24xf32> to vector<24x1xf32>
    %547 = tpu.reciprocal %546 {approx = true} : vector<24x1xf32> -> vector<24x1xf32>
    %548 = vector.broadcast %547 : vector<24x1xf32> to vector<24x24xf32>
    %549 = arith.mulf %544, %548 : vector<24x24xf32>
    %550 = arith.truncf %549 : vector<24x24xf32> to vector<24x24xbf16>
    %cst_238 = arith.constant dense<0.000000e+00> : vector<24x8xf32>
    %551 = tpu.matmul %550, %535, %cst_238 {dimension_numbers = #tpu.dot_dimension_numbers<[1], [0], [0], [1], [0, 0, 1, 1], [], []>} : vector<24x24xbf16>, vector<24x8xbf16>, vector<24x8xf32> -> vector<24x8xf32>
    %552 = arith.truncf %551 : vector<24x8xf32> to vector<24x8xbf16>
    %c2_239 = arith.constant 2 : index
    %c2_240 = arith.constant 2 : index
    %c0_241 = arith.constant 0 : index
    %c0_242 = arith.constant 0 : index
    %553 = vector.load %arg7[%c2_239, %c2_240, %c0_241, %c0_242] : memref<4x4x8x32xbf16, #tpu.memory_space<vmem>>, vector<1x1x8x32xbf16>
    %554 = vector.shape_cast %553 : vector<1x1x8x32xbf16> to vector<8x32xbf16>
    %cst_243 = arith.constant dense<0.000000e+00> : vector<24x32xf32>
    %555 = tpu.matmul %552, %554, %cst_243 {dimension_numbers = #tpu.dot_dimension_numbers<[1], [0], [0], [1], [0, 0, 1, 1], [], []>} : vector<24x8xbf16>, vector<8x32xbf16>, vector<24x32xf32> -> vector<24x32xf32>
    %556 = arith.addf %529, %555 : vector<24x32xf32>
    %557 = vector.extract_strided_slice %476 {offsets = [0, 24], sizes = [24, 8], strides = [1, 1]} : vector<24x96xf32> to vector<24x8xf32>
    %558 = arith.truncf %557 : vector<24x8xf32> to vector<24x8xbf16>
    %559 = vector.extract_strided_slice %476 {offsets = [0, 56], sizes = [24, 8], strides = [1, 1]} : vector<24x96xf32> to vector<24x8xf32>
    %560 = arith.truncf %559 : vector<24x8xf32> to vector<24x8xbf16>
    %561 = vector.extract_strided_slice %476 {offsets = [0, 88], sizes = [24, 8], strides = [1, 1]} : vector<24x96xf32> to vector<24x8xf32>
    %562 = arith.truncf %561 : vector<24x8xf32> to vector<24x8xbf16>
    %cst_244 = arith.constant dense<0.000000e+00> : vector<24x24xf32>
    %563 = tpu.matmul %558, %560, %cst_244 {dimension_numbers = #tpu.dot_dimension_numbers<[1], [1], [0], [0], [0, 0, 1, 0], [], []>} : vector<24x8xbf16>, vector<24x8xbf16>, vector<24x24xf32> -> vector<24x24xf32>
    %cst_245 = arith.constant 0.353553385 : f32
    %564 = vector.broadcast %cst_245 : f32 to vector<24x24xf32>
    %565 = arith.mulf %563, %564 : vector<24x24xf32>
    %566 = arith.addf %565, %55 : vector<24x24xf32>
    %cst_246 = arith.constant dense<0xFF800000> : vector<24xf32>
    %567 = vector.multi_reduction <maximumf>, %566, %cst_246 [1] : vector<24x24xf32> to vector<24xf32>
    %568 = vector.shape_cast %567 : vector<24xf32> to vector<24x1xf32>
    %569 = vector.broadcast %568 : vector<24x1xf32> to vector<24x24xf32>
    %570 = arith.subf %566, %569 : vector<24x24xf32>
    %571 = math.exp %570 : vector<24x24xf32>
    %cst_247 = arith.constant dense<0.000000e+00> : vector<24xf32>
    %572 = vector.multi_reduction <add>, %571, %cst_247 [1] : vector<24x24xf32> to vector<24xf32>
    %573 = vector.shape_cast %572 : vector<24xf32> to vector<24x1xf32>
    %574 = tpu.reciprocal %573 {approx = true} : vector<24x1xf32> -> vector<24x1xf32>
    %575 = vector.broadcast %574 : vector<24x1xf32> to vector<24x24xf32>
    %576 = arith.mulf %571, %575 : vector<24x24xf32>
    %577 = arith.truncf %576 : vector<24x24xf32> to vector<24x24xbf16>
    %cst_248 = arith.constant dense<0.000000e+00> : vector<24x8xf32>
    %578 = tpu.matmul %577, %562, %cst_248 {dimension_numbers = #tpu.dot_dimension_numbers<[1], [0], [0], [1], [0, 0, 1, 1], [], []>} : vector<24x24xbf16>, vector<24x8xbf16>, vector<24x8xf32> -> vector<24x8xf32>
    %579 = arith.truncf %578 : vector<24x8xf32> to vector<24x8xbf16>
    %c2_249 = arith.constant 2 : index
    %c3_250 = arith.constant 3 : index
    %c0_251 = arith.constant 0 : index
    %c0_252 = arith.constant 0 : index
    %580 = vector.load %arg7[%c2_249, %c3_250, %c0_251, %c0_252] : memref<4x4x8x32xbf16, #tpu.memory_space<vmem>>, vector<1x1x8x32xbf16>
    %581 = vector.shape_cast %580 : vector<1x1x8x32xbf16> to vector<8x32xbf16>
    %cst_253 = arith.constant dense<0.000000e+00> : vector<24x32xf32>
    %582 = tpu.matmul %579, %581, %cst_253 {dimension_numbers = #tpu.dot_dimension_numbers<[1], [0], [0], [1], [0, 0, 1, 1], [], []>} : vector<24x8xbf16>, vector<8x32xbf16>, vector<24x32xf32> -> vector<24x32xf32>
    %583 = arith.addf %556, %582 : vector<24x32xf32>
    %584 = arith.addf %444, %583 : vector<24x32xf32>
    %c2_254 = arith.constant 2 : index
    %c4_255 = arith.constant 4 : index
    %c0_256 = arith.constant 0 : index
    %585 = vector.load %arg3[%c2_254, %c4_255, %c0_256] : memref<4x8x128xf32, #tpu.memory_space<vmem>>, vector<1x1x32xf32>
    %586 = vector.shape_cast %585 : vector<1x1x32xf32> to vector<1x32xf32>
    %587 = vector.broadcast %586 : vector<1x32xf32> to vector<24x32xf32>
    %588 = arith.addf %584, %587 : vector<24x32xf32>
    %c2_257 = arith.constant 2 : index
    %c2_258 = arith.constant 2 : index
    %c0_259 = arith.constant 0 : index
    %589 = vector.load %arg3[%c2_257, %c2_258, %c0_259] : memref<4x8x128xf32, #tpu.memory_space<vmem>>, vector<1x1x32xf32>
    %590 = vector.shape_cast %589 : vector<1x1x32xf32> to vector<1x32xf32>
    %c2_260 = arith.constant 2 : index
    %c3_261 = arith.constant 3 : index
    %c0_262 = arith.constant 0 : index
    %591 = vector.load %arg3[%c2_260, %c3_261, %c0_262] : memref<4x8x128xf32, #tpu.memory_space<vmem>>, vector<1x1x32xf32>
    %592 = vector.shape_cast %591 : vector<1x1x32xf32> to vector<1x32xf32>
    %cst_263 = arith.constant dense<0.000000e+00> : vector<24xf32>
    %593 = vector.multi_reduction <add>, %588, %cst_263 [1] : vector<24x32xf32> to vector<24xf32>
    %594 = vector.shape_cast %593 : vector<24xf32> to vector<24x1xf32>
    %cst_264 = arith.constant 3.200000e+01 : f32
    %595 = vector.broadcast %cst_264 : f32 to vector<24x1xf32>
    %596 = arith.divf %594, %595 : vector<24x1xf32>
    %597 = vector.broadcast %596 : vector<24x1xf32> to vector<24x32xf32>
    %598 = arith.subf %588, %597 : vector<24x32xf32>
    %599 = arith.mulf %598, %598 : vector<24x32xf32>
    %cst_265 = arith.constant dense<0.000000e+00> : vector<24xf32>
    %600 = vector.multi_reduction <add>, %599, %cst_265 [1] : vector<24x32xf32> to vector<24xf32>
    %601 = vector.shape_cast %600 : vector<24xf32> to vector<24x1xf32>
    %cst_266 = arith.constant 3.200000e+01 : f32
    %602 = vector.broadcast %cst_266 : f32 to vector<24x1xf32>
    %603 = arith.divf %601, %602 : vector<24x1xf32>
    %cst_267 = arith.constant 9.99999974E-6 : f32
    %604 = vector.broadcast %cst_267 : f32 to vector<24x1xf32>
    %605 = arith.addf %603, %604 : vector<24x1xf32>
    %606 = math.rsqrt %605 : vector<24x1xf32>
    %607 = vector.broadcast %606 : vector<24x1xf32> to vector<24x32xf32>
    %608 = arith.mulf %598, %607 : vector<24x32xf32>
    %609 = vector.broadcast %590 : vector<1x32xf32> to vector<24x32xf32>
    %610 = arith.mulf %608, %609 : vector<24x32xf32>
    %611 = vector.broadcast %592 : vector<1x32xf32> to vector<24x32xf32>
    %612 = arith.addf %610, %611 : vector<24x32xf32>
    %c2_268 = arith.constant 2 : index
    %c0_269 = arith.constant 0 : index
    %c0_270 = arith.constant 0 : index
    %613 = vector.load %arg8[%c2_268, %c0_269, %c0_270] : memref<4x32x128xbf16, #tpu.memory_space<vmem>>, vector<1x32x128xbf16>
    %614 = vector.shape_cast %613 : vector<1x32x128xbf16> to vector<32x128xbf16>
    %c2_271 = arith.constant 2 : index
    %c7_272 = arith.constant 7 : index
    %c0_273 = arith.constant 0 : index
    %615 = vector.load %arg3[%c2_271, %c7_272, %c0_273] : memref<4x8x128xf32, #tpu.memory_space<vmem>>, vector<1x1x128xf32>
    %616 = vector.shape_cast %615 : vector<1x1x128xf32> to vector<1x128xf32>
    %617 = arith.truncf %612 : vector<24x32xf32> to vector<24x32xbf16>
    %cst_274 = arith.constant dense<0.000000e+00> : vector<24x128xf32>
    %618 = tpu.matmul %617, %614, %cst_274 {dimension_numbers = #tpu.dot_dimension_numbers<[1], [0], [0], [1], [0, 0, 1, 1], [], []>} : vector<24x32xbf16>, vector<32x128xbf16>, vector<24x128xf32> -> vector<24x128xf32>
    %619 = vector.broadcast %616 : vector<1x128xf32> to vector<24x128xf32>
    %620 = arith.addf %618, %619 : vector<24x128xf32>
    %cst_275 = arith.constant 1.702000e+00 : f32
    %621 = vector.broadcast %cst_275 : f32 to vector<24x128xf32>
    %622 = arith.mulf %621, %620 : vector<24x128xf32>
    %623 = arith.negf %622 : vector<24x128xf32>
    %624 = math.exp %623 : vector<24x128xf32>
    %cst_276 = arith.constant 1.000000e+00 : f32
    %625 = vector.broadcast %cst_276 : f32 to vector<24x128xf32>
    %626 = arith.addf %625, %624 : vector<24x128xf32>
    %627 = arith.divf %625, %626 : vector<24x128xf32>
    %628 = arith.mulf %620, %627 : vector<24x128xf32>
    %c2_277 = arith.constant 2 : index
    %c0_278 = arith.constant 0 : index
    %c0_279 = arith.constant 0 : index
    %629 = vector.load %arg9[%c2_277, %c0_278, %c0_279] : memref<4x128x32xbf16, #tpu.memory_space<vmem>>, vector<1x128x32xbf16>
    %630 = vector.shape_cast %629 : vector<1x128x32xbf16> to vector<128x32xbf16>
    %c2_280 = arith.constant 2 : index
    %c5_281 = arith.constant 5 : index
    %c0_282 = arith.constant 0 : index
    %631 = vector.load %arg3[%c2_280, %c5_281, %c0_282] : memref<4x8x128xf32, #tpu.memory_space<vmem>>, vector<1x1x32xf32>
    %632 = vector.shape_cast %631 : vector<1x1x32xf32> to vector<1x32xf32>
    %633 = arith.truncf %628 : vector<24x128xf32> to vector<24x128xbf16>
    %cst_283 = arith.constant dense<0.000000e+00> : vector<24x32xf32>
    %634 = tpu.matmul %633, %630, %cst_283 {dimension_numbers = #tpu.dot_dimension_numbers<[1], [0], [0], [1], [0, 0, 1, 1], [], []>} : vector<24x128xbf16>, vector<128x32xbf16>, vector<24x32xf32> -> vector<24x32xf32>
    %635 = vector.broadcast %632 : vector<1x32xf32> to vector<24x32xf32>
    %636 = arith.addf %634, %635 : vector<24x32xf32>
    %637 = arith.addf %588, %636 : vector<24x32xf32>
    %c3_284 = arith.constant 3 : index
    %c0_285 = arith.constant 0 : index
    %c0_286 = arith.constant 0 : index
    %638 = vector.load %arg3[%c3_284, %c0_285, %c0_286] : memref<4x8x128xf32, #tpu.memory_space<vmem>>, vector<1x1x32xf32>
    %639 = vector.shape_cast %638 : vector<1x1x32xf32> to vector<1x32xf32>
    %c3_287 = arith.constant 3 : index
    %c1_288 = arith.constant 1 : index
    %c0_289 = arith.constant 0 : index
    %640 = vector.load %arg3[%c3_287, %c1_288, %c0_289] : memref<4x8x128xf32, #tpu.memory_space<vmem>>, vector<1x1x32xf32>
    %641 = vector.shape_cast %640 : vector<1x1x32xf32> to vector<1x32xf32>
    %cst_290 = arith.constant dense<0.000000e+00> : vector<24xf32>
    %642 = vector.multi_reduction <add>, %637, %cst_290 [1] : vector<24x32xf32> to vector<24xf32>
    %643 = vector.shape_cast %642 : vector<24xf32> to vector<24x1xf32>
    %cst_291 = arith.constant 3.200000e+01 : f32
    %644 = vector.broadcast %cst_291 : f32 to vector<24x1xf32>
    %645 = arith.divf %643, %644 : vector<24x1xf32>
    %646 = vector.broadcast %645 : vector<24x1xf32> to vector<24x32xf32>
    %647 = arith.subf %637, %646 : vector<24x32xf32>
    %648 = arith.mulf %647, %647 : vector<24x32xf32>
    %cst_292 = arith.constant dense<0.000000e+00> : vector<24xf32>
    %649 = vector.multi_reduction <add>, %648, %cst_292 [1] : vector<24x32xf32> to vector<24xf32>
    %650 = vector.shape_cast %649 : vector<24xf32> to vector<24x1xf32>
    %cst_293 = arith.constant 3.200000e+01 : f32
    %651 = vector.broadcast %cst_293 : f32 to vector<24x1xf32>
    %652 = arith.divf %650, %651 : vector<24x1xf32>
    %cst_294 = arith.constant 9.99999974E-6 : f32
    %653 = vector.broadcast %cst_294 : f32 to vector<24x1xf32>
    %654 = arith.addf %652, %653 : vector<24x1xf32>
    %655 = math.rsqrt %654 : vector<24x1xf32>
    %656 = vector.broadcast %655 : vector<24x1xf32> to vector<24x32xf32>
    %657 = arith.mulf %647, %656 : vector<24x32xf32>
    %658 = vector.broadcast %639 : vector<1x32xf32> to vector<24x32xf32>
    %659 = arith.mulf %657, %658 : vector<24x32xf32>
    %660 = vector.broadcast %641 : vector<1x32xf32> to vector<24x32xf32>
    %661 = arith.addf %659, %660 : vector<24x32xf32>
    %c3_295 = arith.constant 3 : index
    %c0_296 = arith.constant 0 : index
    %c0_297 = arith.constant 0 : index
    %662 = vector.load %arg6[%c3_295, %c0_296, %c0_297] : memref<4x32x96xbf16, #tpu.memory_space<vmem>>, vector<1x32x96xbf16>
    %663 = vector.shape_cast %662 : vector<1x32x96xbf16> to vector<32x96xbf16>
    %c3_298 = arith.constant 3 : index
    %c6_299 = arith.constant 6 : index
    %c0_300 = arith.constant 0 : index
    %664 = vector.load %arg3[%c3_298, %c6_299, %c0_300] : memref<4x8x128xf32, #tpu.memory_space<vmem>>, vector<1x1x96xf32>
    %665 = vector.shape_cast %664 : vector<1x1x96xf32> to vector<1x96xf32>
    %666 = arith.truncf %661 : vector<24x32xf32> to vector<24x32xbf16>
    %cst_301 = arith.constant dense<0.000000e+00> : vector<24x96xf32>
    %667 = tpu.matmul %666, %663, %cst_301 {dimension_numbers = #tpu.dot_dimension_numbers<[1], [0], [0], [1], [0, 0, 1, 1], [], []>} : vector<24x32xbf16>, vector<32x96xbf16>, vector<24x96xf32> -> vector<24x96xf32>
    %668 = vector.broadcast %665 : vector<1x96xf32> to vector<24x96xf32>
    %669 = arith.addf %667, %668 : vector<24x96xf32>
    %670 = vector.extract_strided_slice %669 {offsets = [0, 0], sizes = [24, 8], strides = [1, 1]} : vector<24x96xf32> to vector<24x8xf32>
    %671 = arith.truncf %670 : vector<24x8xf32> to vector<24x8xbf16>
    %672 = vector.extract_strided_slice %669 {offsets = [0, 32], sizes = [24, 8], strides = [1, 1]} : vector<24x96xf32> to vector<24x8xf32>
    %673 = arith.truncf %672 : vector<24x8xf32> to vector<24x8xbf16>
    %674 = vector.extract_strided_slice %669 {offsets = [0, 64], sizes = [24, 8], strides = [1, 1]} : vector<24x96xf32> to vector<24x8xf32>
    %675 = arith.truncf %674 : vector<24x8xf32> to vector<24x8xbf16>
    %cst_302 = arith.constant dense<0.000000e+00> : vector<24x24xf32>
    %676 = tpu.matmul %671, %673, %cst_302 {dimension_numbers = #tpu.dot_dimension_numbers<[1], [1], [0], [0], [0, 0, 1, 0], [], []>} : vector<24x8xbf16>, vector<24x8xbf16>, vector<24x24xf32> -> vector<24x24xf32>
    %cst_303 = arith.constant 0.353553385 : f32
    %677 = vector.broadcast %cst_303 : f32 to vector<24x24xf32>
    %678 = arith.mulf %676, %677 : vector<24x24xf32>
    %679 = arith.addf %678, %55 : vector<24x24xf32>
    %cst_304 = arith.constant dense<0xFF800000> : vector<24xf32>
    %680 = vector.multi_reduction <maximumf>, %679, %cst_304 [1] : vector<24x24xf32> to vector<24xf32>
    %681 = vector.shape_cast %680 : vector<24xf32> to vector<24x1xf32>
    %682 = vector.broadcast %681 : vector<24x1xf32> to vector<24x24xf32>
    %683 = arith.subf %679, %682 : vector<24x24xf32>
    %684 = math.exp %683 : vector<24x24xf32>
    %cst_305 = arith.constant dense<0.000000e+00> : vector<24xf32>
    %685 = vector.multi_reduction <add>, %684, %cst_305 [1] : vector<24x24xf32> to vector<24xf32>
    %686 = vector.shape_cast %685 : vector<24xf32> to vector<24x1xf32>
    %687 = tpu.reciprocal %686 {approx = true} : vector<24x1xf32> -> vector<24x1xf32>
    %688 = vector.broadcast %687 : vector<24x1xf32> to vector<24x24xf32>
    %689 = arith.mulf %684, %688 : vector<24x24xf32>
    %690 = arith.truncf %689 : vector<24x24xf32> to vector<24x24xbf16>
    %cst_306 = arith.constant dense<0.000000e+00> : vector<24x8xf32>
    %691 = tpu.matmul %690, %675, %cst_306 {dimension_numbers = #tpu.dot_dimension_numbers<[1], [0], [0], [1], [0, 0, 1, 1], [], []>} : vector<24x24xbf16>, vector<24x8xbf16>, vector<24x8xf32> -> vector<24x8xf32>
    %692 = arith.truncf %691 : vector<24x8xf32> to vector<24x8xbf16>
    %c3_307 = arith.constant 3 : index
    %c0_308 = arith.constant 0 : index
    %c0_309 = arith.constant 0 : index
    %c0_310 = arith.constant 0 : index
    %693 = vector.load %arg7[%c3_307, %c0_308, %c0_309, %c0_310] : memref<4x4x8x32xbf16, #tpu.memory_space<vmem>>, vector<1x1x8x32xbf16>
    %694 = vector.shape_cast %693 : vector<1x1x8x32xbf16> to vector<8x32xbf16>
    %cst_311 = arith.constant dense<0.000000e+00> : vector<24x32xf32>
    %695 = tpu.matmul %692, %694, %cst_311 {dimension_numbers = #tpu.dot_dimension_numbers<[1], [0], [0], [1], [0, 0, 1, 1], [], []>} : vector<24x8xbf16>, vector<8x32xbf16>, vector<24x32xf32> -> vector<24x32xf32>
    %696 = vector.extract_strided_slice %669 {offsets = [0, 8], sizes = [24, 8], strides = [1, 1]} : vector<24x96xf32> to vector<24x8xf32>
    %697 = arith.truncf %696 : vector<24x8xf32> to vector<24x8xbf16>
    %698 = vector.extract_strided_slice %669 {offsets = [0, 40], sizes = [24, 8], strides = [1, 1]} : vector<24x96xf32> to vector<24x8xf32>
    %699 = arith.truncf %698 : vector<24x8xf32> to vector<24x8xbf16>
    %700 = vector.extract_strided_slice %669 {offsets = [0, 72], sizes = [24, 8], strides = [1, 1]} : vector<24x96xf32> to vector<24x8xf32>
    %701 = arith.truncf %700 : vector<24x8xf32> to vector<24x8xbf16>
    %cst_312 = arith.constant dense<0.000000e+00> : vector<24x24xf32>
    %702 = tpu.matmul %697, %699, %cst_312 {dimension_numbers = #tpu.dot_dimension_numbers<[1], [1], [0], [0], [0, 0, 1, 0], [], []>} : vector<24x8xbf16>, vector<24x8xbf16>, vector<24x24xf32> -> vector<24x24xf32>
    %cst_313 = arith.constant 0.353553385 : f32
    %703 = vector.broadcast %cst_313 : f32 to vector<24x24xf32>
    %704 = arith.mulf %702, %703 : vector<24x24xf32>
    %705 = arith.addf %704, %55 : vector<24x24xf32>
    %cst_314 = arith.constant dense<0xFF800000> : vector<24xf32>
    %706 = vector.multi_reduction <maximumf>, %705, %cst_314 [1] : vector<24x24xf32> to vector<24xf32>
    %707 = vector.shape_cast %706 : vector<24xf32> to vector<24x1xf32>
    %708 = vector.broadcast %707 : vector<24x1xf32> to vector<24x24xf32>
    %709 = arith.subf %705, %708 : vector<24x24xf32>
    %710 = math.exp %709 : vector<24x24xf32>
    %cst_315 = arith.constant dense<0.000000e+00> : vector<24xf32>
    %711 = vector.multi_reduction <add>, %710, %cst_315 [1] : vector<24x24xf32> to vector<24xf32>
    %712 = vector.shape_cast %711 : vector<24xf32> to vector<24x1xf32>
    %713 = tpu.reciprocal %712 {approx = true} : vector<24x1xf32> -> vector<24x1xf32>
    %714 = vector.broadcast %713 : vector<24x1xf32> to vector<24x24xf32>
    %715 = arith.mulf %710, %714 : vector<24x24xf32>
    %716 = arith.truncf %715 : vector<24x24xf32> to vector<24x24xbf16>
    %cst_316 = arith.constant dense<0.000000e+00> : vector<24x8xf32>
    %717 = tpu.matmul %716, %701, %cst_316 {dimension_numbers = #tpu.dot_dimension_numbers<[1], [0], [0], [1], [0, 0, 1, 1], [], []>} : vector<24x24xbf16>, vector<24x8xbf16>, vector<24x8xf32> -> vector<24x8xf32>
    %718 = arith.truncf %717 : vector<24x8xf32> to vector<24x8xbf16>
    %c3_317 = arith.constant 3 : index
    %c1_318 = arith.constant 1 : index
    %c0_319 = arith.constant 0 : index
    %c0_320 = arith.constant 0 : index
    %719 = vector.load %arg7[%c3_317, %c1_318, %c0_319, %c0_320] : memref<4x4x8x32xbf16, #tpu.memory_space<vmem>>, vector<1x1x8x32xbf16>
    %720 = vector.shape_cast %719 : vector<1x1x8x32xbf16> to vector<8x32xbf16>
    %cst_321 = arith.constant dense<0.000000e+00> : vector<24x32xf32>
    %721 = tpu.matmul %718, %720, %cst_321 {dimension_numbers = #tpu.dot_dimension_numbers<[1], [0], [0], [1], [0, 0, 1, 1], [], []>} : vector<24x8xbf16>, vector<8x32xbf16>, vector<24x32xf32> -> vector<24x32xf32>
    %722 = arith.addf %695, %721 : vector<24x32xf32>
    %723 = vector.extract_strided_slice %669 {offsets = [0, 16], sizes = [24, 8], strides = [1, 1]} : vector<24x96xf32> to vector<24x8xf32>
    %724 = arith.truncf %723 : vector<24x8xf32> to vector<24x8xbf16>
    %725 = vector.extract_strided_slice %669 {offsets = [0, 48], sizes = [24, 8], strides = [1, 1]} : vector<24x96xf32> to vector<24x8xf32>
    %726 = arith.truncf %725 : vector<24x8xf32> to vector<24x8xbf16>
    %727 = vector.extract_strided_slice %669 {offsets = [0, 80], sizes = [24, 8], strides = [1, 1]} : vector<24x96xf32> to vector<24x8xf32>
    %728 = arith.truncf %727 : vector<24x8xf32> to vector<24x8xbf16>
    %cst_322 = arith.constant dense<0.000000e+00> : vector<24x24xf32>
    %729 = tpu.matmul %724, %726, %cst_322 {dimension_numbers = #tpu.dot_dimension_numbers<[1], [1], [0], [0], [0, 0, 1, 0], [], []>} : vector<24x8xbf16>, vector<24x8xbf16>, vector<24x24xf32> -> vector<24x24xf32>
    %cst_323 = arith.constant 0.353553385 : f32
    %730 = vector.broadcast %cst_323 : f32 to vector<24x24xf32>
    %731 = arith.mulf %729, %730 : vector<24x24xf32>
    %732 = arith.addf %731, %55 : vector<24x24xf32>
    %cst_324 = arith.constant dense<0xFF800000> : vector<24xf32>
    %733 = vector.multi_reduction <maximumf>, %732, %cst_324 [1] : vector<24x24xf32> to vector<24xf32>
    %734 = vector.shape_cast %733 : vector<24xf32> to vector<24x1xf32>
    %735 = vector.broadcast %734 : vector<24x1xf32> to vector<24x24xf32>
    %736 = arith.subf %732, %735 : vector<24x24xf32>
    %737 = math.exp %736 : vector<24x24xf32>
    %cst_325 = arith.constant dense<0.000000e+00> : vector<24xf32>
    %738 = vector.multi_reduction <add>, %737, %cst_325 [1] : vector<24x24xf32> to vector<24xf32>
    %739 = vector.shape_cast %738 : vector<24xf32> to vector<24x1xf32>
    %740 = tpu.reciprocal %739 {approx = true} : vector<24x1xf32> -> vector<24x1xf32>
    %741 = vector.broadcast %740 : vector<24x1xf32> to vector<24x24xf32>
    %742 = arith.mulf %737, %741 : vector<24x24xf32>
    %743 = arith.truncf %742 : vector<24x24xf32> to vector<24x24xbf16>
    %cst_326 = arith.constant dense<0.000000e+00> : vector<24x8xf32>
    %744 = tpu.matmul %743, %728, %cst_326 {dimension_numbers = #tpu.dot_dimension_numbers<[1], [0], [0], [1], [0, 0, 1, 1], [], []>} : vector<24x24xbf16>, vector<24x8xbf16>, vector<24x8xf32> -> vector<24x8xf32>
    %745 = arith.truncf %744 : vector<24x8xf32> to vector<24x8xbf16>
    %c3_327 = arith.constant 3 : index
    %c2_328 = arith.constant 2 : index
    %c0_329 = arith.constant 0 : index
    %c0_330 = arith.constant 0 : index
    %746 = vector.load %arg7[%c3_327, %c2_328, %c0_329, %c0_330] : memref<4x4x8x32xbf16, #tpu.memory_space<vmem>>, vector<1x1x8x32xbf16>
    %747 = vector.shape_cast %746 : vector<1x1x8x32xbf16> to vector<8x32xbf16>
    %cst_331 = arith.constant dense<0.000000e+00> : vector<24x32xf32>
    %748 = tpu.matmul %745, %747, %cst_331 {dimension_numbers = #tpu.dot_dimension_numbers<[1], [0], [0], [1], [0, 0, 1, 1], [], []>} : vector<24x8xbf16>, vector<8x32xbf16>, vector<24x32xf32> -> vector<24x32xf32>
    %749 = arith.addf %722, %748 : vector<24x32xf32>
    %750 = vector.extract_strided_slice %669 {offsets = [0, 24], sizes = [24, 8], strides = [1, 1]} : vector<24x96xf32> to vector<24x8xf32>
    %751 = arith.truncf %750 : vector<24x8xf32> to vector<24x8xbf16>
    %752 = vector.extract_strided_slice %669 {offsets = [0, 56], sizes = [24, 8], strides = [1, 1]} : vector<24x96xf32> to vector<24x8xf32>
    %753 = arith.truncf %752 : vector<24x8xf32> to vector<24x8xbf16>
    %754 = vector.extract_strided_slice %669 {offsets = [0, 88], sizes = [24, 8], strides = [1, 1]} : vector<24x96xf32> to vector<24x8xf32>
    %755 = arith.truncf %754 : vector<24x8xf32> to vector<24x8xbf16>
    %cst_332 = arith.constant dense<0.000000e+00> : vector<24x24xf32>
    %756 = tpu.matmul %751, %753, %cst_332 {dimension_numbers = #tpu.dot_dimension_numbers<[1], [1], [0], [0], [0, 0, 1, 0], [], []>} : vector<24x8xbf16>, vector<24x8xbf16>, vector<24x24xf32> -> vector<24x24xf32>
    %cst_333 = arith.constant 0.353553385 : f32
    %757 = vector.broadcast %cst_333 : f32 to vector<24x24xf32>
    %758 = arith.mulf %756, %757 : vector<24x24xf32>
    %759 = arith.addf %758, %55 : vector<24x24xf32>
    %cst_334 = arith.constant dense<0xFF800000> : vector<24xf32>
    %760 = vector.multi_reduction <maximumf>, %759, %cst_334 [1] : vector<24x24xf32> to vector<24xf32>
    %761 = vector.shape_cast %760 : vector<24xf32> to vector<24x1xf32>
    %762 = vector.broadcast %761 : vector<24x1xf32> to vector<24x24xf32>
    %763 = arith.subf %759, %762 : vector<24x24xf32>
    %764 = math.exp %763 : vector<24x24xf32>
    %cst_335 = arith.constant dense<0.000000e+00> : vector<24xf32>
    %765 = vector.multi_reduction <add>, %764, %cst_335 [1] : vector<24x24xf32> to vector<24xf32>
    %766 = vector.shape_cast %765 : vector<24xf32> to vector<24x1xf32>
    %767 = tpu.reciprocal %766 {approx = true} : vector<24x1xf32> -> vector<24x1xf32>
    %768 = vector.broadcast %767 : vector<24x1xf32> to vector<24x24xf32>
    %769 = arith.mulf %764, %768 : vector<24x24xf32>
    %770 = arith.truncf %769 : vector<24x24xf32> to vector<24x24xbf16>
    %cst_336 = arith.constant dense<0.000000e+00> : vector<24x8xf32>
    %771 = tpu.matmul %770, %755, %cst_336 {dimension_numbers = #tpu.dot_dimension_numbers<[1], [0], [0], [1], [0, 0, 1, 1], [], []>} : vector<24x24xbf16>, vector<24x8xbf16>, vector<24x8xf32> -> vector<24x8xf32>
    %772 = arith.truncf %771 : vector<24x8xf32> to vector<24x8xbf16>
    %c3_337 = arith.constant 3 : index
    %c3_338 = arith.constant 3 : index
    %c0_339 = arith.constant 0 : index
    %c0_340 = arith.constant 0 : index
    %773 = vector.load %arg7[%c3_337, %c3_338, %c0_339, %c0_340] : memref<4x4x8x32xbf16, #tpu.memory_space<vmem>>, vector<1x1x8x32xbf16>
    %774 = vector.shape_cast %773 : vector<1x1x8x32xbf16> to vector<8x32xbf16>
    %cst_341 = arith.constant dense<0.000000e+00> : vector<24x32xf32>
    %775 = tpu.matmul %772, %774, %cst_341 {dimension_numbers = #tpu.dot_dimension_numbers<[1], [0], [0], [1], [0, 0, 1, 1], [], []>} : vector<24x8xbf16>, vector<8x32xbf16>, vector<24x32xf32> -> vector<24x32xf32>
    %776 = arith.addf %749, %775 : vector<24x32xf32>
    %777 = arith.addf %637, %776 : vector<24x32xf32>
    %c3_342 = arith.constant 3 : index
    %c4_343 = arith.constant 4 : index
    %c0_344 = arith.constant 0 : index
    %778 = vector.load %arg3[%c3_342, %c4_343, %c0_344] : memref<4x8x128xf32, #tpu.memory_space<vmem>>, vector<1x1x32xf32>
    %779 = vector.shape_cast %778 : vector<1x1x32xf32> to vector<1x32xf32>
    %780 = vector.broadcast %779 : vector<1x32xf32> to vector<24x32xf32>
    %781 = arith.addf %777, %780 : vector<24x32xf32>
    %c3_345 = arith.constant 3 : index
    %c2_346 = arith.constant 2 : index
    %c0_347 = arith.constant 0 : index
    %782 = vector.load %arg3[%c3_345, %c2_346, %c0_347] : memref<4x8x128xf32, #tpu.memory_space<vmem>>, vector<1x1x32xf32>
    %783 = vector.shape_cast %782 : vector<1x1x32xf32> to vector<1x32xf32>
    %c3_348 = arith.constant 3 : index
    %c3_349 = arith.constant 3 : index
    %c0_350 = arith.constant 0 : index
    %784 = vector.load %arg3[%c3_348, %c3_349, %c0_350] : memref<4x8x128xf32, #tpu.memory_space<vmem>>, vector<1x1x32xf32>
    %785 = vector.shape_cast %784 : vector<1x1x32xf32> to vector<1x32xf32>
    %cst_351 = arith.constant dense<0.000000e+00> : vector<24xf32>
    %786 = vector.multi_reduction <add>, %781, %cst_351 [1] : vector<24x32xf32> to vector<24xf32>
    %787 = vector.shape_cast %786 : vector<24xf32> to vector<24x1xf32>
    %cst_352 = arith.constant 3.200000e+01 : f32
    %788 = vector.broadcast %cst_352 : f32 to vector<24x1xf32>
    %789 = arith.divf %787, %788 : vector<24x1xf32>
    %790 = vector.broadcast %789 : vector<24x1xf32> to vector<24x32xf32>
    %791 = arith.subf %781, %790 : vector<24x32xf32>
    %792 = arith.mulf %791, %791 : vector<24x32xf32>
    %cst_353 = arith.constant dense<0.000000e+00> : vector<24xf32>
    %793 = vector.multi_reduction <add>, %792, %cst_353 [1] : vector<24x32xf32> to vector<24xf32>
    %794 = vector.shape_cast %793 : vector<24xf32> to vector<24x1xf32>
    %cst_354 = arith.constant 3.200000e+01 : f32
    %795 = vector.broadcast %cst_354 : f32 to vector<24x1xf32>
    %796 = arith.divf %794, %795 : vector<24x1xf32>
    %cst_355 = arith.constant 9.99999974E-6 : f32
    %797 = vector.broadcast %cst_355 : f32 to vector<24x1xf32>
    %798 = arith.addf %796, %797 : vector<24x1xf32>
    %799 = math.rsqrt %798 : vector<24x1xf32>
    %800 = vector.broadcast %799 : vector<24x1xf32> to vector<24x32xf32>
    %801 = arith.mulf %791, %800 : vector<24x32xf32>
    %802 = vector.broadcast %783 : vector<1x32xf32> to vector<24x32xf32>
    %803 = arith.mulf %801, %802 : vector<24x32xf32>
    %804 = vector.broadcast %785 : vector<1x32xf32> to vector<24x32xf32>
    %805 = arith.addf %803, %804 : vector<24x32xf32>
    %c3_356 = arith.constant 3 : index
    %c0_357 = arith.constant 0 : index
    %c0_358 = arith.constant 0 : index
    %806 = vector.load %arg8[%c3_356, %c0_357, %c0_358] : memref<4x32x128xbf16, #tpu.memory_space<vmem>>, vector<1x32x128xbf16>
    %807 = vector.shape_cast %806 : vector<1x32x128xbf16> to vector<32x128xbf16>
    %c3_359 = arith.constant 3 : index
    %c7_360 = arith.constant 7 : index
    %c0_361 = arith.constant 0 : index
    %808 = vector.load %arg3[%c3_359, %c7_360, %c0_361] : memref<4x8x128xf32, #tpu.memory_space<vmem>>, vector<1x1x128xf32>
    %809 = vector.shape_cast %808 : vector<1x1x128xf32> to vector<1x128xf32>
    %810 = arith.truncf %805 : vector<24x32xf32> to vector<24x32xbf16>
    %cst_362 = arith.constant dense<0.000000e+00> : vector<24x128xf32>
    %811 = tpu.matmul %810, %807, %cst_362 {dimension_numbers = #tpu.dot_dimension_numbers<[1], [0], [0], [1], [0, 0, 1, 1], [], []>} : vector<24x32xbf16>, vector<32x128xbf16>, vector<24x128xf32> -> vector<24x128xf32>
    %812 = vector.broadcast %809 : vector<1x128xf32> to vector<24x128xf32>
    %813 = arith.addf %811, %812 : vector<24x128xf32>
    %cst_363 = arith.constant 1.702000e+00 : f32
    %814 = vector.broadcast %cst_363 : f32 to vector<24x128xf32>
    %815 = arith.mulf %814, %813 : vector<24x128xf32>
    %816 = arith.negf %815 : vector<24x128xf32>
    %817 = math.exp %816 : vector<24x128xf32>
    %cst_364 = arith.constant 1.000000e+00 : f32
    %818 = vector.broadcast %cst_364 : f32 to vector<24x128xf32>
    %819 = arith.addf %818, %817 : vector<24x128xf32>
    %820 = arith.divf %818, %819 : vector<24x128xf32>
    %821 = arith.mulf %813, %820 : vector<24x128xf32>
    %c3_365 = arith.constant 3 : index
    %c0_366 = arith.constant 0 : index
    %c0_367 = arith.constant 0 : index
    %822 = vector.load %arg9[%c3_365, %c0_366, %c0_367] : memref<4x128x32xbf16, #tpu.memory_space<vmem>>, vector<1x128x32xbf16>
    %823 = vector.shape_cast %822 : vector<1x128x32xbf16> to vector<128x32xbf16>
    %c3_368 = arith.constant 3 : index
    %c5_369 = arith.constant 5 : index
    %c0_370 = arith.constant 0 : index
    %824 = vector.load %arg3[%c3_368, %c5_369, %c0_370] : memref<4x8x128xf32, #tpu.memory_space<vmem>>, vector<1x1x32xf32>
    %825 = vector.shape_cast %824 : vector<1x1x32xf32> to vector<1x32xf32>
    %826 = arith.truncf %821 : vector<24x128xf32> to vector<24x128xbf16>
    %cst_371 = arith.constant dense<0.000000e+00> : vector<24x32xf32>
    %827 = tpu.matmul %826, %823, %cst_371 {dimension_numbers = #tpu.dot_dimension_numbers<[1], [0], [0], [1], [0, 0, 1, 1], [], []>} : vector<24x128xbf16>, vector<128x32xbf16>, vector<24x32xf32> -> vector<24x32xf32>
    %828 = vector.broadcast %825 : vector<1x32xf32> to vector<24x32xf32>
    %829 = arith.addf %827, %828 : vector<24x32xf32>
    %830 = arith.addf %781, %829 : vector<24x32xf32>
    %c26 = arith.constant 26 : index
    %c0_372 = arith.constant 0 : index
    %831 = vector.load %arg2[%c26, %c0_372] : memref<40x32xf32, #tpu.memory_space<vmem>>, vector<1x32xf32>
    %c27 = arith.constant 27 : index
    %c0_373 = arith.constant 0 : index
    %832 = vector.load %arg2[%c27, %c0_373] : memref<40x32xf32, #tpu.memory_space<vmem>>, vector<1x32xf32>
    %cst_374 = arith.constant dense<0.000000e+00> : vector<24xf32>
    %833 = vector.multi_reduction <add>, %830, %cst_374 [1] : vector<24x32xf32> to vector<24xf32>
    %834 = vector.shape_cast %833 : vector<24xf32> to vector<24x1xf32>
    %cst_375 = arith.constant 3.200000e+01 : f32
    %835 = vector.broadcast %cst_375 : f32 to vector<24x1xf32>
    %836 = arith.divf %834, %835 : vector<24x1xf32>
    %837 = vector.broadcast %836 : vector<24x1xf32> to vector<24x32xf32>
    %838 = arith.subf %830, %837 : vector<24x32xf32>
    %839 = arith.mulf %838, %838 : vector<24x32xf32>
    %cst_376 = arith.constant dense<0.000000e+00> : vector<24xf32>
    %840 = vector.multi_reduction <add>, %839, %cst_376 [1] : vector<24x32xf32> to vector<24xf32>
    %841 = vector.shape_cast %840 : vector<24xf32> to vector<24x1xf32>
    %cst_377 = arith.constant 3.200000e+01 : f32
    %842 = vector.broadcast %cst_377 : f32 to vector<24x1xf32>
    %843 = arith.divf %841, %842 : vector<24x1xf32>
    %cst_378 = arith.constant 9.99999997E-7 : f32
    %844 = vector.broadcast %cst_378 : f32 to vector<24x1xf32>
    %845 = arith.addf %843, %844 : vector<24x1xf32>
    %846 = math.rsqrt %845 : vector<24x1xf32>
    %847 = vector.broadcast %846 : vector<24x1xf32> to vector<24x32xf32>
    %848 = arith.mulf %838, %847 : vector<24x32xf32>
    %849 = vector.broadcast %831 : vector<1x32xf32> to vector<24x32xf32>
    %850 = arith.mulf %848, %849 : vector<24x32xf32>
    %851 = vector.broadcast %832 : vector<1x32xf32> to vector<24x32xf32>
    %852 = arith.addf %850, %851 : vector<24x32xf32>
    %853 = vector.extract_strided_slice %852 {offsets = [7, 0], sizes = [17, 32], strides = [1, 1]} : vector<24x32xf32> to vector<17x32xf32>
    %c0_379 = arith.constant 0 : index
    %c0_380 = arith.constant 0 : index
    %c0_381 = arith.constant 0 : index
    %854 = vector.load %arg13[%c0_379, %c0_380, %c0_381] : memref<1x17x32xf32, #tpu.memory_space<vmem>>, vector<1x17x32xf32>
    %855 = vector.shape_cast %854 : vector<1x17x32xf32> to vector<17x32xf32>
    %856 = vector.shape_cast %853 : vector<17x32xf32> to vector<1x17x32xf32>
    tpu.vector_store %arg13[%c0_379, %c0_380, %c0_381], %856 {strides = array<i32>} : memref<1x17x32xf32, #tpu.memory_space<vmem>>, vector<1x17x32xf32>,
    %857 = vector.extract_strided_slice %852 {offsets = [7, 0], sizes = [1, 32], strides = [1, 1]} : vector<24x32xf32> to vector<1x32xf32>
    %c28 = arith.constant 28 : index
    %c0_382 = arith.constant 0 : index
    %858 = vector.load %arg2[%c28, %c0_382] : memref<40x32xf32, #tpu.memory_space<vmem>>, vector<1x32xf32>
    %c29 = arith.constant 29 : index
    %c0_383 = arith.constant 0 : index
    %859 = vector.load %arg2[%c29, %c0_383] : memref<40x32xf32, #tpu.memory_space<vmem>>, vector<1x32xf32>
    %cst_384 = arith.constant dense<0.000000e+00> : vector<1xf32>
    %860 = vector.multi_reduction <add>, %857, %cst_384 [1] : vector<1x32xf32> to vector<1xf32>
    %861 = vector.shape_cast %860 : vector<1xf32> to vector<1x1xf32>
    %cst_385 = arith.constant 3.200000e+01 : f32
    %862 = vector.broadcast %cst_385 : f32 to vector<1x1xf32>
    %863 = arith.divf %861, %862 : vector<1x1xf32>
    %864 = vector.broadcast %863 : vector<1x1xf32> to vector<1x32xf32>
    %865 = arith.subf %857, %864 : vector<1x32xf32>
    %866 = arith.mulf %865, %865 : vector<1x32xf32>
    %cst_386 = arith.constant dense<0.000000e+00> : vector<1xf32>
    %867 = vector.multi_reduction <add>, %866, %cst_386 [1] : vector<1x32xf32> to vector<1xf32>
    %868 = vector.shape_cast %867 : vector<1xf32> to vector<1x1xf32>
    %cst_387 = arith.constant 3.200000e+01 : f32
    %869 = vector.broadcast %cst_387 : f32 to vector<1x1xf32>
    %870 = arith.divf %868, %869 : vector<1x1xf32>
    %cst_388 = arith.constant 9.99999974E-6 : f32
    %871 = vector.broadcast %cst_388 : f32 to vector<1x1xf32>
    %872 = arith.addf %870, %871 : vector<1x1xf32>
    %873 = math.rsqrt %872 : vector<1x1xf32>
    %874 = vector.broadcast %873 : vector<1x1xf32> to vector<1x32xf32>
    %875 = arith.mulf %865, %874 : vector<1x32xf32>
    %876 = arith.mulf %875, %858 : vector<1x32xf32>
    %877 = arith.addf %876, %859 : vector<1x32xf32>
    %c0_389 = arith.constant 0 : index
    %c0_390 = arith.constant 0 : index
    %878 = vector.load %arg10[%c0_389, %c0_390] : memref<32x64xbf16, #tpu.memory_space<vmem>>, vector<32x64xbf16>
    %879 = arith.truncf %877 : vector<1x32xf32> to vector<1x32xbf16>
    %cst_391 = arith.constant dense<0.000000e+00> : vector<1x64xf32>
    %880 = tpu.matmul %879, %878, %cst_391 {dimension_numbers = #tpu.dot_dimension_numbers<[1], [0], [0], [1], [0, 0, 1, 1], [], []>} : vector<1x32xbf16>, vector<32x64xbf16>, vector<1x64xf32> -> vector<1x64xf32>
    %c0_392 = arith.constant 0 : index
    %c0_393 = arith.constant 0 : index
    %c0_394 = arith.constant 0 : index
    %881 = vector.load %arg12[%c0_392, %c0_393, %c0_394] : memref<1x1x64xf32, #tpu.memory_space<vmem>>, vector<1x1x64xf32>
    %882 = vector.shape_cast %881 : vector<1x1x64xf32> to vector<1x64xf32>
    %883 = vector.shape_cast %880 : vector<1x64xf32> to vector<1x1x64xf32>
    tpu.vector_store %arg12[%c0_392, %c0_393, %c0_394], %883 {strides = array<i32>} : memref<1x1x64xf32, #tpu.memory_space<vmem>>, vector<1x1x64xf32>,
    return
  }
  func.func @transform_0(%arg0: i32) -> (i32, i32, i32) {
    %c0_i32 = arith.constant 0 : i32
    %c0_i32_0 = arith.constant 0 : i32
    %c0_i32_1 = arith.constant 0 : i32
    return %arg0, %c0_i32, %c0_i32_0 : i32, i32, i32
  }
  func.func @transform_1(%arg0: i32) -> (i32, i32) {
    %c0_i32 = arith.constant 0 : i32
    %c0_i32_0 = arith.constant 0 : i32
    %c0_i32_1 = arith.constant 0 : i32
    return %c0_i32, %c0_i32_0 : i32, i32
  }
  func.func @transform_2(%arg0: i32) -> (i32, i32, i32) {
    %c0_i32 = arith.constant 0 : i32
    %c0_i32_0 = arith.constant 0 : i32
    %c0_i32_1 = arith.constant 0 : i32
    %c0_i32_2 = arith.constant 0 : i32
    return %c0_i32, %c0_i32_0, %c0_i32_1 : i32, i32, i32
  }
  func.func @transform_3(%arg0: i32) -> (i32, i32) {
    %c0_i32 = arith.constant 0 : i32
    %c0_i32_0 = arith.constant 0 : i32
    %c0_i32_1 = arith.constant 0 : i32
    return %c0_i32, %c0_i32_0 : i32, i32
  }
  func.func @transform_4(%arg0: i32) -> (i32, i32) {
    %c0_i32 = arith.constant 0 : i32
    %c0_i32_0 = arith.constant 0 : i32
    %c0_i32_1 = arith.constant 0 : i32
    return %c0_i32, %c0_i32_0 : i32, i32
  }
  func.func @transform_5(%arg0: i32) -> (i32, i32, i32) {
    %c0_i32 = arith.constant 0 : i32
    %c0_i32_0 = arith.constant 0 : i32
    %c0_i32_1 = arith.constant 0 : i32
    %c0_i32_2 = arith.constant 0 : i32
    return %c0_i32, %c0_i32_0, %c0_i32_1 : i32, i32, i32
  }
  func.func @transform_6(%arg0: i32) -> (i32, i32, i32, i32) {
    %c0_i32 = arith.constant 0 : i32
    %c0_i32_0 = arith.constant 0 : i32
    %c0_i32_1 = arith.constant 0 : i32
    %c0_i32_2 = arith.constant 0 : i32
    %c0_i32_3 = arith.constant 0 : i32
    return %c0_i32, %c0_i32_0, %c0_i32_1, %c0_i32_2 : i32, i32, i32, i32
  }
  func.func @transform_7(%arg0: i32) -> (i32, i32, i32) {
    %c0_i32 = arith.constant 0 : i32
    %c0_i32_0 = arith.constant 0 : i32
    %c0_i32_1 = arith.constant 0 : i32
    %c0_i32_2 = arith.constant 0 : i32
    return %c0_i32, %c0_i32_0, %c0_i32_1 : i32, i32, i32
  }
  func.func @transform_8(%arg0: i32) -> (i32, i32, i32) {
    %c0_i32 = arith.constant 0 : i32
    %c0_i32_0 = arith.constant 0 : i32
    %c0_i32_1 = arith.constant 0 : i32
    %c0_i32_2 = arith.constant 0 : i32
    return %c0_i32, %c0_i32_0, %c0_i32_1 : i32, i32, i32
  }
  func.func @transform_9(%arg0: i32) -> (i32, i32) {
    %c0_i32 = arith.constant 0 : i32
    %c0_i32_0 = arith.constant 0 : i32
    %c0_i32_1 = arith.constant 0 : i32
    return %c0_i32, %c0_i32_0 : i32, i32
  }
  func.func @transform_10(%arg0: i32) -> (i32, i32, i32) {
    %c0_i32 = arith.constant 0 : i32
    %c0_i32_0 = arith.constant 0 : i32
    %c0_i32_1 = arith.constant 0 : i32
    return %arg0, %c0_i32, %c0_i32_0 : i32, i32, i32
  }
  func.func @transform_11(%arg0: i32) -> (i32, i32, i32) {
    %c0_i32 = arith.constant 0 : i32
    %c0_i32_0 = arith.constant 0 : i32
    %c0_i32_1 = arith.constant 0 : i32
    return %arg0, %c0_i32, %c0_i32_0 : i32, i32, i32
  }
  func.func @transform_12(%arg0: i32) -> (i32, i32, i32) {
    %c0_i32 = arith.constant 0 : i32
    %c0_i32_0 = arith.constant 0 : i32
    %c0_i32_1 = arith.constant 0 : i32
    return %arg0, %c0_i32, %c0_i32_0 : i32, i32, i32
  }
}

</mosaic_0001>

<bundles_post_ra>
// kernel: clip_vit_forward.1
= control target key start
LH: loop header
LB: loop body
LE: loop exit
PB: predicated region body
PF: predicated region fallthrough
CT: control target
= control target key end

     0   :  { %s7546_s0 = inlined_call_operand.vmem [shape: f32[2,16,192], index: 0, kind: input, shape index: {}]   ;;  %s7547_s1 = inlined_call_operand.vmem [shape: f32[40,32], index: 1, kind: input, shape index: {}]   ;;  %s7548_s2 = inlined_call_operand.vmem [shape: f32[4,8,128], index: 2, kind: input, shape index: {}]   ;;  %s7549_s3 = inlined_call_operand.vmem [shape: bf16[192,32], index: 3, kind: input, shape index: {}]   ;;  %s7550_s4 = inlined_call_operand.vmem [shape: bf16[32,32], index: 4, kind: input, shape index: {}]   ;;  %s7551_s5 = inlined_call_operand.vmem [shape: bf16[4,32,96], index: 5, kind: input, shape index: {}]   ;;  %s7552_s6 = inlined_call_operand.vmem [shape: bf16[4,4,8,32], index: 6, kind: input, shape index: {}]   ;;  %s7553_s7 = inlined_call_operand.vmem [shape: bf16[4,32,128], index: 7, kind: input, shape index: {}]   ;;  %s7554_s8 = inlined_call_operand.vmem [shape: bf16[4,128,32], index: 8, kind: input, shape index: {}]   ;;  %s7555_s9 = inlined_call_operand.vmem [shape: bf16[32,64], index: 9, kind: input, shape index: {}]   ;;  %s7556_s10 = inlined_call_operand.hbm [shape: f32[2,16,32], index: 10, kind: output, shape index: {0}]   ;;  %s7557_s11 = inlined_call_operand.hbm [shape: f32[2,1,64], index: 11, kind: output, shape index: {1}]   ;;  %s7558_s12 = inlined_call_operand.vmem [shape: f32[2,17,32], index: 12, kind: output, shape index: {2}]  }
   0x1   :  { %7596 = sst [smem:[#allocation18_spill]] %s7546_s0 }
   0x2   :  { %7597 = sst [smem:[#allocation19_spill]] %s7549_s3 }
   0x3   :  { %7598 = sst [smem:[#allocation20_spill]] %s7550_s4 }
   0x4   :  { %7599 = sst [smem:[#allocation21_spill]] %s7556_s10 }
   0x5   :  { %7600 = sst [smem:[#allocation22_spill]] %s7557_s11 }
   0x6   :  { %18 = vsyncpa [#allocation3], 0 }
   0x7   :  { %20 = vsyncpa [#allocation3 + $0x1], 0 }
   0x8   :  { %21 = vsyncpa [#allocation5], 0 }
   0x9   :  { %23 = vsyncpa [#allocation5 + $0x1], 0  ;;  %s6075_s21 = smov 0   ;;  %s6077_s22 = smov 0  }
   0xa   :  { %s6079_s23 = smov 0   ;;  %s6081_s24 = smov 0  }
   0xb LB: > { %7601 = sst [smem:[#allocation8_spill]] %s5981_s21  ;;  %s6096_s25 = sadd.s32 4294967295, %s5993_s24   ;;  %s5993_s24 = sphi %s6081_s24, %s7636_s24   ;;  %s5989_s23 = sphi %s6079_s23, %s7639_s23   ;;  %s5985_s22 = sphi %s6077_s22, %s7638_s22   ;;  %s5981_s21 = sphi %s6075_s21, %s7637_s21  }
   0xc   : > { %7602 = sst [smem:[#allocation9_spill]] %s5985_s22  ;;  %s4925_s26 = sadd.s32 4294967294, %s5993_s24  }
   0xd   : > { %7603 = sst [smem:[#allocation10_spill]] %s5989_s23  ;;  %s6100_s27 = sadd.s32 1, %s5993_s24  }
   0xe   : > { %7604 = sst [smem:[#allocation11_spill]] %s5993_s24  ;;  %s251_s28 = sadd.s32 1, %s5989_s23 }
   0xf   : > { %7605 = sst [smem:[#allocation12_spill]] %s6096_s25  ;;  %s248_s29 = ssub.s32 %s5993_s24, %s6100_s27 }
  0x10   : > { %7606 = sst [smem:[#allocation13_spill]] %s6100_s27  ;;  %p261_p0 = scmp.ne.s32.totalorder %s5989_s23, %s5985_s22 }
  0x11   : > { %p249_p1 = scmp.eq.s32.totalorder %s248_s29, 0  ;;  %p262_p2 = scmp.eq.s32.totalorder %s6096_s25, 1 }
  0x12   : > { %p267_p3 = scmp.ne.s32.totalorder %s5985_s22, %s5981_s21  ;;  %p268_p4 = scmp.eq.s32.totalorder %s4925_s26, 1 }
  0x13   : > { %s6111_s30 = scalar_select %p249_p1, %s5989_s23, %s251_s28  }
  0x14   : > { %p6113_p5 = por %p262_p2, %p261_p0  ;;  %p6117_p6 = por %p268_p4, %p267_p3 }
  0x15   : > { %7607 = sst [smem:[#allocation14_spill]] %s6111_s30  ;;  %p4928_p7 = scmp.ge.s32.totalorder %s5993_s24, 1 }
  0x16   : > { %s7608_s13 = scalar_select %p6113_p5, 1, 0 }
  0x17   : > { %s7610_s14 = scalar_select %p6117_p6, 1, 0 }
  0x18   : > { %7609 = sst [smem:[#allocation15_spill]] %s7608_s13  ;;  %p373_p8 = scmp.lt.s32.totalorder %s5993_s24, 3 }
  0x19   : > { %7611 = sst [smem:[#allocation16_spill]] %s7610_s14 }
  0x1a   : > { %p374_p9 = pnand %p4928_p7, %p373_p8 }
  0x1c   : > { %377 = sbr.rel (%p374_p9) target bundleno = 10788 (0x2a24), region = 60 }
  0x21   : > { %s7612_s3 = sld [smem:[#allocation19_spill]]  ;;  %p424_p10 = scmp.lt.s32.totalorder %s6096_s25, 1  ;;  %v572_v4 = vld [vmem:[%s7547_s1 + $0x20] sm:$0xff]  ;;  %vm569_vm0 = vcmask 261120   ;;  %vm537_vm1 = vcmask 523264   ;;  %vm616_vm2 = vcmask 1043456  }
  0x22   : > { %s7613_s4 = sld [smem:[#allocation20_spill]]  ;;  %v578_v7 = vpack.c.bf16 %v572_v4, %v572_v4  ;;  %v608_v22 = vld [vmem:[%s7547_s1 + $0x4] sm:$0xf]  ;;  %v5558_v23 = vld [vmem:[%s7547_s1 + $0x1e] ss:$0 sm:$0xff]  ;;  %v609_v32 = vld [vmem:[%s7547_s1 + $0x8] sm:$0xff] }
  0x23   : > { %s6143_s17 = scalar_select %p424_p10, %s6096_s25, 1  ;;  %v614_v24 = vrot.slane %v608_v22, 4  ;;  %v610_v38 = vld [vmem:[%s7547_s1 + $0x10] sm:$0xff]  ;;  %v5995_v42 = vmov 32.0  }
  0x24   : > { %s7614_s0 = sld [smem:[#allocation18_spill]]  ;;  %5595 = vrcp.f32 %v5995_v42  ;;  %s7578_s30 = smov 64  }
  0x25   : > { %s5432_s20 = sshll.u32 %s6143_s17, 5  ;;  %s7576_s16 = smov 88  }
  0x26   : > { %s7560_s18 = smov 72   ;;  %s7572_s19 = smov 80  }
  0x27   : > { %v5440_v0 = vld [vmem:[%s7612_s3 + $0x38] sm:$0xff]  ;;  %v5439_v2 = vld [vmem:[%s7612_s3 + $0x30] sm:$0xff]  ;;  %v5438_v8 = vld [vmem:[%s7612_s3 + $0x28] sm:$0xff]  ;;  %s7570_s26 = smov 112   ;;  %s7574_s28 = smov 120  }
  0x28   : > { %v5446_v1 = vld [vmem:[%s7613_s4 + $0x8] sm:$0xff]  ;;  %541 = vmatpush.bf16.msra.mxu0 %v5440_v0  ;;  %v5445_v3 = vld [vmem:[%s7613_s4] sm:$0xff]  ;;  %v5444_v5 = vld [vmem:[%s7612_s3 + $0x58] sm:$0xff]  ;;  %s7562_s29 = smov 104   ;;  %s5498_s24 = smul.u32 24, %s6143_s17 }
  0x29   : > { %601 = vmatpush.bf16.msra.mxu2 %v5446_v1  ;;  %559 = vmatpush.bf16.msra.mxu1 %v5444_v5  ;;  %v5443_v6 = vld [vmem:[%s7612_s3 + $0x50] sm:$0xff]  ;;  %v5442_v9 = vld [vmem:[%s7612_s3 + $0x48] sm:$0xff]  ;;  %v5437_v10 = vld [vmem:[%s7612_s3 + $0x20] sm:$0xff]  ;;  %s7627_s13 = sld [smem:[#allocation12_spill]] }
  0x2a   : > { %s428_s4 = scalar_lea.vmem %s7614_s0, %s5432_s20  ;;  %v5441_v11 = vld [vmem:[%s7612_s3 + $0x40] sm:$0xff]  ;;  %v5436_v14 = vld [vmem:[%s7612_s3 + $0x18] sm:$0xff]  ;;  %v5435_v16 = vld [vmem:[%s7612_s3 + $0x10] sm:$0xff]  ;;  %v5596_v43 = vpop.eup %5595  ;;  %s7580_s20 = smov 96  }
  0x2b   : > { %v436_v12 = vld [vmem:[%s428_s4 + $0x8] sm:$0xff]  ;;  %v438_v13 = vld [vmem:[%s428_s4 + $0x18] sm:$0xff]  ;;  %v5433_v18 = vld [vmem:[%s7612_s3] sm:$0xff]  ;;  %v630_v44 = vmul.f32 32.0, %v5596_v43  ;;  %vm634_vm3 = vweird.f32 %v5596_v43  ;;  %s7622_s0 = smov 112   ;;  %s7630_s11 = sld [smem:[#allocation21_spill]] }
  0x2c   : > { %542 = vmatpush.bf16.msra.mxu0 %v5439_v2  ;;  %v464_v15 = vpack.c.bf16 %v438_v13, %v436_v12  ;;  %v5434_v17 = vld [vmem:[%s7612_s3 + $0x8] sm:$0xff]  ;;  %v435_v19 = vld [vmem:[%s428_s4] sm:$0xff]  ;;  %v437_v20 = vld [vmem:[%s428_s4 + $0x10] sm:$0xff]  ;;  %s6189_s4 = sand.u32 1, %s5985_s22   ;;  %s7626_s3 = smov 40  }
  0x2d   : > { %602 = vmatpush.bf16.msra.mxu2 %v5445_v3  ;;  %560 = vmatpush.bf16.msra.mxu1 %v5443_v6  ;;  %v463_v21 = vpack.c.bf16 %v437_v20, %v435_v19  ;;  %7615 = sst [smem:[#allocation17_spill]] %s6189_s4  ;;  %s4929_s23 = sshll.u32 %s6189_s4, 4  ;;  %v631_v45 = vsub.f32 1.0, %v630_v44 }
  0x2e   : > { %s6195_s15 = scalar_lea.vmem [#allocation2], %s4929_s23  ;;  %s7566_s23 = smov 48  }
  0x2f   : > { %v632_v46 = vmul.f32 %v5596_v43, %v631_v45  ;;  %s7628_s4 = sld [smem:[#allocation17_spill]]  ;;  %s4791_s22 = sshll.u32 %s6195_s15, 4  ;;  %s4792_s22 = int_to_ptr.vmem [resolvable:$true] %s4791_s22 }
  0x30   : > { %4990 = vmatmul.msk.bf16.vlgmr.msra.gmra.mxu2 %vm569_vm0, %v578_v7  ;;  %543 = vmatpush.bf16.msra.mxu0 %v5438_v8  ;;  %s5497_s21 = sshll.u32 %s7627_s13, 4 }
  0x31   : > { %561 = vmatpush.bf16.msra.mxu1 %v5442_v9  ;;  %v633_v47 = vadd.f32 %v5596_v43, %v632_v46 }
  0x33   : > { %v6206_v48 = vsel %vm634_vm3, %v5596_v43, %v633_v47 }
  0x34   : > { %544 = vmatpush.bf16.msra.mxu0 %v5437_v10 }
  0x35   : > { %562 = vmatpush.bf16.msra.mxu1 %v5441_v11  ;;  %v5559_v11 = vld [vmem:[%s7547_s1 + $0x18] ss:$0 sm:$0xff] }
  0x38   : > { %545 = vmatpush.bf16.msra.mxu0 %v5436_v14  ;;  %4981 = vmatmul.msk.bf16.vlgmr.msra.gmra.mxu1 %vm537_vm1, %v464_v15  ;;  %v5560_v15 = vld [vmem:[%s7547_s1 + $0x19] ss:$0 sm:$0xff] }
  0x3c   : > { %546 = vmatpush.bf16.msra.mxu0 %v5435_v16 }
  0x40   : > { %547 = vmatpush.bf16.msra.mxu0 %v5434_v17 }
  0x44   : > { %548 = vmatpush.bf16.msra.mxu0 %v5433_v18 }
  0x47   : > { %549 = vmatmul.bf16.vlgmr.msra.gmra.mxu0 %v463_v21 }
  0xb3   : > { %v604_v25 = vpop.f32.mrf.mxu2 }
  0xb4   : > { %v6183_v26 = vadd.f32 %v5558_v23, %v604_v25 }
  0xb5   : > { %v564_v30 = vpop.f32.mrf.mxu1 }
  0xb6   : > { %v617_v27 = vsel %vm616_vm2, %v6183_v26, %v614_v24 }
  0xb7   : > { %v620_v28 = vsel %vm569_vm0, %v617_v27, 0.0 }
  0xb8   : > { %621 = vadd.xlane.f32.xlu0 %v620_v28 }
  0xbb   : > { %v606_v29 = vpop.f32.mrf.mxu2 }
  0xbd   : > { %v566_v36 = vpop.f32.mrf.mxu1 }
  0xc4   : > { %v550_v31 = vpop.f32.mrf.mxu0 }
  0xc5   : > { %v565_v33 = vadd.f32 %v564_v30, %v550_v31 }
  0xc7   : > { %570 = vst.msk [vmem:[%s6195_s15] sm:$0xff] %vm569_vm0, %v565_v33  ;;  %v611_v34 = vadd.f32 %v609_v32, %v565_v33 }
  0xc9   : > { %v623_v35 = vsel %vm569_vm0, %v611_v34, 0.0 }
  0xca   : > { %624 = vadd.xlane.f32.xlu0 %v623_v35 }
  0xcc   : > { %v552_v37 = vpop.f32.mrf.mxu0 }
  0xcd   : > { %v567_v39 = vadd.f32 %v566_v36, %v552_v37 }
  0xcf   : > { %571 = vst.msk [vmem:[%s6195_s15 + $0x8] sm:$0xff] %vm569_vm0, %v567_v39  ;;  %v612_v40 = vadd.f32 %v610_v38, %v567_v39 }
  0xd1   : > { %v626_v41 = vsel %vm569_vm0, %v612_v40, 0.0 }
  0xd2   : > { %627 = vadd.xlane.f32.xlu1 %v626_v41 }
 0x12b   : > { %v622_v49 = vpop.xlane.xlu0 %621 }
 0x12c   : > { %v636_v50 = vmul.f32 %v6206_v48, %v622_v49 }
 0x12e   : > { %v639_v51 = vsub.f32 %v617_v27, %v636_v50 }
 0x130   : > { %v642_v52 = vmul.f32 %v639_v51, %v639_v51 }
 0x132   : > { %v645_v53 = vsel %vm569_vm0, %v642_v52, 0.0 }
 0x133   : > { %646 = vadd.xlane.f32.xlu1 %v645_v53 }
 0x13d   : > { %v625_v54 = vpop.xlane.xlu0 %624 }
 0x13e   : > { %v637_v55 = vmul.f32 %v6206_v48, %v625_v54 }
 0x140   : > { %v640_v56 = vsub.f32 %v611_v34, %v637_v55 }
 0x142   : > { %v643_v57 = vmul.f32 %v640_v56, %v640_v56 }
 0x144   : > { %v648_v58 = vsel %vm569_vm0, %v643_v57, 0.0 }
 0x145   : > { %649 = vadd.xlane.f32.xlu2 %v648_v58  ;;  %v628_v59 = vpop.xlane.xlu1 %627 }
 0x146   : > { %v638_v60 = vmul.f32 %v6206_v48, %v628_v59 }
 0x148   : > { %v641_v61 = vsub.f32 %v612_v40, %v638_v60 }
 0x14a   : > { %v644_v62 = vmul.f32 %v641_v61, %v641_v61 }
 0x14c   : > { %v651_v63 = vsel %vm569_vm0, %v644_v62, 0.0 }
 0x14d   : > { %652 = vadd.xlane.f32.xlu2 %v651_v63 }
 0x1a6   : > { %v647_v0 = vpop.xlane.xlu1 %646 }
 0x1a7   : > { %v654_v1 = vmul.f32 %v647_v0, %v6206_v48  ;;  %v5448_v0 = vld [vmem:[%s7551_s5 + $0x8] sm:$0xff] }
 0x1a8   : > { %816 = vmatpush.bf16.msra.mxu3 %v5448_v0 }
 0x1a9   : > { %v657_v2 = vadd.f32 1e-05, %v654_v1 }
 0x1ab   : > { %5597 = vrsqrt.f32 %v657_v2  ;;  %vm666_vm5 = vweird.f32 %v657_v2 }
 0x1b1   : > { %v5598_v3 = vpop.eup %5597 }
 0x1b2   : > { %v661_v4 = vmul.f32 %v5598_v3, %v657_v2  ;;  %vm667_vm4 = vweird.f32 %v5598_v3  ;;  %v5447_v2 = vld [vmem:[%s7551_s5] sm:$0xff] }
 0x1b3   : > { %vm668_vm6 = vmor %vm666_vm5, %vm667_vm4  ;;  %817 = vmatpush.bf16.msra.mxu3 %v5447_v2  ;;  %v5998_v2 = vmov -1e+09  }
 0x1b4   : > { %v662_v5 = vmul.f32 %v5598_v3, %v661_v4 }
 0x1b6   : > { %v663_v6 = vmul.f32 0.5, %v662_v5 }
 0x1b8   : > { %v664_v7 = vsub.f32 1.5, %v663_v6  ;;  %v650_v8 = vpop.xlane.xlu2 %649 }
 0x1b9   : > { %v655_v10 = vmul.f32 %v650_v8, %v6206_v48 }
 0x1ba   : > { %v665_v9 = vmul.f32 %v5598_v3, %v664_v7 }
 0x1bb   : > { %v658_v12 = vadd.f32 1e-05, %v655_v10 }
 0x1bc   : > { %v669_v13 = vsel %vm668_vm6, %v5598_v3, %v665_v9 }
 0x1bd   : > { %v690_v14 = vmul.f32 %v669_v13, %v639_v51  ;;  %5599 = vrsqrt.f32 %v658_v12  ;;  %vm676_vm8 = vweird.f32 %v658_v12 }
 0x1bf   : > { %v694_v16 = vmul.f32 %v5559_v11, %v690_v14 }
 0x1c0   : > { %v653_v17 = vpop.xlane.xlu2 %652 }
 0x1c1   : > { %v6222_v18 = vadd.f32 %v5560_v15, %v694_v16  ;;  %v656_v19 = vmul.f32 %v653_v17, %v6206_v48 }
 0x1c3   : > { %v710_v20 = vsel %vm569_vm0, %v6222_v18, 0.0  ;;  %v5600_v21 = vpop.eup %5599  ;;  %v659_v22 = vadd.f32 1e-05, %v656_v19 }
 0x1c4   : > { %711 = vadd.xlane.f32.xlu0 %v710_v20  ;;  %v671_v23 = vmul.f32 %v5600_v21, %v658_v12  ;;  %vm677_vm7 = vweird.f32 %v5600_v21 }
 0x1c5   : > { %5601 = vrsqrt.f32 %v659_v22  ;;  %vm678_vm9 = vmor %vm676_vm8, %vm677_vm7  ;;  %vm686_vm11 = vweird.f32 %v659_v22  ;;  %vm836_vm8 = vcmask 64512  }
 0x1c6   : > { %v672_v24 = vmul.f32 %v5600_v21, %v671_v23  ;;  %v5561_v23 = vld [vmem:[%s7548_s2] ss:$0 sm:$0xff] }
 0x1c8   : > { %v673_v25 = vmul.f32 0.5, %v672_v24 }
 0x1ca   : > { %v674_v27 = vsub.f32 1.5, %v673_v25 }
 0x1cb   : > { %v5602_v28 = vpop.eup %5601 }
 0x1cc   : > { %v675_v29 = vmul.f32 %v5600_v21, %v674_v27  ;;  %v681_v30 = vmul.f32 %v5602_v28, %v659_v22  ;;  %vm687_vm10 = vweird.f32 %v5602_v28 }
 0x1cd   : > { %vm688_vm12 = vmor %vm686_vm11, %vm687_vm10 }
 0x1ce   : > { %v682_v31 = vmul.f32 %v5602_v28, %v681_v30  ;;  %v679_v32 = vsel %vm678_vm9, %v5600_v21, %v675_v29 }
 0x1cf   : > { %v691_v33 = vmul.f32 %v679_v32, %v640_v56 }
 0x1d0   : > { %v683_v34 = vmul.f32 0.5, %v682_v31  ;;  %v5562_v31 = vld [vmem:[%s7548_s2 + $0x1] ss:$0 sm:$0xff] }
 0x1d1   : > { %v695_v35 = vmul.f32 %v5559_v11, %v691_v33 }
 0x1d2   : > { %v684_v36 = vsub.f32 1.5, %v683_v34 }
 0x1d3   : > { %v6227_v37 = vadd.f32 %v5560_v15, %v695_v35 }
 0x1d4   : > { %v685_v38 = vmul.f32 %v5602_v28, %v684_v36 }
 0x1d5   : > { %v713_v39 = vsel %vm569_vm0, %v6227_v37, 0.0 }
 0x1d6   : > { %714 = vadd.xlane.f32.xlu1 %v713_v39  ;;  %v689_v40 = vsel %vm688_vm12, %v5602_v28, %v685_v38  ;;  %vm873_vm12 = vcmask 195584  }
 0x1d7   : > { %v692_v41 = vmul.f32 %v689_v40, %v641_v61 }
 0x1d9   : > { %v696_v42 = vmul.f32 %v5559_v11, %v692_v41 }
 0x1db   : > { %v6231_v43 = vadd.f32 %v5560_v15, %v696_v42 }
 0x1dd   : > { %v716_v44 = vsel %vm569_vm0, %v6231_v43, 0.0 }
 0x1de   : > { %717 = vadd.xlane.f32.xlu2 %v716_v44 }
 0x237   : > { %v712_v45 = vpop.xlane.xlu0 %711 }
 0x238   : > { %v719_v46 = vmul.f32 %v712_v45, %v6206_v48 }
 0x23a   : > { %v722_v47 = vsub.f32 %v6222_v18, %v719_v46 }
 0x23c   : > { %v725_v49 = vmul.f32 %v722_v47, %v722_v47 }
 0x23e   : > { %v728_v50 = vsel %vm569_vm0, %v725_v49, 0.0 }
 0x23f   : > { %729 = vadd.xlane.f32.xlu0 %v728_v50 }
 0x249   : > { %v715_v51 = vpop.xlane.xlu1 %714 }
 0x24a   : > { %v720_v52 = vmul.f32 %v715_v51, %v6206_v48 }
 0x24c   : > { %v723_v53 = vsub.f32 %v6227_v37, %v720_v52 }
 0x24e   : > { %v726_v54 = vmul.f32 %v723_v53, %v723_v53 }
 0x250   : > { %v731_v55 = vsel %vm569_vm0, %v726_v54, 0.0 }
 0x251   : > { %v718_v56 = vpop.xlane.xlu2 %717  ;;  %732 = vadd.xlane.f32.xlu1 %v731_v55 }
 0x252   : > { %v721_v57 = vmul.f32 %v718_v56, %v6206_v48 }
 0x254   : > { %v724_v58 = vsub.f32 %v6231_v43, %v721_v57 }
 0x256   : > { %v727_v59 = vmul.f32 %v724_v58, %v724_v58 }
 0x258   : > { %v734_v60 = vsel %vm569_vm0, %v727_v59, 0.0 }
 0x259   : > { %735 = vadd.xlane.f32.xlu2 %v734_v60 }
 0x2b2   : > { %v730_v61 = vpop.xlane.xlu0 %729 }
 0x2b3   : > { %v737_v62 = vmul.f32 %v730_v61, %v6206_v48 }
 0x2b5   : > { %v740_v63 = vadd.f32 1e-05, %v737_v62 }
 0x2b7   : > { %5603 = vrsqrt.f32 %v740_v63  ;;  %vm749_vm14 = vweird.f32 %v740_v63 }
 0x2bd   : > { %v5604_v1 = vpop.eup %5603 }
 0x2be   : > { %v744_v3 = vmul.f32 %v5604_v1, %v740_v63  ;;  %vm750_vm13 = vweird.f32 %v5604_v1  ;;  %v701_v63 = vlaneseq }
 0x2bf   : > { %vm751_vm15 = vmor %vm749_vm14, %vm750_vm13 }
 0x2c0   : > { %v745_v4 = vmul.f32 %v5604_v1, %v744_v3  ;;  %v6281_v0 = vand.u32 127, %v701_v63 }
 0x2c2   : > { %v746_v8 = vmul.f32 0.5, %v745_v4  ;;  %vm703_vm9 = vcmp.lt.s32.totalorder %v6281_v0, 4  ;;  %vm704_vm10 = vcmp.ge.s32.totalorder %v6281_v0, 7 }
 0x2c3   : > { %vm705_vm11 = vmor %vm703_vm9, %vm704_vm10 }
 0x2c4   : > { %v733_v5 = vpop.xlane.xlu1 %732  ;;  %v747_v9 = vsub.f32 1.5, %v746_v8  ;;  %v6288_v3 = vsel %vm705_vm11, 0.0, %v5998_v2 }
 0x2c5   : > { %v738_v6 = vmul.f32 %v733_v5, %v6206_v48 }
 0x2c6   : > { %v748_v14 = vmul.f32 %v5604_v1, %v747_v9 }
 0x2c7   : > { %v741_v7 = vadd.f32 1e-05, %v738_v6 }
 0x2c8   : > { %v752_v17 = vsel %vm751_vm15, %v5604_v1, %v748_v14 }
 0x2c9   : > { %5605 = vrsqrt.f32 %v741_v7  ;;  %v773_v22 = vmul.f32 %v752_v17, %v722_v47  ;;  %vm759_vm3 = vweird.f32 %v741_v7  ;;  %v5563_v47 = vld [vmem:[%s7548_s2 + $0x6] ss:$0 sm:$0xff] }
 0x2cb   : > { %v777_v30 = vmul.f32 %v5561_v23, %v773_v22 }
 0x2cc   : > { %v736_v10 = vpop.xlane.xlu2 %735 }
 0x2cd   : > { %v739_v11 = vmul.f32 %v736_v10, %v6206_v48  ;;  %v781_v35 = vadd.f32 %v5562_v31, %v777_v30 }
 0x2cf   : > { %v5606_v12 = vpop.eup %5605  ;;  %v742_v13 = vadd.f32 1e-05, %v739_v11 }
 0x2d0   : > { %v754_v15 = vmul.f32 %v5606_v12, %v741_v7  ;;  %vm760_vm1 = vweird.f32 %v5606_v12 }
 0x2d1   : > { %5607 = vrsqrt.f32 %v742_v13  ;;  %vm761_vm4 = vmor %vm759_vm3, %vm760_vm1  ;;  %vm769_vm6 = vweird.f32 %v742_v13 }
 0x2d2   : > { %v755_v16 = vmul.f32 %v5606_v12, %v754_v15 }
 0x2d4   : > { %v756_v19 = vmul.f32 0.5, %v755_v16 }
 0x2d6   : > { %v757_v20 = vsub.f32 1.5, %v756_v19 }
 0x2d7   : > { %v5608_v21 = vpop.eup %5607 }
 0x2d8   : > { %v758_v24 = vmul.f32 %v5606_v12, %v757_v20  ;;  %v764_v25 = vmul.f32 %v5608_v21, %v742_v13  ;;  %vm770_vm5 = vweird.f32 %v5608_v21 }
 0x2d9   : > { %vm771_vm7 = vmor %vm769_vm6, %vm770_vm5 }
 0x2da   : > { %v762_v27 = vsel %vm761_vm4, %v5606_v12, %v758_v24  ;;  %v765_v28 = vmul.f32 %v5608_v21, %v764_v25 }
 0x2db   : > { %v774_v29 = vmul.f32 %v762_v27, %v723_v53 }
 0x2dc   : > { %v766_v32 = vmul.f32 0.5, %v765_v28 }
 0x2dd   : > { %v778_v33 = vmul.f32 %v5561_v23, %v774_v29 }
 0x2de   : > { %v767_v34 = vsub.f32 1.5, %v766_v32 }
 0x2df   : > { %v782_v36 = vadd.f32 %v5562_v31, %v778_v33 }
 0x2e0   : > { %v768_v38 = vmul.f32 %v5608_v21, %v767_v34 }
 0x2e1   : > { %v789_v39 = vpack.c.bf16 %v782_v36, %v781_v35  ;;  %v943_v35 = vld [vmem:[%s7552_s6] sm:$0xf] }
 0x2e2   : > { %v772_v40 = vsel %vm771_vm7, %v5608_v21, %v768_v38 }
 0x2e3   : > { %4999 = vmatmul.msk.bf16.vlgmr.msra.gmra.mxu3 %vm569_vm0, %v789_v39  ;;  %v775_v41 = vmul.f32 %v772_v40, %v724_v58  ;;  %v1093_v39 = vsel %vm616_vm2, %v943_v35, 0 }
 0x2e5   : > { %v779_v42 = vmul.f32 %v5561_v23, %v775_v41 }
 0x2e7   : > { %v783_v44 = vadd.f32 %v5562_v31, %v779_v42 }
 0x2e9   : > { %v790_v45 = vpack.c.bf16 %v783_v44, %v783_v44 }
 0x2f3   : > { %5000 = vmatmul.msk.bf16.gmra.mxu3 %vm569_vm0, %v790_v45 }
 0x366   : > { %v819_v46 = vpop.f32.mrf.mxu3 }
 0x367   : > { %v820_v50 = vadd.f32 %v5563_v47, %v819_v46 }
 0x36e   : > { %v821_v49 = vpop.f32.mrf.mxu3 }
 0x36f   : > { %v822_v51 = vadd.f32 %v5563_v47, %v821_v49 }
 0x371   : > { %v6264_v52 = vpack.c.bf16 %v822_v51, %v820_v50 }
 0x373   : > { %832 = vrot.lane.b32.xlu1 %v6264_v52, %s7580_s20 }
 0x376   : > { %v824_v53 = vpop.f32.mrf.mxu3 }
 0x377   : > { %v825_v54 = vadd.f32 %v5563_v47, %v824_v53 }
 0x379   : > { %v6268_v55 = vpack.c.bf16 %v825_v54, %v825_v54 }
 0x37b   : > { %834 = vrot.lane.b32.xlu0 %v6268_v55, %s7580_s20  ;;  %911 = vrot.lane.b32.xlu1 %v6268_v55, %s7578_s30  ;;  %s7623_s20 = smov 104  }
 0x37e   : > { %v826_v56 = vpop.f32.mrf.mxu3 }
 0x3e5   : > { %v833_v57 = vpop.permute.xlu1 %832 }
 0x3e6   : > { %v844_v62 = vsel %vm836_vm8, %v833_v57, 0 }
 0x3ed   : > { %v835_v58 = vpop.permute.xlu0 %834  ;;  %v912_v59 = vpop.permute.xlu1 %911 }
 0x3ee   : > { %v847_v60 = vsel %vm836_vm8, %v835_v58, 0  ;;  %v921_v61 = vsel %vm616_vm2, %v912_v59, 0 }
 0x3ef   : > { %855 = vmatpush.bf16.xpose.msrb.mxu2 %v847_v60  ;;  %929 = vmatpush.bf16.msrb.mxu1 %v921_v61 }
 0x3f7   : > { %856 = vmatpush.bf16.xpose.msrb.mxu2 %v844_v62 }
 0x3fe   : > { %5001 = vmatmul.msk.bf16.vlgmr.msrb.gmra.mxu2 %vm836_vm8, %v6264_v52 }
 0x40e   : > { %5002 = vmatmul.msk.bf16.gmra.mxu2 %vm836_vm8, %v6268_v55 }
 0x481   : > { %v858_v1 = vpop.f32.mrf.mxu2 }
 0x482   : > { %v867_v4 = vmul.f32 0.35355338, %v858_v1 }
 0x484   : > { %v870_v5 = vadd.f32 %v867_v4, %v6288_v3 }
 0x486   : > { %v874_v6 = vsel %vm873_vm12, %v870_v5, -inf }
 0x487   : > { %875 = vmax.xlane.f32.xlu2 %v874_v6 }
 0x489   : > { %v860_v7 = vpop.f32.mrf.mxu2 }
 0x48a   : > { %v868_v8 = vmul.f32 0.35355338, %v860_v7 }
 0x48c   : > { %v871_v9 = vadd.f32 %v868_v8, %v6288_v3 }
 0x48e   : > { %v877_v10 = vsel %vm873_vm12, %v871_v9, -inf }
 0x48f   : > { %878 = vmax.xlane.f32.xlu2 %v877_v10 }
 0x491   : > { %v863_v11 = vpop.f32.mrf.mxu2 }
 0x492   : > { %v869_v12 = vmul.f32 0.35355338, %v863_v11 }
 0x494   : > { %v872_v13 = vadd.f32 %v869_v12, %v6288_v3 }
 0x496   : > { %v880_v14 = vsel %vm873_vm12, %v872_v13, -inf }
 0x497   : > { %881 = vmax.xlane.f32.xlu2 %v880_v14 }
 0x499   : > { %v865_v15 = vpop.f32.mrf.mxu2 }
 0x4fa   : > { %v876_v16 = vpop.xlane.xlu2 %875 }
 0x4fb   : > { %v883_v17 = vsub.f32 %v870_v5, %v876_v16 }
 0x4fd   : > { %v886_v19 = vmul.f32 1.442695, %v883_v17 }
 0x4ff   : > { %5609 = vpow2.f32 %v886_v19 }
 0x502   : > { %v879_v20 = vpop.xlane.xlu2 %878 }
 0x503   : > { %v884_v21 = vsub.f32 %v871_v9, %v879_v20 }
 0x505   : > { %v5610_v22 = vpop.eup %5609  ;;  %v888_v23 = vmul.f32 1.442695, %v884_v21 }
 0x506   : > { %v892_v24 = vsel %vm873_vm12, %v5610_v22, 0.0 }
 0x507   : > { %5611 = vpow2.f32 %v888_v23  ;;  %893 = vadd.xlane.f32.xlu0 %v892_v24 }
 0x50a   : > { %v882_v25 = vpop.xlane.xlu2 %881 }
 0x50b   : > { %v885_v27 = vsub.f32 %v872_v13, %v882_v25 }
 0x50d   : > { %v5612_v28 = vpop.eup %5611  ;;  %v890_v29 = vmul.f32 1.442695, %v885_v27 }
 0x50e   : > { %v895_v30 = vsel %vm873_vm12, %v5612_v28, 0.0 }
 0x50f   : > { %5613 = vpow2.f32 %v890_v29  ;;  %896 = vadd.xlane.f32.xlu2 %v895_v30 }
 0x515   : > { %v5614_v31 = vpop.eup %5613 }
 0x516   : > { %v898_v32 = vsel %vm873_vm12, %v5614_v31, 0.0 }
 0x517   : > { %899 = vadd.xlane.f32.xlu1 %v898_v32 }
 0x51b   : > { %948 = vrot.lane.b32.xlu0 %v6264_v52, %s7576_s16 }
 0x523   : > { %1264 = vrot.lane.b32.xlu0 %v6268_v55, %s7560_s18 }
 0x527   : > { %909 = vrot.lane.b32.xlu2 %v6264_v52, %s7578_s30  ;;  %s7620_s30 = smov 120  }
 0x52b   : > { %1262 = vrot.lane.b32.xlu0 %v6264_v52, %s7560_s18  ;;  %s7568_s18 = smov 56  }
 0x52f   : > { %950 = vrot.lane.b32.xlu2 %v6268_v55, %s7576_s16  ;;  %s7621_s16 = smov 80  }
 0x530   : > { %1119 = vrot.lane.b32.xlu1 %v6268_v55, %s7572_s19 }
 0x533   : > { %1115 = vrot.lane.b32.xlu0 %v6268_v55, %s7570_s26 }
 0x537   : > { %944 = vrot.lane.b32.xlu2 %v6264_v52, %s7574_s28 }
 0x538   : > { %1260 = vrot.lane.b32.xlu1 %v6268_v55, %s7562_s29 }
 0x53f   : > { %946 = vrot.lane.b32.xlu2 %v6268_v55, %s7574_s28  ;;  %s7625_s28 = smov 48  }
 0x547   : > { %1117 = vrot.lane.b32.xlu2 %v6264_v52, %s7572_s19  ;;  %s7624_s19 = smov 56  }
 0x54f   : > { %1113 = vrot.lane.b32.xlu2 %v6264_v52, %s7570_s26  ;;  %s7616_s26 = smov 96  }
 0x557   : > { %1258 = vrot.lane.b32.xlu2 %v6264_v52, %s7562_s29  ;;  %s7564_s29 = smov 40  }
 0x57a   : > { %v894_v33 = vpop.xlane.xlu0 %893 }
 0x57b   : > { %5615 = vrcp.f32 %v894_v33 }
 0x581   : > { %v5616_v36 = vpop.eup %5615 }
 0x582   : > { %v897_v34 = vpop.xlane.xlu2 %896  ;;  %v904_v40 = vmul.f32 %v5616_v36, %v5610_v22 }
 0x583   : > { %5617 = vrcp.f32 %v897_v34 }
 0x589   : > { %v5618_v38 = vpop.eup %5617 }
 0x58a   : > { %v905_v41 = vmul.f32 %v5618_v38, %v5612_v28  ;;  %v910_v42 = vpop.permute.xlu2 %909  ;;  %v900_v44 = vpop.xlane.xlu1 %899 }
 0x58b   : > { %930 = vmatpush.bf16.msrb.mxu1 %v910_v42  ;;  %5619 = vrcp.f32 %v900_v44 }
 0x58c   : > { %v907_v45 = vpack.c.bf16 %v905_v41, %v904_v40 }
 0x58d   : > { %v949_v46 = vpop.permute.xlu0 %948 }
 0x58e   : > { %5003 = vmatmul.msk.bf16.vlgmr.msrb.gmra.mxu1 %vm873_vm12, %v907_v45  ;;  %v959_v57 = vsel %vm836_vm8, %v949_v46, 0 }
 0x58f   : > { %1102 = vmatpush.bf16.msra.mxu1 %v1093_v39 }
 0x591   : > { %v5620_v50 = vpop.eup %5619 }
 0x592   : > { %v951_v47 = vpop.permute.xlu2 %950  ;;  %v906_v54 = vmul.f32 %v5620_v50, %v5614_v31 }
 0x593   : > { %v962_v49 = vsel %vm836_vm8, %v951_v47, 0 }
 0x594   : > { %970 = vmatpush.bf16.xpose.msrb.mxu3 %v962_v49  ;;  %v908_v58 = vpack.c.bf16 %v906_v54, %v906_v54 }
 0x595   : > { %v1265_v51 = vpop.permute.xlu0 %1264 }
 0x596   : > { %v1276_v53 = vsel %vm836_vm8, %v1265_v51, 0 }
 0x597   : > { %1284 = vmatpush.bf16.xpose.msrb.mxu1 %v1276_v53 }
 0x59a   : > { %v945_v56 = vpop.permute.xlu2 %944 }
 0x59c   : > { %971 = vmatpush.bf16.xpose.msrb.mxu3 %v959_v57 }
 0x59d   : > { %v1263_v59 = vpop.permute.xlu0 %1262 }
 0x59e   : > { %5004 = vmatmul.msk.bf16.gmra.mxu1 %vm873_vm12, %v908_v58  ;;  %v1273_v60 = vsel %vm836_vm8, %v1263_v59, 0 }
 0x59f   : > { %1285 = vmatpush.bf16.xpose.msrb.mxu1 %v1273_v60 }
 0x5a2   : > { %v947_v61 = vpop.permute.xlu2 %946  ;;  %v1120_v62 = vpop.permute.xlu1 %1119 }
 0x5a3   : > { %v1131_v63 = vsel %vm836_vm8, %v1120_v62, 0  ;;  %5005 = vmatmul.msk.bf16.vlgmr.msrb.gmra.mxu3 %vm836_vm8, %v945_v56 }
 0x5a4   : > { %1139 = vmatpush.bf16.xpose.msra.mxu3 %v1131_v63 }
 0x5a5   : > { %v1116_v6 = vpop.permute.xlu0 %1115 }
 0x5aa   : > { %v1118_v1 = vpop.permute.xlu2 %1117  ;;  %v1261_v29 = vpop.permute.xlu1 %1260 }
 0x5ab   : > { %v1128_v4 = vsel %vm836_vm8, %v1118_v1, 0 }
 0x5ac   : > { %1140 = vmatpush.bf16.xpose.msra.mxu3 %v1128_v4 }
 0x5b2   : > { %v1114_v5 = vpop.permute.xlu2 %1113 }
 0x5b3   : > { %5006 = vmatmul.msk.bf16.gmra.mxu3 %vm836_vm8, %v947_v61 }
 0x5ba   : > { %v1259_v22 = vpop.permute.xlu2 %1258 }
 0x5c3   : > { %5014 = vmatmul.msk.bf16.vlgmr.msra.gmra.mxu3 %vm836_vm8, %v1114_v5 }
 0x5d3   : > { %5015 = vmatmul.msk.bf16.gmra.mxu3 %vm836_vm8, %v1116_v6 }
 0x60b   : > { %v932_v7 = vpop.f32.mrf.mxu1 }
 0x613   : > { %v934_v8 = vpop.f32.mrf.mxu1 }
 0x614   : > { %v941_v9 = vpack.c.bf16 %v934_v8, %v932_v7 }
 0x616   : > { %5012 = vmatmul.msk.bf16.vlgmr.msra.gmra.mxu1 %vm836_vm8, %v941_v9 }
 0x61b   : > { %v937_v10 = vpop.f32.mrf.mxu1 }
 0x61c   : > { %v942_v12 = vpack.c.bf16 %v937_v10, %v937_v10 }
 0x623   : > { %v939_v11 = vpop.f32.mrf.mxu1 }
 0x626   : > { %v973_v13 = vpop.f32.mrf.mxu3  ;;  %5013 = vmatmul.msk.bf16.gmra.mxu1 %vm836_vm8, %v942_v12 }
 0x627   : > { %v982_v14 = vmul.f32 0.35355338, %v973_v13 }
 0x629   : > { %v985_v15 = vadd.f32 %v982_v14, %v6288_v3 }
 0x62b   : > { %v988_v16 = vsel %vm873_vm12, %v985_v15, -inf }
 0x62c   : > { %989 = vmax.xlane.f32.xlu2 %v988_v16 }
 0x62e   : > { %v975_v17 = vpop.f32.mrf.mxu3 }
 0x62f   : > { %v983_v19 = vmul.f32 0.35355338, %v975_v17 }
 0x631   : > { %v986_v20 = vadd.f32 %v983_v19, %v6288_v3 }
 0x633   : > { %v991_v21 = vsel %vm873_vm12, %v986_v20, -inf }
 0x634   : > { %992 = vmax.xlane.f32.xlu0 %v991_v21 }
 0x636   : > { %v978_v23 = vpop.f32.mrf.mxu3  ;;  %5021 = vmatmul.msk.bf16.vlgmr.msrb.gmra.mxu1 %vm836_vm8, %v1259_v22 }
 0x637   : > { %v984_v24 = vmul.f32 0.35355338, %v978_v23 }
 0x639   : > { %v987_v25 = vadd.f32 %v984_v24, %v6288_v3 }
 0x63b   : > { %v994_v27 = vsel %vm873_vm12, %v987_v25, -inf }
 0x63c   : > { %995 = vmax.xlane.f32.xlu1 %v994_v27 }
 0x63e   : > { %v980_v28 = vpop.f32.mrf.mxu3 }
 0x646   : > { %v1142_v30 = vpop.f32.mrf.mxu3  ;;  %5022 = vmatmul.msk.bf16.gmra.mxu1 %vm836_vm8, %v1261_v29 }
 0x647   : > { %v1151_v31 = vmul.f32 0.35355338, %v1142_v30 }
 0x649   : > { %v1154_v32 = vadd.f32 %v1151_v31, %v6288_v3 }
 0x64b   : > { %v1157_v33 = vsel %vm873_vm12, %v1154_v32, -inf }
 0x64c   : > { %1158 = vmax.xlane.f32.xlu2 %v1157_v33 }
 0x64e   : > { %v1144_v34 = vpop.f32.mrf.mxu3 }
 0x64f   : > { %v1152_v35 = vmul.f32 0.35355338, %v1144_v34 }
 0x651   : > { %v1155_v36 = vadd.f32 %v1152_v35, %v6288_v3 }
 0x653   : > { %v1160_v38 = vsel %vm873_vm12, %v1155_v36, -inf }
 0x654   : > { %1161 = vmax.xlane.f32.xlu0 %v1160_v38 }
 0x656   : > { %v1147_v39 = vpop.f32.mrf.mxu3 }
 0x657   : > { %v1153_v10 = vmul.f32 0.35355338, %v1147_v39 }
 0x659   : > { %v6380_v13 = vadd.f32 %v1153_v10, %v6288_v3 }
 0x65e   : > { %v1149_v40 = vpop.f32.mrf.mxu3 }
 0x693   : > { %v6355_v41 = vpop.f32.mrf.mxu1 }
 0x69b   : > { %v6357_v42 = vpop.f32.mrf.mxu1 }
 0x69f   : > { %v990_v44 = vpop.xlane.xlu2 %989 }
 0x6a0   : > { %v997_v45 = vsub.f32 %v985_v15, %v990_v44  ;;  %v1163_v15 = vsel %vm873_vm12, %v6380_v13, -inf }
 0x6a2   : > { %v1000_v46 = vmul.f32 1.442695, %v997_v45 }
 0x6a3   : > { %v6359_v47 = vpop.f32.mrf.mxu1 }
 0x6a4   : > { %5621 = vpow2.f32 %v1000_v46 }
 0x6a7   : > { %v993_v49 = vpop.xlane.xlu0 %992 }
 0x6a8   : > { %v998_v50 = vsub.f32 %v986_v20, %v993_v49 }
 0x6aa   : > { %v6361_v51 = vpop.eup %5621  ;;  %v1002_v53 = vmul.f32 1.442695, %v998_v50 }
 0x6ab   : > { %v1111_v54 = vpop.f32.mrf.mxu1  ;;  %v1006_v56 = vsel %vm873_vm12, %v6361_v51, 0.0 }
 0x6ac   : > { %5623 = vpow2.f32 %v1002_v53  ;;  %1007 = vadd.xlane.f32.xlu0 %v1006_v56 }
 0x6af   : > { %v996_v57 = vpop.xlane.xlu1 %995 }
 0x6b0   : > { %v999_v59 = vsub.f32 %v987_v25, %v996_v57 }
 0x6b2   : > { %v6365_v58 = vpop.eup %5623  ;;  %v1004_v63 = vmul.f32 1.442695, %v999_v59 }
 0x6b3   : > { %v1287_v60 = vpop.f32.mrf.mxu1  ;;  %v1009_v61 = vsel %vm873_vm12, %v6365_v58, 0.0 }
 0x6b4   : > { %v1296_v62 = vmul.f32 0.35355338, %v1287_v60  ;;  %1010 = vadd.xlane.f32.xlu1 %v1009_v61  ;;  %5625 = vpow2.f32 %v1004_v63 }
 0x6b6   : > { %v1299_v1 = vadd.f32 %v1296_v62, %v6288_v3 }
 0x6b8   : > { %v1302_v5 = vsel %vm873_vm12, %v1299_v1, -inf }
 0x6ba   : > { %v6372_v8 = vpop.eup %5625 }
 0x6bb   : > { %v1289_v4 = vpop.f32.mrf.mxu1  ;;  %v1012_v12 = vsel %vm873_vm12, %v6372_v8, 0.0 }
 0x6bc   : > { %v1297_v6 = vmul.f32 0.35355338, %v1289_v4  ;;  %1303 = vmax.xlane.f32.xlu1 %v1302_v5 }
 0x6be   : > { %v1300_v7 = vadd.f32 %v1297_v6, %v6288_v3 }
 0x6bf   : > { %v1159_v16 = vpop.xlane.xlu2 %1158 }
 0x6c0   : > { %1023 = vrot.lane.b32.xlu0 %v6264_v52, %s7568_s18  ;;  %v1305_v9 = vsel %vm873_vm12, %v1300_v7, -inf  ;;  %v1166_v17 = vsub.f32 %v1154_v32, %v1159_v16 }
 0x6c1   : > { %1306 = vmax.xlane.f32.xlu2 %v1305_v9 }
 0x6c2   : > { %v1169_v19 = vmul.f32 1.442695, %v1166_v17 }
 0x6c3   : > { %v1292_v11 = vpop.f32.mrf.mxu1 }
 0x6c4   : > { %1013 = vadd.xlane.f32.xlu1 %v1012_v12  ;;  %5627 = vpow2.f32 %v1169_v19  ;;  %v1298_v28 = vmul.f32 0.35355338, %v1292_v11 }
 0x6c6   : > { %v6399_v29 = vadd.f32 %v1298_v28, %v6288_v3 }
 0x6c7   : > { %v1162_v22 = vpop.xlane.xlu0 %1161 }
 0x6c8   : > { %v1167_v23 = vsub.f32 %v1155_v36, %v1162_v22  ;;  %v1308_v30 = vsel %vm873_vm12, %v6399_v29, -inf }
 0x6ca   : > { %v6388_v20 = vpop.eup %5627  ;;  %v1171_v24 = vmul.f32 1.442695, %v1167_v23 }
 0x6cb   : > { %v1294_v14 = vpop.f32.mrf.mxu1  ;;  %v1175_v21 = vsel %vm873_vm12, %v6388_v20, 0.0 }
 0x6cc   : > { %1164 = vmax.xlane.f32.xlu1 %v1163_v15  ;;  %5629 = vpow2.f32 %v1171_v24 }
 0x6d2   : > { %v6392_v25 = vpop.eup %5629 }
 0x6d3   : > { %v1178_v27 = vsel %vm873_vm12, %v6392_v25, 0.0 }
 0x6d9   : > { %1025 = vrot.lane.b32.xlu2 %v6268_v55, %s7568_s18  ;;  %s7617_s18 = smov 64  }
 0x6e5   : > { %1194 = vrot.lane.b32.xlu1 %v6268_v55, %s7566_s23 }
 0x6ea   : > { %1176 = vadd.xlane.f32.xlu0 %v1175_v21 }
 0x6fe   : > { %1339 = vrot.lane.b32.xlu0 %v6268_v55, %s7564_s29 }
 0x702   : > { %1179 = vadd.xlane.f32.xlu2 %v1178_v27 }
 0x70f   : > { %1309 = vmax.xlane.f32.xlu1 %v1308_v30 }
 0x71a   : > { %1192 = vrot.lane.b32.xlu2 %v6264_v52, %s7566_s23  ;;  %s7619_s23 = smov 72  }
 0x71f   : > { %v1008_v35 = vpop.xlane.xlu0 %1007 }
 0x727   : > { %v1011_v31 = vpop.xlane.xlu1 %1010 }
 0x72f   : > { %v1304_v32 = vpop.xlane.xlu1 %1303 }
 0x730   : > { %v1311_v33 = vsub.f32 %v1299_v1, %v1304_v32 }
 0x732   : > { %v1314_v34 = vmul.f32 1.442695, %v1311_v33  ;;  %v1024_v56 = vpop.permute.xlu0 %1023 }
 0x734   : > { %5631 = vpow2.f32 %v1314_v34  ;;  %v1307_v55 = vpop.xlane.xlu2 %1306 }
 0x735   : > { %v1312_v36 = vsub.f32 %v1300_v7, %v1307_v55  ;;  %5633 = vrcp.f32 %v1011_v31 }
 0x736   : > { %5635 = vrcp.f32 %v1008_v35 }
 0x737   : > { %v1316_v38 = vmul.f32 1.442695, %v1312_v36  ;;  %v1014_v57 = vpop.xlane.xlu1 %1013 }
 0x739   : > { %5637 = vpow2.f32 %v1316_v38 }
 0x73a   : > { %v6405_v39 = vpop.eup %5631  ;;  %5639 = vrcp.f32 %v1014_v57 }
 0x73b   : > { %v1320_v40 = vsel %vm873_vm12, %v6405_v39, 0.0  ;;  %v5634_v44 = vpop.eup %5633 }
 0x73c   : > { %v1026_v45 = vpop.permute.xlu2 %1025  ;;  %1321 = vadd.xlane.f32.xlu1 %v1320_v40  ;;  %v5636_v49 = vpop.eup %5635  ;;  %v1019_v50 = vmul.f32 %v5634_v44, %v6365_v58  ;;  %v5018_v44 = vld [vmem:[%s7552_s6 + $0x8] sm:$0xf] }
 0x73d   : > { %v1035_v46 = vsel %vm616_vm2, %v1026_v45, 0  ;;  %v1018_v54 = vmul.f32 %v5636_v49, %v6361_v51  ;;  %v1235_v45 = vsel %vm616_vm2, %v5018_v44, 0 }
 0x73e   : > { %1043 = vmatpush.bf16.msrb.mxu0 %v1035_v46 }
 0x73f   : > { %v5638_v53 = vpop.eup %5637  ;;  %v1021_v60 = vpack.c.bf16 %v1019_v50, %v1018_v54  ;;  %v1165_v62 = vpop.xlane.xlu1 %1164 }
 0x740   : > { %v1323_v59 = vsel %vm873_vm12, %v5638_v53, 0.0  ;;  %v5640_v61 = vpop.eup %5639  ;;  %v1168_v7 = vsub.f32 %v6380_v13, %v1165_v62  ;;  %v5025_v62 = vld [vmem:[%s7552_s6 + $0xc] sm:$0xf] }
 0x741   : > { %v1020_v63 = vmul.f32 %v5640_v61, %v6372_v8 }
 0x742   : > { %1044 = vmatpush.bf16.msrb.mxu0 %v1024_v56  ;;  %v1173_v8 = vmul.f32 1.442695, %v1168_v7 }
 0x743   : > { %v1022_v1 = vpack.c.bf16 %v1020_v63, %v1020_v63  ;;  %v1380_v63 = vsel %vm616_vm2, %v5025_v62, 0 }
 0x744   : > { %1324 = vadd.xlane.f32.xlu1 %v1323_v59 }
 0x745   : > { %5007 = vmatmul.msk.bf16.vlgmr.msrb.gmra.mxu0 %vm873_vm12, %v1021_v60 }
 0x755   : > { %5008 = vmatmul.msk.bf16.gmra.mxu0 %vm873_vm12, %v1022_v1 }
 0x757   : > { %v1195_v58 = vpop.permute.xlu1 %1194 }
 0x758   : > { %v1204_v51 = vsel %vm616_vm2, %v1195_v58, 0 }
 0x759   : > { %1212 = vmatpush.bf16.msra.mxu0 %v1204_v51 }
 0x75d   : > { %1337 = vrot.lane.b32.xlu1 %v6264_v52, %s7564_s29  ;;  %v1177_v4 = vpop.xlane.xlu0 %1176  ;;  %s7618_s29 = smov 88  }
 0x75e   : > { %5641 = vrcp.f32 %v1177_v4 }
 0x764   : > { %v5642_v10 = vpop.eup %5641 }
 0x765   : > { %v1187_v12 = vmul.f32 %v5642_v10, %v6388_v20  ;;  %v5009_v20 = vld [vmem:[%s7552_s6 + $0x4] sm:$0xf] }
 0x766   : > { %v1066_v24 = vsel %vm616_vm2, %v5009_v20, 0 }
 0x767   : > { %1075 = vmatpush.bf16.msra.mxu2 %v1066_v24 }
 0x76b   : > { %1244 = vmatpush.bf16.msrb.mxu2 %v1235_v45 }
 0x770   : > { %v1340_v5 = vpop.permute.xlu0 %1339 }
 0x771   : > { %v1349_v6 = vsel %vm616_vm2, %v1340_v5, 0 }
 0x772   : > { %1357 = vmatpush.bf16.msrb.mxu3 %v1349_v6 }
 0x775   : > { %v1180_v9 = vpop.xlane.xlu2 %1179 }
 0x776   : > { %5643 = vrcp.f32 %v1180_v9 }
 0x777   : > { %5645 = vpow2.f32 %v1173_v8 }
 0x77c   : > { %v5644_v11 = vpop.eup %5643 }
 0x77d   : > { %v1188_v14 = vmul.f32 %v5644_v11, %v6392_v25  ;;  %v1193_v15 = vpop.permute.xlu2 %1192  ;;  %v5646_v17 = vpop.eup %5645 }
 0x77e   : > { %1213 = vmatpush.bf16.msra.mxu0 %v1193_v15  ;;  %v1181_v21 = vsel %vm873_vm12, %v5646_v17, 0.0 }
 0x77f   : > { %v1190_v52 = vpack.c.bf16 %v1188_v14, %v1187_v12 }
 0x781   : > { %5016 = vmatmul.msk.bf16.vlgmr.msra.gmra.mxu0 %vm873_vm12, %v1190_v52 }
 0x782   : > { %v1310_v16 = vpop.xlane.xlu1 %1309  ;;  %1389 = vmatpush.bf16.msrb.mxu0 %v1380_v63  ;;  %v5449_v63 = vld [vmem:[%s7553_s7] sm:$0xff] }
 0x783   : > { %v1313_v19 = vsub.f32 %v6399_v29, %v1310_v16 }
 0x785   : > { %v1318_v13 = vmul.f32 1.442695, %v1313_v19 }
 0x787   : > { %5647 = vpow2.f32 %v1318_v13  ;;  %1182 = vadd.xlane.f32.xlu1 %v1181_v21  ;;  %v5564_v13 = vld [vmem:[%s7548_s2 + $0x4] ss:$0 sm:$0xff] }
 0x78d   : > { %v5648_v22 = vpop.eup %5647 }
 0x78e   : > { %v1326_v23 = vsel %vm873_vm12, %v5648_v22, 0.0 }
 0x78f   : > { %1327 = vadd.xlane.f32.xlu0 %v1326_v23 }
 0x7af   : > { %v1322_v25 = vpop.xlane.xlu1 %1321 }
 0x7b7   : > { %v1325_v27 = vpop.xlane.xlu1 %1324 }
 0x7b8   : > { %5649 = vrcp.f32 %v1325_v27 }
 0x7b9   : > { %5651 = vrcp.f32 %v1322_v25 }
 0x7be   : > { %v5650_v29 = vpop.eup %5649 }
 0x7bf   : > { %v5652_v32 = vpop.eup %5651  ;;  %v1333_v33 = vmul.f32 %v5650_v29, %v5638_v53 }
 0x7c0   : > { %v1332_v34 = vmul.f32 %v5652_v32, %v6405_v39 }
 0x7c2   : > { %v1046_v28 = vpop.f32.mrf.mxu0  ;;  %v1335_v35 = vpack.c.bf16 %v1333_v33, %v1332_v34 }
 0x7ca   : > { %v1048_v30 = vpop.f32.mrf.mxu0 }
 0x7cb   : > { %v1055_v31 = vpack.c.bf16 %v1048_v30, %v1046_v28 }
 0x7cd   : > { %5010 = vmatmul.msk.bf16.vlgmr.msra.gmra.mxu2 %vm836_vm8, %v1055_v31 }
 0x7cf   : > { %v1338_v55 = vpop.permute.xlu1 %1337 }
 0x7d0   : > { %1358 = vmatpush.bf16.msrb.mxu3 %v1338_v55 }
 0x7d2   : > { %v1051_v36 = vpop.f32.mrf.mxu0 }
 0x7d3   : > { %5023 = vmatmul.msk.bf16.vlgmr.msrb.gmra.mxu3 %vm873_vm12, %v1335_v35  ;;  %v1056_v40 = vpack.c.bf16 %v1051_v36, %v1051_v36 }
 0x7da   : > { %v1053_v38 = vpop.f32.mrf.mxu0 }
 0x7dd   : > { %5011 = vmatmul.msk.bf16.gmra.mxu2 %vm836_vm8, %v1056_v40 }
 0x7fa   : > { %v1183_v46 = vpop.xlane.xlu1 %1182 }
 0x7fb   : > { %5653 = vrcp.f32 %v1183_v46 }
 0x7fe   : > { %v1215_v39 = vpop.f32.mrf.mxu0 }
 0x801   : > { %v5654_v49 = vpop.eup %5653 }
 0x802   : > { %v1328_v50 = vpop.xlane.xlu0 %1327  ;;  %v1189_v53 = vmul.f32 %v5654_v49, %v5646_v17 }
 0x803   : > { %5655 = vrcp.f32 %v1328_v50 }
 0x804   : > { %v1191_v54 = vpack.c.bf16 %v1189_v53, %v1189_v53 }
 0x806   : > { %v1217_v56 = vpop.f32.mrf.mxu0  ;;  %5017 = vmatmul.msk.bf16.gmra.mxu0 %vm873_vm12, %v1191_v54 }
 0x807   : > { %v1224_v57 = vpack.c.bf16 %v1217_v56, %v1215_v39 }
 0x809   : > { %v5656_v59 = vpop.eup %5655  ;;  %5019 = vmatmul.msk.bf16.vlgmr.msrb.gmra.mxu2 %vm836_vm8, %v1224_v57 }
 0x80a   : > { %v1334_v60 = vmul.f32 %v5656_v59, %v5648_v22 }
 0x80c   : > { %v1336_v61 = vpack.c.bf16 %v1334_v60, %v1334_v60  ;;  %v5450_v60 = vld [vmem:[%s7553_s7 + $0x8] sm:$0xff] }
 0x80d   : > { %1519 = vmatpush.bf16.msra.mxu2 %v5450_v60 }
 0x80e   : > { %5024 = vmatmul.msk.bf16.gmra.mxu3 %vm873_vm12, %v1336_v61 }
 0x811   : > { %1520 = vmatpush.bf16.msra.mxu2 %v5449_v63 }
 0x850   : > { %v1077_v1 = vpop.f32.mrf.mxu2 }
 0x851   : > { %v1105_v52 = vadd.f32 %v6355_v41, %v1077_v1 }
 0x856   : > { %v1360_v58 = vpop.f32.mrf.mxu3 }
 0x858   : > { %v1079_v51 = vpop.f32.mrf.mxu2 }
 0x859   : > { %v1107_v23 = vadd.f32 %v6357_v42, %v1079_v51 }
 0x85e   : > { %v1362_v4 = vpop.f32.mrf.mxu3 }
 0x85f   : > { %v1369_v5 = vpack.c.bf16 %v1362_v4, %v1360_v58 }
 0x860   : > { %v1082_v6 = vpop.f32.mrf.mxu2 }
 0x861   : > { %5026 = vmatmul.msk.bf16.vlgmr.msrb.gmra.mxu0 %vm836_vm8, %v1369_v5  ;;  %v1110_v42 = vadd.f32 %v6359_v47, %v1082_v6 }
 0x868   : > { %v1084_v7 = vpop.f32.mrf.mxu2 }
 0x883   : > { %v1220_v9 = vpop.f32.mrf.mxu0 }
 0x884   : > { %v1225_v8 = vpack.c.bf16 %v1220_v9, %v1220_v9 }
 0x886   : > { %5020 = vmatmul.msk.bf16.gmra.mxu2 %vm836_vm8, %v1225_v8 }
 0x88b   : > { %v1222_v10 = vpop.f32.mrf.mxu0 }
 0x88c   : > { %v1246_v15 = vpop.f32.mrf.mxu2 }
 0x88d   : > { %v1255_v16 = vadd.f32 %v1246_v15, %v1105_v52 }
 0x891   : > { %v1365_v11 = vpop.f32.mrf.mxu3 }
 0x892   : > { %v1370_v12 = vpack.c.bf16 %v1365_v11, %v1365_v11 }
 0x894   : > { %5027 = vmatmul.msk.bf16.gmra.mxu0 %vm836_vm8, %v1370_v12  ;;  %v1248_v22 = vpop.f32.mrf.mxu2 }
 0x895   : > { %v1256_v24 = vadd.f32 %v1248_v22, %v1107_v23 }
 0x899   : > { %v1367_v14 = vpop.f32.mrf.mxu3 }
 0x8de   : > { %v1391_v17 = vpop.f32.mrf.mxu0 }
 0x8df   : > { %v1400_v19 = vadd.f32 %v1391_v17, %v1255_v16  ;;  %v5565_v17 = vld [vmem:[%s7548_s2 + $0x2] ss:$0 sm:$0xff] }
 0x8e1   : > { %v1403_v21 = vadd.f32 %v1400_v19, %v6222_v18 }
 0x8e3   : > { %v6455_v20 = vadd.f32 %v5564_v13, %v1403_v21 }
 0x8e5   : > { %v1413_v25 = vsel %vm569_vm0, %v6455_v20, 0.0 }
 0x8e6   : > { %1414 = vadd.xlane.f32.xlu2 %v1413_v25  ;;  %v1393_v41 = vpop.f32.mrf.mxu0 }
 0x8e7   : > { %v1401_v27 = vadd.f32 %v1393_v41, %v1256_v24  ;;  %v5566_v24 = vld [vmem:[%s7548_s2 + $0x3] ss:$0 sm:$0xff] }
 0x8e9   : > { %v1404_v28 = vadd.f32 %v1401_v27, %v6227_v37 }
 0x8eb   : > { %v6460_v29 = vadd.f32 %v5564_v13, %v1404_v28 }
 0x8ed   : > { %v1416_v30 = vsel %vm569_vm0, %v6460_v29, 0.0 }
 0x8ee   : > { %1417 = vadd.xlane.f32.xlu1 %v1416_v30 }
 0x909   : > { %v1251_v18 = vpop.f32.mrf.mxu2 }
 0x90a   : > { %v1257_v31 = vadd.f32 %v1251_v18, %v1110_v42 }
 0x911   : > { %v1253_v32 = vpop.f32.mrf.mxu2  ;;  %v1396_v33 = vpop.f32.mrf.mxu0 }
 0x912   : > { %v1402_v34 = vadd.f32 %v1396_v33, %v1257_v31 }
 0x914   : > { %v1405_v55 = vadd.f32 %v1402_v34, %v6231_v43 }
 0x916   : > { %v6466_v35 = vadd.f32 %v5564_v13, %v1405_v55 }
 0x918   : > { %v1419_v37 = vsel %vm569_vm0, %v6466_v35, 0.0 }
 0x919   : > { %1420 = vadd.xlane.f32.xlu0 %v1419_v37  ;;  %v1398_v36 = vpop.f32.mrf.mxu0 }
 0x959   : > { %v1415_v38 = vpop.xlane.xlu2 %1414 }
 0x95a   : > { %v1422_v40 = vmul.f32 %v1415_v38, %v6206_v48 }
 0x95c   : > { %v1425_v44 = vsub.f32 %v6455_v20, %v1422_v40 }
 0x95e   : > { %v1428_v45 = vmul.f32 %v1425_v44, %v1425_v44 }
 0x960   : > { %v1431_v47 = vsel %vm569_vm0, %v1428_v45, 0.0 }
 0x961   : > { %1432 = vadd.xlane.f32.xlu1 %v1431_v47  ;;  %v1418_v46 = vpop.xlane.xlu1 %1417  ;;  %v5458_v47 = vld [vmem:[%s7554_s8 + $0x38] sm:$0xff] }
 0x962   : > { %v1423_v39 = vmul.f32 %v1418_v46, %v6206_v48  ;;  %1662 = vmatpush.bf16.msra.mxu1 %v5458_v47  ;;  %v5457_v46 = vld [vmem:[%s7554_s8 + $0x30] sm:$0xff] }
 0x964   : > { %v1426_v43 = vsub.f32 %v6460_v29, %v1423_v39  ;;  %v5456_v39 = vld [vmem:[%s7554_s8 + $0x28] sm:$0xff] }
 0x966   : > { %v1429_v49 = vmul.f32 %v1426_v43, %v1426_v43  ;;  %1663 = vmatpush.bf16.msra.mxu1 %v5457_v46 }
 0x968   : > { %v1434_v50 = vsel %vm569_vm0, %v1429_v49, 0.0  ;;  %v5454_v49 = vld [vmem:[%s7554_s8 + $0x18] sm:$0xff] }
 0x969   : > { %1435 = vadd.xlane.f32.xlu2 %v1434_v50  ;;  %v5567_v50 = vld [vmem:[%s7548_s2 + $0x7] ss:$0 sm:$0xff] }
 0x96a   : > { %1664 = vmatpush.bf16.msra.mxu1 %v5456_v39 }
 0x98c   : > { %v1421_v53 = vpop.xlane.xlu0 %1420 }
 0x98d   : > { %v1424_v54 = vmul.f32 %v1421_v53, %v6206_v48 }
 0x98f   : > { %v1427_v56 = vsub.f32 %v6466_v35, %v1424_v54  ;;  %v5453_v54 = vld [vmem:[%s7554_s8 + $0x10] sm:$0xff] }
 0x991   : > { %v1430_v57 = vmul.f32 %v1427_v56, %v1427_v56 }
 0x993   : > { %v1437_v59 = vsel %vm569_vm0, %v1430_v57, 0.0 }
 0x994   : > { %1438 = vadd.xlane.f32.xlu0 %v1437_v59  ;;  %v5452_v59 = vld [vmem:[%s7554_s8 + $0x8] sm:$0xff] }
 0x9d4   : > { %v1433_v61 = vpop.xlane.xlu1 %1432 }
 0x9d5   : > { %v1440_v62 = vmul.f32 %v1433_v61, %v6206_v48 }
 0x9d7   : > { %v1443_v1 = vadd.f32 1e-05, %v1440_v62  ;;  %v5451_v62 = vld [vmem:[%s7554_s8] sm:$0xff] }
 0x9d9   : > { %5657 = vrsqrt.f32 %v1443_v1  ;;  %vm1452_vm14 = vweird.f32 %v1443_v1 }
 0x9dc   : > { %v1436_v58 = vpop.xlane.xlu2 %1435 }
 0x9dd   : > { %v1441_v51 = vmul.f32 %v1436_v58, %v6206_v48 }
 0x9df   : > { %v5658_v4 = vpop.eup %5657  ;;  %v1444_v5 = vadd.f32 1e-05, %v1441_v51 }
 0x9e0   : > { %v1447_v6 = vmul.f32 %v5658_v4, %v1443_v1  ;;  %vm1453_vm13 = vweird.f32 %v5658_v4 }
 0x9e1   : > { %5659 = vrsqrt.f32 %v1444_v5  ;;  %vm1454_vm15 = vmor %vm1452_vm14, %vm1453_vm13  ;;  %vm1462_vm3 = vweird.f32 %v1444_v5 }
 0x9e2   : > { %v1448_v7 = vmul.f32 %v5658_v4, %v1447_v6 }
 0x9e4   : > { %v1449_v9 = vmul.f32 0.5, %v1448_v7 }
 0x9e6   : > { %v1450_v8 = vsub.f32 1.5, %v1449_v9 }
 0x9e7   : > { %v5660_v10 = vpop.eup %5659 }
 0x9e8   : > { %v1451_v11 = vmul.f32 %v5658_v4, %v1450_v8  ;;  %v1457_v12 = vmul.f32 %v5660_v10, %v1444_v5  ;;  %vm1463_vm1 = vweird.f32 %v5660_v10 }
 0x9e9   : > { %vm1464_vm4 = vmor %vm1462_vm3, %vm1463_vm1 }
 0x9ea   : > { %v1458_v14 = vmul.f32 %v5660_v10, %v1457_v12  ;;  %v1455_v15 = vsel %vm1454_vm15, %v5658_v4, %v1451_v11 }
 0x9eb   : > { %v1476_v19 = vmul.f32 %v1455_v15, %v1425_v44 }
 0x9ec   : > { %v1459_v52 = vmul.f32 0.5, %v1458_v14 }
 0x9ed   : > { %v1480_v22 = vmul.f32 %v5565_v17, %v1476_v19 }
 0x9ee   : > { %v1460_v16 = vsub.f32 1.5, %v1459_v52 }
 0x9ef   : > { %v1484_v41 = vadd.f32 %v5566_v24, %v1480_v22 }
 0x9f0   : > { %v1461_v13 = vmul.f32 %v5660_v10, %v1460_v16 }
 0x9f2   : > { %v1465_v21 = vsel %vm1464_vm4, %v5660_v10, %v1461_v13 }
 0x9f3   : > { %v1477_v23 = vmul.f32 %v1465_v21, %v1426_v43  ;;  %v5455_v43 = vld [vmem:[%s7554_s8 + $0x20] sm:$0xff] }
 0x9f4   : > { %1665 = vmatpush.bf16.msra.mxu1 %v5455_v43 }
 0x9f5   : > { %v1481_v25 = vmul.f32 %v5565_v17, %v1477_v23 }
 0x9f7   : > { %v1485_v27 = vadd.f32 %v5566_v24, %v1481_v25 }
 0x9f8   : > { %1666 = vmatpush.bf16.msra.mxu1 %v5454_v49 }
 0x9f9   : > { %v1492_v28 = vpack.c.bf16 %v1485_v27, %v1484_v41 }
 0x9fb   : > { %5036 = vmatmul.msk.bf16.vlgmr.msra.gmra.mxu2 %vm569_vm0, %v1492_v28 }
 0x9fc   : > { %1667 = vmatpush.bf16.msra.mxu1 %v5453_v54  ;;  %v5568_v54 = vld [vmem:[%s7548_s2 + $0x5] ss:$0 sm:$0xff] }
 0xa00   : > { %1668 = vmatpush.bf16.msra.mxu1 %v5452_v59 }
 0xa04   : > { %1669 = vmatpush.bf16.msra.mxu1 %v5451_v62 }
 0xa07   : > { %v1439_v30 = vpop.xlane.xlu0 %1438 }
 0xa08   : > { %v1442_v18 = vmul.f32 %v1439_v30, %v6206_v48 }
 0xa0a   : > { %v1445_v42 = vadd.f32 1e-05, %v1442_v18 }
 0xa0c   : > { %5661 = vrsqrt.f32 %v1445_v42  ;;  %vm1472_vm6 = vweird.f32 %v1445_v42 }
 0xa12   : > { %v5662_v31 = vpop.eup %5661 }
 0xa13   : > { %v1467_v32 = vmul.f32 %v5662_v31, %v1445_v42  ;;  %vm1473_vm5 = vweird.f32 %v5662_v31 }
 0xa14   : > { %vm1474_vm7 = vmor %vm1472_vm6, %vm1473_vm5 }
 0xa15   : > { %v1468_v33 = vmul.f32 %v5662_v31, %v1467_v32 }
 0xa17   : > { %v1469_v34 = vmul.f32 0.5, %v1468_v33 }
 0xa19   : > { %v1470_v55 = vsub.f32 1.5, %v1469_v34 }
 0xa1b   : > { %v1471_v37 = vmul.f32 %v5662_v31, %v1470_v55 }
 0xa1d   : > { %v1475_v36 = vsel %vm1474_vm7, %v5662_v31, %v1471_v37 }
 0xa1e   : > { %v1478_v38 = vmul.f32 %v1475_v36, %v1427_v56 }
 0xa20   : > { %v1482_v40 = vmul.f32 %v5565_v17, %v1478_v38 }
 0xa22   : > { %v1486_v44 = vadd.f32 %v5566_v24, %v1482_v40 }
 0xa24   : > { %v1493_v45 = vpack.c.bf16 %v1486_v44, %v1486_v44 }
 0xa26   : > { %5037 = vmatmul.msk.bf16.gmra.mxu2 %vm569_vm0, %v1493_v45 }
 0xa7e   : > { %v1522_v53 = vpop.f32.mrf.mxu2 }
 0xa7f   : > { %v1523_v56 = vadd.f32 %v5567_v50, %v1522_v53 }
 0xa81   : > { %v5038_v57 = vmul.f32 -1.702, %v1523_v56 }
 0xa83   : > { %v1537_v60 = vmul.f32 1.442695, %v5038_v57 }
 0xa85   : > { %5663 = vpow2.f32 %v1537_v60 }
 0xa86   : > { %v1524_v61 = vpop.f32.mrf.mxu2 }
 0xa87   : > { %v1525_v63 = vadd.f32 %v5567_v50, %v1524_v61 }
 0xa89   : > { %v5039_v1 = vmul.f32 -1.702, %v1525_v63 }
 0xa8b   : > { %v5664_v58 = vpop.eup %5663  ;;  %v1539_v51 = vmul.f32 1.442695, %v5039_v1 }
 0xa8c   : > { %v1543_v4 = vadd.f32 1.0, %v5664_v58 }
 0xa8d   : > { %5665 = vpow2.f32 %v1539_v51 }
 0xa8e   : > { %5667 = vrcp.f32 %v1543_v4  ;;  %v1557_v15 = vand.u32 2147483648, %v1543_v4  ;;  %vm1551_vm11 = vweird.f32 %v1543_v4  ;;  %v1555_v52 = vand.u32 2147483647, %v1543_v4 }
 0xa90   : > { %v1558_v22 = vor.u32 1.1754944e-38, %v1557_v15  ;;  %vm1556_vm15 = vcmp.eq.f32.partialorder %v1555_v52, 8.507059e+37 }
 0xa93   : > { %v5666_v5 = vpop.eup %5665 }
 0xa94   : > { %v5668_v6 = vpop.eup %5667  ;;  %v1544_v7 = vadd.f32 1.0, %v5666_v5 }
 0xa95   : > { %v1547_v9 = vmul.f32 %v5668_v6, %v1543_v4  ;;  %vm1552_vm9 = vweird.f32 %v5668_v6 }
 0xa96   : > { %5669 = vrcp.f32 %v1544_v7  ;;  %vm1553_vm13 = vmor %vm1551_vm11, %vm1552_vm9  ;;  %v1572_v17 = vand.u32 2147483648, %v1544_v7  ;;  %v1570_v21 = vand.u32 2147483647, %v1544_v7  ;;  %vm1566_vm1 = vweird.f32 %v1544_v7 }
 0xa97   : > { %v1548_v8 = vsub.f32 1.0, %v1547_v9 }
 0xa98   : > { %v1573_v25 = vor.u32 1.1754944e-38, %v1572_v17  ;;  %vm1571_vm4 = vcmp.eq.f32.partialorder %v1570_v21, 8.507059e+37 }
 0xa99   : > { %v1549_v10 = vmul.f32 %v5668_v6, %v1548_v8 }
 0xa9b   : > { %v1550_v12 = vadd.f32 %v5668_v6, %v1549_v10 }
 0xa9c   : > { %v5670_v11 = vpop.eup %5669 }
 0xa9d   : > { %v1562_v14 = vmul.f32 %v5670_v11, %v1544_v7  ;;  %v1554_v19 = vsel %vm1553_vm13, %v5668_v6, %v1550_v12  ;;  %vm1567_vm14 = vweird.f32 %v5670_v11 }
 0xa9e   : > { %v1559_v24 = vsel %vm1556_vm15, %v1558_v22, %v1554_v19  ;;  %vm1568_vm3 = vmor %vm1566_vm1, %vm1567_vm14 }
 0xa9f   : > { %v1563_v16 = vsub.f32 1.0, %v1562_v14  ;;  %v1591_v28 = vmul.f32 %v1559_v24, %v1523_v56 }
 0xaa1   : > { %v1564_v13 = vmul.f32 %v5670_v11, %v1563_v16 }
 0xaa3   : > { %v1565_v23 = vadd.f32 %v5670_v11, %v1564_v13  ;;  %v5460_v13 = vld [vmem:[%s7551_s5 + $0x18] sm:$0xff] }
 0xaa4   : > { %1794 = vmatpush.bf16.msra.mxu3 %v5460_v13 }
 0xaa5   : > { %v1569_v41 = vsel %vm1568_vm3, %v5670_v11, %v1565_v23  ;;  %v5459_v23 = vld [vmem:[%s7551_s5 + $0x10] sm:$0xff] }
 0xaa6   : > { %v1574_v27 = vsel %vm1571_vm4, %v1573_v25, %v1569_v41 }
 0xaa7   : > { %v1592_v30 = vmul.f32 %v1574_v27, %v1525_v63 }
 0xaa8   : > { %1795 = vmatpush.bf16.msra.mxu3 %v5459_v23 }
 0xaa9   : > { %v1611_v18 = vpack.c.bf16 %v1592_v30, %v1591_v28  ;;  %v1527_v42 = vpop.f32.mrf.mxu2 }
 0xaaa   : > { %v1528_v31 = vadd.f32 %v5567_v50, %v1527_v42 }
 0xaab   : > { %1670 = vmatmul.bf16.vlgmr.msra.gmra.mxu1 %v1611_v18 }
 0xaac   : > { %v5040_v32 = vmul.f32 -1.702, %v1528_v31 }
 0xaae   : > { %v1541_v33 = vmul.f32 1.442695, %v5040_v32 }
 0xab0   : > { %5671 = vpow2.f32 %v1541_v33 }
 0xab1   : > { %v1529_v34 = vpop.f32.mrf.mxu2 }
 0xab6   : > { %v5672_v55 = vpop.eup %5671 }
 0xab7   : > { %v1545_v37 = vadd.f32 1.0, %v5672_v55 }
 0xab9   : > { %5673 = vrcp.f32 %v1545_v37  ;;  %v1587_v44 = vand.u32 2147483648, %v1545_v37  ;;  %v1585_v47 = vand.u32 2147483647, %v1545_v37  ;;  %vm1581_vm6 = vweird.f32 %v1545_v37 }
 0xabb   : > { %v1588_v39 = vor.u32 1.1754944e-38, %v1587_v44  ;;  %vm1586_vm9 = vcmp.eq.f32.partialorder %v1585_v47, 8.507059e+37 }
 0xabf   : > { %v5674_v36 = vpop.eup %5673 }
 0xac0   : > { %v1577_v38 = vmul.f32 %v5674_v36, %v1545_v37  ;;  %vm1582_vm5 = vweird.f32 %v5674_v36 }
 0xac1   : > { %vm1583_vm7 = vmor %vm1581_vm6, %vm1582_vm5 }
 0xac2   : > { %v1578_v40 = vsub.f32 1.0, %v1577_v38 }
 0xac4   : > { %v1579_v45 = vmul.f32 %v5674_v36, %v1578_v40  ;;  %v5569_v40 = vld [vmem:[%s7548_s2 + $0x8] ss:$0 sm:$0xff] }
 0xac6   : > { %v1580_v46 = vadd.f32 %v5674_v36, %v1579_v45 }
 0xac8   : > { %v1584_v43 = vsel %vm1583_vm7, %v5674_v36, %v1580_v46  ;;  %v5570_v46 = vld [vmem:[%s7548_s2 + $0x9] ss:$0 sm:$0xff] }
 0xac9   : > { %v1589_v49 = vsel %vm1586_vm9, %v1588_v39, %v1584_v43 }
 0xaca   : > { %v1593_v50 = vmul.f32 %v1589_v49, %v1528_v31 }
 0xacc   : > { %v1612_v53 = vpack.c.bf16 %v1593_v50, %v1593_v50 }
 0xace   : > { %1675 = vmatmul.bf16.gmra.mxu1 %v1612_v53 }
 0xb28   : > { %v1671_v56 = vpop.f32.mrf.mxu1 }
 0xb29   : > { %v1672_v57 = vadd.f32 %v5568_v54, %v1671_v56 }
 0xb2b   : > { %v1680_v59 = vadd.f32 %v1672_v57, %v6455_v20 }
 0xb2d   : > { %v6529_v60 = vsel %vm616_vm2, %v6183_v26, %v1680_v59 }
 0xb2e   : > { %v1687_v61 = vsel %vm569_vm0, %v6529_v60, 0.0 }
 0xb2f   : > { %1688 = vadd.xlane.f32.xlu1 %v1687_v61 }
 0xb30   : > { %v1673_v62 = vpop.f32.mrf.mxu1 }
 0xb31   : > { %v1674_v63 = vadd.f32 %v5568_v54, %v1673_v62 }
 0xb33   : > { %v6534_v1 = vadd.f32 %v1674_v63, %v6460_v29 }
 0xb35   : > { %v1690_v58 = vsel %vm569_vm0, %v6534_v1, 0.0 }
 0xb36   : > { %1691 = vadd.xlane.f32.xlu2 %v1690_v58 }
 0xb4b   : > { %v1676_v51 = vpop.f32.mrf.mxu1 }
 0xb4c   : > { %v1677_v4 = vadd.f32 %v5568_v54, %v1676_v51 }
 0xb4e   : > { %v6539_v20 = vadd.f32 %v1677_v4, %v6466_v35 }
 0xb50   : > { %v1693_v26 = vsel %vm569_vm0, %v6539_v20, 0.0 }
 0xb51   : > { %1694 = vadd.xlane.f32.xlu0 %v1693_v26 }
 0xb53   : > { %v1678_v5 = vpop.f32.mrf.mxu1 }
 0xba2   : > { %v1689_v6 = vpop.xlane.xlu1 %1688 }
 0xba3   : > { %v1696_v7 = vmul.f32 %v1689_v6, %v6206_v48 }
 0xba5   : > { %v1699_v29 = vsub.f32 %v6529_v60, %v1696_v7 }
 0xba7   : > { %v1702_v9 = vmul.f32 %v1699_v29, %v1699_v29 }
 0xba9   : > { %v1692_v8 = vpop.xlane.xlu2 %1691  ;;  %v1705_v10 = vsel %vm569_vm0, %v1702_v9, 0.0 }
 0xbaa   : > { %v1697_v11 = vmul.f32 %v1692_v8, %v6206_v48  ;;  %1706 = vadd.xlane.f32.xlu1 %v1705_v10  ;;  %v5571_v8 = vld [vmem:[%s7548_s2 + $0xe] ss:$0 sm:$0xff] }
 0xbac   : > { %v1700_v35 = vsub.f32 %v6534_v1, %v1697_v11 }
 0xbae   : > { %v1703_v12 = vmul.f32 %v1700_v35, %v1700_v35 }
 0xbb0   : > { %v1708_v14 = vsel %vm569_vm0, %v1703_v12, 0.0 }
 0xbb1   : > { %1709 = vadd.xlane.f32.xlu2 %v1708_v14 }
 0xbc4   : > { %v1695_v15 = vpop.xlane.xlu0 %1694 }
 0xbc5   : > { %v1698_v52 = vmul.f32 %v1695_v15, %v6206_v48 }
 0xbc7   : > { %v1701_v16 = vsub.f32 %v6539_v20, %v1698_v52 }
 0xbc9   : > { %v1704_v17 = vmul.f32 %v1701_v16, %v1701_v16 }
 0xbcb   : > { %v1711_v19 = vsel %vm569_vm0, %v1704_v17, 0.0 }
 0xbcc   : > { %1712 = vadd.xlane.f32.xlu0 %v1711_v19 }
 0xc1d   : > { %v1707_v21 = vpop.xlane.xlu1 %1706 }
 0xc1e   : > { %v1714_v22 = vmul.f32 %v1707_v21, %v6206_v48 }
 0xc20   : > { %v1717_v24 = vadd.f32 1e-05, %v1714_v22 }
 0xc22   : > { %5675 = vrsqrt.f32 %v1717_v24  ;;  %vm1726_vm13 = vweird.f32 %v1717_v24 }
 0xc24   : > { %v1710_v25 = vpop.xlane.xlu2 %1709 }
 0xc25   : > { %v1715_v41 = vmul.f32 %v1710_v25, %v6206_v48 }
 0xc27   : > { %v1718_v27 = vadd.f32 1e-05, %v1715_v41 }
 0xc28   : > { %v5676_v28 = vpop.eup %5675 }
 0xc29   : > { %v1721_v30 = vmul.f32 %v5676_v28, %v1717_v24  ;;  %5677 = vrsqrt.f32 %v1718_v27  ;;  %vm1727_vm11 = vweird.f32 %v5676_v28  ;;  %vm1736_vm1 = vweird.f32 %v1718_v27 }
 0xc2a   : > { %vm1728_vm14 = vmor %vm1726_vm13, %vm1727_vm11 }
 0xc2b   : > { %v1722_v18 = vmul.f32 %v5676_v28, %v1721_v30 }
 0xc2d   : > { %v1723_v42 = vmul.f32 0.5, %v1722_v18 }
 0xc2f   : > { %v5678_v31 = vpop.eup %5677  ;;  %v1724_v32 = vsub.f32 1.5, %v1723_v42 }
 0xc30   : > { %v1731_v33 = vmul.f32 %v5678_v31, %v1718_v27  ;;  %vm1737_vm15 = vweird.f32 %v5678_v31 }
 0xc31   : > { %v1725_v34 = vmul.f32 %v5676_v28, %v1724_v32  ;;  %vm1738_vm3 = vmor %vm1736_vm1, %vm1737_vm15 }
 0xc32   : > { %v1732_v55 = vmul.f32 %v5678_v31, %v1731_v33 }
 0xc33   : > { %v1729_v37 = vsel %vm1728_vm14, %v5676_v28, %v1725_v34 }
 0xc34   : > { %v1733_v36 = vmul.f32 0.5, %v1732_v55  ;;  %v1750_v44 = vmul.f32 %v1729_v37, %v1699_v29 }
 0xc36   : > { %v1734_v38 = vsub.f32 1.5, %v1733_v36  ;;  %v1754_v39 = vmul.f32 %v5569_v40, %v1750_v44 }
 0xc38   : > { %v1735_v45 = vmul.f32 %v5678_v31, %v1734_v38  ;;  %v1758_v50 = vadd.f32 %v5570_v46, %v1754_v39 }
 0xc3a   : > { %v1739_v47 = vsel %vm1738_vm3, %v5678_v31, %v1735_v45 }
 0xc3b   : > { %v1751_v43 = vmul.f32 %v1739_v47, %v1700_v35 }
 0xc3d   : > { %v1755_v49 = vmul.f32 %v5569_v40, %v1751_v43 }
 0xc3f   : > { %v1713_v53 = vpop.xlane.xlu0 %1712  ;;  %v1759_v54 = vadd.f32 %v5570_v46, %v1755_v49 }
 0xc40   : > { %v1716_v56 = vmul.f32 %v1713_v53, %v6206_v48 }
 0xc41   : > { %v1767_v57 = vpack.c.bf16 %v1759_v54, %v1758_v50 }
 0xc42   : > { %v1719_v59 = vadd.f32 1e-05, %v1716_v56 }
 0xc43   : > { %5088 = vmatmul.msk.bf16.vlgmr.msra.gmra.mxu3 %vm569_vm0, %v1767_v57 }
 0xc44   : > { %5679 = vrsqrt.f32 %v1719_v59  ;;  %vm1746_vm5 = vweird.f32 %v1719_v59 }
 0xc4a   : > { %v5680_v61 = vpop.eup %5679 }
 0xc4b   : > { %v1741_v62 = vmul.f32 %v5680_v61, %v1719_v59  ;;  %vm1747_vm4 = vweird.f32 %v5680_v61  ;;  %v5094_v59 = vld [vmem:[%s7552_s6 + $0x10] sm:$0xf] }
 0xc4c   : > { %vm1748_vm6 = vmor %vm1746_vm5, %vm1747_vm4 }
 0xc4d   : > { %v1742_v63 = vmul.f32 %v5680_v61, %v1741_v62 }
 0xc4f   : > { %v1743_v58 = vmul.f32 0.5, %v1742_v63 }
 0xc51   : > { %v1744_v51 = vsub.f32 1.5, %v1743_v58 }
 0xc53   : > { %v1745_v4 = vmul.f32 %v5680_v61, %v1744_v51 }
 0xc55   : > { %v1749_v26 = vsel %vm1748_vm6, %v5680_v61, %v1745_v4  ;;  %v2070_v61 = vsel %vm616_vm2, %v5094_v59, 0 }
 0xc56   : > { %v1752_v5 = vmul.f32 %v1749_v26, %v1701_v16 }
 0xc58   : > { %v1756_v6 = vmul.f32 %v5569_v40, %v1752_v5 }
 0xc5a   : > { %v1760_v7 = vadd.f32 %v5570_v46, %v1756_v6 }
 0xc5c   : > { %v1768_v29 = vpack.c.bf16 %v1760_v7, %v1760_v7 }
 0xc5e   : > { %5089 = vmatmul.msk.bf16.gmra.mxu3 %vm569_vm0, %v1768_v29 }
 0xcc6   : > { %v1797_v9 = vpop.f32.mrf.mxu3 }
 0xcc7   : > { %v1798_v11 = vadd.f32 %v5571_v8, %v1797_v9 }
 0xcce   : > { %v1799_v10 = vpop.f32.mrf.mxu3 }
 0xccf   : > { %v1800_v35 = vadd.f32 %v5571_v8, %v1799_v10 }
 0xcd1   : > { %v6572_v12 = vpack.c.bf16 %v1800_v35, %v1798_v11 }
 0xcd3   : > { %1810 = vrot.lane.b32.xlu2 %v6572_v12, %s7616_s26 }
 0xce1   : > { %v1802_v14 = vpop.f32.mrf.mxu3 }
 0xce2   : > { %v1803_v15 = vadd.f32 %v5571_v8, %v1802_v14 }
 0xce4   : > { %v6576_v52 = vpack.c.bf16 %v1803_v15, %v1803_v15 }
 0xce6   : > { %1812 = vrot.lane.b32.xlu1 %v6576_v52, %s7616_s26 }
 0xce9   : > { %v1804_v16 = vpop.f32.mrf.mxu3 }
 0xd2d   : > { %v1811_v13 = vpop.permute.xlu2 %1810 }
 0xd2e   : > { %v1821_v21 = vsel %vm836_vm8, %v1811_v13, 0 }
 0xd58   : > { %v1813_v17 = vpop.permute.xlu1 %1812 }
 0xd59   : > { %v1824_v19 = vsel %vm836_vm8, %v1813_v17, 0 }
 0xd5a   : > { %1832 = vmatpush.bf16.xpose.msra.mxu0 %v1824_v19 }
 0xd62   : > { %1833 = vmatpush.bf16.xpose.msra.mxu0 %v1821_v21 }
 0xd69   : > { %5090 = vmatmul.msk.bf16.vlgmr.msra.gmra.mxu0 %vm836_vm8, %v6572_v12 }
 0xd79   : > { %5091 = vmatmul.msk.bf16.gmra.mxu0 %vm836_vm8, %v6576_v52 }
 0xde6   : > { %v1835_v22 = vpop.f32.mrf.mxu0 }
 0xde7   : > { %v1844_v23 = vmul.f32 0.35355338, %v1835_v22 }
 0xde9   : > { %v1847_v24 = vadd.f32 %v1844_v23, %v6288_v3 }
 0xdeb   : > { %v1850_v25 = vsel %vm873_vm12, %v1847_v24, -inf }
 0xdec   : > { %1851 = vmax.xlane.f32.xlu0 %v1850_v25 }
 0xdee   : > { %v1837_v41 = vpop.f32.mrf.mxu0 }
 0xdef   : > { %v1845_v27 = vmul.f32 0.35355338, %v1837_v41 }
 0xdf1   : > { %v1848_v28 = vadd.f32 %v1845_v27, %v6288_v3 }
 0xdf3   : > { %v1853_v30 = vsel %vm873_vm12, %v1848_v28, -inf }
 0xdf4   : > { %1854 = vmax.xlane.f32.xlu0 %v1853_v30 }
 0xdf6   : > { %v1840_v18 = vpop.f32.mrf.mxu0 }
 0xdf7   : > { %v1846_v42 = vmul.f32 0.35355338, %v1840_v18 }
 0xdf9   : > { %v1849_v31 = vadd.f32 %v1846_v42, %v6288_v3 }
 0xdfb   : > { %v1856_v32 = vsel %vm873_vm12, %v1849_v31, -inf }
 0xdfc   : > { %1857 = vmax.xlane.f32.xlu0 %v1856_v32 }
 0xdfe   : > { %v1842_v33 = vpop.f32.mrf.mxu0 }
 0xe10   : > { %1887 = vrot.lane.b32.xlu0 %v6576_v52, %s7617_s18 }
 0xe18   : > { %1885 = vrot.lane.b32.xlu0 %v6572_v12, %s7617_s18 }
 0xe5f   : > { %v1852_v34 = vpop.xlane.xlu0 %1851 }
 0xe60   : > { %v1859_v55 = vsub.f32 %v1847_v24, %v1852_v34 }
 0xe62   : > { %v1862_v37 = vmul.f32 1.442695, %v1859_v55 }
 0xe64   : > { %5681 = vpow2.f32 %v1862_v37 }
 0xe67   : > { %v1855_v36 = vpop.xlane.xlu0 %1854 }
 0xe68   : > { %v1860_v38 = vsub.f32 %v1848_v28, %v1855_v36 }
 0xe6a   : > { %v5682_v40 = vpop.eup %5681  ;;  %v1864_v44 = vmul.f32 1.442695, %v1860_v38 }
 0xe6b   : > { %v1868_v45 = vsel %vm873_vm12, %v5682_v40, 0.0 }
 0xe6c   : > { %5683 = vpow2.f32 %v1864_v44  ;;  %1869 = vadd.xlane.f32.xlu1 %v1868_v45 }
 0xe6f   : > { %v1858_v47 = vpop.xlane.xlu0 %1857 }
 0xe70   : > { %v1861_v46 = vsub.f32 %v1849_v31, %v1858_v47 }
 0xe72   : > { %v5684_v39 = vpop.eup %5683  ;;  %v1866_v43 = vmul.f32 1.442695, %v1861_v46 }
 0xe73   : > { %v1871_v49 = vsel %vm873_vm12, %v5684_v39, 0.0 }
 0xe74   : > { %5685 = vpow2.f32 %v1866_v43  ;;  %1872 = vadd.xlane.f32.xlu2 %v1871_v49 }
 0xe7a   : > { %v5686_v50 = vpop.eup %5685 }
 0xe7b   : > { %v1874_v53 = vsel %vm873_vm12, %v5686_v50, 0.0 }
 0xe7c   : > { %1875 = vadd.xlane.f32.xlu0 %v1874_v53 }
 0xe82   : > { %v1888_v54 = vpop.permute.xlu0 %1887 }
 0xe83   : > { %v1897_v56 = vsel %vm616_vm2, %v1888_v54, 0 }
 0xe84   : > { %1905 = vmatpush.bf16.msrb.mxu2 %v1897_v56 }
 0xe85   : > { %1927 = vrot.lane.b32.xlu1 %v6576_v52, %s7618_s29 }
 0xe8a   : > { %v1886_v57 = vpop.permute.xlu0 %1885 }
 0xe8b   : > { %1906 = vmatpush.bf16.msrb.mxu2 %v1886_v57 }
 0xe8c   : > { %1925 = vrot.lane.b32.xlu2 %v6572_v12, %s7618_s29 }
 0xe8d   : > { %2241 = vrot.lane.b32.xlu1 %v6576_v52, %s7619_s23 }
 0xe8f   : > { %2079 = vmatpush.bf16.msra.mxu2 %v2070_v61 }
 0xe90   : > { %2239 = vrot.lane.b32.xlu0 %v6572_v12, %s7619_s23 }
 0xe94   : > { %1921 = vrot.lane.b32.xlu2 %v6572_v12, %s7620_s30 }
 0xe95   : > { %2096 = vrot.lane.b32.xlu1 %v6576_v52, %s7621_s16 }
 0xe98   : > { %2092 = vrot.lane.b32.xlu0 %v6576_v52, %s7622_s0 }
 0xe9c   : > { %1923 = vrot.lane.b32.xlu2 %v6576_v52, %s7620_s30 }
 0xe9d   : > { %2235 = vrot.lane.b32.xlu1 %v6572_v12, %s7623_s20 }
 0xea4   : > { %2094 = vrot.lane.b32.xlu2 %v6572_v12, %s7621_s16 }
 0xea5   : > { %2237 = vrot.lane.b32.xlu1 %v6576_v52, %s7623_s20 }
 0xeac   : > { %2090 = vrot.lane.b32.xlu2 %v6572_v12, %s7622_s0 }
 0xedf   : > { %v1870_v62 = vpop.xlane.xlu1 %1869 }
 0xee0   : > { %5687 = vrcp.f32 %v1870_v62 }
 0xee6   : > { %v5688_v58 = vpop.eup %5687 }
 0xee7   : > { %v1873_v63 = vpop.xlane.xlu2 %1872  ;;  %v1880_v4 = vmul.f32 %v5688_v58, %v5682_v40 }
 0xee8   : > { %5689 = vrcp.f32 %v1873_v63 }
 0xeee   : > { %v5690_v51 = vpop.eup %5689 }
 0xeef   : > { %v1881_v26 = vmul.f32 %v5690_v51, %v5684_v39  ;;  %v1926_v5 = vpop.permute.xlu2 %1925  ;;  %v1876_v7 = vpop.xlane.xlu0 %1875 }
 0xef0   : > { %5691 = vrcp.f32 %v1876_v7  ;;  %v1936_v15 = vsel %vm836_vm8, %v1926_v5, 0 }
 0xef1   : > { %v1883_v6 = vpack.c.bf16 %v1881_v26, %v1880_v4 }
 0xef3   : > { %5092 = vmatmul.msk.bf16.vlgmr.msrb.gmra.mxu2 %vm873_vm12, %v1883_v6 }
 0xef6   : > { %v5692_v10 = vpop.eup %5691 }
 0xef7   : > { %v1928_v29 = vpop.permute.xlu1 %1927  ;;  %v1922_v8 = vpop.permute.xlu2 %1921  ;;  %v1882_v11 = vmul.f32 %v5692_v10, %v5686_v50 }
 0xef8   : > { %v1939_v9 = vsel %vm836_vm8, %v1928_v29, 0 }
 0xef9   : > { %1947 = vmatpush.bf16.xpose.msrb.mxu1 %v1939_v9  ;;  %v1884_v16 = vpack.c.bf16 %v1882_v11, %v1882_v11 }
 0xeff   : > { %v2242_v35 = vpop.permute.xlu1 %2241  ;;  %v1924_v17 = vpop.permute.xlu2 %1923 }
 0xf00   : > { %v2253_v14 = vsel %vm836_vm8, %v2242_v35, 0 }
 0xf01   : > { %1948 = vmatpush.bf16.xpose.msrb.mxu1 %v1936_v15  ;;  %2261 = vmatpush.bf16.xpose.msrb.mxu2 %v2253_v14 }
 0xf02   : > { %v2240_v19 = vpop.permute.xlu0 %2239 }
 0xf03   : > { %5093 = vmatmul.msk.bf16.gmra.mxu2 %vm873_vm12, %v1884_v16  ;;  %v2250_v22 = vsel %vm836_vm8, %v2240_v19, 0 }
 0xf07   : > { %v2097_v13 = vpop.permute.xlu1 %2096  ;;  %v2095_v23 = vpop.permute.xlu2 %2094 }
 0xf08   : > { %v2108_v21 = vsel %vm836_vm8, %v2097_v13, 0  ;;  %5095 = vmatmul.msk.bf16.vlgmr.msrb.gmra.mxu1 %vm836_vm8, %v1922_v8  ;;  %v2105_v24 = vsel %vm836_vm8, %v2095_v23, 0 }
 0xf09   : > { %2116 = vmatpush.bf16.xpose.msra.mxu1 %v2108_v21  ;;  %2262 = vmatpush.bf16.xpose.msrb.mxu2 %v2250_v22 }
 0xf0a   : > { %v2093_v41 = vpop.permute.xlu0 %2092 }
 0xf0f   : > { %v2091_v25 = vpop.permute.xlu2 %2090  ;;  %v2236_v43 = vpop.permute.xlu1 %2235 }
 0xf11   : > { %2117 = vmatpush.bf16.xpose.msra.mxu1 %v2105_v24 }
 0xf17   : > { %v2238_v59 = vpop.permute.xlu1 %2237 }
 0xf18   : > { %5096 = vmatmul.msk.bf16.gmra.mxu1 %vm836_vm8, %v1924_v17 }
 0xf28   : > { %5104 = vmatmul.msk.bf16.vlgmr.msra.gmra.mxu1 %vm836_vm8, %v2091_v25 }
 0xf38   : > { %5105 = vmatmul.msk.bf16.gmra.mxu1 %vm836_vm8, %v2093_v41 }
 0xf76   : > { %v1908_v27 = vpop.f32.mrf.mxu2 }
 0xf7e   : > { %v1910_v28 = vpop.f32.mrf.mxu2 }
 0xf7f   : > { %v1917_v30 = vpack.c.bf16 %v1910_v28, %v1908_v27 }
 0xf81   : > { %5102 = vmatmul.msk.bf16.vlgmr.msra.gmra.mxu2 %vm836_vm8, %v1917_v30 }
 0xf85   : > { %v1950_v18 = vpop.f32.mrf.mxu1 }
 0xf86   : > { %v1959_v42 = vmul.f32 0.35355338, %v1950_v18  ;;  %v1913_v31 = vpop.f32.mrf.mxu2 }
 0xf87   : > { %v1918_v36 = vpack.c.bf16 %v1913_v31, %v1913_v31 }
 0xf88   : > { %v1962_v32 = vadd.f32 %v1959_v42, %v6288_v3 }
 0xf8a   : > { %v1965_v33 = vsel %vm873_vm12, %v1962_v32, -inf }
 0xf8b   : > { %1966 = vmax.xlane.f32.xlu2 %v1965_v33 }
 0xf8d   : > { %v1952_v34 = vpop.f32.mrf.mxu1 }
 0xf8e   : > { %v1960_v55 = vmul.f32 0.35355338, %v1952_v34  ;;  %v1915_v37 = vpop.f32.mrf.mxu2 }
 0xf90   : > { %v1963_v38 = vadd.f32 %v1960_v55, %v6288_v3 }
 0xf91   : > { %5103 = vmatmul.msk.bf16.gmra.mxu2 %vm836_vm8, %v1918_v36 }
 0xf92   : > { %v1968_v40 = vsel %vm873_vm12, %v1963_v38, -inf }
 0xf93   : > { %1969 = vmax.xlane.f32.xlu1 %v1968_v40 }
 0xf95   : > { %v1955_v44 = vpop.f32.mrf.mxu1 }
 0xf96   : > { %v1961_v45 = vmul.f32 0.35355338, %v1955_v44 }
 0xf98   : > { %v1964_v47 = vadd.f32 %v1961_v45, %v6288_v3 }
 0xf9a   : > { %v1971_v46 = vsel %vm873_vm12, %v1964_v47, -inf }
 0xf9b   : > { %1972 = vmax.xlane.f32.xlu0 %v1971_v46 }
 0xf9d   : > { %v1957_v39 = vpop.f32.mrf.mxu1 }
 0xfa1   : > { %5111 = vmatmul.msk.bf16.vlgmr.msrb.gmra.mxu2 %vm836_vm8, %v2236_v43 }
 0xfa5   : > { %v2119_v49 = vpop.f32.mrf.mxu1 }
 0xfa6   : > { %v2128_v50 = vmul.f32 0.35355338, %v2119_v49 }
 0xfa8   : > { %v6650_v53 = vadd.f32 %v2128_v50, %v6288_v3 }
 0xfaa   : > { %v2134_v54 = vsel %vm873_vm12, %v6650_v53, -inf }
 0xfab   : > { %2135 = vmax.xlane.f32.xlu2 %v2134_v54 }
 0xfad   : > { %v2121_v56 = vpop.f32.mrf.mxu1 }
 0xfae   : > { %v2129_v57 = vmul.f32 0.35355338, %v2121_v56 }
 0xfb0   : > { %v2132_v61 = vadd.f32 %v2129_v57, %v6288_v3 }
 0xfb1   : > { %5112 = vmatmul.msk.bf16.gmra.mxu2 %vm836_vm8, %v2238_v59 }
 0xfb2   : > { %v2137_v62 = vsel %vm873_vm12, %v2132_v61, -inf }
 0xfb3   : > { %2138 = vmax.xlane.f32.xlu1 %v2137_v62 }
 0xfb5   : > { %v2124_v63 = vpop.f32.mrf.mxu1 }
 0xfb6   : > { %v2130_v28 = vmul.f32 0.35355338, %v2124_v63 }
 0xfb8   : > { %v6682_v31 = vadd.f32 %v2130_v28, %v6288_v3 }
 0xfba   : > { %v2140_v33 = vsel %vm873_vm12, %v6682_v31, -inf }
 0xfbd   : > { %v2126_v58 = vpop.f32.mrf.mxu1 }
 0xffe   : > { %v1967_v51 = vpop.xlane.xlu2 %1966 }
 0xfff   : > { %v1974_v4 = vsub.f32 %v1962_v32, %v1967_v51 }
0x1001   : > { %v1977_v26 = vmul.f32 1.442695, %v1974_v4 }
0x1003   : > { %5693 = vpow2.f32 %v1977_v26 }
0x1004   : > { %v6657_v5 = vpop.f32.mrf.mxu2 }
0x1006   : > { %v1970_v6 = vpop.xlane.xlu1 %1969 }
0x1007   : > { %v1975_v7 = vsub.f32 %v1963_v38, %v1970_v6 }
0x1009   : > { %v6659_v29 = vpop.eup %5693  ;;  %v1979_v9 = vmul.f32 1.442695, %v1975_v7 }
0x100a   : > { %v1983_v8 = vsel %vm873_vm12, %v6659_v29, 0.0 }
0x100b   : > { %5695 = vpow2.f32 %v1979_v9  ;;  %1984 = vadd.xlane.f32.xlu1 %v1983_v8 }
0x100c   : > { %v6663_v10 = vpop.f32.mrf.mxu2 }
0x100e   : > { %v1973_v16 = vpop.xlane.xlu0 %1972 }
0x100f   : > { %v1976_v17 = vsub.f32 %v1964_v47, %v1973_v16 }
0x1011   : > { %v6665_v11 = vpop.eup %5695  ;;  %v1981_v19 = vmul.f32 1.442695, %v1976_v17 }
0x1012   : > { %v1986_v35 = vsel %vm873_vm12, %v6665_v11, 0.0 }
0x1013   : > { %1987 = vadd.xlane.f32.xlu0 %v1986_v35  ;;  %5697 = vpow2.f32 %v1981_v19 }
0x1014   : > { %v6669_v14 = vpop.f32.mrf.mxu2 }
0x1019   : > { %v6675_v41 = vpop.eup %5697 }
0x101a   : > { %v1989_v18 = vsel %vm873_vm12, %v6675_v41, 0.0 }
0x101c   : > { %v2088_v15 = vpop.f32.mrf.mxu2 }
0x101e   : > { %v2136_v40 = vpop.xlane.xlu2 %2135 }
0x101f   : > { %v2143_v44 = vsub.f32 %v6650_v53, %v2136_v40 }
0x1021   : > { %v2146_v45 = vmul.f32 1.442695, %v2143_v44 }
0x1024   : > { %2000 = vrot.lane.b32.xlu1 %v6572_v12, %s7624_s19  ;;  %v2264_v13 = vpop.f32.mrf.mxu2 }
0x1025   : > { %v2273_v21 = vmul.f32 0.35355338, %v2264_v13 }
0x1026   : > { %v2139_v32 = vpop.xlane.xlu1 %2138 }
0x1027   : > { %v2276_v22 = vadd.f32 %v2273_v21, %v6288_v3  ;;  %v2144_v34 = vsub.f32 %v2132_v61, %v2139_v32 }
0x1029   : > { %v2279_v23 = vsel %vm873_vm12, %v2276_v22, -inf  ;;  %v2148_v37 = vmul.f32 1.442695, %v2144_v34  ;;  %v5099_v34 = vld [vmem:[%s7552_s6 + $0x14] sm:$0xf] }
0x102a   : > { %2280 = vmax.xlane.f32.xlu0 %v2279_v23 }
0x102b   : > { %5699 = vpow2.f32 %v2148_v37 }
0x102c   : > { %v2266_v24 = vpop.f32.mrf.mxu2  ;;  %5701 = vpow2.f32 %v2146_v45 }
0x102d   : > { %v2274_v25 = vmul.f32 0.35355338, %v2266_v24 }
0x102f   : > { %v2277_v27 = vadd.f32 %v2274_v25, %v6288_v3 }
0x1031   : > { %v2282_v30 = vsel %vm873_vm12, %v2277_v27, -inf  ;;  %v6686_v36 = vpop.eup %5699 }
0x1032   : > { %2283 = vmax.xlane.f32.xlu2 %v2282_v30  ;;  %1990 = vadd.xlane.f32.xlu0 %v1989_v18  ;;  %v2155_v38 = vsel %vm873_vm12, %v6686_v36, 0.0  ;;  %v6697_v47 = vpop.eup %5701 }
0x1033   : > { %v2152_v39 = vsel %vm873_vm12, %v6697_v47, 0.0 }
0x1034   : > { %v2269_v42 = vpop.f32.mrf.mxu2 }
0x1035   : > { %v2275_v46 = vmul.f32 0.35355338, %v2269_v42 }
0x1037   : > { %v2278_v43 = vadd.f32 %v2275_v46, %v6288_v3 }
0x1039   : > { %v2285_v49 = vsel %vm873_vm12, %v2278_v43, -inf }
0x103a   : > { %2141 = vmax.xlane.f32.xlu0 %v2140_v33 }
0x103c   : > { %v2271_v55 = vpop.f32.mrf.mxu2 }
0x103d   : > { %v2043_v55 = vsel %vm616_vm2, %v5099_v34, 0 }
0x103e   : > { %2052 = vmatpush.bf16.msrb.mxu0 %v2043_v55 }
0x104a   : > { %2002 = vrot.lane.b32.xlu2 %v6576_v52, %s7624_s19 }
0x104e   : > { %2156 = vadd.xlane.f32.xlu1 %v2155_v38  ;;  %2171 = vrot.lane.b32.xlu0 %v6576_v52, %s7625_s28 }
0x1067   : > { %2314 = vrot.lane.b32.xlu1 %v6572_v12, %s7626_s3 }
0x1073   : > { %2153 = vadd.xlane.f32.xlu2 %v2152_v39 }
0x1078   : > { %2286 = vmax.xlane.f32.xlu0 %v2285_v49 }
0x107e   : > { %v1985_v59 = vpop.xlane.xlu1 %1984 }
0x1086   : > { %v1988_v50 = vpop.xlane.xlu0 %1987 }
0x108b   : > { %2316 = vrot.lane.b32.xlu2 %v6576_v52, %s7626_s3 }
0x1096   : > { %v2001_v35 = vpop.permute.xlu1 %2000 }
0x109d   : > { %v2281_v53 = vpop.xlane.xlu0 %2280 }
0x109e   : > { %v2288_v54 = vsub.f32 %v2276_v22, %v2281_v53 }
0x10a0   : > { %v2291_v56 = vmul.f32 1.442695, %v2288_v54 }
0x10a2   : > { %5703 = vpow2.f32 %v2291_v56 }
0x10a3   : > { %5705 = vrcp.f32 %v1988_v50 }
0x10a4   : > { %5707 = vrcp.f32 %v1985_v59 }
0x10a5   : > { %v2284_v57 = vpop.xlane.xlu2 %2283  ;;  %v1991_v4 = vpop.xlane.xlu0 %1990 }
0x10a6   : > { %v2289_v61 = vsub.f32 %v2277_v27, %v2284_v57 }
0x10a8   : > { %v5704_v62 = vpop.eup %5703  ;;  %v2293_v63 = vmul.f32 1.442695, %v2289_v61 }
0x10a9   : > { %v2297_v3 = vsel %vm873_vm12, %v5704_v62, 0.0  ;;  %v5706_v58 = vpop.eup %5705 }
0x10aa   : > { %5709 = vpow2.f32 %v2293_v63  ;;  %2298 = vadd.xlane.f32.xlu0 %v2297_v3  ;;  %v5708_v26 = vpop.eup %5707  ;;  %v1996_v7 = vmul.f32 %v5706_v58, %v6665_v11 }
0x10ab   : > { %v1995_v8 = vmul.f32 %v5708_v26, %v6659_v29  ;;  %5711 = vrcp.f32 %v1991_v4 }
0x10ad   : > { %v2003_v51 = vpop.permute.xlu2 %2002  ;;  %v1998_v15 = vpack.c.bf16 %v1996_v7, %v1995_v8  ;;  %v2142_v16 = vpop.xlane.xlu0 %2141 }
0x10ae   : > { %v2012_v52 = vsel %vm616_vm2, %v2003_v51, 0  ;;  %v2145_v29 = vsub.f32 %v6682_v31, %v2142_v16 }
0x10af   : > { %2020 = vmatpush.bf16.msrb.mxu3 %v2012_v52 }
0x10b0   : > { %v5710_v6 = vpop.eup %5709  ;;  %v2150_v22 = vmul.f32 1.442695, %v2145_v29 }
0x10b1   : > { %v2300_v9 = vsel %vm873_vm12, %v5710_v6, 0.0  ;;  %v5712_v17 = vpop.eup %5711 }
0x10b2   : > { %2301 = vadd.xlane.f32.xlu0 %v2300_v9  ;;  %v1997_v13 = vmul.f32 %v5712_v17, %v6675_v41  ;;  %5713 = vpow2.f32 %v2150_v22  ;;  %v5108_v9 = vld [vmem:[%s7552_s6 + $0x18] sm:$0xf] }
0x10b3   : > { %2021 = vmatpush.bf16.msrb.mxu3 %v2001_v35  ;;  %v2212_v8 = vsel %vm616_vm2, %v5108_v9, 0 }
0x10b4   : > { %v1999_v11 = vpack.c.bf16 %v1997_v13, %v1997_v13  ;;  %2221 = vmatpush.bf16.msra.mxu0 %v2212_v8 }
0x10b6   : > { %5097 = vmatmul.msk.bf16.vlgmr.msrb.gmra.mxu3 %vm873_vm12, %v1998_v15 }
0x10b8   : > { %v5714_v27 = vpop.eup %5713 }
0x10b9   : > { %v2158_v42 = vsel %vm873_vm12, %v5714_v27, 0.0 }
0x10c0   : > { %v2172_v19 = vpop.permute.xlu0 %2171 }
0x10c1   : > { %v2181_v21 = vsel %vm616_vm2, %v2172_v19, 0  ;;  %v2157_v24 = vpop.xlane.xlu1 %2156 }
0x10c2   : > { %2189 = vmatpush.bf16.msra.mxu3 %v2181_v21 }
0x10c6   : > { %2169 = vrot.lane.b32.xlu0 %v6572_v12, %s7625_s28  ;;  %5098 = vmatmul.msk.bf16.gmra.mxu3 %vm873_vm12, %v1999_v11 }
0x10d9   : > { %v2315_v12 = vpop.permute.xlu1 %2314 }
0x10e6   : > { %v2154_v23 = vpop.xlane.xlu2 %2153 }
0x10eb   : > { %v2287_v25 = vpop.xlane.xlu0 %2286 }
0x10ec   : > { %v2290_v28 = vsub.f32 %v2278_v43, %v2287_v25 }
0x10ee   : > { %v2295_v30 = vmul.f32 1.442695, %v2290_v28  ;;  %v2317_v41 = vpop.permute.xlu2 %2316 }
0x10ef   : > { %v2326_v18 = vsel %vm616_vm2, %v2317_v41, 0 }
0x10f0   : > { %5715 = vpow2.f32 %v2295_v30  ;;  %2334 = vmatpush.bf16.msrb.mxu1 %v2326_v18  ;;  %2159 = vadd.xlane.f32.xlu0 %v2158_v42 }
0x10f4   : > { %2335 = vmatpush.bf16.msrb.mxu1 %v2315_v12 }
0x10f6   : > { %v5716_v32 = vpop.eup %5715 }
0x10f7   : > { %v2303_v31 = vsel %vm873_vm12, %v5716_v32, 0.0 }
0x10f8   : > { %2304 = vadd.xlane.f32.xlu2 %v2303_v31  ;;  %v5572_v31 = vld [vmem:[%s7548_s2 + $0xc] ss:$0 sm:$0xff] }
0x111d   : > { %v2299_v33 = vpop.xlane.xlu0 %2298 }
0x111e   : > { %5717 = vrcp.f32 %v2299_v33 }
0x1124   : > { %v5718_v38 = vpop.eup %5717 }
0x1125   : > { %v2302_v37 = vpop.xlane.xlu0 %2301  ;;  %v2309_v44 = vmul.f32 %v5718_v38, %v5704_v62 }
0x1126   : > { %5719 = vrcp.f32 %v2302_v37 }
0x1127   : > { %5721 = vrcp.f32 %v2154_v23 }
0x1128   : > { %5723 = vrcp.f32 %v2157_v24 }
0x112c   : > { %v5720_v40 = vpop.eup %5719 }
0x112d   : > { %v2310_v45 = vmul.f32 %v5720_v40, %v5710_v6  ;;  %v5722_v39 = vpop.eup %5721  ;;  %v5115_v6 = vld [vmem:[%s7552_s6 + $0x1c] sm:$0xf] }
0x112e   : > { %v5724_v43 = vpop.eup %5723  ;;  %v2164_v49 = vmul.f32 %v5722_v39, %v6697_v47  ;;  %v2357_v7 = vsel %vm616_vm2, %v5115_v6, 0 }
0x112f   : > { %v2312_v46 = vpack.c.bf16 %v2310_v45, %v2309_v44  ;;  %v2165_v50 = vmul.f32 %v5724_v43, %v6686_v36 }
0x1131   : > { %5113 = vmatmul.msk.bf16.vlgmr.msrb.gmra.mxu1 %vm873_vm12, %v2312_v46  ;;  %v2167_v56 = vpack.c.bf16 %v2165_v50, %v2164_v49 }
0x1138   : > { %v2170_v53 = vpop.permute.xlu0 %2169 }
0x1139   : > { %v2023_v54 = vpop.f32.mrf.mxu3  ;;  %2190 = vmatpush.bf16.msra.mxu3 %v2170_v53 }
0x113c   : > { %5106 = vmatmul.msk.bf16.vlgmr.msra.gmra.mxu3 %vm873_vm12, %v2167_v56 }
0x113d   : > { %2366 = vmatpush.bf16.msrb.mxu3 %v2357_v7  ;;  %v5462_v7 = vld [vmem:[%s7553_s7 + $0x18] sm:$0xff] }
0x1141   : > { %v2025_v57 = vpop.f32.mrf.mxu3 }
0x1142   : > { %v2032_v59 = vpack.c.bf16 %v2025_v57, %v2023_v54 }
0x1144   : > { %5100 = vmatmul.msk.bf16.vlgmr.msrb.gmra.mxu0 %vm836_vm8, %v2032_v59 }
0x1145   : > { %2497 = vmatpush.bf16.msrb.mxu0 %v5462_v7  ;;  %v5463_v7 = vld [vmem:[%s7554_s8 + $0x40] sm:$0xff] }
0x1149   : > { %v2028_v61 = vpop.f32.mrf.mxu3 }
0x114a   : > { %v2033_v63 = vpack.c.bf16 %v2028_v61, %v2028_v61 }
0x1151   : > { %v2030_v62 = vpop.f32.mrf.mxu3 }
0x1154   : > { %5101 = vmatmul.msk.bf16.gmra.mxu0 %vm836_vm8, %v2033_v63 }
0x1163   : > { %v2160_v3 = vpop.xlane.xlu0 %2159 }
0x1164   : > { %5725 = vrcp.f32 %v2160_v3 }
0x116a   : > { %v5726_v47 = vpop.eup %5725 }
0x116b   : > { %v2166_v58 = vmul.f32 %v5726_v47, %v5714_v27  ;;  %v2305_v36 = vpop.xlane.xlu2 %2304 }
0x116c   : > { %5727 = vrcp.f32 %v2305_v36 }
0x116d   : > { %v2168_v51 = vpack.c.bf16 %v2166_v58, %v2166_v58 }
0x116f   : > { %5107 = vmatmul.msk.bf16.gmra.mxu3 %vm873_vm12, %v2168_v51 }
0x1172   : > { %v5728_v4 = vpop.eup %5727 }
0x1173   : > { %v2311_v52 = vmul.f32 %v5728_v4, %v5716_v32 }
0x1175   : > { %v2313_v26 = vpack.c.bf16 %v2311_v52, %v2311_v52 }
0x1177   : > { %5114 = vmatmul.msk.bf16.gmra.mxu1 %vm873_vm12, %v2313_v26 }
0x11ae   : > { %v2337_v35 = vpop.f32.mrf.mxu1 }
0x11b6   : > { %v2339_v15 = vpop.f32.mrf.mxu1 }
0x11b7   : > { %v2346_v16 = vpack.c.bf16 %v2339_v15, %v2337_v35  ;;  %v5461_v35 = vld [vmem:[%s7553_s7 + $0x10] sm:$0xff] }
0x11b8   : > { %2498 = vmatpush.bf16.msrb.mxu0 %v5461_v35 }
0x11b9   : > { %5116 = vmatmul.msk.bf16.vlgmr.msrb.gmra.mxu3 %vm836_vm8, %v2346_v16 }
0x11bf   : > { %v2192_v17 = vpop.f32.mrf.mxu3 }
0x11c1   : > { %v2054_v19 = vpop.f32.mrf.mxu0 }
0x11c2   : > { %v2082_v41 = vadd.f32 %v6657_v5, %v2054_v19 }
0x11c7   : > { %v2194_v13 = vpop.f32.mrf.mxu3 }
0x11c8   : > { %v2201_v21 = vpack.c.bf16 %v2194_v13, %v2192_v17 }
0x11c9   : > { %v2056_v11 = vpop.f32.mrf.mxu0 }
0x11ca   : > { %5109 = vmatmul.msk.bf16.vlgmr.msra.gmra.mxu0 %vm836_vm8, %v2201_v21  ;;  %v2084_v34 = vadd.f32 %v6663_v10, %v2056_v11 }
0x11d1   : > { %v2059_v29 = vpop.f32.mrf.mxu0 }
0x11d2   : > { %v2087_v10 = vadd.f32 %v6669_v14, %v2059_v29 }
0x11d9   : > { %v2061_v22 = vpop.f32.mrf.mxu0 }
0x11f2   : > { %v2197_v23 = vpop.f32.mrf.mxu3 }
0x11f3   : > { %v2202_v24 = vpack.c.bf16 %v2197_v23, %v2197_v23 }
0x11f4   : > { %v2342_v25 = vpop.f32.mrf.mxu1 }
0x11f5   : > { %v2347_v27 = vpack.c.bf16 %v2342_v25, %v2342_v25  ;;  %5110 = vmatmul.msk.bf16.gmra.mxu0 %vm836_vm8, %v2202_v24 }
0x11f7   : > { %5117 = vmatmul.msk.bf16.gmra.mxu3 %vm836_vm8, %v2347_v27 }
0x11fa   : > { %v2199_v28 = vpop.f32.mrf.mxu3 }
0x11fc   : > { %v2344_v30 = vpop.f32.mrf.mxu1 }
0x123c   : > { %v2368_v18 = vpop.f32.mrf.mxu3 }
0x1244   : > { %v2370_v5 = vpop.f32.mrf.mxu3 }
0x1247   : > { %v2223_v42 = vpop.f32.mrf.mxu0 }
0x1248   : > { %v2232_v12 = vadd.f32 %v2223_v42, %v2082_v41 }
0x124a   : > { %v2377_v32 = vadd.f32 %v2368_v18, %v2232_v12  ;;  %v5573_v18 = vld [vmem:[%s7548_s2 + $0xa] ss:$0 sm:$0xff] }
0x124c   : > { %v2380_v33 = vadd.f32 %v2377_v32, %v6529_v60 }
0x124e   : > { %v6750_v55 = vadd.f32 %v5572_v31, %v2380_v33 }
0x124f   : > { %v2225_v37 = vpop.f32.mrf.mxu0 }
0x1250   : > { %v2233_v38 = vadd.f32 %v2225_v37, %v2084_v34  ;;  %v2390_v40 = vsel %vm569_vm0, %v6750_v55, 0.0 }
0x1251   : > { %2391 = vadd.xlane.f32.xlu1 %v2390_v40 }
0x1252   : > { %v2378_v44 = vadd.f32 %v2370_v5, %v2233_v38 }
0x1254   : > { %v2381_v45 = vadd.f32 %v2378_v44, %v6534_v1 }
0x1256   : > { %v6755_v46 = vadd.f32 %v5572_v31, %v2381_v45 }
0x1258   : > { %v2393_v39 = vsel %vm569_vm0, %v6755_v46, 0.0 }
0x1259   : > { %2394 = vadd.xlane.f32.xlu0 %v2393_v39 }
0x1272   : > { %v2228_v60 = vpop.f32.mrf.mxu0 }
0x1273   : > { %v2234_v43 = vadd.f32 %v2228_v60, %v2087_v10 }
0x127a   : > { %v2230_v49 = vpop.f32.mrf.mxu0  ;;  %v2373_v50 = vpop.f32.mrf.mxu3 }
0x127b   : > { %v2379_v53 = vadd.f32 %v2373_v50, %v2234_v43 }
0x127d   : > { %v2382_v54 = vadd.f32 %v2379_v53, %v6539_v20 }
0x127f   : > { %v6761_v56 = vadd.f32 %v5572_v31, %v2382_v54  ;;  %v5574_v31 = vld [vmem:[%s7548_s2 + $0xb] ss:$0 sm:$0xff] }
0x1281   : > { %v2396_v1 = vsel %vm569_vm0, %v6761_v56, 0.0 }
0x1282   : > { %v2375_v57 = vpop.f32.mrf.mxu3  ;;  %2397 = vadd.xlane.f32.xlu0 %v2396_v1 }
0x12c4   : > { %v2392_v59 = vpop.xlane.xlu1 %2391 }
0x12c5   : > { %v2399_v61 = vmul.f32 %v2392_v59, %v6206_v48 }
0x12c7   : > { %v2402_v62 = vsub.f32 %v6750_v55, %v2399_v61 }
0x12c9   : > { %v2405_v63 = vmul.f32 %v2402_v62, %v2402_v62 }
0x12cb   : > { %v2408_v14 = vsel %vm569_vm0, %v2405_v63, 0.0  ;;  %v5469_v63 = vld [vmem:[%s7554_s8 + $0x70] sm:$0xff] }
0x12cc   : > { %2409 = vadd.xlane.f32.xlu2 %v2408_v14  ;;  %v2395_v3 = vpop.xlane.xlu0 %2394  ;;  %v5468_v14 = vld [vmem:[%s7554_s8 + $0x68] sm:$0xff] }
0x12cd   : > { %v2400_v47 = vmul.f32 %v2395_v3, %v6206_v48  ;;  %v5467_v3 = vld [vmem:[%s7554_s8 + $0x60] sm:$0xff] }
0x12cf   : > { %v2403_v20 = vsub.f32 %v6755_v46, %v2400_v47  ;;  %v5466_v47 = vld [vmem:[%s7554_s8 + $0x58] sm:$0xff] }
0x12d1   : > { %v2406_v58 = vmul.f32 %v2403_v20, %v2403_v20 }
0x12d3   : > { %v2411_v36 = vsel %vm569_vm0, %v2406_v58, 0.0 }
0x12d4   : > { %2412 = vadd.xlane.f32.xlu0 %v2411_v36  ;;  %v5465_v36 = vld [vmem:[%s7554_s8 + $0x50] sm:$0xff] }
0x12f5   : > { %v2398_v51 = vpop.xlane.xlu0 %2397 }
0x12f6   : > { %v2401_v4 = vmul.f32 %v2398_v51, %v6206_v48 }
0x12f8   : > { %v2404_v52 = vsub.f32 %v6761_v56, %v2401_v4 }
0x12fa   : > { %v2407_v26 = vmul.f32 %v2404_v52, %v2404_v52 }
0x12fc   : > { %v2414_v6 = vsel %vm569_vm0, %v2407_v26, 0.0 }
0x12fd   : > { %2415 = vadd.xlane.f32.xlu1 %v2414_v6 }
0x133f   : > { %v2410_v9 = vpop.xlane.xlu2 %2409 }
0x1340   : > { %v2417_v8 = vmul.f32 %v2410_v9, %v6206_v48 }
0x1342   : > { %v2420_v15 = vadd.f32 1e-05, %v2417_v8 }
0x1344   : > { %5729 = vrsqrt.f32 %v2420_v15  ;;  %vm2429_vm9 = vweird.f32 %v2420_v15 }
0x1347   : > { %v2413_v16 = vpop.xlane.xlu0 %2412 }
0x1348   : > { %v2418_v17 = vmul.f32 %v2413_v16, %v6206_v48 }
0x134a   : > { %v5730_v19 = vpop.eup %5729  ;;  %v2421_v13 = vadd.f32 1e-05, %v2418_v17 }
0x134b   : > { %v2424_v21 = vmul.f32 %v5730_v19, %v2420_v15  ;;  %vm2430_vm7 = vweird.f32 %v5730_v19 }
0x134c   : > { %5731 = vrsqrt.f32 %v2421_v13  ;;  %vm2431_vm11 = vmor %vm2429_vm9, %vm2430_vm7  ;;  %vm2439_vm14 = vweird.f32 %v2421_v13 }
0x134d   : > { %v2425_v11 = vmul.f32 %v5730_v19, %v2424_v21 }
0x134f   : > { %v2426_v29 = vmul.f32 0.5, %v2425_v11 }
0x1351   : > { %v2427_v22 = vsub.f32 1.5, %v2426_v29 }
0x1352   : > { %v5732_v23 = vpop.eup %5731 }
0x1353   : > { %v2428_v24 = vmul.f32 %v5730_v19, %v2427_v22  ;;  %v2434_v25 = vmul.f32 %v5732_v23, %v2421_v13  ;;  %vm2440_vm13 = vweird.f32 %v5732_v23 }
0x1354   : > { %vm2441_vm15 = vmor %vm2439_vm14, %vm2440_vm13 }
0x1355   : > { %v2435_v27 = vmul.f32 %v5732_v23, %v2434_v25  ;;  %v2432_v28 = vsel %vm2431_vm11, %v5730_v19, %v2428_v24 }
0x1356   : > { %v2453_v42 = vmul.f32 %v2432_v28, %v2402_v62  ;;  %v5470_v62 = vld [vmem:[%s7554_s8 + $0x78] sm:$0xff] }
0x1357   : > { %v2436_v30 = vmul.f32 0.5, %v2435_v27  ;;  %2641 = vmatpush.bf16.msra.mxu2 %v5470_v62 }
0x1358   : > { %v2457_v33 = vmul.f32 %v5573_v18, %v2453_v42 }
0x1359   : > { %v2437_v41 = vsub.f32 1.5, %v2436_v30 }
0x135a   : > { %v2461_v38 = vadd.f32 %v5574_v31, %v2457_v33 }
0x135b   : > { %v2438_v12 = vmul.f32 %v5732_v23, %v2437_v41  ;;  %2642 = vmatpush.bf16.msra.mxu2 %v5469_v63 }
0x135d   : > { %v2442_v32 = vsel %vm2441_vm15, %v5732_v23, %v2438_v12 }
0x135e   : > { %v2454_v34 = vmul.f32 %v2442_v32, %v2403_v20  ;;  %v5575_v20 = vld [vmem:[%s7548_s2 + $0xf] ss:$0 sm:$0xff] }
0x135f   : > { %2643 = vmatpush.bf16.msra.mxu2 %v5468_v14 }
0x1360   : > { %v2458_v37 = vmul.f32 %v5573_v18, %v2454_v34 }
0x1362   : > { %v2462_v40 = vadd.f32 %v5574_v31, %v2458_v37 }
0x1363   : > { %2644 = vmatpush.bf16.msra.mxu2 %v5467_v3 }
0x1364   : > { %v2470_v5 = vpack.c.bf16 %v2462_v40, %v2461_v38 }
0x1366   : > { %5134 = vmatmul.msk.bf16.vlgmr.msrb.gmra.mxu0 %vm569_vm0, %v2470_v5 }
0x1367   : > { %2645 = vmatpush.bf16.msra.mxu2 %v5466_v47 }
0x136b   : > { %2646 = vmatpush.bf16.msra.mxu2 %v5465_v36 }
0x1370   : > { %v2416_v44 = vpop.xlane.xlu1 %2415 }
0x1371   : > { %v2419_v45 = vmul.f32 %v2416_v44, %v6206_v48 }
0x1373   : > { %v2422_v39 = vadd.f32 1e-05, %v2419_v45 }
0x1375   : > { %5733 = vrsqrt.f32 %v2422_v39  ;;  %vm2449_vm3 = vweird.f32 %v2422_v39 }
0x137b   : > { %v5734_v60 = vpop.eup %5733 }
0x137c   : > { %v2444_v10 = vmul.f32 %v5734_v60, %v2422_v39  ;;  %vm2450_vm1 = vweird.f32 %v5734_v60 }
0x137d   : > { %vm2451_vm4 = vmor %vm2449_vm3, %vm2450_vm1 }
0x137e   : > { %v2445_v43 = vmul.f32 %v5734_v60, %v2444_v10 }
0x1380   : > { %v2446_v49 = vmul.f32 0.5, %v2445_v43 }
0x1382   : > { %v2447_v50 = vsub.f32 1.5, %v2446_v49 }
0x1384   : > { %v2448_v53 = vmul.f32 %v5734_v60, %v2447_v50 }
0x1386   : > { %v2452_v54 = vsel %vm2451_vm4, %v5734_v60, %v2448_v53 }
0x1387   : > { %v2455_v1 = vmul.f32 %v2452_v54, %v2404_v52  ;;  %v5464_v52 = vld [vmem:[%s7554_s8 + $0x48] sm:$0xff] }
0x1388   : > { %2647 = vmatpush.bf16.msra.mxu2 %v5464_v52 }
0x1389   : > { %v2459_v57 = vmul.f32 %v5573_v18, %v2455_v1 }
0x138b   : > { %v2463_v59 = vadd.f32 %v5574_v31, %v2459_v57 }
0x138c   : > { %2648 = vmatpush.bf16.msra.mxu2 %v5463_v7 }
0x138d   : > { %v2471_v61 = vpack.c.bf16 %v2463_v59, %v2463_v59 }
0x138f   : > { %5135 = vmatmul.msk.bf16.gmra.mxu0 %vm569_vm0, %v2471_v61 }
0x13e3   : > { %v2500_v58 = vpop.f32.mrf.mxu0 }
0x13e4   : > { %v2501_v51 = vadd.f32 %v5575_v20, %v2500_v58 }
0x13e6   : > { %v5136_v4 = vmul.f32 -1.702, %v2501_v51 }
0x13e8   : > { %v2515_v26 = vmul.f32 1.442695, %v5136_v4 }
0x13ea   : > { %5735 = vpow2.f32 %v2515_v26 }
0x13eb   : > { %v2502_v6 = vpop.f32.mrf.mxu0 }
0x13ec   : > { %v2503_v9 = vadd.f32 %v5575_v20, %v2502_v6 }
0x13ee   : > { %v5137_v8 = vmul.f32 -1.702, %v2503_v9 }
0x13f0   : > { %v5736_v35 = vpop.eup %5735  ;;  %v2517_v15 = vmul.f32 1.442695, %v5137_v8 }
0x13f1   : > { %v2521_v16 = vadd.f32 1.0, %v5736_v35 }
0x13f2   : > { %5737 = vpow2.f32 %v2517_v15 }
0x13f3   : > { %5739 = vrcp.f32 %v2521_v16  ;;  %v2535_v25 = vand.u32 2147483648, %v2521_v16  ;;  %vm2529_vm6 = vweird.f32 %v2521_v16  ;;  %v2533_v27 = vand.u32 2147483647, %v2521_v16 }
0x13f5   : > { %v2536_v12 = vor.u32 1.1754944e-38, %v2535_v25  ;;  %vm2534_vm11 = vcmp.eq.f32.partialorder %v2533_v27, 8.507059e+37 }
0x13f8   : > { %v5738_v17 = vpop.eup %5737 }
0x13f9   : > { %v5740_v19 = vpop.eup %5739  ;;  %v2522_v13 = vadd.f32 1.0, %v5738_v17 }
0x13fa   : > { %v2525_v21 = vmul.f32 %v5740_v19, %v2521_v16  ;;  %vm2530_vm5 = vweird.f32 %v5740_v19 }
0x13fb   : > { %5741 = vrcp.f32 %v2522_v13  ;;  %vm2531_vm7 = vmor %vm2529_vm6, %vm2530_vm5  ;;  %v2550_v30 = vand.u32 2147483648, %v2522_v13  ;;  %v2548_v42 = vand.u32 2147483647, %v2522_v13  ;;  %vm2544_vm13 = vweird.f32 %v2522_v13 }
0x13fc   : > { %v2526_v11 = vsub.f32 1.0, %v2525_v21 }
0x13fd   : > { %v2551_v33 = vor.u32 1.1754944e-38, %v2550_v30  ;;  %vm2549_vm15 = vcmp.eq.f32.partialorder %v2548_v42, 8.507059e+37  ;;  %v5472_v30 = vld [vmem:[%s7551_s5 + $0x28] sm:$0xff]  ;;  %v5471_v42 = vld [vmem:[%s7551_s5 + $0x20] sm:$0xff] }
0x13fe   : > { %v2527_v29 = vmul.f32 %v5740_v19, %v2526_v11  ;;  %2772 = vmatpush.bf16.msra.mxu1 %v5472_v30 }
0x1400   : > { %v2528_v23 = vadd.f32 %v5740_v19, %v2527_v29 }
0x1401   : > { %v5742_v22 = vpop.eup %5741 }
0x1402   : > { %v2540_v24 = vmul.f32 %v5742_v22, %v2522_v13  ;;  %v2532_v41 = vsel %vm2531_vm7, %v5740_v19, %v2528_v23  ;;  %vm2545_vm9 = vweird.f32 %v5742_v22  ;;  %2773 = vmatpush.bf16.msra.mxu1 %v5471_v42 }
0x1403   : > { %v2537_v31 = vsel %vm2534_vm11, %v2536_v12, %v2532_v41  ;;  %vm2546_vm14 = vmor %vm2544_vm13, %vm2545_vm9 }
0x1404   : > { %v2541_v28 = vsub.f32 1.0, %v2540_v24  ;;  %v2569_v38 = vmul.f32 %v2537_v31, %v2501_v51 }
0x1406   : > { %v2542_v18 = vmul.f32 %v5742_v22, %v2541_v28 }
0x1408   : > { %v2543_v32 = vadd.f32 %v5742_v22, %v2542_v18 }
0x140a   : > { %v2547_v34 = vsel %vm2546_vm14, %v5742_v22, %v2543_v32 }
0x140b   : > { %v2552_v37 = vsel %vm2549_vm15, %v2551_v33, %v2547_v34 }
0x140c   : > { %v2570_v40 = vmul.f32 %v2552_v37, %v2503_v9  ;;  %v2505_v5 = vpop.f32.mrf.mxu0 }
0x140d   : > { %v2506_v44 = vadd.f32 %v5575_v20, %v2505_v5  ;;  %v5576_v20 = vld [vmem:[%s7548_s2 + $0xd] ss:$0 sm:$0xff] }
0x140e   : > { %v2590_v45 = vpack.c.bf16 %v2570_v40, %v2569_v38 }
0x140f   : > { %v5138_v39 = vmul.f32 -1.702, %v2506_v44 }
0x1410   : > { %2649 = vmatmul.bf16.vlgmr.msra.gmra.mxu2 %v2590_v45 }
0x1411   : > { %v2519_v60 = vmul.f32 1.442695, %v5138_v39 }
0x1413   : > { %5743 = vpow2.f32 %v2519_v60 }
0x1414   : > { %v2507_v10 = vpop.f32.mrf.mxu0 }
0x1419   : > { %v5744_v43 = vpop.eup %5743 }
0x141a   : > { %v2523_v49 = vadd.f32 1.0, %v5744_v43 }
0x141c   : > { %5745 = vrcp.f32 %v2523_v49  ;;  %v2565_v1 = vand.u32 2147483648, %v2523_v49  ;;  %v2563_v59 = vand.u32 2147483647, %v2523_v49  ;;  %vm2559_vm3 = vweird.f32 %v2523_v49 }
0x141e   : > { %v2566_v62 = vor.u32 1.1754944e-38, %v2565_v1  ;;  %vm2564_vm5 = vcmp.eq.f32.partialorder %v2563_v59, 8.507059e+37 }
0x1422   : > { %v5746_v50 = vpop.eup %5745 }
0x1423   : > { %v2555_v53 = vmul.f32 %v5746_v50, %v2523_v49  ;;  %vm2560_vm1 = vweird.f32 %v5746_v50 }
0x1424   : > { %vm2561_vm4 = vmor %vm2559_vm3, %vm2560_vm1 }
0x1425   : > { %v2556_v54 = vsub.f32 1.0, %v2555_v53 }
0x1427   : > { %v2557_v57 = vmul.f32 %v5746_v50, %v2556_v54 }
0x1429   : > { %v2558_v61 = vadd.f32 %v5746_v50, %v2557_v57  ;;  %v5578_v57 = vld [vmem:[%s7548_s2 + $0x11] ss:$0 sm:$0xff] }
0x142b   : > { %v2562_v63 = vsel %vm2561_vm4, %v5746_v50, %v2558_v61  ;;  %v5577_v50 = vld [vmem:[%s7548_s2 + $0x10] ss:$0 sm:$0xff] }
0x142c   : > { %v2567_v14 = vsel %vm2564_vm5, %v2566_v62, %v2562_v63 }
0x142d   : > { %v2571_v3 = vmul.f32 %v2567_v14, %v2506_v44 }
0x142f   : > { %v2591_v47 = vpack.c.bf16 %v2571_v3, %v2571_v3 }
0x1431   : > { %2654 = vmatmul.bf16.gmra.mxu2 %v2591_v47 }
0x1493   : > { %v2650_v58 = vpop.f32.mrf.mxu2 }
0x1494   : > { %v2651_v36 = vadd.f32 %v5576_v20, %v2650_v58 }
0x1496   : > { %v6822_v51 = vadd.f32 %v2651_v36, %v6750_v55 }
0x1498   : > { %v2665_v4 = vsel %vm569_vm0, %v6822_v51, 0.0 }
0x1499   : > { %2666 = vadd.xlane.f32.xlu2 %v2665_v4 }
0x149b   : > { %v2652_v52 = vpop.f32.mrf.mxu2 }
0x149c   : > { %v2653_v26 = vadd.f32 %v5576_v20, %v2652_v52 }
0x149e   : > { %v6827_v6 = vadd.f32 %v2653_v26, %v6755_v46 }
0x14a0   : > { %v2668_v7 = vsel %vm569_vm0, %v6827_v6, 0.0 }
0x14a1   : > { %2669 = vadd.xlane.f32.xlu0 %v2668_v7 }
0x14b4   : > { %v2655_v9 = vpop.f32.mrf.mxu2 }
0x14b5   : > { %v2656_v8 = vadd.f32 %v5576_v20, %v2655_v9 }
0x14b7   : > { %v6832_v35 = vadd.f32 %v2656_v8, %v6761_v56 }
0x14b9   : > { %v2671_v55 = vsel %vm569_vm0, %v6832_v35, 0.0 }
0x14ba   : > { %2672 = vadd.xlane.f32.xlu1 %v2671_v55 }
0x14bc   : > { %v2657_v15 = vpop.f32.mrf.mxu2 }
0x150c   : > { %v2667_v16 = vpop.xlane.xlu2 %2666 }
0x150d   : > { %v2674_v17 = vmul.f32 %v2667_v16, %v6206_v48 }
0x150f   : > { %v2677_v46 = vsub.f32 %v6822_v51, %v2674_v17 }
0x1511   : > { %v2680_v19 = vmul.f32 %v2677_v46, %v2677_v46 }
0x1513   : > { %v2683_v13 = vsel %vm569_vm0, %v2680_v19, 0.0  ;;  %v5579_v19 = vld [vmem:[%s7548_s2 + $0x16] ss:$0 sm:$0xff] }
0x1514   : > { %v2670_v21 = vpop.xlane.xlu0 %2669  ;;  %2684 = vadd.xlane.f32.xlu2 %v2683_v13 }
0x1515   : > { %v2675_v11 = vmul.f32 %v2670_v21, %v6206_v48 }
0x1517   : > { %v2678_v56 = vsub.f32 %v6827_v6, %v2675_v11 }
0x1519   : > { %v2681_v29 = vmul.f32 %v2678_v56, %v2678_v56 }
0x151b   : > { %v2686_v22 = vsel %vm569_vm0, %v2681_v29, 0.0 }
0x151c   : > { %2687 = vadd.xlane.f32.xlu0 %v2686_v22 }
0x152d   : > { %v2673_v23 = vpop.xlane.xlu1 %2672 }
0x152e   : > { %v2676_v24 = vmul.f32 %v2673_v23, %v6206_v48 }
0x1530   : > { %v2679_v25 = vsub.f32 %v6832_v35, %v2676_v24 }
0x1532   : > { %v2682_v27 = vmul.f32 %v2679_v25, %v2679_v25 }
0x1534   : > { %v2689_v28 = vsel %vm569_vm0, %v2682_v27, 0.0 }
0x1535   : > { %2690 = vadd.xlane.f32.xlu1 %v2689_v28 }
0x1587   : > { %v2685_v41 = vpop.xlane.xlu2 %2684 }
0x1588   : > { %v2692_v18 = vmul.f32 %v2685_v41, %v6206_v48 }
0x158a   : > { %v2695_v12 = vadd.f32 1e-05, %v2692_v18  ;;  %v6882_v18 = vsel %vm704_vm10, 0.0, %v5998_v2 }
0x158c   : > { %5747 = vrsqrt.f32 %v2695_v12  ;;  %vm2704_vm7 = vweird.f32 %v2695_v12 }
0x158f   : > { %v2688_v32 = vpop.xlane.xlu0 %2687 }
0x1590   : > { %v2693_v31 = vmul.f32 %v2688_v32, %v6206_v48 }
0x1592   : > { %v5748_v33 = vpop.eup %5747  ;;  %v2696_v34 = vadd.f32 1e-05, %v2693_v31 }
0x1593   : > { %v2699_v37 = vmul.f32 %v5748_v33, %v2695_v12  ;;  %vm2705_vm6 = vweird.f32 %v5748_v33 }
0x1594   : > { %5749 = vrsqrt.f32 %v2696_v34  ;;  %vm2706_vm9 = vmor %vm2704_vm7, %vm2705_vm6  ;;  %vm2714_vm13 = vweird.f32 %v2696_v34 }
0x1595   : > { %v2700_v38 = vmul.f32 %v5748_v33, %v2699_v37 }
0x1597   : > { %v2701_v40 = vmul.f32 0.5, %v2700_v38 }
0x1599   : > { %v2702_v5 = vsub.f32 1.5, %v2701_v40 }
0x159a   : > { %v5750_v44 = vpop.eup %5749 }
0x159b   : > { %v2703_v45 = vmul.f32 %v5748_v33, %v2702_v5  ;;  %v2709_v39 = vmul.f32 %v5750_v44, %v2696_v34  ;;  %vm2715_vm11 = vweird.f32 %v5750_v44 }
0x159c   : > { %vm2716_vm14 = vmor %vm2714_vm13, %vm2715_vm11 }
0x159d   : > { %v2710_v60 = vmul.f32 %v5750_v44, %v2709_v39  ;;  %v2707_v10 = vsel %vm2706_vm9, %v5748_v33, %v2703_v45 }
0x159e   : > { %v2728_v53 = vmul.f32 %v2707_v10, %v2677_v46 }
0x159f   : > { %v2711_v43 = vmul.f32 0.5, %v2710_v60 }
0x15a0   : > { %v2732_v59 = vmul.f32 %v5577_v50, %v2728_v53 }
0x15a1   : > { %v2712_v49 = vsub.f32 1.5, %v2711_v43 }
0x15a2   : > { %v2736_v3 = vadd.f32 %v5578_v57, %v2732_v59 }
0x15a3   : > { %v2713_v54 = vmul.f32 %v5750_v44, %v2712_v49 }
0x15a5   : > { %v2717_v1 = vsel %vm2716_vm14, %v5750_v44, %v2713_v54 }
0x15a6   : > { %v2729_v61 = vmul.f32 %v2717_v1, %v2678_v56 }
0x15a8   : > { %v2733_v62 = vmul.f32 %v5577_v50, %v2729_v61  ;;  %v2691_v63 = vpop.xlane.xlu1 %2690 }
0x15a9   : > { %v2694_v14 = vmul.f32 %v2691_v63, %v6206_v48 }
0x15aa   : > { %v2737_v47 = vadd.f32 %v5578_v57, %v2733_v62 }
0x15ab   : > { %v2697_v20 = vadd.f32 1e-05, %v2694_v14 }
0x15ac   : > { %v2745_v58 = vpack.c.bf16 %v2737_v47, %v2736_v3 }
0x15ad   : > { %5751 = vrsqrt.f32 %v2697_v20  ;;  %vm2724_vm1 = vweird.f32 %v2697_v20 }
0x15ae   : > { %5203 = vmatmul.msk.bf16.vlgmr.msra.gmra.mxu1 %vm569_vm0, %v2745_v58  ;;  %v5209_v58 = vld [vmem:[%s7552_s6 + $0x20] sm:$0xf] }
0x15b3   : > { %v5752_v36 = vpop.eup %5751 }
0x15b4   : > { %v2719_v4 = vmul.f32 %v5752_v36, %v2697_v20  ;;  %vm2725_vm15 = vweird.f32 %v5752_v36 }
0x15b5   : > { %vm2726_vm3 = vmor %vm2724_vm1, %vm2725_vm15 }
0x15b6   : > { %v2720_v52 = vmul.f32 %v5752_v36, %v2719_v4 }
0x15b8   : > { %v2721_v26 = vmul.f32 0.5, %v2720_v52 }
0x15ba   : > { %v2722_v7 = vsub.f32 1.5, %v2721_v26 }
0x15bc   : > { %v2723_v9 = vmul.f32 %v5752_v36, %v2722_v7 }
0x15be   : > { %v2727_v8 = vsel %vm2726_vm3, %v5752_v36, %v2723_v9  ;;  %v3048_v36 = vsel %vm616_vm2, %v5209_v58, 0 }
0x15bf   : > { %v2730_v55 = vmul.f32 %v2727_v8, %v2679_v25 }
0x15c1   : > { %v2734_v15 = vmul.f32 %v5577_v50, %v2730_v55 }
0x15c3   : > { %v2738_v16 = vadd.f32 %v5578_v57, %v2734_v15 }
0x15c5   : > { %v2746_v17 = vpack.c.bf16 %v2738_v16, %v2738_v16 }
0x15c7   : > { %5204 = vmatmul.msk.bf16.gmra.mxu1 %vm569_vm0, %v2746_v17 }
0x162b   : > { %v2775_v46 = vpop.f32.mrf.mxu1 }
0x162c   : > { %v2776_v21 = vadd.f32 %v5579_v19, %v2775_v46 }
0x1633   : > { %v2777_v13 = vpop.f32.mrf.mxu1 }
0x1634   : > { %v2778_v11 = vadd.f32 %v5579_v19, %v2777_v13 }
0x1636   : > { %v6865_v56 = vpack.c.bf16 %v2778_v11, %v2776_v21 }
0x1638   : > { %2788 = vrot.lane.b32.xlu0 %v6865_v56, %s7616_s26 }
0x1644   : > { %v2780_v29 = vpop.f32.mrf.mxu1 }
0x1645   : > { %v2781_v22 = vadd.f32 %v5579_v19, %v2780_v29 }
0x1647   : > { %v6869_v23 = vpack.c.bf16 %v2781_v22, %v2781_v22 }
0x1649   : > { %2790 = vrot.lane.b32.xlu2 %v6869_v23, %s7616_s26 }
0x164c   : > { %v2782_v24 = vpop.f32.mrf.mxu1 }
0x16a3   : > { %v2791_v25 = vpop.permute.xlu2 %2790 }
0x16a4   : > { %v2802_v27 = vsel %vm836_vm8, %v2791_v25, 0 }
0x16a5   : > { %2810 = vmatpush.bf16.xpose.msra.mxu3 %v2802_v27 }
0x16aa   : > { %v2789_v28 = vpop.permute.xlu0 %2788 }
0x16ab   : > { %v2799_v30 = vsel %vm836_vm8, %v2789_v28, 0 }
0x16ad   : > { %2811 = vmatpush.bf16.xpose.msra.mxu3 %v2799_v30 }
0x16b4   : > { %5205 = vmatmul.msk.bf16.vlgmr.msra.gmra.mxu3 %vm836_vm8, %v6865_v56 }
0x16c4   : > { %5206 = vmatmul.msk.bf16.gmra.mxu3 %vm836_vm8, %v6869_v23 }
0x1737   : > { %v2813_v41 = vpop.f32.mrf.mxu3 }
0x1738   : > { %v2822_v42 = vmul.f32 0.35355338, %v2813_v41 }
0x173a   : > { %v2825_v12 = vadd.f32 %v2822_v42, %v6882_v18 }
0x173c   : > { %v2828_v32 = vsel %vm873_vm12, %v2825_v12, -inf }
0x173d   : > { %2829 = vmax.xlane.f32.xlu1 %v2828_v32 }
0x173f   : > { %v2815_v31 = vpop.f32.mrf.mxu3 }
0x1740   : > { %v2823_v33 = vmul.f32 0.35355338, %v2815_v31 }
0x1742   : > { %v2826_v34 = vadd.f32 %v2823_v33, %v6882_v18 }
0x1744   : > { %v2831_v37 = vsel %vm873_vm12, %v2826_v34, -inf }
0x1745   : > { %2832 = vmax.xlane.f32.xlu1 %v2831_v37 }
0x1747   : > { %v2818_v38 = vpop.f32.mrf.mxu3 }
0x1748   : > { %v2824_v40 = vmul.f32 0.35355338, %v2818_v38 }
0x174a   : > { %v2827_v5 = vadd.f32 %v2824_v40, %v6882_v18 }
0x174c   : > { %v2834_v0 = vsel %vm873_vm12, %v2827_v5, -inf }
0x174d   : > { %2835 = vmax.xlane.f32.xlu1 %v2834_v0 }
0x174f   : > { %v2820_v2 = vpop.f32.mrf.mxu3 }
0x1766   : > { %2865 = vrot.lane.b32.xlu1 %v6869_v23, %s7617_s18 }
0x176e   : > { %2863 = vrot.lane.b32.xlu1 %v6865_v56, %s7617_s18 }
0x17b0   : > { %v2830_v44 = vpop.xlane.xlu1 %2829 }
0x17b1   : > { %v2837_v45 = vsub.f32 %v2825_v12, %v2830_v44 }
0x17b3   : > { %v2840_v39 = vmul.f32 1.442695, %v2837_v45 }
0x17b5   : > { %5753 = vpow2.f32 %v2840_v39 }
0x17b8   : > { %v2833_v60 = vpop.xlane.xlu1 %2832 }
0x17b9   : > { %v2838_v10 = vsub.f32 %v2826_v34, %v2833_v60 }
0x17bb   : > { %v5754_v43 = vpop.eup %5753  ;;  %v2842_v49 = vmul.f32 1.442695, %v2838_v10 }
0x17bc   : > { %v2846_v50 = vsel %vm873_vm12, %v5754_v43, 0.0 }
0x17bd   : > { %5755 = vpow2.f32 %v2842_v49  ;;  %2847 = vadd.xlane.f32.xlu0 %v2846_v50 }
0x17c0   : > { %v2836_v53 = vpop.xlane.xlu1 %2835 }
0x17c1   : > { %v2839_v54 = vsub.f32 %v2827_v5, %v2836_v53 }
0x17c3   : > { %v5756_v1 = vpop.eup %5755  ;;  %v2844_v57 = vmul.f32 1.442695, %v2839_v54 }
0x17c4   : > { %v2849_v59 = vsel %vm873_vm12, %v5756_v1, 0.0 }
0x17c5   : > { %5757 = vpow2.f32 %v2844_v57  ;;  %2850 = vadd.xlane.f32.xlu2 %v2849_v59 }
0x17cb   : > { %v5758_v61 = vpop.eup %5757 }
0x17cc   : > { %v2852_v62 = vsel %vm873_vm12, %v5758_v61, 0.0 }
0x17cd   : > { %2853 = vadd.xlane.f32.xlu1 %v2852_v62 }
0x17d1   : > { %2905 = vrot.lane.b32.xlu0 %v6869_v23, %s7618_s29 }
0x17d8   : > { %v2866_v63 = vpop.permute.xlu1 %2865 }
0x17d9   : > { %v2875_v14 = vsel %vm616_vm2, %v2866_v63, 0  ;;  %2899 = vrot.lane.b32.xlu0 %v6865_v56, %s7620_s30 }
0x17da   : > { %2883 = vmatpush.bf16.msra.mxu0 %v2875_v14 }
0x17dd   : > { %2903 = vrot.lane.b32.xlu2 %v6865_v56, %s7618_s29 }
0x17e0   : > { %v2864_v3 = vpop.permute.xlu1 %2863 }
0x17e1   : > { %3074 = vrot.lane.b32.xlu0 %v6869_v23, %s7621_s16  ;;  %2884 = vmatpush.bf16.msra.mxu0 %v2864_v3 }
0x17e5   : > { %2901 = vrot.lane.b32.xlu2 %v6869_v23, %s7620_s30  ;;  %3057 = vmatpush.bf16.msrb.mxu0 %v3048_v36 }
0x17e6   : > { %3068 = vrot.lane.b32.xlu1 %v6865_v56, %s7622_s0 }
0x17e9   : > { %3219 = vrot.lane.b32.xlu0 %v6869_v23, %s7619_s23 }
0x17ed   : > { %3072 = vrot.lane.b32.xlu2 %v6865_v56, %s7621_s16 }
0x17f1   : > { %3213 = vrot.lane.b32.xlu0 %v6865_v56, %s7623_s20 }
0x17f5   : > { %3217 = vrot.lane.b32.xlu2 %v6865_v56, %s7619_s23 }
0x17f9   : > { %3215 = vrot.lane.b32.xlu0 %v6869_v23, %s7623_s20 }
0x17fd   : > { %3070 = vrot.lane.b32.xlu2 %v6869_v23, %s7622_s0 }
0x1830   : > { %v2848_v47 = vpop.xlane.xlu0 %2847 }
0x1831   : > { %5759 = vrcp.f32 %v2848_v47 }
0x1837   : > { %v5760_v4 = vpop.eup %5759 }
0x1838   : > { %v2851_v20 = vpop.xlane.xlu2 %2850  ;;  %v2858_v26 = vmul.f32 %v5760_v4, %v5754_v43 }
0x1839   : > { %5761 = vrcp.f32 %v2851_v20 }
0x183f   : > { %v5762_v52 = vpop.eup %5761 }
0x1840   : > { %v2859_v7 = vmul.f32 %v5762_v52, %v5756_v1  ;;  %v2854_v8 = vpop.xlane.xlu1 %2853  ;;  %v2904_v55 = vpop.permute.xlu2 %2903 }
0x1841   : > { %5763 = vrcp.f32 %v2854_v8  ;;  %v2914_v19 = vsel %vm836_vm8, %v2904_v55, 0 }
0x1842   : > { %v2861_v9 = vpack.c.bf16 %v2859_v7, %v2858_v26 }
0x1843   : > { %v2906_v15 = vpop.permute.xlu0 %2905 }
0x1844   : > { %v2917_v16 = vsel %vm836_vm8, %v2906_v15, 0  ;;  %5207 = vmatmul.msk.bf16.vlgmr.msra.gmra.mxu0 %vm873_vm12, %v2861_v9 }
0x1845   : > { %2925 = vmatpush.bf16.xpose.msrb.mxu2 %v2917_v16 }
0x1847   : > { %v5764_v17 = vpop.eup %5763 }
0x1848   : > { %v2902_v13 = vpop.permute.xlu2 %2901  ;;  %v2860_v21 = vmul.f32 %v5764_v17, %v5758_v61 }
0x184a   : > { %v2862_v11 = vpack.c.bf16 %v2860_v21, %v2860_v21 }
0x184b   : > { %v2900_v46 = vpop.permute.xlu0 %2899 }
0x184d   : > { %2926 = vmatpush.bf16.xpose.msrb.mxu2 %v2914_v19 }
0x1850   : > { %v3073_v24 = vpop.permute.xlu2 %3072 }
0x1851   : > { %v3083_v27 = vsel %vm836_vm8, %v3073_v24, 0 }
0x1853   : > { %v3075_v29 = vpop.permute.xlu0 %3074 }
0x1854   : > { %v3086_v22 = vsel %vm836_vm8, %v3075_v29, 0  ;;  %5208 = vmatmul.msk.bf16.gmra.mxu0 %vm873_vm12, %v2862_v11  ;;  %5210 = vmatmul.msk.bf16.vlgmr.msrb.gmra.mxu2 %vm836_vm8, %v2900_v46 }
0x1855   : > { %3094 = vmatpush.bf16.xpose.msra.mxu2 %v3086_v22 }
0x1858   : > { %v3218_v30 = vpop.permute.xlu2 %3217  ;;  %v3069_v42 = vpop.permute.xlu1 %3068 }
0x1859   : > { %v3228_v41 = vsel %vm836_vm8, %v3218_v30, 0 }
0x185b   : > { %v3220_v25 = vpop.permute.xlu0 %3219 }
0x185c   : > { %v3231_v28 = vsel %vm836_vm8, %v3220_v25, 0 }
0x185d   : > { %3095 = vmatpush.bf16.xpose.msra.mxu2 %v3083_v27  ;;  %3239 = vmatpush.bf16.xpose.msra.mxu0 %v3231_v28 }
0x1860   : > { %v3071_v12 = vpop.permute.xlu2 %3070 }
0x1863   : > { %v3214_v50 = vpop.permute.xlu0 %3213 }
0x1864   : > { %5211 = vmatmul.msk.bf16.gmra.mxu2 %vm836_vm8, %v2902_v13 }
0x1865   : > { %3240 = vmatpush.bf16.xpose.msra.mxu0 %v3228_v41 }
0x186b   : > { %v3216_v61 = vpop.permute.xlu0 %3215 }
0x1874   : > { %5219 = vmatmul.msk.bf16.vlgmr.msra.gmra.mxu2 %vm836_vm8, %v3069_v42 }
0x1884   : > { %5220 = vmatmul.msk.bf16.gmra.mxu2 %vm836_vm8, %v3071_v12 }
0x18c1   : > { %v2886_v32 = vpop.f32.mrf.mxu0 }
0x18c9   : > { %v2888_v31 = vpop.f32.mrf.mxu0 }
0x18ca   : > { %v2895_v33 = vpack.c.bf16 %v2888_v31, %v2886_v32 }
0x18cc   : > { %5217 = vmatmul.msk.bf16.vlgmr.msrb.gmra.mxu0 %vm836_vm8, %v2895_v33 }
0x18d1   : > { %v2891_v34 = vpop.f32.mrf.mxu0 }
0x18d2   : > { %v2896_v5 = vpack.c.bf16 %v2891_v34, %v2891_v34 }
0x18d7   : > { %v2928_v37 = vpop.f32.mrf.mxu2 }
0x18d8   : > { %v2937_v38 = vmul.f32 0.35355338, %v2928_v37 }
0x18d9   : > { %v2893_v40 = vpop.f32.mrf.mxu0 }
0x18da   : > { %v2940_v0 = vadd.f32 %v2937_v38, %v6882_v18 }
0x18dc   : > { %5218 = vmatmul.msk.bf16.gmra.mxu0 %vm836_vm8, %v2896_v5  ;;  %v2943_v2 = vsel %vm873_vm12, %v2940_v0, -inf }
0x18dd   : > { %2944 = vmax.xlane.f32.xlu2 %v2943_v2 }
0x18df   : > { %v2930_v44 = vpop.f32.mrf.mxu2 }
0x18e0   : > { %v2938_v45 = vmul.f32 0.35355338, %v2930_v44 }
0x18e2   : > { %v2941_v39 = vadd.f32 %v2938_v45, %v6882_v18 }
0x18e4   : > { %v2946_v60 = vsel %vm873_vm12, %v2941_v39, -inf }
0x18e5   : > { %2947 = vmax.xlane.f32.xlu0 %v2946_v60 }
0x18e7   : > { %v2933_v10 = vpop.f32.mrf.mxu2 }
0x18e8   : > { %v2939_v43 = vmul.f32 0.35355338, %v2933_v10 }
0x18ea   : > { %v2942_v49 = vadd.f32 %v2939_v43, %v6882_v18 }
0x18ec   : > { %5226 = vmatmul.msk.bf16.vlgmr.msra.gmra.mxu0 %vm836_vm8, %v3214_v50  ;;  %v2949_v53 = vsel %vm873_vm12, %v2942_v49, -inf }
0x18ed   : > { %2950 = vmax.xlane.f32.xlu1 %v2949_v53 }
0x18ef   : > { %v2935_v54 = vpop.f32.mrf.mxu2 }
0x18f7   : > { %v3097_v1 = vpop.f32.mrf.mxu2 }
0x18f8   : > { %v3106_v57 = vmul.f32 0.35355338, %v3097_v1 }
0x18fa   : > { %v3109_v59 = vadd.f32 %v3106_v57, %v6882_v18 }
0x18fc   : > { %5227 = vmatmul.msk.bf16.gmra.mxu0 %vm836_vm8, %v3216_v61  ;;  %v3112_v62 = vsel %vm873_vm12, %v3109_v59, -inf }
0x18fd   : > { %3113 = vmax.xlane.f32.xlu2 %v3112_v62 }
0x18ff   : > { %v3099_v63 = vpop.f32.mrf.mxu2 }
0x1900   : > { %v3107_v14 = vmul.f32 0.35355338, %v3099_v63 }
0x1902   : > { %v3110_v3 = vadd.f32 %v3107_v14, %v6882_v18 }
0x1904   : > { %v3115_v47 = vsel %vm873_vm12, %v3110_v3, -inf }
0x1905   : > { %3116 = vmax.xlane.f32.xlu0 %v3115_v47 }
0x1907   : > { %v3102_v20 = vpop.f32.mrf.mxu2 }
0x1908   : > { %v3108_v12 = vmul.f32 0.35355338, %v3102_v20 }
0x190a   : > { %v6977_v34 = vadd.f32 %v3108_v12, %v6882_v18 }
0x190c   : > { %v3118_v37 = vsel %vm873_vm12, %v6977_v34, -inf }
0x190f   : > { %v3104_v58 = vpop.f32.mrf.mxu2 }
0x1949   : > { %v6952_v36 = vpop.f32.mrf.mxu0 }
0x1950   : > { %v2945_v4 = vpop.xlane.xlu2 %2944 }
0x1951   : > { %v2952_v52 = vsub.f32 %v2940_v0, %v2945_v4  ;;  %v6954_v26 = vpop.f32.mrf.mxu0 }
0x1953   : > { %v2955_v7 = vmul.f32 1.442695, %v2952_v52 }
0x1955   : > { %5765 = vpow2.f32 %v2955_v7 }
0x1958   : > { %v2948_v9 = vpop.xlane.xlu0 %2947 }
0x1959   : > { %v2953_v8 = vsub.f32 %v2941_v39, %v2948_v9  ;;  %v6956_v55 = vpop.f32.mrf.mxu0 }
0x195b   : > { %v6958_v15 = vpop.eup %5765  ;;  %v2957_v16 = vmul.f32 1.442695, %v2953_v8 }
0x195c   : > { %v2961_v17 = vsel %vm873_vm12, %v6958_v15, 0.0 }
0x195d   : > { %5767 = vpow2.f32 %v2957_v16  ;;  %2962 = vadd.xlane.f32.xlu0 %v2961_v17 }
0x1960   : > { %v2951_v19 = vpop.xlane.xlu1 %2950 }
0x1961   : > { %v3066_v46 = vpop.f32.mrf.mxu0  ;;  %v2954_v11 = vsub.f32 %v2942_v49, %v2951_v19 }
0x1963   : > { %v6962_v13 = vpop.eup %5767  ;;  %v2959_v29 = vmul.f32 1.442695, %v2954_v11 }
0x1964   : > { %v2964_v21 = vsel %vm873_vm12, %v6962_v13, 0.0 }
0x1965   : > { %2965 = vadd.xlane.f32.xlu2 %v2964_v21  ;;  %5769 = vpow2.f32 %v2959_v29 }
0x1969   : > { %v3242_v22 = vpop.f32.mrf.mxu0 }
0x196a   : > { %v3251_v24 = vmul.f32 0.35355338, %v3242_v22 }
0x196b   : > { %v6970_v41 = vpop.eup %5769 }
0x196c   : > { %v3254_v25 = vadd.f32 %v3251_v24, %v6882_v18  ;;  %v2967_v31 = vsel %vm873_vm12, %v6970_v41, 0.0 }
0x196e   : > { %v3257_v27 = vsel %vm873_vm12, %v3254_v25, -inf }
0x196f   : > { %3258 = vmax.xlane.f32.xlu2 %v3257_v27 }
0x1970   : > { %v3114_v40 = vpop.xlane.xlu2 %3113 }
0x1971   : > { %v3244_v28 = vpop.f32.mrf.mxu0  ;;  %2978 = vrot.lane.b32.xlu0 %v6865_v56, %s7624_s19  ;;  %v3121_v5 = vsub.f32 %v3109_v59, %v3114_v40 }
0x1972   : > { %v3252_v30 = vmul.f32 0.35355338, %v3244_v28 }
0x1973   : > { %v3124_v0 = vmul.f32 1.442695, %v3121_v5 }
0x1974   : > { %v3255_v42 = vadd.f32 %v3252_v30, %v6882_v18 }
0x1975   : > { %5771 = vpow2.f32 %v3124_v0 }
0x1976   : > { %v3260_v32 = vsel %vm873_vm12, %v3255_v42, -inf }
0x1977   : > { %3261 = vmax.xlane.f32.xlu1 %v3260_v32  ;;  %2968 = vadd.xlane.f32.xlu2 %v2967_v31 }
0x1978   : > { %v3117_v45 = vpop.xlane.xlu0 %3116 }
0x1979   : > { %v3247_v33 = vpop.f32.mrf.mxu0  ;;  %v3122_v39 = vsub.f32 %v3110_v3, %v3117_v45 }
0x197a   : > { %v3253_v43 = vmul.f32 0.35355338, %v3247_v33 }
0x197b   : > { %v6983_v2 = vpop.eup %5771  ;;  %v3126_v60 = vmul.f32 1.442695, %v3122_v39  ;;  %v5214_v39 = vld [vmem:[%s7552_s6 + $0x24] sm:$0xf] }
0x197c   : > { %v3130_v44 = vsel %vm873_vm12, %v6983_v2, 0.0  ;;  %v3256_v50 = vadd.f32 %v3253_v43, %v6882_v18  ;;  %v3021_v43 = vsel %vm616_vm2, %v5214_v39, 0 }
0x197d   : > { %5773 = vpow2.f32 %v3126_v60  ;;  %3030 = vmatpush.bf16.msrb.mxu3 %v3021_v43 }
0x197e   : > { %v3263_v53 = vsel %vm873_vm12, %v3256_v50, -inf }
0x197f   : > { %3119 = vmax.xlane.f32.xlu2 %v3118_v37 }
0x1981   : > { %v3249_v38 = vpop.f32.mrf.mxu0 }
0x1983   : > { %v6991_v10 = vpop.eup %5773 }
0x1984   : > { %v3133_v49 = vsel %vm873_vm12, %v6991_v10, 0.0 }
0x1990   : > { %2980 = vrot.lane.b32.xlu1 %v6869_v23, %s7624_s19 }
0x1997   : > { %3149 = vrot.lane.b32.xlu2 %v6869_v23, %s7625_s28 }
0x199b   : > { %3131 = vadd.xlane.f32.xlu0 %v3130_v44 }
0x19af   : > { %3294 = vrot.lane.b32.xlu0 %v6869_v23, %s7626_s3 }
0x19ba   : > { %3134 = vadd.xlane.f32.xlu1 %v3133_v49 }
0x19c0   : > { %3264 = vmax.xlane.f32.xlu2 %v3263_v53 }
0x19d0   : > { %v2963_v58 = vpop.xlane.xlu0 %2962 }
0x19d3   : > { %3147 = vrot.lane.b32.xlu1 %v6865_v56, %s7625_s28 }
0x19d8   : > { %v2966_v54 = vpop.xlane.xlu2 %2965 }
0x19e2   : > { %v3259_v1 = vpop.xlane.xlu2 %3258 }
0x19e3   : > { %v3266_v57 = vsub.f32 %v3254_v25, %v3259_v1  ;;  %v2979_v19 = vpop.permute.xlu0 %2978 }
0x19e5   : > { %v3269_v23 = vmul.f32 1.442695, %v3266_v57 }
0x19e7   : > { %5775 = vpow2.f32 %v3269_v23 }
0x19ea   : > { %v3262_v59 = vpop.xlane.xlu1 %3261  ;;  %v2969_v3 = vpop.xlane.xlu2 %2968 }
0x19eb   : > { %v3267_v61 = vsub.f32 %v3255_v42, %v3262_v59 }
0x19ed   : > { %v6999_v62 = vpop.eup %5775  ;;  %v3271_v63 = vmul.f32 1.442695, %v3267_v61 }
0x19ee   : > { %v3275_v14 = vsel %vm873_vm12, %v6999_v62, 0.0 }
0x19ef   : > { %5777 = vpow2.f32 %v3271_v63  ;;  %3276 = vadd.xlane.f32.xlu2 %v3275_v14 }
0x19f0   : > { %5779 = vrcp.f32 %v2966_v54 }
0x19f1   : > { %5781 = vrcp.f32 %v2963_v58 }
0x19f2   : > { %v3120_v4 = vpop.xlane.xlu2 %3119  ;;  %5783 = vrcp.f32 %v2969_v3 }
0x19f3   : > { %v3123_v27 = vsub.f32 %v6977_v34, %v3120_v4 }
0x19f5   : > { %v7003_v47 = vpop.eup %5777  ;;  %v3128_v28 = vmul.f32 1.442695, %v3123_v27 }
0x19f6   : > { %v3278_v20 = vsel %vm873_vm12, %v7003_v47, 0.0  ;;  %v5780_v52 = vpop.eup %5779 }
0x19f7   : > { %3279 = vadd.xlane.f32.xlu2 %v3278_v20  ;;  %v5782_v8 = vpop.eup %5781  ;;  %v2974_v16 = vmul.f32 %v5780_v52, %v6962_v13  ;;  %5785 = vpow2.f32 %v3128_v28 }
0x19f8   : > { %v2973_v46 = vmul.f32 %v5782_v8, %v6958_v15  ;;  %v5784_v29 = vpop.eup %5783 }
0x19f9   : > { %v2975_v22 = vmul.f32 %v5784_v29, %v6970_v41 }
0x19fa   : > { %v3150_v17 = vpop.permute.xlu2 %3149  ;;  %v2976_v11 = vpack.c.bf16 %v2974_v16, %v2973_v46 }
0x19fb   : > { %v3159_v21 = vsel %vm616_vm2, %v3150_v17, 0  ;;  %v2977_v13 = vpack.c.bf16 %v2975_v22, %v2975_v22  ;;  %v5230_v17 = vld [vmem:[%s7552_s6 + $0x2c] sm:$0xf] }
0x19fc   : > { %v3335_v46 = vsel %vm616_vm2, %v5230_v17, 0 }
0x19fd   : > { %v5786_v42 = vpop.eup %5785 }
0x19fe   : > { %v3136_v31 = vsel %vm873_vm12, %v5786_v42, 0.0 }
0x1a02   : > { %v2981_v7 = vpop.permute.xlu1 %2980 }
0x1a03   : > { %v2990_v9 = vsel %vm616_vm2, %v2981_v7, 0 }
0x1a04   : > { %2998 = vmatpush.bf16.msrb.mxu1 %v2990_v9 }
0x1a08   : > { %2999 = vmatpush.bf16.msrb.mxu1 %v2979_v19 }
0x1a0b   : > { %5212 = vmatmul.msk.bf16.vlgmr.msrb.gmra.mxu1 %vm873_vm12, %v2976_v11 }
0x1a0c   : > { %3167 = vmatpush.bf16.msra.mxu1 %v3159_v21 }
0x1a0e   : > { %v3132_v24 = vpop.xlane.xlu0 %3131 }
0x1a0f   : > { %3292 = vrot.lane.b32.xlu2 %v6865_v56, %s7626_s3 }
0x1a1b   : > { %5213 = vmatmul.msk.bf16.gmra.mxu1 %vm873_vm12, %v2977_v13 }
0x1a21   : > { %v3295_v15 = vpop.permute.xlu0 %3294 }
0x1a22   : > { %v3304_v25 = vsel %vm616_vm2, %v3295_v15, 0 }
0x1a23   : > { %3312 = vmatpush.bf16.msrb.mxu2 %v3304_v25 }
0x1a2d   : > { %v3135_v56 = vpop.xlane.xlu1 %3134 }
0x1a33   : > { %v3265_v30 = vpop.xlane.xlu2 %3264 }
0x1a34   : > { %v3268_v12 = vsub.f32 %v3256_v50, %v3265_v30 }
0x1a36   : > { %v3273_v32 = vmul.f32 1.442695, %v3268_v12 }
0x1a38   : > { %5787 = vpow2.f32 %v3273_v32  ;;  %3137 = vadd.xlane.f32.xlu2 %v3136_v31 }
0x1a39   : > { %5789 = vrcp.f32 %v3135_v56 }
0x1a3a   : > { %5791 = vrcp.f32 %v3132_v24 }
0x1a3e   : > { %v5788_v41 = vpop.eup %5787 }
0x1a3f   : > { %v3281_v33 = vsel %vm873_vm12, %v5788_v41, 0.0  ;;  %v5790_v37 = vpop.eup %5789 }
0x1a40   : > { %3282 = vadd.xlane.f32.xlu0 %v3281_v33  ;;  %v5792_v38 = vpop.eup %5791  ;;  %v3143_v34 = vmul.f32 %v5790_v37, %v6991_v10  ;;  %v5580_v33 = vld [vmem:[%s7548_s2 + $0x14] ss:$0 sm:$0xff] }
0x1a41   : > { %v3142_v40 = vmul.f32 %v5792_v38, %v6983_v2 }
0x1a43   : > { %v3145_v0 = vpack.c.bf16 %v3143_v34, %v3142_v40 }
0x1a45   : > { %v3148_v5 = vpop.permute.xlu1 %3147 }
0x1a46   : > { %3168 = vmatpush.bf16.msra.mxu1 %v3148_v5 }
0x1a49   : > { %5221 = vmatmul.msk.bf16.vlgmr.msra.gmra.mxu1 %vm873_vm12, %v3145_v0 }
0x1a4a   : > { %3344 = vmatpush.bf16.msrb.mxu1 %v3335_v46 }
0x1a62   : > { %v3277_v44 = vpop.xlane.xlu2 %3276 }
0x1a63   : > { %5793 = vrcp.f32 %v3277_v44 }
0x1a69   : > { %v5794_v60 = vpop.eup %5793 }
0x1a6a   : > { %v3280_v45 = vpop.xlane.xlu2 %3279  ;;  %v3287_v2 = vmul.f32 %v5794_v60, %v6999_v62  ;;  %v5223_v62 = vld [vmem:[%s7552_s6 + $0x28] sm:$0xf] }
0x1a6b   : > { %5795 = vrcp.f32 %v3280_v45  ;;  %v3190_v14 = vsel %vm616_vm2, %v5223_v62, 0 }
0x1a6c   : > { %3199 = vmatpush.bf16.msra.mxu3 %v3190_v14 }
0x1a71   : > { %v5796_v10 = vpop.eup %5795 }
0x1a72   : > { %v3288_v49 = vmul.f32 %v5796_v10, %v7003_v47  ;;  %v3293_v50 = vpop.permute.xlu2 %3292 }
0x1a73   : > { %3313 = vmatpush.bf16.msrb.mxu2 %v3293_v50 }
0x1a74   : > { %v3290_v53 = vpack.c.bf16 %v3288_v49, %v3287_v2 }
0x1a76   : > { %5228 = vmatmul.msk.bf16.vlgmr.msrb.gmra.mxu2 %vm873_vm12, %v3290_v53 }
0x1a88   : > { %v3001_v54 = vpop.f32.mrf.mxu1 }
0x1a90   : > { %v3003_v1 = vpop.f32.mrf.mxu1 }
0x1a91   : > { %v3010_v57 = vpack.c.bf16 %v3003_v1, %v3001_v54 }
0x1a93   : > { %5215 = vmatmul.msk.bf16.vlgmr.msrb.gmra.mxu3 %vm836_vm8, %v3010_v57 }
0x1a98   : > { %v3006_v23 = vpop.f32.mrf.mxu1 }
0x1a99   : > { %v3011_v61 = vpack.c.bf16 %v3006_v23, %v3006_v23 }
0x1aa0   : > { %v3008_v59 = vpop.f32.mrf.mxu1 }
0x1aa3   : > { %5216 = vmatmul.msk.bf16.gmra.mxu3 %vm836_vm8, %v3011_v61 }
0x1aab   : > { %v3138_v63 = vpop.xlane.xlu2 %3137 }
0x1aac   : > { %5797 = vrcp.f32 %v3138_v63 }
0x1ab2   : > { %v5798_v3 = vpop.eup %5797 }
0x1ab3   : > { %v3144_v47 = vmul.f32 %v5798_v3, %v5786_v42  ;;  %v3283_v20 = vpop.xlane.xlu0 %3282 }
0x1ab4   : > { %5799 = vrcp.f32 %v3283_v20 }
0x1ab5   : > { %v3146_v58 = vpack.c.bf16 %v3144_v47, %v3144_v47 }
0x1ab7   : > { %5222 = vmatmul.msk.bf16.gmra.mxu1 %vm873_vm12, %v3146_v58 }
0x1aba   : > { %v5800_v4 = vpop.eup %5799 }
0x1abb   : > { %v3289_v52 = vmul.f32 %v5800_v4, %v5788_v41 }
0x1abd   : > { %v3291_v7 = vpack.c.bf16 %v3289_v52, %v3289_v52  ;;  %v5474_v52 = vld [vmem:[%s7553_s7 + $0x28] sm:$0xff] }
0x1abe   : > { %3475 = vmatpush.bf16.msrb.mxu3 %v5474_v52 }
0x1abf   : > { %5229 = vmatmul.msk.bf16.gmra.mxu2 %vm873_vm12, %v3291_v7 }
0x1ac6   : > { %v3170_v9 = vpop.f32.mrf.mxu1 }
0x1ace   : > { %v3172_v8 = vpop.f32.mrf.mxu1 }
0x1acf   : > { %v3179_v16 = vpack.c.bf16 %v3172_v8, %v3170_v9  ;;  %v5473_v8 = vld [vmem:[%s7553_s7 + $0x20] sm:$0xff] }
0x1ad0   : > { %3476 = vmatpush.bf16.msrb.mxu3 %v5473_v8 }
0x1ad1   : > { %5224 = vmatmul.msk.bf16.vlgmr.msra.gmra.mxu3 %vm836_vm8, %v3179_v16 }
0x1af9   : > { %v3315_v19 = vpop.f32.mrf.mxu2 }
0x1b01   : > { %v3317_v21 = vpop.f32.mrf.mxu2 }
0x1b02   : > { %v3324_v11 = vpack.c.bf16 %v3317_v21, %v3315_v19 }
0x1b04   : > { %5231 = vmatmul.msk.bf16.vlgmr.msrb.gmra.mxu1 %vm836_vm8, %v3324_v11 }
0x1b16   : > { %v3032_v29 = vpop.f32.mrf.mxu3 }
0x1b17   : > { %v3060_v32 = vadd.f32 %v6952_v36, %v3032_v29 }
0x1b1e   : > { %v3034_v22 = vpop.f32.mrf.mxu3 }
0x1b1f   : > { %v3062_v34 = vadd.f32 %v6954_v26, %v3034_v22 }
0x1b26   : > { %v3037_v24 = vpop.f32.mrf.mxu3 }
0x1b27   : > { %v3065_v26 = vadd.f32 %v6956_v55, %v3037_v24 }
0x1b2e   : > { %v3039_v13 = vpop.f32.mrf.mxu3 }
0x1b34   : > { %v3175_v15 = vpop.f32.mrf.mxu1 }
0x1b35   : > { %v3180_v25 = vpack.c.bf16 %v3175_v15, %v3175_v15 }
0x1b37   : > { %5225 = vmatmul.msk.bf16.gmra.mxu3 %vm836_vm8, %v3180_v25 }
0x1b3c   : > { %v3177_v27 = vpop.f32.mrf.mxu1 }
0x1b42   : > { %v3320_v28 = vpop.f32.mrf.mxu2 }
0x1b43   : > { %v3325_v30 = vpack.c.bf16 %v3320_v28, %v3320_v28 }
0x1b45   : > { %5232 = vmatmul.msk.bf16.gmra.mxu1 %vm836_vm8, %v3325_v30 }
0x1b4a   : > { %v3322_v42 = vpop.f32.mrf.mxu2 }
0x1b54   : > { %v3201_v12 = vpop.f32.mrf.mxu3 }
0x1b55   : > { %v3210_v56 = vadd.f32 %v3201_v12, %v3060_v32  ;;  %v5581_v12 = vld [vmem:[%s7548_s2 + $0x12] ss:$0 sm:$0xff] }
0x1b5c   : > { %v3203_v38 = vpop.f32.mrf.mxu3 }
0x1b5d   : > { %v3211_v5 = vadd.f32 %v3203_v38, %v3062_v34 }
0x1b81   : > { %v3346_v31 = vpop.f32.mrf.mxu1 }
0x1b82   : > { %v3355_v41 = vadd.f32 %v3346_v31, %v3210_v56 }
0x1b84   : > { %v3358_v37 = vadd.f32 %v3355_v41, %v6822_v51  ;;  %v5582_v41 = vld [vmem:[%s7548_s2 + $0x13] ss:$0 sm:$0xff] }
0x1b86   : > { %v7052_v40 = vadd.f32 %v5580_v33, %v3358_v37 }
0x1b88   : > { %v3368_v0 = vsel %vm569_vm0, %v7052_v40, 0.0 }
0x1b89   : > { %v3348_v44 = vpop.f32.mrf.mxu1  ;;  %3369 = vadd.xlane.f32.xlu1 %v3368_v0 }
0x1b8a   : > { %v3356_v36 = vadd.f32 %v3348_v44, %v3211_v5 }
0x1b8c   : > { %v3359_v45 = vadd.f32 %v3356_v36, %v6827_v6 }
0x1b8e   : > { %v7057_v39 = vadd.f32 %v5580_v33, %v3359_v45 }
0x1b90   : > { %v3371_v60 = vsel %vm569_vm0, %v7057_v39, 0.0 }
0x1b91   : > { %3372 = vadd.xlane.f32.xlu2 %v3371_v60 }
0x1bba   : > { %v3206_v51 = vpop.f32.mrf.mxu3 }
0x1bbb   : > { %v3212_v43 = vadd.f32 %v3206_v51, %v3065_v26 }
0x1bc2   : > { %v3208_v10 = vpop.f32.mrf.mxu3  ;;  %v3351_v2 = vpop.f32.mrf.mxu1 }
0x1bc3   : > { %v3357_v49 = vadd.f32 %v3351_v2, %v3212_v43 }
0x1bc5   : > { %v3360_v50 = vadd.f32 %v3357_v49, %v6832_v35 }
0x1bc7   : > { %v7063_v53 = vadd.f32 %v5580_v33, %v3360_v50 }
0x1bc9   : > { %v3374_v6 = vsel %vm569_vm0, %v7063_v53, 0.0 }
0x1bca   : > { %v3353_v54 = vpop.f32.mrf.mxu1  ;;  %3375 = vadd.xlane.f32.xlu0 %v3374_v6 }
0x1bfc   : > { %v3370_v1 = vpop.xlane.xlu1 %3369 }
0x1bfd   : > { %v3377_v57 = vmul.f32 %v3370_v1, %v6206_v48 }
0x1bff   : > { %v3380_v23 = vsub.f32 %v7052_v40, %v3377_v57  ;;  %v5482_v57 = vld [vmem:[%s7554_s8 + $0xb8] sm:$0xff] }
0x1c00   : > { %3619 = vmatpush.bf16.msrb.mxu0 %v5482_v57 }
0x1c01   : > { %v3383_v59 = vmul.f32 %v3380_v23, %v3380_v23 }
0x1c03   : > { %v3386_v55 = vsel %vm569_vm0, %v3383_v59, 0.0  ;;  %v5480_v59 = vld [vmem:[%s7554_s8 + $0xa8] sm:$0xff] }
0x1c04   : > { %3387 = vadd.xlane.f32.xlu2 %v3386_v55  ;;  %v3373_v61 = vpop.xlane.xlu2 %3372  ;;  %v5479_v55 = vld [vmem:[%s7554_s8 + $0xa0] sm:$0xff] }
0x1c05   : > { %v3378_v63 = vmul.f32 %v3373_v61, %v6206_v48  ;;  %v5478_v61 = vld [vmem:[%s7554_s8 + $0x98] sm:$0xff] }
0x1c07   : > { %v3381_v35 = vsub.f32 %v7057_v39, %v3378_v63  ;;  %v5583_v63 = vld [vmem:[%s7548_s2 + $0x17] ss:$0 sm:$0xff] }
0x1c09   : > { %v3384_v62 = vmul.f32 %v3381_v35, %v3381_v35 }
0x1c0b   : > { %v3389_v14 = vsel %vm569_vm0, %v3384_v62, 0.0  ;;  %v5477_v62 = vld [vmem:[%s7554_s8 + $0x90] sm:$0xff] }
0x1c0c   : > { %3390 = vadd.xlane.f32.xlu1 %v3389_v14 }
0x1c3d   : > { %v3376_v3 = vpop.xlane.xlu0 %3375 }
0x1c3e   : > { %v3379_v47 = vmul.f32 %v3376_v3, %v6206_v48 }
0x1c40   : > { %v3382_v20 = vsub.f32 %v7063_v53, %v3379_v47  ;;  %v5476_v47 = vld [vmem:[%s7554_s8 + $0x88] sm:$0xff] }
0x1c42   : > { %v3385_v58 = vmul.f32 %v3382_v20, %v3382_v20 }
0x1c44   : > { %v3392_v4 = vsel %vm569_vm0, %v3385_v58, 0.0 }
0x1c45   : > { %3393 = vadd.xlane.f32.xlu0 %v3392_v4  ;;  %v5475_v4 = vld [vmem:[%s7554_s8 + $0x80] sm:$0xff] }
0x1c77   : > { %v3388_v7 = vpop.xlane.xlu2 %3387 }
0x1c78   : > { %v3395_v9 = vmul.f32 %v3388_v7, %v6206_v48 }
0x1c7a   : > { %v3398_v16 = vadd.f32 1e-05, %v3395_v9 }
0x1c7c   : > { %5801 = vrsqrt.f32 %v3398_v16  ;;  %vm3407_vm4 = vweird.f32 %v3398_v16 }
0x1c7f   : > { %v3391_v17 = vpop.xlane.xlu1 %3390 }
0x1c80   : > { %v3396_v46 = vmul.f32 %v3391_v17, %v6206_v48 }
0x1c82   : > { %v5802_v19 = vpop.eup %5801  ;;  %v3399_v21 = vadd.f32 1e-05, %v3396_v46 }
0x1c83   : > { %v3402_v11 = vmul.f32 %v5802_v19, %v3398_v16  ;;  %vm3408_vm10 = vweird.f32 %v5802_v19 }
0x1c84   : > { %5803 = vrsqrt.f32 %v3399_v21  ;;  %vm3409_vm5 = vmor %vm3407_vm4, %vm3408_vm10  ;;  %vm3417_vm7 = vweird.f32 %v3399_v21 }
0x1c85   : > { %v3403_v29 = vmul.f32 %v5802_v19, %v3402_v11 }
0x1c87   : > { %v3404_v22 = vmul.f32 0.5, %v3403_v29 }
0x1c89   : > { %v3405_v24 = vsub.f32 1.5, %v3404_v22 }
0x1c8a   : > { %v5804_v13 = vpop.eup %5803 }
0x1c8b   : > { %v3406_v15 = vmul.f32 %v5802_v19, %v3405_v24  ;;  %v3412_v25 = vmul.f32 %v5804_v13, %v3399_v21  ;;  %vm3418_vm6 = vweird.f32 %v5804_v13 }
0x1c8c   : > { %vm3419_vm9 = vmor %vm3417_vm7, %vm3418_vm6 }
0x1c8d   : > { %v3413_v27 = vmul.f32 %v5804_v13, %v3412_v25  ;;  %v3410_v28 = vsel %vm3409_vm5, %v5802_v19, %v3406_v15 }
0x1c8e   : > { %v3431_v32 = vmul.f32 %v3410_v28, %v3380_v23  ;;  %v5481_v23 = vld [vmem:[%s7554_s8 + $0xb0] sm:$0xff] }
0x1c8f   : > { %v3414_v30 = vmul.f32 0.5, %v3413_v27  ;;  %3620 = vmatpush.bf16.msrb.mxu0 %v5481_v23 }
0x1c90   : > { %v3435_v33 = vmul.f32 %v5581_v12, %v3431_v32 }
0x1c91   : > { %v3415_v42 = vsub.f32 1.5, %v3414_v30 }
0x1c92   : > { %v3439_v34 = vadd.f32 %v5582_v41, %v3435_v33 }
0x1c93   : > { %v3416_v56 = vmul.f32 %v5804_v13, %v3415_v42  ;;  %3621 = vmatpush.bf16.msrb.mxu0 %v5480_v59 }
0x1c95   : > { %v3420_v31 = vsel %vm3419_vm9, %v5804_v13, %v3416_v56 }
0x1c96   : > { %v3432_v37 = vmul.f32 %v3420_v31, %v3381_v35 }
0x1c97   : > { %3622 = vmatpush.bf16.msrb.mxu0 %v5479_v55 }
0x1c98   : > { %v3436_v38 = vmul.f32 %v5581_v12, %v3432_v37 }
0x1c9a   : > { %v3440_v5 = vadd.f32 %v5582_v41, %v3436_v38 }
0x1c9b   : > { %3623 = vmatpush.bf16.msrb.mxu0 %v5478_v61  ;;  %v5584_v61 = vld [vmem:[%s7548_s2 + $0x15] ss:$0 sm:$0xff] }
0x1c9c   : > { %v3448_v0 = vpack.c.bf16 %v3440_v5, %v3439_v34 }
0x1c9e   : > { %5249 = vmatmul.msk.bf16.vlgmr.msrb.gmra.mxu3 %vm569_vm0, %v3448_v0 }
0x1c9f   : > { %3624 = vmatpush.bf16.msrb.mxu0 %v5477_v62 }
0x1ca3   : > { %3625 = vmatpush.bf16.msrb.mxu0 %v5476_v47 }
0x1ca7   : > { %3626 = vmatpush.bf16.msrb.mxu0 %v5475_v4 }
0x1cb8   : > { %v3394_v44 = vpop.xlane.xlu0 %3393 }
0x1cb9   : > { %v3397_v36 = vmul.f32 %v3394_v44, %v6206_v48 }
0x1cbb   : > { %v3400_v45 = vadd.f32 1e-05, %v3397_v36 }
0x1cbd   : > { %5805 = vrsqrt.f32 %v3400_v45  ;;  %vm3427_vm13 = vweird.f32 %v3400_v45 }
0x1cc3   : > { %v5806_v60 = vpop.eup %5805 }
0x1cc4   : > { %v3422_v51 = vmul.f32 %v5806_v60, %v3400_v45  ;;  %vm3428_vm11 = vweird.f32 %v5806_v60 }
0x1cc5   : > { %vm3429_vm14 = vmor %vm3427_vm13, %vm3428_vm11 }
0x1cc6   : > { %v3423_v26 = vmul.f32 %v5806_v60, %v3422_v51 }
0x1cc8   : > { %v3424_v43 = vmul.f32 0.5, %v3423_v26 }
0x1cca   : > { %v3425_v10 = vsub.f32 1.5, %v3424_v43 }
0x1ccc   : > { %v3426_v2 = vmul.f32 %v5806_v60, %v3425_v10 }
0x1cce   : > { %v3430_v49 = vsel %vm3429_vm14, %v5806_v60, %v3426_v2 }
0x1ccf   : > { %v3433_v50 = vmul.f32 %v3430_v49, %v3382_v20 }
0x1cd1   : > { %v3437_v6 = vmul.f32 %v5581_v12, %v3433_v50 }
0x1cd3   : > { %v3441_v54 = vadd.f32 %v5582_v41, %v3437_v6 }
0x1cd5   : > { %v3449_v1 = vpack.c.bf16 %v3441_v54, %v3441_v54 }
0x1cd7   : > { %5250 = vmatmul.msk.bf16.gmra.mxu3 %vm569_vm0, %v3449_v1 }
0x1d21   : > { %v3478_v35 = vpop.f32.mrf.mxu3 }
0x1d22   : > { %v3479_v14 = vadd.f32 %v5583_v63, %v3478_v35 }
0x1d24   : > { %v5251_v3 = vmul.f32 -1.702, %v3479_v14 }
0x1d26   : > { %v3493_v20 = vmul.f32 1.442695, %v5251_v3 }
0x1d28   : > { %5807 = vpow2.f32 %v3493_v20 }
0x1d29   : > { %v3480_v58 = vpop.f32.mrf.mxu3 }
0x1d2a   : > { %v3481_v52 = vadd.f32 %v5583_v63, %v3480_v58 }
0x1d2c   : > { %v5252_v7 = vmul.f32 -1.702, %v3481_v52 }
0x1d2e   : > { %v5808_v9 = vpop.eup %5807  ;;  %v3495_v8 = vmul.f32 1.442695, %v5252_v7 }
0x1d2f   : > { %v3499_v16 = vadd.f32 1.0, %v5808_v9 }
0x1d30   : > { %5809 = vpow2.f32 %v3495_v8 }
0x1d31   : > { %5811 = vrcp.f32 %v3499_v16  ;;  %v3513_v15 = vand.u32 2147483648, %v3499_v16  ;;  %vm3507_vm1 = vweird.f32 %v3499_v16  ;;  %v3511_v25 = vand.u32 2147483647, %v3499_v16 }
0x1d33   : > { %v3514_v32 = vor.u32 1.1754944e-38, %v3513_v15  ;;  %vm3512_vm4 = vcmp.eq.f32.partialorder %v3511_v25, 8.507059e+37 }
0x1d36   : > { %v5810_v17 = vpop.eup %5809 }
0x1d37   : > { %v5812_v46 = vpop.eup %5811  ;;  %v3500_v19 = vadd.f32 1.0, %v5810_v17 }
0x1d38   : > { %v3503_v21 = vmul.f32 %v5812_v46, %v3499_v16  ;;  %vm3508_vm15 = vweird.f32 %v5812_v46 }
0x1d39   : > { %5813 = vrcp.f32 %v3500_v19  ;;  %vm3509_vm3 = vmor %vm3507_vm1, %vm3508_vm15  ;;  %v3528_v28 = vand.u32 2147483648, %v3500_v19  ;;  %v3526_v12 = vand.u32 2147483647, %v3500_v19  ;;  %vm3522_vm5 = vweird.f32 %v3500_v19 }
0x1d3a   : > { %v3504_v11 = vsub.f32 1.0, %v3503_v21 }
0x1d3b   : > { %v3529_v41 = vor.u32 1.1754944e-38, %v3528_v28  ;;  %vm3527_vm7 = vcmp.eq.f32.partialorder %v3526_v12, 8.507059e+37 }
0x1d3c   : > { %v3505_v29 = vmul.f32 %v5812_v46, %v3504_v11 }
0x1d3e   : > { %v3506_v24 = vadd.f32 %v5812_v46, %v3505_v29 }
0x1d3f   : > { %v5814_v22 = vpop.eup %5813 }
0x1d40   : > { %v3518_v13 = vmul.f32 %v5814_v22, %v3500_v19  ;;  %v3510_v30 = vsel %vm3509_vm3, %v5812_v46, %v3506_v24  ;;  %vm3523_vm10 = vweird.f32 %v5814_v22 }
0x1d41   : > { %v3515_v31 = vsel %vm3512_vm4, %v3514_v32, %v3510_v30  ;;  %vm3524_vm6 = vmor %vm3522_vm5, %vm3523_vm10 }
0x1d42   : > { %v3519_v27 = vsub.f32 1.0, %v3518_v13  ;;  %v3547_v38 = vmul.f32 %v3515_v31, %v3479_v14 }
0x1d44   : > { %v3520_v42 = vmul.f32 %v5814_v22, %v3519_v27  ;;  %v5484_v27 = vld [vmem:[%s7551_s5 + $0x38] sm:$0xff] }
0x1d45   : > { %3750 = vmatpush.bf16.msra.mxu2 %v5484_v27 }
0x1d46   : > { %v3521_v56 = vadd.f32 %v5814_v22, %v3520_v42  ;;  %v5483_v42 = vld [vmem:[%s7551_s5 + $0x30] sm:$0xff] }
0x1d48   : > { %v3525_v33 = vsel %vm3524_vm6, %v5814_v22, %v3521_v56 }
0x1d49   : > { %v3530_v37 = vsel %vm3527_vm7, %v3529_v41, %v3525_v33  ;;  %3751 = vmatpush.bf16.msra.mxu2 %v5483_v42 }
0x1d4a   : > { %v3548_v34 = vmul.f32 %v3530_v37, %v3481_v52 }
0x1d4c   : > { %v3568_v5 = vpack.c.bf16 %v3548_v34, %v3547_v38 }
0x1d4e   : > { %3627 = vmatmul.bf16.vlgmr.msrb.gmra.mxu0 %v3568_v5 }
0x1d5a   : > { %v3483_v0 = vpop.f32.mrf.mxu3 }
0x1d5b   : > { %v3484_v44 = vadd.f32 %v5583_v63, %v3483_v0 }
0x1d5d   : > { %v5253_v36 = vmul.f32 -1.702, %v3484_v44 }
0x1d5f   : > { %v3497_v45 = vmul.f32 1.442695, %v5253_v36 }
0x1d61   : > { %5815 = vpow2.f32 %v3497_v45 }
0x1d62   : > { %v3485_v60 = vpop.f32.mrf.mxu3 }
0x1d67   : > { %v5816_v51 = vpop.eup %5815 }
0x1d68   : > { %v3501_v26 = vadd.f32 1.0, %v5816_v51 }
0x1d6a   : > { %5817 = vrcp.f32 %v3501_v26  ;;  %v3543_v49 = vand.u32 2147483648, %v3501_v26  ;;  %v3541_v6 = vand.u32 2147483647, %v3501_v26  ;;  %vm3537_vm11 = vweird.f32 %v3501_v26 }
0x1d6c   : > { %v3544_v1 = vor.u32 1.1754944e-38, %v3543_v49  ;;  %vm3542_vm14 = vcmp.eq.f32.partialorder %v3541_v6, 8.507059e+37  ;;  %v5586_v49 = vld [vmem:[%s7548_s2 + $0x19] ss:$0 sm:$0xff] }
0x1d70   : > { %v5818_v43 = vpop.eup %5817 }
0x1d71   : > { %v3533_v10 = vmul.f32 %v5818_v43, %v3501_v26  ;;  %vm3538_vm9 = vweird.f32 %v5818_v43  ;;  %v5585_v26 = vld [vmem:[%s7548_s2 + $0x18] ss:$0 sm:$0xff] }
0x1d72   : > { %vm3539_vm13 = vmor %vm3537_vm11, %vm3538_vm9 }
0x1d73   : > { %v3534_v2 = vsub.f32 1.0, %v3533_v10 }
0x1d75   : > { %v3535_v50 = vmul.f32 %v5818_v43, %v3534_v2 }
0x1d77   : > { %v3536_v54 = vadd.f32 %v5818_v43, %v3535_v50 }
0x1d79   : > { %v3540_v57 = vsel %vm3539_vm13, %v5818_v43, %v3536_v54 }
0x1d7a   : > { %v3545_v23 = vsel %vm3542_vm14, %v3544_v1, %v3540_v57 }
0x1d7b   : > { %v3549_v59 = vmul.f32 %v3545_v23, %v3484_v44 }
0x1d7d   : > { %v3569_v55 = vpack.c.bf16 %v3549_v59, %v3549_v59 }
0x1d7f   : > { %3632 = vmatmul.bf16.gmra.mxu0 %v3569_v55 }
0x1dcb   : > { %v3628_v63 = vpop.f32.mrf.mxu0 }
0x1dcc   : > { %v3629_v35 = vadd.f32 %v5584_v61, %v3628_v63 }
0x1dce   : > { %v7124_v62 = vadd.f32 %v3629_v35, %v7052_v40 }
0x1dd0   : > { %v3643_v14 = vsel %vm569_vm0, %v7124_v62, 0.0 }
0x1dd1   : > { %3644 = vadd.xlane.f32.xlu2 %v3643_v14 }
0x1dd3   : > { %v3630_v3 = vpop.f32.mrf.mxu0 }
0x1dd4   : > { %v3631_v47 = vadd.f32 %v5584_v61, %v3630_v3 }
0x1dd6   : > { %v7129_v20 = vadd.f32 %v3631_v47, %v7057_v39 }
0x1dd8   : > { %v3646_v58 = vsel %vm569_vm0, %v7129_v20, 0.0 }
0x1dd9   : > { %3647 = vadd.xlane.f32.xlu1 %v3646_v58 }
0x1dfc   : > { %v3633_v4 = vpop.f32.mrf.mxu0 }
0x1dfd   : > { %v3634_v52 = vadd.f32 %v5584_v61, %v3633_v4 }
0x1dff   : > { %v7134_v7 = vadd.f32 %v3634_v52, %v7063_v53 }
0x1e01   : > { %v3649_v40 = vsel %vm569_vm0, %v7134_v7, 0.0 }
0x1e02   : > { %3650 = vadd.xlane.f32.xlu0 %v3649_v40 }
0x1e04   : > { %v3635_v9 = vpop.f32.mrf.mxu0 }
0x1e44   : > { %v3645_v8 = vpop.xlane.xlu2 %3644 }
0x1e45   : > { %v3652_v16 = vmul.f32 %v3645_v8, %v6206_v48 }
0x1e47   : > { %v3655_v39 = vsub.f32 %v7124_v62, %v3652_v16 }
0x1e49   : > { %v3658_v17 = vmul.f32 %v3655_v39, %v3655_v39 }
0x1e4b   : > { %v3661_v46 = vsel %vm569_vm0, %v3658_v17, 0.0 }
0x1e4c   : > { %v3648_v19 = vpop.xlane.xlu1 %3647  ;;  %3662 = vadd.xlane.f32.xlu2 %v3661_v46 }
0x1e4d   : > { %v3653_v21 = vmul.f32 %v3648_v19, %v6206_v48 }
0x1e4f   : > { %v3656_v53 = vsub.f32 %v7129_v20, %v3653_v21 }
0x1e51   : > { %v3659_v11 = vmul.f32 %v3656_v53, %v3656_v53 }
0x1e53   : > { %v3664_v29 = vsel %vm569_vm0, %v3659_v11, 0.0 }
0x1e54   : > { %3665 = vadd.xlane.f32.xlu1 %v3664_v29 }
0x1e75   : > { %v3651_v22 = vpop.xlane.xlu0 %3650 }
0x1e76   : > { %v3654_v24 = vmul.f32 %v3651_v22, %v6206_v48 }
0x1e78   : > { %v3657_v13 = vsub.f32 %v7134_v7, %v3654_v24 }
0x1e7a   : > { %v3660_v15 = vmul.f32 %v3657_v13, %v3657_v13 }
0x1e7c   : > { %v3667_v25 = vsel %vm569_vm0, %v3660_v15, 0.0 }
0x1e7d   : > { %3668 = vadd.xlane.f32.xlu0 %v3667_v25 }
0x1ebf   : > { %v3663_v28 = vpop.xlane.xlu2 %3662 }
0x1ec0   : > { %v3670_v30 = vmul.f32 %v3663_v28, %v6206_v48 }
0x1ec2   : > { %v3673_v12 = vadd.f32 1e-05, %v3670_v30 }
0x1ec4   : > { %5819 = vrsqrt.f32 %v3673_v12  ;;  %vm3682_vm1 = vweird.f32 %v3673_v12 }
0x1ec7   : > { %v3666_v32 = vpop.xlane.xlu1 %3665 }
0x1ec8   : > { %v3671_v56 = vmul.f32 %v3666_v32, %v6206_v48 }
0x1eca   : > { %v5820_v31 = vpop.eup %5819  ;;  %v3674_v41 = vadd.f32 1e-05, %v3671_v56 }
0x1ecb   : > { %v3677_v33 = vmul.f32 %v5820_v31, %v3673_v12  ;;  %vm3683_vm15 = vweird.f32 %v5820_v31 }
0x1ecc   : > { %5821 = vrsqrt.f32 %v3674_v41  ;;  %vm3684_vm3 = vmor %vm3682_vm1, %vm3683_vm15  ;;  %vm3692_vm4 = vweird.f32 %v3674_v41 }
0x1ecd   : > { %v3678_v37 = vmul.f32 %v5820_v31, %v3677_v33 }
0x1ecf   : > { %v3679_v38 = vmul.f32 0.5, %v3678_v37 }
0x1ed1   : > { %v3680_v34 = vsub.f32 1.5, %v3679_v38 }
0x1ed2   : > { %v5822_v5 = vpop.eup %5821 }
0x1ed3   : > { %v3681_v0 = vmul.f32 %v5820_v31, %v3680_v34  ;;  %v3687_v44 = vmul.f32 %v5822_v5, %v3674_v41  ;;  %vm3693_vm10 = vweird.f32 %v5822_v5 }
0x1ed4   : > { %vm3694_vm5 = vmor %vm3692_vm4, %vm3693_vm10 }
0x1ed5   : > { %v3688_v36 = vmul.f32 %v5822_v5, %v3687_v44  ;;  %v3685_v45 = vsel %vm3684_vm3, %v5820_v31, %v3681_v0 }
0x1ed6   : > { %v3706_v43 = vmul.f32 %v3685_v45, %v3655_v39  ;;  %v5587_v39 = vld [vmem:[%s7548_s2 + $0x1e] ss:$0 sm:$0xff] }
0x1ed7   : > { %v3689_v60 = vmul.f32 0.5, %v3688_v36 }
0x1ed8   : > { %v3710_v50 = vmul.f32 %v5585_v26, %v3706_v43 }
0x1ed9   : > { %v3690_v51 = vsub.f32 1.5, %v3689_v60 }
0x1eda   : > { %v3714_v1 = vadd.f32 %v5586_v49, %v3710_v50 }
0x1edb   : > { %v3691_v10 = vmul.f32 %v5822_v5, %v3690_v51 }
0x1edd   : > { %v3695_v2 = vsel %vm3694_vm5, %v5822_v5, %v3691_v10 }
0x1ede   : > { %v3707_v6 = vmul.f32 %v3695_v2, %v3656_v53 }
0x1ee0   : > { %v3711_v54 = vmul.f32 %v5585_v26, %v3707_v6 }
0x1ee2   : > { %v3715_v57 = vadd.f32 %v5586_v49, %v3711_v54 }
0x1ee4   : > { %v3723_v23 = vpack.c.bf16 %v3715_v57, %v3714_v1 }
0x1ee6   : > { %5318 = vmatmul.msk.bf16.vlgmr.msra.gmra.mxu2 %vm569_vm0, %v3723_v23 }
0x1ef0   : > { %v3669_v59 = vpop.xlane.xlu0 %3668 }
0x1ef1   : > { %v3672_v55 = vmul.f32 %v3669_v59, %v6206_v48 }
0x1ef3   : > { %v3675_v61 = vadd.f32 1e-05, %v3672_v55 }
0x1ef5   : > { %5823 = vrsqrt.f32 %v3675_v61  ;;  %vm3702_vm7 = vweird.f32 %v3675_v61 }
0x1efb   : > { %v5824_v63 = vpop.eup %5823 }
0x1efc   : > { %v3697_v35 = vmul.f32 %v5824_v63, %v3675_v61  ;;  %vm3703_vm6 = vweird.f32 %v5824_v63  ;;  %v5324_v61 = vld [vmem:[%s7552_s6 + $0x30] sm:$0xf] }
0x1efd   : > { %vm3704_vm9 = vmor %vm3702_vm7, %vm3703_vm6 }
0x1efe   : > { %v3698_v14 = vmul.f32 %v5824_v63, %v3697_v35 }
0x1f00   : > { %v3699_v3 = vmul.f32 0.5, %v3698_v14  ;;  %v4026_v14 = vsel %vm616_vm2, %v5324_v61, 0 }
0x1f02   : > { %v3700_v47 = vsub.f32 1.5, %v3699_v3 }
0x1f04   : > { %v3701_v58 = vmul.f32 %v5824_v63, %v3700_v47 }
0x1f06   : > { %v3705_v4 = vsel %vm3704_vm9, %v5824_v63, %v3701_v58 }
0x1f07   : > { %v3708_v52 = vmul.f32 %v3705_v4, %v3657_v13 }
0x1f09   : > { %v3712_v40 = vmul.f32 %v5585_v26, %v3708_v52 }
0x1f0b   : > { %v3716_v9 = vadd.f32 %v5586_v49, %v3712_v40 }
0x1f0d   : > { %v3724_v8 = vpack.c.bf16 %v3716_v9, %v3716_v9 }
0x1f0f   : > { %5319 = vmatmul.msk.bf16.gmra.mxu2 %vm569_vm0, %v3724_v8 }
0x1f69   : > { %v3753_v16 = vpop.f32.mrf.mxu2 }
0x1f6a   : > { %v3754_v46 = vadd.f32 %v5587_v39, %v3753_v16 }
0x1f71   : > { %v3755_v17 = vpop.f32.mrf.mxu2 }
0x1f72   : > { %v3756_v19 = vadd.f32 %v5587_v39, %v3755_v17 }
0x1f74   : > { %v7167_v21 = vpack.c.bf16 %v3756_v19, %v3754_v46 }
0x1f76   : > { %3766 = vrot.lane.b32.xlu1 %v7167_v21, %s7616_s26 }
0x1f92   : > { %v3758_v53 = vpop.f32.mrf.mxu2 }
0x1f93   : > { %v3759_v11 = vadd.f32 %v5587_v39, %v3758_v53 }
0x1f95   : > { %v7171_v29 = vpack.c.bf16 %v3759_v11, %v3759_v11 }
0x1f97   : > { %3768 = vrot.lane.b32.xlu2 %v7171_v29, %s7616_s26  ;;  %3843 = vrot.lane.b32.xlu1 %v7171_v29, %s7617_s18  ;;  %s4770_s26 = scalar_lea.sflag [#allocation3], %s7628_s4 }
0x1f9a   : > { %v3760_v22 = vpop.f32.mrf.mxu2 }
0x1fe8   : > { %v3767_v15 = vpop.permute.xlu1 %3766 }
0x1fe9   : > { %v3777_v25 = vsel %vm836_vm8, %v3767_v15, 0 }
0x1ff1   : > { %v3769_v24 = vpop.permute.xlu2 %3768 }
0x1ff2   : > { %v3780_v13 = vsel %vm836_vm8, %v3769_v24, 0 }
0x1ff3   : > { %3788 = vmatpush.bf16.xpose.msra.mxu1 %v3780_v13 }
0x1ffb   : > { %3789 = vmatpush.bf16.xpose.msra.mxu1 %v3777_v25 }
0x2002   : > { %5320 = vmatmul.msk.bf16.vlgmr.msra.gmra.mxu1 %vm836_vm8, %v7167_v21 }
0x2009   : > { %v3844_v27 = vpop.permute.xlu1 %3843 }
0x200a   : > { %v3853_v28 = vsel %vm616_vm2, %v3844_v27, 0 }
0x200b   : > { %3861 = vmatpush.bf16.msra.mxu3 %v3853_v28 }
0x2012   : > { %5321 = vmatmul.msk.bf16.gmra.mxu1 %vm836_vm8, %v7171_v29 }
0x207f   : > { %v3791_v30 = vpop.f32.mrf.mxu1 }
0x2080   : > { %v3800_v42 = vmul.f32 0.35355338, %v3791_v30 }
0x2082   : > { %v3803_v12 = vadd.f32 %v3800_v42, %v6882_v18 }
0x2084   : > { %v3806_v32 = vsel %vm873_vm12, %v3803_v12, -inf }
0x2085   : > { %3807 = vmax.xlane.f32.xlu0 %v3806_v32 }
0x2087   : > { %v3793_v56 = vpop.f32.mrf.mxu1 }
0x2088   : > { %v3801_v31 = vmul.f32 0.35355338, %v3793_v56 }
0x208a   : > { %v3804_v41 = vadd.f32 %v3801_v31, %v6882_v18 }
0x208c   : > { %v3809_v33 = vsel %vm873_vm12, %v3804_v41, -inf }
0x208d   : > { %3810 = vmax.xlane.f32.xlu0 %v3809_v33 }
0x208f   : > { %v3796_v37 = vpop.f32.mrf.mxu1 }
0x2090   : > { %v3802_v38 = vmul.f32 0.35355338, %v3796_v37 }
0x2092   : > { %v3805_v34 = vadd.f32 %v3802_v38, %v6882_v18 }
0x2094   : > { %v3812_v5 = vsel %vm873_vm12, %v3805_v34, -inf }
0x2095   : > { %3813 = vmax.xlane.f32.xlu0 %v3812_v5 }
0x2097   : > { %v3798_v0 = vpop.f32.mrf.mxu1 }
0x20f8   : > { %v3808_v44 = vpop.xlane.xlu0 %3807 }
0x20f9   : > { %v3815_v36 = vsub.f32 %v3803_v12, %v3808_v44 }
0x20fb   : > { %v3818_v45 = vmul.f32 1.442695, %v3815_v36 }
0x20fd   : > { %5825 = vpow2.f32 %v3818_v45 }
0x2100   : > { %v3811_v60 = vpop.xlane.xlu0 %3810 }
0x2101   : > { %v3816_v51 = vsub.f32 %v3804_v41, %v3811_v60 }
0x2103   : > { %v5826_v26 = vpop.eup %5825  ;;  %v3820_v43 = vmul.f32 1.442695, %v3816_v51 }
0x2104   : > { %v3824_v10 = vsel %vm873_vm12, %v5826_v26, 0.0 }
0x2105   : > { %5827 = vpow2.f32 %v3820_v43  ;;  %3825 = vadd.xlane.f32.xlu2 %v3824_v10 }
0x2108   : > { %v3814_v2 = vpop.xlane.xlu0 %3813 }
0x2109   : > { %v3817_v49 = vsub.f32 %v3805_v34, %v3814_v2 }
0x210b   : > { %v5828_v50 = vpop.eup %5827  ;;  %v3822_v6 = vmul.f32 1.442695, %v3817_v49 }
0x210c   : > { %v3827_v54 = vsel %vm873_vm12, %v5828_v50, 0.0 }
0x210d   : > { %5829 = vpow2.f32 %v3822_v6  ;;  %3828 = vadd.xlane.f32.xlu0 %v3827_v54 }
0x2113   : > { %v5830_v1 = vpop.eup %5829 }
0x2114   : > { %v3830_v57 = vsel %vm873_vm12, %v5830_v1, 0.0 }
0x2115   : > { %3831 = vadd.xlane.f32.xlu1 %v3830_v57 }
0x211d   : > { %3881 = vrot.lane.b32.xlu2 %v7167_v21, %s7618_s29 }
0x2121   : > { %3841 = vrot.lane.b32.xlu0 %v7167_v21, %s7617_s18 }
0x2125   : > { %4195 = vrot.lane.b32.xlu2 %v7167_v21, %s7619_s23 }
0x2129   : > { %3883 = vrot.lane.b32.xlu0 %v7171_v29, %s7618_s29  ;;  %s7452_s29 = scalar_lea.vmem %s7558_s12, %s5498_s24  ;;  %s4790_s24 = scalar_lea.hbm %s7630_s11, %s5497_s21 }
0x212a   : > { %s4793_s25 = sshll.u32 %s4790_s24, 4  ;;  %s4794_s25 = int_to_ptr.hbm [resolvable:$true] %s4793_s25 }
0x212b   : > { %s5913_s18 = sshra.s32 %s4794_s25, 4  ;;  %s5914_s18 = int_to_ptr.hbm [resolvable:$true] %s5913_s18 }
0x212c   : > { %s5915_s15 = scalar_lea.hbm %s5914_s18, 16  ;;  %p5920_p0 = scmp.lt.s32.totalorder %s5914_s18, %s7630_s11 }
0x212d   : > { %4191 = vrot.lane.b32.xlu2 %v7167_v21, %s7623_s20  ;;  %p5916_p11 = scmp.ne.s32.totalorder %s5914_s18, %s5915_s15 }
0x212e   : > { %3879 = vrot.lane.b32.xlu1 %v7171_v29, %s7620_s30 }
0x212f   : > { %p5917_p12 = pnand %p5916_p11, %p6113_p5 }
0x2131   : > { %3877 = vrot.lane.b32.xlu0 %v7167_v21, %s7620_s30  ;;  %p5918_p13 = pneg %p5917_p12 }
0x2135   : > { %4048 = vrot.lane.b32.xlu2 %v7171_v29, %s7622_s0 }
0x2139   : > { %4197 = vrot.lane.b32.xlu0 %v7171_v29, %s7619_s23  ;;  %s5919_s23 = scalar_lea.hbm %s7630_s11, 32 }
0x213a   : > { %p5921_p1 = scmp.lt.s32.totalorder %s5919_s23, %s5915_s15 }
0x213c   : > { %p5922_p2 = por %p5921_p1, %p5920_p0 }
0x213e   : > { %p5923_p3 = pnand %p5922_p2, %p5918_p13 }
0x2141   : > { %4052 = vrot.lane.b32.xlu0 %v7171_v29, %s7621_s16 }
0x2149   : > { %4050 = vrot.lane.b32.xlu0 %v7167_v21, %s7621_s16 }
0x2151   : > { %4046 = vrot.lane.b32.xlu0 %v7167_v21, %s7622_s0 }
0x2178   : > { %v3826_v59 = vpop.xlane.xlu2 %3825 }
0x2180   : > { %v3829_v23 = vpop.xlane.xlu0 %3828  ;;  %v3882_v8 = vpop.permute.xlu2 %3881 }
0x2181   : > { %5831 = vrcp.f32 %v3829_v23  ;;  %v3892_v17 = vsel %vm836_vm8, %v3882_v8, 0 }
0x2182   : > { %5833 = vrcp.f32 %v3826_v59 }
0x2187   : > { %v5832_v55 = vpop.eup %5831 }
0x2188   : > { %v5834_v63 = vpop.eup %5833  ;;  %v3837_v35 = vmul.f32 %v5832_v55, %v5828_v50  ;;  %v3832_v4 = vpop.xlane.xlu1 %3831 }
0x2189   : > { %v3836_v3 = vmul.f32 %v5834_v63, %v5826_v26  ;;  %5835 = vrcp.f32 %v3832_v4  ;;  %v4196_v11 = vpop.permute.xlu2 %4195 }
0x218a   : > { %v4206_v24 = vsel %vm836_vm8, %v4196_v11, 0 }
0x218b   : > { %v3839_v58 = vpack.c.bf16 %v3837_v35, %v3836_v3 }
0x218f   : > { %v5836_v9 = vpop.eup %5835 }
0x2190   : > { %v3838_v16 = vmul.f32 %v5836_v9, %v5830_v1 }
0x2191   : > { %v4192_v30 = vpop.permute.xlu2 %4191 }
0x2192   : > { %v3840_v46 = vpack.c.bf16 %v3838_v16, %v3838_v16 }
0x2193   : > { %v3842_v47 = vpop.permute.xlu0 %3841 }
0x2194   : > { %3862 = vmatpush.bf16.msra.mxu3 %v3842_v47 }
0x2197   : > { %5322 = vmatmul.msk.bf16.vlgmr.msra.gmra.mxu3 %vm873_vm12, %v3839_v58 }
0x2198   : > { %4035 = vmatpush.bf16.msrb.mxu3 %v4026_v14 }
0x2199   : > { %v4049_v42 = vpop.permute.xlu2 %4048 }
0x219b   : > { %v3884_v52 = vpop.permute.xlu0 %3883 }
0x219c   : > { %v3895_v40 = vsel %vm836_vm8, %v3884_v52, 0 }
0x219d   : > { %3903 = vmatpush.bf16.xpose.msra.mxu0 %v3895_v40 }
0x21a0   : > { %v3880_v15 = vpop.permute.xlu1 %3879 }
0x21a3   : > { %v3878_v39 = vpop.permute.xlu0 %3877 }
0x21a5   : > { %3904 = vmatpush.bf16.xpose.msra.mxu0 %v3892_v17 }
0x21a7   : > { %5323 = vmatmul.msk.bf16.gmra.mxu3 %vm873_vm12, %v3840_v46 }
0x21ab   : > { %v4198_v19 = vpop.permute.xlu0 %4197 }
0x21ac   : > { %v4209_v53 = vsel %vm836_vm8, %v4198_v19, 0  ;;  %5325 = vmatmul.msk.bf16.vlgmr.msra.gmra.mxu0 %vm836_vm8, %v3878_v39 }
0x21ad   : > { %4217 = vmatpush.bf16.xpose.msra.mxu3 %v4209_v53 }
0x21b3   : > { %v4053_v22 = vpop.permute.xlu0 %4052 }
0x21b4   : > { %v4064_v13 = vsel %vm836_vm8, %v4053_v22, 0 }
0x21b5   : > { %4072 = vmatpush.bf16.xpose.msrb.mxu0 %v4064_v13  ;;  %4218 = vmatpush.bf16.xpose.msra.mxu3 %v4206_v24 }
0x21bb   : > { %v4051_v25 = vpop.permute.xlu0 %4050 }
0x21bc   : > { %v4061_v27 = vsel %vm836_vm8, %v4051_v25, 0  ;;  %5326 = vmatmul.msk.bf16.gmra.mxu0 %vm836_vm8, %v3880_v15 }
0x21bd   : > { %4073 = vmatpush.bf16.xpose.msrb.mxu0 %v4061_v27 }
0x21c3   : > { %v4047_v28 = vpop.permute.xlu0 %4046 }
0x21cc   : > { %5334 = vmatmul.msk.bf16.vlgmr.msrb.gmra.mxu0 %vm836_vm8, %v4047_v28 }
0x21dc   : > { %5335 = vmatmul.msk.bf16.gmra.mxu0 %vm836_vm8, %v4049_v42 }
0x221a   : > { %v3864_v12 = vpop.f32.mrf.mxu3 }
0x2222   : > { %v3866_v32 = vpop.f32.mrf.mxu3 }
0x2223   : > { %v3873_v56 = vpack.c.bf16 %v3866_v32, %v3864_v12 }
0x2225   : > { %5332 = vmatmul.msk.bf16.vlgmr.msrb.gmra.mxu3 %vm836_vm8, %v3873_v56 }
0x2229   : > { %v3906_v31 = vpop.f32.mrf.mxu0 }
0x222a   : > { %v3915_v41 = vmul.f32 0.35355338, %v3906_v31  ;;  %v3869_v33 = vpop.f32.mrf.mxu3 }
0x222b   : > { %v3874_v44 = vpack.c.bf16 %v3869_v33, %v3869_v33 }
0x222c   : > { %v3918_v37 = vadd.f32 %v3915_v41, %v6882_v18 }
0x222e   : > { %v3921_v38 = vsel %vm873_vm12, %v3918_v37, -inf }
0x222f   : > { %3922 = vmax.xlane.f32.xlu1 %v3921_v38 }
0x2231   : > { %v3908_v34 = vpop.f32.mrf.mxu0 }
0x2232   : > { %v3916_v5 = vmul.f32 0.35355338, %v3908_v34  ;;  %v3871_v0 = vpop.f32.mrf.mxu3 }
0x2234   : > { %v3919_v36 = vadd.f32 %v3916_v5, %v6882_v18 }
0x2235   : > { %5333 = vmatmul.msk.bf16.gmra.mxu3 %vm836_vm8, %v3874_v44 }
0x2236   : > { %v3924_v45 = vsel %vm873_vm12, %v3919_v36, -inf }
0x2237   : > { %3925 = vmax.xlane.f32.xlu0 %v3924_v45 }
0x2239   : > { %v3911_v60 = vpop.f32.mrf.mxu0 }
0x223a   : > { %v3917_v51 = vmul.f32 0.35355338, %v3911_v60 }
0x223c   : > { %v3920_v26 = vadd.f32 %v3917_v51, %v6882_v18 }
0x223e   : > { %v3927_v43 = vsel %vm873_vm12, %v3920_v26, -inf }
0x223f   : > { %3928 = vmax.xlane.f32.xlu2 %v3927_v43 }
0x2241   : > { %v3913_v10 = vpop.f32.mrf.mxu0 }
0x2245   : > { %5341 = vmatmul.msk.bf16.vlgmr.msra.gmra.mxu3 %vm836_vm8, %v4192_v30 }
0x2249   : > { %v4075_v2 = vpop.f32.mrf.mxu0 }
0x224a   : > { %v4084_v49 = vmul.f32 0.35355338, %v4075_v2 }
0x224c   : > { %v4087_v50 = vadd.f32 %v4084_v49, %v6882_v18 }
0x224e   : > { %v4090_v6 = vsel %vm873_vm12, %v4087_v50, -inf }
0x224f   : > { %4091 = vmax.xlane.f32.xlu1 %v4090_v6 }
0x2251   : > { %v4077_v54 = vpop.f32.mrf.mxu0 }
0x2252   : > { %v4085_v1 = vmul.f32 0.35355338, %v4077_v54 }
0x2254   : > { %v4088_v57 = vadd.f32 %v4085_v1, %v6882_v18 }
0x2256   : > { %v4093_v23 = vsel %vm873_vm12, %v4088_v57, -inf }
0x2257   : > { %4094 = vmax.xlane.f32.xlu0 %v4093_v23 }
0x2259   : > { %v7246_v59 = vpop.f32.mrf.mxu0 }
0x2261   : > { %v4082_v55 = vpop.f32.mrf.mxu0 }
0x22a2   : > { %v3923_v61 = vpop.xlane.xlu1 %3922 }
0x22a3   : > { %v3930_v63 = vsub.f32 %v3918_v37, %v3923_v61 }
0x22a5   : > { %v3933_v35 = vmul.f32 1.442695, %v3930_v63 }
0x22a7   : > { %5837 = vpow2.f32 %v3933_v35 }
0x22a8   : > { %v7248_v14 = vpop.f32.mrf.mxu3 }
0x22aa   : > { %v3926_v3 = vpop.xlane.xlu0 %3925 }
0x22ab   : > { %v3931_v47 = vsub.f32 %v3919_v36, %v3926_v3 }
0x22ad   : > { %v7250_v58 = vpop.eup %5837  ;;  %v3935_v4 = vmul.f32 1.442695, %v3931_v47 }
0x22ae   : > { %v3939_v52 = vsel %vm873_vm12, %v7250_v58, 0.0 }
0x22af   : > { %5839 = vpow2.f32 %v3935_v4  ;;  %3940 = vadd.xlane.f32.xlu0 %v3939_v52 }
0x22b0   : > { %v7254_v40 = vpop.f32.mrf.mxu3 }
0x22b2   : > { %v3929_v17 = vpop.xlane.xlu2 %3928 }
0x22b3   : > { %v3932_v46 = vsub.f32 %v3920_v26, %v3929_v17 }
0x22b5   : > { %v5840_v9 = vpop.eup %5839  ;;  %v3937_v19 = vmul.f32 1.442695, %v3932_v46 }
0x22b6   : > { %v3942_v8 = vsel %vm873_vm12, %v5840_v9, 0.0 }
0x22b7   : > { %3943 = vadd.xlane.f32.xlu2 %v3942_v8  ;;  %5841 = vpow2.f32 %v3937_v19 }
0x22b8   : > { %v7257_v16 = vpop.f32.mrf.mxu3 }
0x22bd   : > { %v5842_v30 = vpop.eup %5841 }
0x22be   : > { %v3945_v12 = vsel %vm873_vm12, %v5842_v30, 0.0 }
0x22c0   : > { %v4044_v39 = vpop.f32.mrf.mxu3 }
0x22c2   : > { %v4092_v11 = vpop.xlane.xlu1 %4091 }
0x22c3   : > { %3956 = vrot.lane.b32.xlu0 %v7167_v21, %s7624_s19  ;;  %v4099_v13 = vsub.f32 %v4087_v50, %v4092_v11  ;;  %v5329_v11 = vld [vmem:[%s7552_s6 + $0x34] sm:$0xf] }
0x22c5   : > { %v4102_v25 = vmul.f32 1.442695, %v4099_v13  ;;  %v3999_v13 = vsel %vm616_vm2, %v5329_v11, 0 }
0x22c6   : > { %4008 = vmatpush.bf16.msrb.mxu1 %v3999_v13  ;;  %v7328_v13 = vld [vmem:[%s7548_s2 + $0x1c] ss:$0 sm:$0xff] }
0x22c7   : > { %5843 = vpow2.f32 %v4102_v25 }
0x22c8   : > { %v4220_v53 = vpop.f32.mrf.mxu3 }
0x22c9   : > { %v4229_v22 = vmul.f32 0.35355338, %v4220_v53 }
0x22ca   : > { %v4095_v56 = vpop.xlane.xlu0 %4094 }
0x22cb   : > { %v4232_v24 = vadd.f32 %v4229_v22, %v6882_v18  ;;  %v4100_v41 = vsub.f32 %v4088_v57, %v4095_v56 }
0x22cd   : > { %v4235_v15 = vsel %vm873_vm12, %v4232_v24, -inf  ;;  %v7266_v31 = vpop.eup %5843  ;;  %v4104_v37 = vmul.f32 1.442695, %v4100_v41 }
0x22ce   : > { %4236 = vmax.xlane.f32.xlu2 %v4235_v15  ;;  %v4108_v33 = vsel %vm873_vm12, %v7266_v31, 0.0 }
0x22cf   : > { %5845 = vpow2.f32 %v4104_v37 }
0x22d0   : > { %v4222_v27 = vpop.f32.mrf.mxu3 }
0x22d1   : > { %v4230_v28 = vmul.f32 0.35355338, %v4222_v27 }
0x22d3   : > { %v4233_v42 = vadd.f32 %v4230_v28, %v6882_v18 }
0x22d5   : > { %v4238_v32 = vsel %vm873_vm12, %v4233_v42, -inf  ;;  %v7270_v38 = vpop.eup %5845 }
0x22d6   : > { %3946 = vadd.xlane.f32.xlu2 %v3945_v12  ;;  %4239 = vmax.xlane.f32.xlu1 %v4238_v32  ;;  %v4111_v34 = vsel %vm873_vm12, %v7270_v38, 0.0 }
0x22de   : > { %4109 = vadd.xlane.f32.xlu2 %v4108_v33 }
0x22ed   : > { %4112 = vadd.xlane.f32.xlu0 %v4111_v34 }
0x22ef   : > { %3958 = vrot.lane.b32.xlu1 %v7171_v29, %s7624_s19 }
0x2301   : > { %4270 = vrot.lane.b32.xlu0 %v7167_v21, %s7626_s3 }
0x2322   : > { %v3941_v49 = vpop.xlane.xlu0 %3940 }
0x232a   : > { %v3944_v5 = vpop.xlane.xlu2 %3943 }
0x2335   : > { %v3957_v55 = vpop.permute.xlu0 %3956 }
0x2341   : > { %v4237_v0 = vpop.xlane.xlu2 %4236 }
0x2342   : > { %v4244_v44 = vsub.f32 %v4232_v24, %v4237_v0 }
0x2344   : > { %v4247_v36 = vmul.f32 1.442695, %v4244_v44 }
0x2346   : > { %5847 = vpow2.f32 %v4247_v36 }
0x2349   : > { %v4240_v45 = vpop.xlane.xlu1 %4239  ;;  %v3947_v63 = vpop.xlane.xlu2 %3946 }
0x234a   : > { %v4245_v60 = vsub.f32 %v4233_v42, %v4240_v45 }
0x234c   : > { %v5848_v51 = vpop.eup %5847  ;;  %v4249_v26 = vmul.f32 1.442695, %v4245_v60  ;;  %v5338_v60 = vld [vmem:[%s7552_s6 + $0x38] sm:$0xf] }
0x234d   : > { %v4253_v43 = vsel %vm873_vm12, %v5848_v51, 0.0 }
0x234e   : > { %5849 = vpow2.f32 %v4249_v26  ;;  %4254 = vadd.xlane.f32.xlu2 %v4253_v43 }
0x234f   : > { %5851 = vrcp.f32 %v3944_v5 }
0x2350   : > { %5853 = vrcp.f32 %v3941_v49 }
0x2351   : > { %5855 = vrcp.f32 %v3947_v63 }
0x2354   : > { %v5850_v10 = vpop.eup %5849 }
0x2355   : > { %v4256_v2 = vsel %vm873_vm12, %v5850_v10, 0.0  ;;  %v5852_v50 = vpop.eup %5851 }
0x2356   : > { %4257 = vadd.xlane.f32.xlu1 %v4256_v2  ;;  %v5854_v1 = vpop.eup %5853  ;;  %v3952_v57 = vmul.f32 %v5852_v50, %v5840_v9  ;;  %v4110_v9 = vpop.xlane.xlu2 %4109 }
0x2357   : > { %v3951_v23 = vmul.f32 %v5854_v1, %v7250_v58  ;;  %v5856_v35 = vpop.eup %5855  ;;  %v4086_v58 = vmul.f32 0.35355338, %v7246_v59 }
0x2358   : > { %v3953_v3 = vmul.f32 %v5856_v35, %v5842_v30 }
0x2359   : > { %v3954_v61 = vpack.c.bf16 %v3952_v57, %v3951_v23  ;;  %v4089_v4 = vadd.f32 %v4086_v58, %v6882_v18  ;;  %v5345_v23 = vld [vmem:[%s7552_s6 + $0x3c] sm:$0xf] }
0x235a   : > { %v3955_v47 = vpack.c.bf16 %v3953_v3, %v3953_v3 }
0x235b   : > { %v4096_v52 = vsel %vm873_vm12, %v4089_v4, -inf }
0x2360   : > { %v4113_v46 = vpop.xlane.xlu0 %4112 }
0x2361   : > { %v3959_v6 = vpop.permute.xlu1 %3958 }
0x2362   : > { %v3968_v54 = vsel %vm616_vm2, %v3959_v6, 0 }
0x2363   : > { %3976 = vmatpush.bf16.msrb.mxu2 %v3968_v54 }
0x2366   : > { %4127 = vrot.lane.b32.xlu2 %v7171_v29, %s7625_s28 }
0x2367   : > { %3977 = vmatpush.bf16.msrb.mxu2 %v3957_v55  ;;  %v4313_v55 = vsel %vm616_vm2, %v5345_v23, 0 }
0x236a   : > { %5327 = vmatmul.msk.bf16.vlgmr.msrb.gmra.mxu2 %vm873_vm12, %v3954_v61 }
0x236e   : > { %4272 = vrot.lane.b32.xlu2 %v7171_v29, %s7626_s3 }
0x236f   : > { %4193 = vrot.lane.b32.xlu1 %v7171_v29, %s7623_s20 }
0x2373   : > { %v4271_v25 = vpop.permute.xlu0 %4270 }
0x2376   : > { %4125 = vrot.lane.b32.xlu2 %v7167_v21, %s7625_s28 }
0x237a   : > { %5328 = vmatmul.msk.bf16.gmra.mxu2 %vm873_vm12, %v3955_v47 }
0x239f   : > { %4097 = vmax.xlane.f32.xlu2 %v4096_v52 }
0x23c1   : > { %v4255_v8 = vpop.xlane.xlu2 %4254 }
0x23c9   : > { %v4128_v39 = vpop.permute.xlu2 %4127  ;;  %v4258_v17 = vpop.xlane.xlu1 %4257 }
0x23ca   : > { %v4137_v29 = vsel %vm616_vm2, %v4128_v39, 0  ;;  %5857 = vrcp.f32 %v4258_v17 }
0x23cb   : > { %4145 = vmatpush.bf16.msra.mxu2 %v4137_v29  ;;  %5859 = vrcp.f32 %v4255_v8 }
0x23cc   : > { %5861 = vrcp.f32 %v4113_v46 }
0x23cd   : > { %5863 = vrcp.f32 %v4110_v9 }
0x23d0   : > { %v5858_v21 = vpop.eup %5857 }
0x23d1   : > { %v4273_v19 = vpop.permute.xlu2 %4272  ;;  %v5860_v53 = vpop.eup %5859  ;;  %v4266_v24 = vmul.f32 %v5858_v21, %v5850_v10 }
0x23d2   : > { %v4282_v59 = vsel %vm616_vm2, %v4273_v19, 0  ;;  %v5862_v22 = vpop.eup %5861  ;;  %v4265_v27 = vmul.f32 %v5860_v53, %v5848_v51  ;;  %v4168_v51 = vsel %vm616_vm2, %v5338_v60, 0 }
0x23d3   : > { %4290 = vmatpush.bf16.msra.mxu0 %v4282_v59  ;;  %v5864_v15 = vpop.eup %5863  ;;  %v4121_v28 = vmul.f32 %v5862_v22, %v7270_v38  ;;  %4177 = vmatpush.bf16.msra.mxu1 %v4168_v51 }
0x23d4   : > { %v4268_v30 = vpack.c.bf16 %v4266_v24, %v4265_v27  ;;  %v4120_v42 = vmul.f32 %v5864_v15, %v7266_v31 }
0x23d6   : > { %v4123_v32 = vpack.c.bf16 %v4121_v28, %v4120_v42 }
0x23d7   : > { %4291 = vmatpush.bf16.msra.mxu0 %v4271_v25 }
0x23d9   : > { %v4126_v12 = vpop.permute.xlu2 %4125 }
0x23da   : > { %4146 = vmatpush.bf16.msra.mxu2 %v4126_v12  ;;  %5343 = vmatmul.msk.bf16.vlgmr.msra.gmra.mxu0 %vm873_vm12, %v4268_v30 }
0x23dd   : > { %5336 = vmatmul.msk.bf16.vlgmr.msra.gmra.mxu2 %vm873_vm12, %v4123_v32 }
0x23de   : > { %4322 = vmatpush.bf16.msrb.mxu2 %v4313_v55 }
0x23e1   : > { %v4194_v56 = vpop.permute.xlu1 %4193 }
0x23e2   : > { %5342 = vmatmul.msk.bf16.gmra.mxu3 %vm836_vm8, %v4194_v56 }
0x23ed   : > { %v3979_v41 = vpop.f32.mrf.mxu2 }
0x23f5   : > { %v3981_v33 = vpop.f32.mrf.mxu2 }
0x23f6   : > { %v3988_v37 = vpack.c.bf16 %v3981_v33, %v3979_v41 }
0x23f8   : > { %5330 = vmatmul.msk.bf16.vlgmr.msrb.gmra.mxu1 %vm836_vm8, %v3988_v37 }
0x23fd   : > { %v3984_v38 = vpop.f32.mrf.mxu2 }
0x23fe   : > { %v3989_v5 = vpack.c.bf16 %v3984_v38, %v3984_v38 }
0x2405   : > { %v3986_v34 = vpop.f32.mrf.mxu2 }
0x2408   : > { %5331 = vmatmul.msk.bf16.gmra.mxu1 %vm836_vm8, %v3989_v5 }
0x2412   : > { %v4098_v31 = vpop.xlane.xlu2 %4097 }
0x2413   : > { %v4101_v0 = vsub.f32 %v4089_v4, %v4098_v31 }
0x2415   : > { %v4106_v44 = vmul.f32 1.442695, %v4101_v0 }
0x2417   : > { %5865 = vpow2.f32 %v4106_v44 }
0x241d   : > { %v5866_v36 = vpop.eup %5865 }
0x241e   : > { %v4114_v45 = vsel %vm873_vm12, %v5866_v36, 0.0 }
0x241f   : > { %4115 = vadd.xlane.f32.xlu0 %v4114_v45 }
0x2457   : > { %v4293_v58 = vpop.f32.mrf.mxu0 }
0x245f   : > { %v4295_v4 = vpop.f32.mrf.mxu0 }
0x2460   : > { %v4148_v26 = vpop.f32.mrf.mxu2  ;;  %v4302_v52 = vpack.c.bf16 %v4295_v4, %v4293_v58 }
0x2465   : > { %v4225_v43 = vpop.f32.mrf.mxu3 }
0x2466   : > { %v4231_v10 = vmul.f32 0.35355338, %v4225_v43 }
0x2468   : > { %v4234_v2 = vadd.f32 %v4231_v10, %v6882_v18  ;;  %v4150_v49 = vpop.f32.mrf.mxu2 }
0x2469   : > { %v4157_v50 = vpack.c.bf16 %v4150_v49, %v4148_v26 }
0x246a   : > { %v4241_v6 = vsel %vm873_vm12, %v4234_v2, -inf }
0x246b   : > { %5339 = vmatmul.msk.bf16.vlgmr.msra.gmra.mxu1 %vm836_vm8, %v4157_v50  ;;  %4242 = vmax.xlane.f32.xlu1 %v4241_v6  ;;  %v5486_v50 = vld [vmem:[%s7553_s7 + $0x38] sm:$0xff] }
0x246c   : > { %4453 = vmatpush.bf16.msrb.mxu1 %v5486_v50 }
0x246d   : > { %v4227_v54 = vpop.f32.mrf.mxu3 }
0x2475   : > { %v4010_v1 = vpop.f32.mrf.mxu1 }
0x2476   : > { %v4038_v53 = vadd.f32 %v7248_v14, %v4010_v1  ;;  %v5485_v1 = vld [vmem:[%s7553_s7 + $0x30] sm:$0xff] }
0x2477   : > { %4454 = vmatpush.bf16.msrb.mxu1 %v5485_v1 }
0x247d   : > { %v4012_v57 = vpop.f32.mrf.mxu1 }
0x247e   : > { %v4040_v27 = vadd.f32 %v7254_v40, %v4012_v57 }
0x2485   : > { %v4015_v61 = vpop.f32.mrf.mxu1 }
0x2486   : > { %v4043_v38 = vadd.f32 %v7257_v16, %v4015_v61 }
0x248d   : > { %v4017_v63 = vpop.f32.mrf.mxu1 }
0x2492   : > { %v4116_v18 = vpop.xlane.xlu0 %4115 }
0x2493   : > { %5867 = vrcp.f32 %v4116_v18 }
0x2499   : > { %v5868_v35 = vpop.eup %5867 }
0x249a   : > { %v4122_v3 = vmul.f32 %v5868_v35, %v5866_v36 }
0x249c   : > { %v4124_v47 = vpack.c.bf16 %v4122_v3, %v4122_v3 }
0x249e   : > { %5337 = vmatmul.msk.bf16.gmra.mxu2 %vm873_vm12, %v4124_v47 }
0x24ae   : > { %5346 = vmatmul.msk.bf16.vlgmr.msrb.gmra.mxu2 %vm836_vm8, %v4302_v52 }
0x24de   : > { %v4243_v9 = vpop.xlane.xlu1 %4242 }
0x24df   : > { %v4246_v8 = vsub.f32 %v4234_v2, %v4243_v9 }
0x24e1   : > { %v4251_v39 = vmul.f32 1.442695, %v4246_v8 }
0x24e3   : > { %5869 = vpow2.f32 %v4251_v39 }
0x24e8   : > { %v4179_v59 = vpop.f32.mrf.mxu1 }
0x24e9   : > { %v5870_v17 = vpop.eup %5869  ;;  %v4188_v11 = vadd.f32 %v4179_v59, %v4038_v53  ;;  %v7368_v59 = vld [vmem:[%s7548_s2 + $0x1b] ss:$0 sm:$0xff] }
0x24ea   : > { %v4259_v29 = vsel %vm873_vm12, %v5870_v17, 0.0 }
0x24eb   : > { %4260 = vadd.xlane.f32.xlu2 %v4259_v29  ;;  %v7363_v29 = vld [vmem:[%s7548_s2 + $0x1a] ss:$0 sm:$0xff] }
0x24f0   : > { %v4181_v25 = vpop.f32.mrf.mxu1 }
0x24f1   : > { %v4189_v30 = vadd.f32 %v4181_v25, %v4040_v27 }
0x2521   : > { %v4153_v46 = vpop.f32.mrf.mxu2 }
0x2522   : > { %v4158_v21 = vpack.c.bf16 %v4153_v46, %v4153_v46 }
0x2524   : > { %5340 = vmatmul.msk.bf16.gmra.mxu1 %vm836_vm8, %v4158_v21 }
0x2529   : > { %v4155_v19 = vpop.f32.mrf.mxu2 }
0x2531   : > { %v4324_v22 = vpop.f32.mrf.mxu2 }
0x2532   : > { %v4333_v24 = vadd.f32 %v4324_v22, %v4188_v11 }
0x2534   : > { %v4336_v15 = vadd.f32 %v4333_v24, %v7124_v62 }
0x2536   : > { %v7333_v28 = vadd.f32 %v7328_v13, %v4336_v15 }
0x2538   : > { %v4346_v14 = vsel %vm569_vm0, %v7333_v28, 0.0 }
0x2539   : > { %v4326_v42 = vpop.f32.mrf.mxu2  ;;  %4347 = vadd.xlane.f32.xlu2 %v4346_v14 }
0x253a   : > { %v4334_v12 = vadd.f32 %v4326_v42, %v4189_v30 }
0x253c   : > { %v4337_v32 = vadd.f32 %v4334_v12, %v7129_v20 }
0x253e   : > { %v7339_v56 = vadd.f32 %v7328_v13, %v4337_v32 }
0x2540   : > { %v4349_v62 = vsel %vm569_vm0, %v7339_v56, 0.0 }
0x2541   : > { %4350 = vadd.xlane.f32.xlu0 %v4349_v62  ;;  %v5494_v62 = vld [vmem:[%s7554_s8 + $0xf8] sm:$0xff] }
0x2542   : > { %4597 = vmatpush.bf16.msrb.mxu3 %v5494_v62  ;;  %v7419_v62 = vld [vmem:[%s7548_s2 + $0x1d] ss:$0 sm:$0xff] }
0x255e   : > { %v4261_v40 = vpop.xlane.xlu2 %4260 }
0x255f   : > { %5871 = vrcp.f32 %v4261_v40  ;;  %v5493_v40 = vld [vmem:[%s7554_s8 + $0xf0] sm:$0xff] }
0x2560   : > { %4598 = vmatpush.bf16.msrb.mxu3 %v5493_v40 }
0x2565   : > { %v5872_v41 = vpop.eup %5871 }
0x2566   : > { %v4267_v33 = vmul.f32 %v5872_v41, %v5870_v17  ;;  %v5490_v41 = vld [vmem:[%s7554_s8 + $0xd8] sm:$0xff] }
0x2568   : > { %v4269_v37 = vpack.c.bf16 %v4267_v33, %v4267_v33  ;;  %v7399_v33 = vld [vmem:[%s7548_s2 + $0x1f] ss:$0 sm:$0xff] }
0x256a   : > { %5344 = vmatmul.msk.bf16.gmra.mxu0 %vm873_vm12, %v4269_v37 }
0x25a1   : > { %v4184_v34 = vpop.f32.mrf.mxu1 }
0x25a2   : > { %v4190_v5 = vadd.f32 %v4184_v34, %v4043_v38  ;;  %v5489_v38 = vld [vmem:[%s7554_s8 + $0xd0] sm:$0xff] }
0x25a9   : > { %v4186_v31 = vpop.f32.mrf.mxu1 }
0x25aa   : > { %v5488_v31 = vld [vmem:[%s7554_s8 + $0xc8] sm:$0xff] }
0x25ac   : > { %v4348_v20 = vpop.xlane.xlu2 %4347 }
0x25ad   : > { %v4355_v0 = vmul.f32 %v4348_v20, %v6206_v48 }
0x25af   : > { %v4358_v44 = vsub.f32 %v7333_v28, %v4355_v0 }
0x25b1   : > { %v4361_v36 = vmul.f32 %v4358_v44, %v4358_v44 }
0x25b3   : > { %v4364_v45 = vsel %vm569_vm0, %v4361_v36, 0.0 }
0x25b4   : > { %v4351_v60 = vpop.xlane.xlu0 %4350  ;;  %4365 = vadd.xlane.f32.xlu2 %v4364_v45 }
0x25b5   : > { %v4356_v51 = vmul.f32 %v4351_v60, %v6206_v48 }
0x25b7   : > { %v4359_v26 = vsub.f32 %v7339_v56, %v4356_v51 }
0x25b9   : > { %v4362_v43 = vmul.f32 %v4359_v26, %v4359_v26 }
0x25bb   : > { %v4367_v16 = vsel %vm569_vm0, %v4362_v43, 0.0 }
0x25bc   : > { %4368 = vadd.xlane.f32.xlu0 %v4367_v16 }
0x25e7   : > { %v4298_v10 = vpop.f32.mrf.mxu0 }
0x25e8   : > { %v4303_v2 = vpack.c.bf16 %v4298_v10, %v4298_v10 }
0x25ea   : > { %5347 = vmatmul.msk.bf16.gmra.mxu2 %vm836_vm8, %v4303_v2 }
0x25ef   : > { %v4300_v49 = vpop.f32.mrf.mxu0 }
0x2627   : > { %v4366_v6 = vpop.xlane.xlu2 %4365 }
0x2628   : > { %v4373_v54 = vmul.f32 %v4366_v6, %v6206_v48 }
0x262a   : > { %v4376_v57 = vadd.f32 1e-05, %v4373_v54 }
0x262c   : > { %5873 = vrsqrt.f32 %v4376_v57  ;;  %vm4385_vm8 = vweird.f32 %v4376_v57 }
0x262f   : > { %v4369_v23 = vpop.xlane.xlu0 %4368 }
0x2630   : > { %v4374_v55 = vmul.f32 %v4369_v23, %v6206_v48 }
0x2632   : > { %v5874_v61 = vpop.eup %5873  ;;  %v4377_v63 = vadd.f32 1e-05, %v4374_v55 }
0x2633   : > { %v4380_v18 = vmul.f32 %v5874_v61, %v4376_v57  ;;  %vm4386_vm2 = vweird.f32 %v5874_v61 }
0x2634   : > { %5875 = vrsqrt.f32 %v4377_v63  ;;  %vm4387_vm12 = vmor %vm4385_vm8, %vm4386_vm2  ;;  %vm4395_vm13 = vweird.f32 %v4377_v63 }
0x2635   : > { %v4381_v35 = vmul.f32 %v5874_v61, %v4380_v18 }
0x2637   : > { %v4382_v3 = vmul.f32 0.5, %v4381_v35 }
0x2639   : > { %v4383_v47 = vsub.f32 1.5, %v4382_v3 }
0x263a   : > { %v5876_v58 = vpop.eup %5875 }
0x263b   : > { %v4384_v4 = vmul.f32 %v5874_v61, %v4383_v47  ;;  %v4390_v52 = vmul.f32 %v5876_v58, %v4377_v63  ;;  %vm4396_vm11 = vweird.f32 %v5876_v58 }
0x263c   : > { %vm4397_vm14 = vmor %vm4395_vm13, %vm4396_vm11 }
0x263d   : > { %v4391_v9 = vmul.f32 %v5876_v58, %v4390_v52  ;;  %v4388_v8 = vsel %vm4387_vm12, %v5874_v61, %v4384_v4 }
0x263e   : > { %v4409_v46 = vmul.f32 %v4388_v8, %v4358_v44  ;;  %v5487_v44 = vld [vmem:[%s7554_s8 + $0xc0] sm:$0xff] }
0x263f   : > { %v4392_v39 = vmul.f32 0.5, %v4391_v9 }
0x2640   : > { %v4413_v53 = vmul.f32 %v7363_v29, %v4409_v46 }
0x2641   : > { %v4393_v17 = vsub.f32 1.5, %v4392_v39 }
0x2642   : > { %v4417_v24 = vadd.f32 %v7368_v59, %v4413_v53 }
0x2643   : > { %v4394_v21 = vmul.f32 %v5876_v58, %v4393_v17 }
0x2645   : > { %v4398_v19 = vsel %vm4397_vm14, %v5876_v58, %v4394_v21 }
0x2646   : > { %v4410_v11 = vmul.f32 %v4398_v19, %v4359_v26 }
0x2648   : > { %v4414_v22 = vmul.f32 %v7363_v29, %v4410_v11 }
0x264a   : > { %v4418_v15 = vadd.f32 %v7368_v59, %v4414_v22 }
0x264c   : > { %v4426_v25 = vpack.c.bf16 %v4418_v15, %v4417_v24 }
0x264e   : > { %5364 = vmatmul.msk.bf16.vlgmr.msrb.gmra.mxu1 %vm569_vm0, %v4426_v25 }
0x266d   : > { %v4329_v27 = vpop.f32.mrf.mxu2 }
0x266e   : > { %v4335_v30 = vadd.f32 %v4329_v27, %v4190_v5 }
0x2670   : > { %v4338_v14 = vadd.f32 %v4335_v30, %v7134_v7  ;;  %v5492_v7 = vld [vmem:[%s7554_s8 + $0xe8] sm:$0xff] }
0x2671   : > { %4599 = vmatpush.bf16.msrb.mxu3 %v5492_v7 }
0x2672   : > { %v7377_v42 = vadd.f32 %v7328_v13, %v4338_v14  ;;  %v5491_v13 = vld [vmem:[%s7554_s8 + $0xe0] sm:$0xff] }
0x2674   : > { %v4352_v12 = vsel %vm569_vm0, %v7377_v42, 0.0 }
0x2675   : > { %4353 = vadd.xlane.f32.xlu1 %v4352_v12  ;;  %v4331_v32 = vpop.f32.mrf.mxu2  ;;  %4600 = vmatpush.bf16.msrb.mxu3 %v5491_v13 }
0x2679   : > { %4601 = vmatpush.bf16.msrb.mxu3 %v5490_v41 }
0x267d   : > { %4602 = vmatpush.bf16.msrb.mxu3 %v5489_v38 }
0x2681   : > { %4603 = vmatpush.bf16.msrb.mxu3 %v5488_v31 }
0x2685   : > { %4604 = vmatpush.bf16.msrb.mxu3 %v5487_v44 }
0x26cb   : > { %v4456_v37 = vpop.f32.mrf.mxu1 }
0x26cc   : > { %v4457_v34 = vadd.f32 %v7399_v33, %v4456_v37 }
0x26ce   : > { %v5366_v5 = vmul.f32 -1.702, %v4457_v34 }
0x26d0   : > { %v4471_v20 = vmul.f32 1.442695, %v5366_v5 }
0x26d2   : > { %5877 = vpow2.f32 %v4471_v20 }
0x26d3   : > { %v4458_v0 = vpop.f32.mrf.mxu1 }
0x26d4   : > { %v4459_v36 = vadd.f32 %v7399_v33, %v4458_v0 }
0x26d6   : > { %v5367_v45 = vmul.f32 -1.702, %v4459_v36 }
0x26d8   : > { %v5878_v60 = vpop.eup %5877  ;;  %v4473_v51 = vmul.f32 1.442695, %v5367_v45 }
0x26d9   : > { %v4477_v26 = vadd.f32 1.0, %v5878_v60 }
0x26da   : > { %5879 = vpow2.f32 %v4473_v51 }
0x26db   : > { %5881 = vrcp.f32 %v4477_v26  ;;  %v4491_v55 = vand.u32 2147483648, %v4477_v26  ;;  %vm4485_vm1 = vweird.f32 %v4477_v26  ;;  %v4489_v63 = vand.u32 2147483647, %v4477_v26 }
0x26dd   : > { %v4492_v52 = vor.u32 1.1754944e-38, %v4491_v55  ;;  %vm4490_vm4 = vcmp.eq.f32.partialorder %v4489_v63, 8.507059e+37 }
0x26e0   : > { %v5880_v43 = vpop.eup %5879 }
0x26e1   : > { %v5882_v16 = vpop.eup %5881  ;;  %v4478_v10 = vadd.f32 1.0, %v5880_v43 }
0x26e2   : > { %v4481_v2 = vmul.f32 %v5882_v16, %v4477_v26  ;;  %vm4486_vm15 = vweird.f32 %v5882_v16 }
0x26e3   : > { %5883 = vrcp.f32 %v4478_v10  ;;  %vm4487_vm3 = vmor %vm4485_vm1, %vm4486_vm15  ;;  %v4506_v35 = vand.u32 2147483648, %v4478_v10  ;;  %v4504_v4 = vand.u32 2147483647, %v4478_v10  ;;  %vm4500_vm5 = vweird.f32 %v4478_v10 }
0x26e4   : > { %v4482_v49 = vsub.f32 1.0, %v4481_v2 }
0x26e5   : > { %v4507_v17 = vor.u32 1.1754944e-38, %v4506_v35  ;;  %vm4505_vm7 = vcmp.eq.f32.partialorder %v4504_v4, 8.507059e+37 }
0x26e6   : > { %v4483_v50 = vmul.f32 %v5882_v16, %v4482_v49 }
0x26e8   : > { %v4354_v6 = vpop.xlane.xlu1 %4353  ;;  %v4484_v57 = vadd.f32 %v5882_v16, %v4483_v50 }
0x26e9   : > { %v5884_v54 = vpop.eup %5883  ;;  %v4357_v1 = vmul.f32 %v4354_v6, %v6206_v48 }
0x26ea   : > { %v4496_v23 = vmul.f32 %v5884_v54, %v4478_v10  ;;  %v4488_v47 = vsel %vm4487_vm3, %v5882_v16, %v4484_v57  ;;  %vm4501_vm10 = vweird.f32 %v5884_v54 }
0x26eb   : > { %v4360_v61 = vsub.f32 %v7377_v42, %v4357_v1  ;;  %v4493_v39 = vsel %vm4490_vm4, %v4492_v52, %v4488_v47  ;;  %vm4502_vm6 = vmor %vm4500_vm5, %vm4501_vm10  ;;  %vm4694_vm10 = vcmask 261127  }
0x26ec   : > { %v4497_v18 = vsub.f32 1.0, %v4496_v23  ;;  %v4525_v19 = vmul.f32 %v4493_v39, %v4457_v34 }
0x26ed   : > { %v4363_v3 = vmul.f32 %v4360_v61, %v4360_v61 }
0x26ee   : > { %v4498_v58 = vmul.f32 %v5884_v54, %v4497_v18 }
0x26ef   : > { %v4370_v9 = vsel %vm569_vm0, %v4363_v3, 0.0 }
0x26f0   : > { %v4499_v8 = vadd.f32 %v5884_v54, %v4498_v58  ;;  %4371 = vadd.xlane.f32.xlu2 %v4370_v9 }
0x26f2   : > { %v4503_v46 = vsel %vm4502_vm6, %v5884_v54, %v4499_v8 }
0x26f3   : > { %v4508_v21 = vsel %vm4505_vm7, %v4507_v17, %v4503_v46  ;;  %v7440_v17 = vld [vmem:[%s7547_s1 + $0x1a] ss:$0 sm:$0xff] }
0x26f4   : > { %v4526_v53 = vmul.f32 %v4508_v21, %v4459_v36 }
0x26f6   : > { %v4546_v11 = vpack.c.bf16 %v4526_v53, %v4525_v19  ;;  %v7446_v19 = vld [vmem:[%s7547_s1 + $0x1b] ss:$0 sm:$0xff] }
0x26f8   : > { %4605 = vmatmul.bf16.vlgmr.msrb.gmra.mxu3 %v4546_v11 }
0x2763   : > { %v4372_v22 = vpop.xlane.xlu2 %4371 }
0x2764   : > { %v4375_v24 = vmul.f32 %v4372_v22, %v6206_v48 }
0x2766   : > { %v4378_v15 = vadd.f32 1e-05, %v4375_v24 }
0x2768   : > { %5885 = vrsqrt.f32 %v4378_v15  ;;  %vm4405_vm2 = vweird.f32 %v4378_v15 }
0x276e   : > { %v5886_v25 = vpop.eup %5885 }
0x276f   : > { %v4400_v27 = vmul.f32 %v5886_v25, %v4378_v15  ;;  %vm4406_vm9 = vweird.f32 %v5886_v25 }
0x2770   : > { %vm4407_vm8 = vmor %vm4405_vm2, %vm4406_vm9 }
0x2771   : > { %v4401_v30 = vmul.f32 %v5886_v25, %v4400_v27 }
0x2773   : > { %v4402_v14 = vmul.f32 0.5, %v4401_v30 }
0x2775   : > { %v4403_v12 = vsub.f32 1.5, %v4402_v14 }
0x2777   : > { %v4404_v32 = vmul.f32 %v5886_v25, %v4403_v12 }
0x2779   : > { %v4408_v40 = vsel %vm4407_vm8, %v5886_v25, %v4404_v32 }
0x277a   : > { %v4411_v7 = vmul.f32 %v4408_v40, %v4360_v61 }
0x277b   : > { %v4606_v13 = vpop.f32.mrf.mxu3 }
0x277c   : > { %v4607_v41 = vadd.f32 %v7419_v62, %v4606_v13  ;;  %v4415_v37 = vmul.f32 %v7363_v29, %v4411_v7 }
0x277e   : > { %v4615_v38 = vadd.f32 %v4607_v41, %v7333_v28  ;;  %v4419_v34 = vadd.f32 %v7368_v59, %v4415_v37 }
0x2780   : > { %v4620_v5 = vsel %vm569_vm0, %v4615_v38, 0.0  ;;  %v4427_v31 = vpack.c.bf16 %v4419_v34, %v4419_v34 }
0x2781   : > { %4621 = vadd.xlane.f32.xlu0 %v4620_v5 }
0x2782   : > { %5365 = vmatmul.msk.bf16.gmra.mxu1 %vm569_vm0, %v4427_v31 }
0x2783   : > { %v4608_v36 = vpop.f32.mrf.mxu3 }
0x2784   : > { %v4609_v60 = vadd.f32 %v7419_v62, %v4608_v36 }
0x2786   : > { %v7431_v28 = vadd.f32 %v4609_v60, %v7339_v56 }
0x2788   : > { %v4623_v43 = vsel %vm569_vm0, %v7431_v28, 0.0 }
0x27f4   : > { %v4622_v20 = vpop.xlane.xlu0 %4621 }
0x27f5   : > { %v4629_v0 = vmul.f32 %v4622_v20, %v6206_v48 }
0x27f7   : > { %v4632_v44 = vsub.f32 %v4615_v38, %v4629_v0  ;;  %v5496_v0 = vld [vmem:[%s7555_s9 + $0x8] sm:$0xff] }
0x27f8   : > { %4760 = vmatpush.bf16.msrb.mxu0 %v5496_v0 }
0x27f9   : > { %v4635_v45 = vmul.f32 %v4632_v44, %v4632_v44 }
0x27fb   : > { %v4638_v29 = vsel %vm569_vm0, %v4635_v45, 0.0 }
0x27fc   : > { %4639 = vadd.xlane.f32.xlu1 %v4638_v29 }
0x27ff   : > { %v4461_v59 = vpop.f32.mrf.mxu1 }
0x2800   : > { %v4462_v51 = vadd.f32 %v7399_v33, %v4461_v59 }
0x2802   : > { %v5368_v26 = vmul.f32 -1.702, %v4462_v51 }
0x2804   : > { %v4475_v16 = vmul.f32 1.442695, %v5368_v26  ;;  %4624 = vadd.xlane.f32.xlu1 %v4623_v43 }
0x2806   : > { %5887 = vpow2.f32 %v4475_v16 }
0x2807   : > { %v4463_v10 = vpop.f32.mrf.mxu1 }
0x2808   : > { %v4698_v10 = vld [vmem:[%s7547_s1 + $0x1c] sm:$0x1] }
0x280c   : > { %v5888_v2 = vpop.eup %5887 }
0x280d   : > { %v4479_v49 = vadd.f32 1.0, %v5888_v2 }
0x280f   : > { %5889 = vrcp.f32 %v4479_v49  ;;  %v4521_v1 = vand.u32 2147483648, %v4479_v49  ;;  %v4519_v57 = vand.u32 2147483647, %v4479_v49  ;;  %vm4515_vm11 = vweird.f32 %v4479_v49 }
0x2811   : > { %v4522_v33 = vor.u32 1.1754944e-38, %v4521_v1  ;;  %vm4520_vm14 = vcmp.eq.f32.partialorder %v4519_v57, 8.507059e+37  ;;  %v4723_v1 = vrot.slane %v4698_v10, 1 }
0x2815   : > { %v5890_v50 = vpop.eup %5889 }
0x2816   : > { %v4511_v6 = vmul.f32 %v5890_v50, %v4479_v49  ;;  %vm4516_vm12 = vweird.f32 %v5890_v50 }
0x2817   : > { %vm4517_vm13 = vmor %vm4515_vm11, %vm4516_vm12 }
0x2818   : > { %v4512_v54 = vsub.f32 1.0, %v4511_v6 }
0x281a   : > { %v4513_v56 = vmul.f32 %v5890_v50, %v4512_v54 }
0x281c   : > { %v4514_v23 = vadd.f32 %v5890_v50, %v4513_v56 }
0x281e   : > { %v4518_v55 = vsel %vm4517_vm13, %v5890_v50, %v4514_v23  ;;  %v4699_v50 = vld [vmem:[%s7547_s1 + $0x1d] sm:$0x1] }
0x281f   : > { %v4523_v61 = vsel %vm4520_vm14, %v4522_v33, %v4518_v55  ;;  %v4727_v23 = vrot.slane %v4699_v50, 1 }
0x2820   : > { %v4527_v63 = vmul.f32 %v4523_v61, %v4462_v51 }
0x2822   : > { %v4547_v18 = vpack.c.bf16 %v4527_v63, %v4527_v63 }
0x2824   : > { %4610 = vmatmul.bf16.gmra.mxu3 %v4547_v18 }
0x286f   : > { %v4640_v35 = vpop.xlane.xlu1 %4639 }
0x2870   : > { %v4647_v3 = vmul.f32 %v4640_v35, %v6206_v48 }
0x2872   : > { %v4650_v47 = vadd.f32 1e-06, %v4647_v3 }
0x2874   : > { %5891 = vrsqrt.f32 %v4650_v47  ;;  %vm4659_vm1 = vweird.f32 %v4650_v47 }
0x2877   : > { %v4625_v14 = vpop.xlane.xlu1 %4624 }
0x2878   : > { %v4630_v40 = vmul.f32 %v4625_v14, %v6206_v48 }
0x287a   : > { %v5892_v58 = vpop.eup %5891  ;;  %v4633_v41 = vsub.f32 %v7431_v28, %v4630_v40 }
0x287b   : > { %v4654_v4 = vmul.f32 %v5892_v58, %v4650_v47  ;;  %vm4660_vm15 = vweird.f32 %v5892_v58 }
0x287c   : > { %vm4661_vm3 = vmor %vm4659_vm1, %vm4660_vm15 }
0x287d   : > { %v4655_v52 = vmul.f32 %v5892_v58, %v4654_v4 }
0x287f   : > { %v4656_v9 = vmul.f32 0.5, %v4655_v52 }
0x2881   : > { %v4657_v8 = vsub.f32 1.5, %v4656_v9 }
0x2883   : > { %v4658_v39 = vmul.f32 %v5892_v58, %v4657_v8 }
0x2885   : > { %v4662_v46 = vsel %vm4661_vm3, %v5892_v58, %v4658_v39 }
0x2886   : > { %v4683_v21 = vmul.f32 %v4662_v46, %v4632_v44  ;;  %v5495_v44 = vld [vmem:[%s7555_s9] sm:$0xff] }
0x2887   : > { %4761 = vmatpush.bf16.msrb.mxu0 %v5495_v44 }
0x2888   : > { %v4687_v53 = vmul.f32 %v7440_v17, %v4683_v21 }
0x288a   : > { %v4691_v11 = vadd.f32 %v7446_v19, %v4687_v53 }
0x288c   : > { %v4700_v22 = vsel %vm4694_vm10, %v4691_v11, 0.0  ;;  %4695 = vst.msk [vmem:[%s7452_s29 - $0x7] sm:$0x80] %vm4694_vm10, %v4691_v11 }
0x288d   : > { %4701 = vadd.xlane.f32.xlu2 %v4700_v22 }
0x28a7   : > { %v4611_v24 = vpop.f32.mrf.mxu3 }
0x28a8   : > { %v4612_v15 = vadd.f32 %v7419_v62, %v4611_v24  ;;  %v4636_v62 = vmul.f32 %v4633_v41, %v4633_v41 }
0x28aa   : > { %v4617_v25 = vadd.f32 %v4612_v15, %v7377_v42  ;;  %v4641_v42 = vsel %vm569_vm0, %v4636_v62, 0.0 }
0x28ac   : > { %v4626_v27 = vsel %vm569_vm0, %v4617_v25, 0.0 }
0x28ad   : > { %4627 = vadd.xlane.f32.xlu2 %v4626_v27 }
0x28af   : > { %v4613_v30 = vpop.f32.mrf.mxu3 }
0x2900   : > { %v4702_v12 = vpop.xlane.xlu2 %4701 }
0x2901   : > { %v4703_v32 = vmul.f32 %v4702_v12, %v6206_v48 }
0x2903   : > { %v4704_v7 = vsub.f32 %v4691_v11, %v4703_v32 }
0x2905   : > { %v4705_v13 = vmul.f32 %v4704_v7, %v4704_v7 }
0x2907   : > { %v4706_v37 = vsel %vm4694_vm10, %v4705_v13, 0.0 }
0x2908   : > { %4707 = vadd.xlane.f32.xlu0 %v4706_v37 }
0x2910   : > { %4642 = vadd.xlane.f32.xlu0 %v4641_v42 }
0x2920   : > { %v4628_v38 = vpop.xlane.xlu2 %4627 }
0x2921   : > { %v4631_v34 = vmul.f32 %v4628_v38, %v6206_v48 }
0x2923   : > { %v7467_v5 = vsub.f32 %v4617_v25, %v4631_v34 }
0x2925   : > { %v4637_v31 = vmul.f32 %v7467_v5, %v7467_v5 }
0x2927   : > { %v4644_v20 = vsel %vm569_vm0, %v4637_v31, 0.0 }
0x2928   : > { %4645 = vadd.xlane.f32.xlu1 %v4644_v20 }
0x297b   : > { %v4708_v36 = vpop.xlane.xlu0 %4707 }
0x297c   : > { %v4709_v45 = vmul.f32 %v4708_v36, %v6206_v48 }
0x297e   : > { %v4710_v60 = vadd.f32 1e-05, %v4709_v45 }
0x2980   : > { %5893 = vrsqrt.f32 %v4710_v60  ;;  %vm4717_vm5 = vweird.f32 %v4710_v60 }
0x2983   : > { %v4643_v29 = vpop.xlane.xlu0 %4642 }
0x2984   : > { %v4648_v28 = vmul.f32 %v4643_v29, %v6206_v48 }
0x2986   : > { %v5894_v59 = vpop.eup %5893  ;;  %v4651_v51 = vadd.f32 1e-06, %v4648_v28 }
0x2987   : > { %v4712_v26 = vmul.f32 %v5894_v59, %v4710_v60  ;;  %vm4718_vm4 = vweird.f32 %v5894_v59 }
0x2988   : > { %5895 = vrsqrt.f32 %v4651_v51  ;;  %vm4719_vm6 = vmor %vm4717_vm5, %vm4718_vm4  ;;  %vm4669_vm9 = vweird.f32 %v4651_v51 }
0x2989   : > { %v4713_v43 = vmul.f32 %v5894_v59, %v4712_v26 }
0x298b   : > { %v4714_v16 = vmul.f32 0.5, %v4713_v43 }
0x298d   : > { %v4715_v2 = vsub.f32 1.5, %v4714_v16 }
0x298e   : > { %v5896_v49 = vpop.eup %5895 }
0x298f   : > { %v4716_v6 = vmul.f32 %v5894_v59, %v4715_v2  ;;  %v4664_v54 = vmul.f32 %v5896_v49, %v4651_v51  ;;  %vm4670_vm7 = vweird.f32 %v5896_v49 }
0x2990   : > { %vm4671_vm2 = vmor %vm4669_vm9, %vm4670_vm7 }
0x2991   : > { %v4720_v56 = vsel %vm4719_vm6, %v5894_v59, %v4716_v6  ;;  %v4665_v57 = vmul.f32 %v5896_v49, %v4664_v54 }
0x2992   : > { %v4721_v33 = vmul.f32 %v4720_v56, %v4704_v7 }
0x2993   : > { %v4666_v55 = vmul.f32 0.5, %v4665_v57 }
0x2994   : > { %v4725_v61 = vmul.f32 %v4723_v1, %v4721_v33 }
0x2995   : > { %v4667_v63 = vsub.f32 1.5, %v4666_v55 }
0x2996   : > { %v4729_v18 = vadd.f32 %v4727_v23, %v4725_v61 }
0x2997   : > { %v4668_v35 = vmul.f32 %v5896_v49, %v4667_v63 }
0x2998   : > { %v4734_v3 = vpack.c.bf16 %v4729_v18, %v4729_v18 }
0x2999   : > { %v4672_v47 = vsel %vm4671_vm2, %v5896_v49, %v4668_v35 }
0x299a   : > { %v4736_v58 = vshrl.u32 %v4734_v3, 16  ;;  %v4684_v4 = vmul.f32 %v4672_v47, %v4633_v41 }
0x299b   : > { %v4646_v52 = vpop.xlane.xlu1 %4645 }
0x299c   : > { %v4738_v9 = vrot.slane %v4736_v58, 3  ;;  %v4688_v8 = vmul.f32 %v7440_v17, %v4684_v4  ;;  %v4649_v39 = vmul.f32 %v4646_v52, %v6206_v48 }
0x299e   : > { %v4692_v46 = vadd.f32 %v7446_v19, %v4688_v8  ;;  %v4652_v21 = vadd.f32 1e-06, %v4649_v39  ;;  %5426 = vmatmul.msk.bf16.vlgmr.msrb.gmra.mxu0 %vm569_vm0, %v4738_v9 }
0x29a0   : > { %4696 = vst.msk [vmem:[%s7452_s29 + $0x1] sm:$0xff] %vm569_vm0, %v4692_v46  ;;  %5897 = vrsqrt.f32 %v4652_v21 }
0x29a1   : > { %5926 = shalt.err (!%p5923_p3)
}
0x29a2   : > { %s6008_s0 = smov 128   ;;  %s6009_s20 = smov 8   ;;  %vm4679_vm12 = vweird.f32 %v4652_v21  ;;  %vm4767_vm13 = vcmask 516096  }
0x29a3   : > { %5499 = dma.vmem_to_hbm [thread:$0]  (%p6113_p5), %s4792_s22, 256, %s4794_s25, %s4770_s26, %s6008_s0, %s6008_s0, %s6009_s20  }
0x29a4   : > { %s7631_s22 = sld [smem:[#allocation22_spill]]  ;;  %s416_s10 = scalar_lea.vmem [#allocation4], %s7628_s4 }
0x29a5   : > { %s4807_s24 = sshll.u32 %s416_s10, 4  ;;  %s4775_s26 = scalar_lea.sflag [#allocation5], %s7628_s4  ;;  %s4808_s24 = int_to_ptr.vmem [resolvable:$true] %s4807_s24 }
0x29a6   : > { %v5898_v48 = vpop.eup %5897 }
0x29a7   : > { %v4674_v53 = vmul.f32 %v5898_v48, %v4652_v21  ;;  %vm4680_vm8 = vweird.f32 %v5898_v48 }
0x29a8   : > { %vm4681_vm11 = vmor %vm4679_vm12, %vm4680_vm8 }
0x29a9   : > { %v4675_v11 = vmul.f32 %v5898_v48, %v4674_v53 }
0x29aa   : > { %s7632_s14 = smov %s7631_s22  ;;  %s4805_s21 = scalar_lea.hbm %s7631_s22, %s7627_s13 }
0x29ab   : > { %v4676_v22 = vmul.f32 0.5, %v4675_v11  ;;  %s4809_s25 = sshll.u32 %s4805_s21, 4  ;;  %s5947_s13 = scalar_lea.hbm %s7632_s14, 2  ;;  %s4810_s25 = int_to_ptr.hbm [resolvable:$true] %s4809_s25 }
0x29ac   : > { %s5941_s18 = sshra.s32 %s4810_s25, 4  ;;  %s5942_s18 = int_to_ptr.hbm [resolvable:$true] %s5941_s18 }
0x29ad   : > { %v4677_v24 = vsub.f32 1.5, %v4676_v22  ;;  %s5943_s15 = scalar_lea.hbm %s5942_s18, 1  ;;  %p5948_p9 = scmp.lt.s32.totalorder %s5942_s18, %s7632_s14 }
0x29ae   : > { %p5944_p4 = scmp.ne.s32.totalorder %s5942_s18, %s5943_s15  ;;  %p5949_p10 = scmp.lt.s32.totalorder %s5947_s13, %s5943_s15 }
0x29af   : > { %v4678_v15 = vmul.f32 %v5898_v48, %v4677_v24 }
0x29b0   : > { %p5945_p7 = pnand %p5944_p4, %p6113_p5  ;;  %p5950_p11 = por %p5949_p10, %p5948_p9 }
0x29b1   : > { %v4682_v25 = vsel %vm4681_vm11, %v5898_v48, %v4678_v15 }
0x29b2   : > { %v4685_v27 = vmul.f32 %v4682_v25, %v7467_v5  ;;  %p5946_p8 = pneg %p5945_p7 }
0x29b4   : > { %v4689_v30 = vmul.f32 %v7440_v17, %v4685_v27  ;;  %p5951_p12 = pnand %p5950_p11, %p5946_p8 }
0x29b6   : > { %v4693_v14 = vadd.f32 %v7446_v19, %v4689_v30 }
0x29b8   : > { %4697 = vst.msk [vmem:[%s7452_s29 + $0x9] sm:$0xff] %vm569_vm0, %v4693_v14 }
0x2a1b   : > { %v4763_v12 = vpop.f32.mrf.mxu0 }
0x2a1c   : > { %4768 = vst.msk [vmem:[%s416_s10] sm:$0x1] %vm4767_vm13, %v4763_v12 }
0x2a1d   : > { %5954 = shalt.err (!%p5951_p12)
}
0x2a1e   : > { %5500 = dma.vmem_to_hbm [thread:$0]  (%p6113_p5), %s4808_s24, 16, %s4810_s25, %s4775_s26  }
0x2a23   : > { %v4765_v17 = vpop.f32.mrf.mxu0 }
0x2a24 PF: > { %s7633_s4 = sld [smem:[#allocation11_spill]] }
0x2a25   : > { %s7634_s30 = sld [smem:[#allocation8_spill]] }
0x2a2a   : > { %p5510_p13 = scmp.ge.s32.totalorder %s7633_s4, 2 }
0x2a2b   : > { %s4824_s0 = sand.u32 1, %s7634_s30  }
0x2a2c   : > { %p5504_p0 = pnand %p5510_p13, %p6117_p6  ;;  %s4825_s20 = scalar_lea.sflag [#allocation3], %s4824_s0 }
0x2a2e   : > { %p5505_p1 = pneg %p5504_p0 }
0x2a30   : > { %5972 = dma.done.wait (%p5505_p1), %s4825_s20, 256  }
0x2a31   : > { %5974 = vsyncadd (%p5505_p1), %s4825_s20, 4294967040  ;;  %s4835_s19 = scalar_lea.sflag [#allocation5], %s4824_s0 }
0x2a32   : > { %5976 = dma.done.wait (%p5505_p1), %s4835_s19, 16  }
0x2a33   : > { %5978 = vsyncadd (%p5505_p1), %s4835_s19, 4294967280  ;;  %s7636_s24 = sld [smem:[#allocation13_spill]] }
0x2a34   : > { %s7637_s21 = sld [smem:[#allocation9_spill]] }
0x2a35   : > { %s7638_s22 = sld [smem:[#allocation10_spill]] }
0x2a36   : > { %s7639_s23 = sld [smem:[#allocation14_spill]] }
0x2a39   : > { %p26_p5 = scmp.ge.s32.totalorder %s7636_s24, 4  }
0x2a3b   :  { %28 = sbr.rel (!%p26_p5) target bundleno = 11 (0xb), region = 151 }
0x2a40   :  { %4848 = vsyncpa [#allocation3], 1 }
0x2a41   :  { %4850 = vsyncpa [#allocation3 + $0x1], 1 }
0x2a42   :  { %4851 = vsyncpa [#allocation5], 1 }
0x2a43   :  { %4853 = vsyncpa [#allocation5 + $0x1], 1 }

</bundles_post_ra>
